<compile_context>
chip_gen: v6e
topology: v6e:2x2x1
jax: 0.10.0
libtpu: 0.0.40
codegen_flags: <defaults>
</compile_context>

<pallas_src>
import functools

import jax
import jax.numpy as jnp
from jax.experimental import pallas as pl
from jax.experimental.pallas import tpu as pltpu


# ----------------------------------------------------------------------------- #
# Pallas kernel: fused (W2d @ patches^T) * scale + shift, optional ReLU + skip
# ----------------------------------------------------------------------------- #
def _conv_mm_kernel(*refs, relu, skip_mode):
    if skip_mode == "conv":
        w_ref, x_ref, scale_ref, shift_ref, sw_ref, sx_ref, sb_ref, o_ref = refs
    elif skip_mode == "identity":
        w_ref, x_ref, scale_ref, shift_ref, skip_ref, o_ref = refs
    else:
        w_ref, x_ref, scale_ref, shift_ref, o_ref = refs

    # bf16 operands, f32 accumulation on the MXU.
    y = jnp.dot(w_ref[...], x_ref[...], preferred_element_type=jnp.float32)
    # f32 epilogue (folded conv-bias + eval BatchNorm), cheap on all generations.
    y = y * scale_ref[...] + shift_ref[...]
    if relu:
        y = jnp.maximum(y, 0.0)
    if skip_mode == "conv":
        # Fused 1x1-conv residual skip: relu(main) + (Wskip @ x0 + bskip)
        y = y + jnp.dot(sw_ref[...], sx_ref[...],
                        preferred_element_type=jnp.float32) + sb_ref[...]
    elif skip_mode == "identity":
        y = y + skip_ref[...]
    o_ref[...] = y


def fused_conv_matmul(w_t, patches_t, scale, shift, *, relu,
                      skip=None, skip_w=None, skip_b=None):
    """w_t: (C,K) bf16, patches_t: (K,M) bf16, scale/shift: (C,1) f32 -> (C,M) f32."""
    C, K = w_t.shape
    M = patches_t.shape[1]

    # Lane tile over M: >=2 "parallel" blocks for full-resolution layers (lets v7x
    # shard across both TensorCores); otherwise a single full-array block.
    TM = 256 if (M >= 512 and M % 256 == 0) else M
    grid = (M // TM,)

    in_specs = [
        pl.BlockSpec((C, K), lambda i: (0, 0)),    # weights, resident
        pl.BlockSpec((K, TM), lambda i: (0, i)),   # patches tile (M on lane axis)
        pl.BlockSpec((C, 1), lambda i: (0, 0)),    # folded BN scale
        pl.BlockSpec((C, 1), lambda i: (0, 0)),    # folded BN shift / bias
    ]
    args = [w_t, patches_t, scale, shift]

    if skip_w is not None:
        skip_mode = "conv"
        cin = skip.shape[0]
        in_specs += [
            pl.BlockSpec((C, cin), lambda i: (0, 0)),   # 1x1 skip weight
            pl.BlockSpec((cin, TM), lambda i: (0, i)),  # skip input tile
            pl.BlockSpec((C, 1), lambda i: (0, 0)),     # skip bias
        ]
        args += [skip_w, skip, skip_b]
    elif skip is not None:
        skip_mode = "identity"
        in_specs += [pl.BlockSpec((C, TM), lambda i: (0, i))]
        args += [skip]
    else:
        skip_mode = None

    return pl.pallas_call(
        functools.partial(_conv_mm_kernel, relu=relu, skip_mode=skip_mode),
        out_shape=jax.ShapeDtypeStruct((C, M), jnp.float32),
        grid_spec=pltpu.PrefetchScalarGridSpec(
            num_scalar_prefetch=0,
            grid=grid,
            in_specs=in_specs,
            out_specs=pl.BlockSpec((C, TM), lambda i: (0, i)),
        ),
        compiler_params=pltpu.CompilerParams(dimension_semantics=("parallel",)),
    )(*args)


# ----------------------------------------------------------------------------- #
# Conv layers built on the Pallas kernel (im2col / pooling / resize are JAX glue)
# ----------------------------------------------------------------------------- #
def conv2d(x, p, k, pad, *, bn, relu, pad_mode="constant",
           skip=None, skip_w=None, skip_b=None):
    """x: (Cin, N, H, W) f32.  p['w']: (Cout, Cin, k, k) PyTorch layout."""
    Cin, N, H, W = x.shape
    Cout = p["w"].shape[0]
    M = N * H * W

    # im2col directly into the transposed (K, M) layout; K order = (kh, kw, cin).
    # TODO(synk): for larger images move this patch gather into the kernel (shifted
    # views of a VMEM-resident tile) to avoid the k^2 HBM read amplification.
    if k == 1:
        patches = x.reshape(Cin, M)
    else:
        xp = jnp.pad(x, ((0, 0), (0, 0), (pad, pad), (pad, pad)), mode=pad_mode)
        cols = [xp[:, :, di:di + H, dj:dj + W] for di in range(k) for dj in range(k)]
        patches = jnp.concatenate(cols, axis=0).reshape(k * k * Cin, M)
    patches = patches.astype(jnp.bfloat16)

    w_t = jnp.transpose(p["w"], (0, 2, 3, 1)).reshape(Cout, k * k * Cin)
    w_t = w_t.astype(jnp.bfloat16)

    if bn:  # fold eval-mode BatchNorm + conv bias into scale/shift
        scale = p["gamma"] / jnp.sqrt(p["var"] + 1e-5)
        shift = p["beta"] + scale * (p["b"] - p["mean"])
    else:
        scale = jnp.ones((Cout,), jnp.float32)
        shift = p["b"]

    y = fused_conv_matmul(w_t, patches,
                          scale.reshape(Cout, 1), shift.reshape(Cout, 1),
                          relu=relu, skip=skip, skip_w=skip_w, skip_b=skip_b)
    return y.reshape(Cout, N, H, W)


def conv_block(x, p, k, pad, pad_mode="constant"):
    return conv2d(x, p, k, pad, bn=True, relu=True, pad_mode=pad_mode)


def res_block(x, p, k):
    Cin, N, H, W = x.shape
    M = N * H * W
    h = conv_block(x, p["cb1"], k, k // 2)
    if "skip" in p:
        # 1x1-conv skip fused into the second ConvBlock's kernel epilogue.
        Cout = p["skip"]["w"].shape[0]
        return conv2d(h, p["cb2"], k, k // 2, bn=True, relu=True,
                      skip=x.reshape(Cin, M).astype(jnp.bfloat16),
                      skip_w=p["skip"]["w"].reshape(Cout, Cin).astype(jnp.bfloat16),
                      skip_b=p["skip"]["b"].reshape(Cout, 1))
    # Identity skip fused into the second ConvBlock's kernel epilogue.
    return conv2d(h, p["cb2"], k, k // 2, bn=True, relu=True,
                  skip=x.reshape(Cin, M))


def maxpool2(x):
    # TODO(synk): 2x2 max-pool kept in plain JAX (trivial reduction, not the hot path).
    C, N, H, W = x.shape
    return x.reshape(C, N, H // 2, 2, W // 2, 2).max(axis=(3, 5))


def upsample_bilinear(x, s):
    # TODO(synk): bilinear upsample kept in plain JAX; matches
    # nn.Upsample(align_corners=False) up to float rounding.
    C, N, H, W = x.shape
    return jax.image.resize(x, (C, N, H * s, W * s), method="bilinear")


def upconv_block(x, p):
    return conv_block(upsample_bilinear(x, 2), p, 3, 1)


# ----------------------------------------------------------------------------- #
# Parameter init (deterministic, PyTorch init_weights semantics)
# ----------------------------------------------------------------------------- #
def conv_params(key, cin, cout, k, bn=True):
    std = (2.0 / (cout * k * k)) ** 0.5  # kaiming-normal, fan_out, relu
    w = std * jax.random.normal(key, (cout, cin, k, k), jnp.float32)
    p = {"w": w, "b": jnp.zeros((cout,), jnp.float32)}
    if bn:
        p.update(
            gamma=jnp.ones((cout,), jnp.float32),
            beta=jnp.zeros((cout,), jnp.float32),
            mean=jnp.zeros((cout,), jnp.float32),
            var=jnp.ones((cout,), jnp.float32),
        )
    return p


def init_params(key, n_f=4, in_ch=3, out_ch=3):
    f = [n_f, n_f * 2, n_f * 4, n_f * 8, n_f * 16]
    keys = iter(jax.random.split(key, 64))
    nk = lambda: next(keys)

    def res(cin, cout, k):
        p = {"cb1": conv_params(nk(), cin, cout, k),
             "cb2": conv_params(nk(), cout, cout, k)}
        if cin != cout:
            p["skip"] = conv_params(nk(), cin, cout, 1, bn=False)
        return p

    return {
        "inconv": conv_params(nk(), in_ch, f[0], 7),
        "eres1": res(f[0], f[0], 9),
        "eres2": res(f[0], f[1], 7),
        "eres3": res(f[1], f[2], 5),
        "eres4": res(f[2], f[3], 3),
        "eres5": res(f[3], f[4], 3),
        "uc1": conv_params(nk(), f[4], f[3], 3),
        "uc2": conv_params(nk(), f[3], f[2], 3),
        "uc3": conv_params(nk(), f[2], f[1], 3),
        "uc4": conv_params(nk(), f[1], f[0], 3),
        "dres1": res(2 * f[3], f[3], 3),
        "dres2": res(2 * f[2], f[2], 3),
        "dres3": res(2 * f[1], f[1], 3),
        "dres4": res(2 * f[0], f[0], 3),
        "outconv1": conv_params(nk(), f[4], 1, 1),
        "outconv2": conv_params(nk(), f[3], 1, 1),
        "outconv3": conv_params(nk(), f[2], 1, 1),
        "outconv4": conv_params(nk(), f[1], 1, 1),
        "outconv5": conv_params(nk(), f[0], 1, 1),
        "outconv": conv_params(nk(), 5, out_ch, 1, bn=False),
    }


# ----------------------------------------------------------------------------- #
# Full forward pass
# ----------------------------------------------------------------------------- #
def unet_forward(params, x_nchw):
    x = jnp.transpose(x_nchw, (1, 0, 2, 3))  # NCHW -> (C, N, H, W)

    ini = conv_block(x, params["inconv"], 7, 3, pad_mode="reflect")
    e1 = res_block(ini, params["eres1"], 9)
    m1 = maxpool2(e1)
    e2 = res_block(m1, params["eres2"], 7)
    m2 = maxpool2(e2)
    e3 = res_block(m2, params["eres3"], 5)
    m3 = maxpool2(e3)
    e4 = res_block(m3, params["eres4"], 3)
    m4 = maxpool2(e4)
    e5 = res_block(m4, params["eres5"], 3)

    u1 = upconv_block(e5, params["uc1"])
    d1 = res_block(jnp.concatenate([e4, u1], axis=0), params["dres1"], 3)
    u2 = upconv_block(d1, params["uc2"])
    d2 = res_block(jnp.concatenate([e3, u2], axis=0), params["dres2"], 3)
    u3 = upconv_block(d2, params["uc3"])
    d3 = res_block(jnp.concatenate([e2, u3], axis=0), params["dres3"], 3)
    u4 = upconv_block(d3, params["uc4"])
    d4 = res_block(jnp.concatenate([e1, u4], axis=0), params["dres4"], 3)

    o1 = conv_block(e5, params["outconv1"], 1, 0)
    o2 = conv_block(d1, params["outconv2"], 1, 0)
    o3 = conv_block(d2, params["outconv3"], 1, 0)
    o4 = conv_block(d3, params["outconv4"], 1, 0)
    o5 = conv_block(d4, params["outconv5"], 1, 0)

    out = jnp.concatenate(
        [upsample_bilinear(o1, 16), upsample_bilinear(o2, 8),
         upsample_bilinear(o3, 4), upsample_bilinear(o4, 2), o5],
        axis=0,
    )
    out = conv2d(out, params["outconv"], 1, 0, bn=False, relu=False)
    return jnp.transpose(out, (1, 0, 2, 3))  # (C, N, H, W) -> NCHW


if __name__ == "__main__":
    key = jax.random.PRNGKey(0)
    pkey, xkey = jax.random.split(key)

    n_f, in_ch, out_ch = 4, 3, 3
    params = init_params(pkey, n_f=n_f, in_ch=in_ch, out_ch=out_ch)
    x = jax.random.normal(xkey, (2, in_ch, 16, 16), jnp.float32)

    y = jax.jit(unet_forward)(params, x)
    y = jax.block_until_ready(y)
    assert y.shape == (2, out_ch, 16, 16), y.shape
    assert jnp.all(jnp.isfinite(y))
    print("KERNEL_OK")
</pallas_src>

<mosaic_0001>
module attributes {stable_mosaic.version = 11 : i64} {
  func.func @_conv_mm_kernel(%arg0: i32, %arg1: memref<4x147xbf16, #tpu.memory_space<vmem>>, %arg2: memref<147x256xbf16, #tpu.memory_space<vmem>>, %arg3: memref<4x1xf32, #tpu.memory_space<vmem>>, %arg4: memref<4x1xf32, #tpu.memory_space<vmem>>, %arg5: memref<4x256xf32, #tpu.memory_space<vmem>>) attributes {dimension_semantics = [#tpu.dimension_semantics<parallel>], iteration_bounds = array<i64: 2>, scalar_prefetch = 0 : i64, scratch_operands = 0 : i64, tpu.core_type = #tpu.core_type<tc>, window_params = [{pipeline_mode = #tpu.pipeline_mode<synchronous>, transform_indices = @transform_0, window_bounds = array<i64: 4, 147>}, {transform_indices = @transform_1, window_bounds = array<i64: 147, 256>}, {pipeline_mode = #tpu.pipeline_mode<synchronous>, transform_indices = @transform_2, window_bounds = array<i64: 4, 1>}, {pipeline_mode = #tpu.pipeline_mode<synchronous>, transform_indices = @transform_3, window_bounds = array<i64: 4, 1>}, {transform_indices = @transform_4, window_bounds = array<i64: 4, 256>}]} {
    %c0 = arith.constant 0 : index
    %c0_0 = arith.constant 0 : index
    %0 = vector.load %arg1[%c0, %c0_0] : memref<4x147xbf16, #tpu.memory_space<vmem>>, vector<4x147xbf16>
    %c0_1 = arith.constant 0 : index
    %c0_2 = arith.constant 0 : index
    %1 = vector.load %arg2[%c0_1, %c0_2] : memref<147x256xbf16, #tpu.memory_space<vmem>>, vector<147x256xbf16>
    %cst = arith.constant dense<0.000000e+00> : vector<4x256xf32>
    %2 = tpu.matmul %0, %1, %cst {dimension_numbers = #tpu.dot_dimension_numbers<[1], [0], [0], [1], [0, 0, 1, 1], [], []>} : vector<4x147xbf16>, vector<147x256xbf16>, vector<4x256xf32> -> vector<4x256xf32>
    %c0_3 = arith.constant 0 : index
    %c0_4 = arith.constant 0 : index
    %3 = vector.load %arg3[%c0_3, %c0_4] : memref<4x1xf32, #tpu.memory_space<vmem>>, vector<4x1xf32>
    %4 = vector.broadcast %3 : vector<4x1xf32> to vector<4x256xf32>
    %5 = arith.mulf %2, %4 : vector<4x256xf32>
    %c0_5 = arith.constant 0 : index
    %c0_6 = arith.constant 0 : index
    %6 = vector.load %arg4[%c0_5, %c0_6] : memref<4x1xf32, #tpu.memory_space<vmem>>, vector<4x1xf32>
    %7 = vector.broadcast %6 : vector<4x1xf32> to vector<4x256xf32>
    %8 = arith.addf %5, %7 : vector<4x256xf32>
    %cst_7 = arith.constant 0.000000e+00 : f32
    %9 = vector.broadcast %cst_7 : f32 to vector<4x256xf32>
    %10 = arith.maximumf %8, %9 : vector<4x256xf32>
    %c0_8 = arith.constant 0 : index
    %c0_9 = arith.constant 0 : index
    %11 = vector.load %arg5[%c0_8, %c0_9] : memref<4x256xf32, #tpu.memory_space<vmem>>, vector<4x256xf32>
    tpu.vector_store %arg5[%c0_8, %c0_9], %10 {strides = array<i32>} : memref<4x256xf32, #tpu.memory_space<vmem>>, vector<4x256xf32>,
    return
  }
  func.func @transform_0(%arg0: i32) -> (i32, i32) {
    %c0_i32 = arith.constant 0 : i32
    %c0_i32_0 = arith.constant 0 : i32
    %c0_i32_1 = arith.constant 0 : i32
    return %c0_i32, %c0_i32_0 : i32, i32
  }
  func.func @transform_1(%arg0: i32) -> (i32, i32) {
    %c0_i32 = arith.constant 0 : i32
    %c0_i32_0 = arith.constant 0 : i32
    return %c0_i32, %arg0 : i32, i32
  }
  func.func @transform_2(%arg0: i32) -> (i32, i32) {
    %c0_i32 = arith.constant 0 : i32
    %c0_i32_0 = arith.constant 0 : i32
    %c0_i32_1 = arith.constant 0 : i32
    return %c0_i32, %c0_i32_0 : i32, i32
  }
  func.func @transform_3(%arg0: i32) -> (i32, i32) {
    %c0_i32 = arith.constant 0 : i32
    %c0_i32_0 = arith.constant 0 : i32
    %c0_i32_1 = arith.constant 0 : i32
    return %c0_i32, %c0_i32_0 : i32, i32
  }
  func.func @transform_4(%arg0: i32) -> (i32, i32) {
    %c0_i32 = arith.constant 0 : i32
    %c0_i32_0 = arith.constant 0 : i32
    return %c0_i32, %arg0 : i32, i32
  }
}

module attributes {stable_mosaic.version = 11 : i64} {
  func.func @_conv_mm_kernel(%arg0: i32, %arg1: memref<4x324xbf16, #tpu.memory_space<vmem>>, %arg2: memref<324x256xbf16, #tpu.memory_space<vmem>>, %arg3: memref<4x1xf32, #tpu.memory_space<vmem>>, %arg4: memref<4x1xf32, #tpu.memory_space<vmem>>, %arg5: memref<4x256xf32, #tpu.memory_space<vmem>>) attributes {dimension_semantics = [#tpu.dimension_semantics<parallel>], iteration_bounds = array<i64: 2>, scalar_prefetch = 0 : i64, scratch_operands = 0 : i64, tpu.core_type = #tpu.core_type<tc>, window_params = [{pipeline_mode = #tpu.pipeline_mode<synchronous>, transform_indices = @transform_0, window_bounds = array<i64: 4, 324>}, {transform_indices = @transform_1, window_bounds = array<i64: 324, 256>}, {pipeline_mode = #tpu.pipeline_mode<synchronous>, transform_indices = @transform_2, window_bounds = array<i64: 4, 1>}, {pipeline_mode = #tpu.pipeline_mode<synchronous>, transform_indices = @transform_3, window_bounds = array<i64: 4, 1>}, {transform_indices = @transform_4, window_bounds = array<i64: 4, 256>}]} {
    %c0 = arith.constant 0 : index
    %c0_0 = arith.constant 0 : index
    %0 = vector.load %arg1[%c0, %c0_0] : memref<4x324xbf16, #tpu.memory_space<vmem>>, vector<4x324xbf16>
    %c0_1 = arith.constant 0 : index
    %c0_2 = arith.constant 0 : index
    %1 = vector.load %arg2[%c0_1, %c0_2] : memref<324x256xbf16, #tpu.memory_space<vmem>>, vector<324x256xbf16>
    %cst = arith.constant dense<0.000000e+00> : vector<4x256xf32>
    %2 = tpu.matmul %0, %1, %cst {dimension_numbers = #tpu.dot_dimension_numbers<[1], [0], [0], [1], [0, 0, 1, 1], [], []>} : vector<4x324xbf16>, vector<324x256xbf16>, vector<4x256xf32> -> vector<4x256xf32>
    %c0_3 = arith.constant 0 : index
    %c0_4 = arith.constant 0 : index
    %3 = vector.load %arg3[%c0_3, %c0_4] : memref<4x1xf32, #tpu.memory_space<vmem>>, vector<4x1xf32>
    %4 = vector.broadcast %3 : vector<4x1xf32> to vector<4x256xf32>
    %5 = arith.mulf %2, %4 : vector<4x256xf32>
    %c0_5 = arith.constant 0 : index
    %c0_6 = arith.constant 0 : index
    %6 = vector.load %arg4[%c0_5, %c0_6] : memref<4x1xf32, #tpu.memory_space<vmem>>, vector<4x1xf32>
    %7 = vector.broadcast %6 : vector<4x1xf32> to vector<4x256xf32>
    %8 = arith.addf %5, %7 : vector<4x256xf32>
    %cst_7 = arith.constant 0.000000e+00 : f32
    %9 = vector.broadcast %cst_7 : f32 to vector<4x256xf32>
    %10 = arith.maximumf %8, %9 : vector<4x256xf32>
    %c0_8 = arith.constant 0 : index
    %c0_9 = arith.constant 0 : index
    %11 = vector.load %arg5[%c0_8, %c0_9] : memref<4x256xf32, #tpu.memory_space<vmem>>, vector<4x256xf32>
    tpu.vector_store %arg5[%c0_8, %c0_9], %10 {strides = array<i32>} : memref<4x256xf32, #tpu.memory_space<vmem>>, vector<4x256xf32>,
    return
  }
  func.func @transform_0(%arg0: i32) -> (i32, i32) {
    %c0_i32 = arith.constant 0 : i32
    %c0_i32_0 = arith.constant 0 : i32
    %c0_i32_1 = arith.constant 0 : i32
    return %c0_i32, %c0_i32_0 : i32, i32
  }
  func.func @transform_1(%arg0: i32) -> (i32, i32) {
    %c0_i32 = arith.constant 0 : i32
    %c0_i32_0 = arith.constant 0 : i32
    return %c0_i32, %arg0 : i32, i32
  }
  func.func @transform_2(%arg0: i32) -> (i32, i32) {
    %c0_i32 = arith.constant 0 : i32
    %c0_i32_0 = arith.constant 0 : i32
    %c0_i32_1 = arith.constant 0 : i32
    return %c0_i32, %c0_i32_0 : i32, i32
  }
  func.func @transform_3(%arg0: i32) -> (i32, i32) {
    %c0_i32 = arith.constant 0 : i32
    %c0_i32_0 = arith.constant 0 : i32
    %c0_i32_1 = arith.constant 0 : i32
    return %c0_i32, %c0_i32_0 : i32, i32
  }
  func.func @transform_4(%arg0: i32) -> (i32, i32) {
    %c0_i32 = arith.constant 0 : i32
    %c0_i32_0 = arith.constant 0 : i32
    return %c0_i32, %arg0 : i32, i32
  }
}

module attributes {stable_mosaic.version = 11 : i64} {
  func.func @_conv_mm_kernel(%arg0: i32, %arg1: memref<4x324xbf16, #tpu.memory_space<vmem>>, %arg2: memref<324x256xbf16, #tpu.memory_space<vmem>>, %arg3: memref<4x1xf32, #tpu.memory_space<vmem>>, %arg4: memref<4x1xf32, #tpu.memory_space<vmem>>, %arg5: memref<4x256xf32, #tpu.memory_space<vmem>>, %arg6: memref<4x256xf32, #tpu.memory_space<vmem>>) attributes {dimension_semantics = [#tpu.dimension_semantics<parallel>], iteration_bounds = array<i64: 2>, scalar_prefetch = 0 : i64, scratch_operands = 0 : i64, tpu.core_type = #tpu.core_type<tc>, window_params = [{pipeline_mode = #tpu.pipeline_mode<synchronous>, transform_indices = @transform_0, window_bounds = array<i64: 4, 324>}, {transform_indices = @transform_1, window_bounds = array<i64: 324, 256>}, {pipeline_mode = #tpu.pipeline_mode<synchronous>, transform_indices = @transform_2, window_bounds = array<i64: 4, 1>}, {pipeline_mode = #tpu.pipeline_mode<synchronous>, transform_indices = @transform_3, window_bounds = array<i64: 4, 1>}, {transform_indices = @transform_4, window_bounds = array<i64: 4, 256>}, {transform_indices = @transform_5, window_bounds = array<i64: 4, 256>}]} {
    %c0 = arith.constant 0 : index
    %c0_0 = arith.constant 0 : index
    %0 = vector.load %arg1[%c0, %c0_0] : memref<4x324xbf16, #tpu.memory_space<vmem>>, vector<4x324xbf16>
    %c0_1 = arith.constant 0 : index
    %c0_2 = arith.constant 0 : index
    %1 = vector.load %arg2[%c0_1, %c0_2] : memref<324x256xbf16, #tpu.memory_space<vmem>>, vector<324x256xbf16>
    %cst = arith.constant dense<0.000000e+00> : vector<4x256xf32>
    %2 = tpu.matmul %0, %1, %cst {dimension_numbers = #tpu.dot_dimension_numbers<[1], [0], [0], [1], [0, 0, 1, 1], [], []>} : vector<4x324xbf16>, vector<324x256xbf16>, vector<4x256xf32> -> vector<4x256xf32>
    %c0_3 = arith.constant 0 : index
    %c0_4 = arith.constant 0 : index
    %3 = vector.load %arg3[%c0_3, %c0_4] : memref<4x1xf32, #tpu.memory_space<vmem>>, vector<4x1xf32>
    %4 = vector.broadcast %3 : vector<4x1xf32> to vector<4x256xf32>
    %5 = arith.mulf %2, %4 : vector<4x256xf32>
    %c0_5 = arith.constant 0 : index
    %c0_6 = arith.constant 0 : index
    %6 = vector.load %arg4[%c0_5, %c0_6] : memref<4x1xf32, #tpu.memory_space<vmem>>, vector<4x1xf32>
    %7 = vector.broadcast %6 : vector<4x1xf32> to vector<4x256xf32>
    %8 = arith.addf %5, %7 : vector<4x256xf32>
    %cst_7 = arith.constant 0.000000e+00 : f32
    %9 = vector.broadcast %cst_7 : f32 to vector<4x256xf32>
    %10 = arith.maximumf %8, %9 : vector<4x256xf32>
    %c0_8 = arith.constant 0 : index
    %c0_9 = arith.constant 0 : index
    %11 = vector.load %arg5[%c0_8, %c0_9] : memref<4x256xf32, #tpu.memory_space<vmem>>, vector<4x256xf32>
    %12 = arith.addf %10, %11 : vector<4x256xf32>
    %c0_10 = arith.constant 0 : index
    %c0_11 = arith.constant 0 : index
    %13 = vector.load %arg6[%c0_10, %c0_11] : memref<4x256xf32, #tpu.memory_space<vmem>>, vector<4x256xf32>
    tpu.vector_store %arg6[%c0_10, %c0_11], %12 {strides = array<i32>} : memref<4x256xf32, #tpu.memory_space<vmem>>, vector<4x256xf32>,
    return
  }
  func.func @transform_0(%arg0: i32) -> (i32, i32) {
    %c0_i32 = arith.constant 0 : i32
    %c0_i32_0 = arith.constant 0 : i32
    %c0_i32_1 = arith.constant 0 : i32
    return %c0_i32, %c0_i32_0 : i32, i32
  }
  func.func @transform_1(%arg0: i32) -> (i32, i32) {
    %c0_i32 = arith.constant 0 : i32
    %c0_i32_0 = arith.constant 0 : i32
    return %c0_i32, %arg0 : i32, i32
  }
  func.func @transform_2(%arg0: i32) -> (i32, i32) {
    %c0_i32 = arith.constant 0 : i32
    %c0_i32_0 = arith.constant 0 : i32
    %c0_i32_1 = arith.constant 0 : i32
    return %c0_i32, %c0_i32_0 : i32, i32
  }
  func.func @transform_3(%arg0: i32) -> (i32, i32) {
    %c0_i32 = arith.constant 0 : i32
    %c0_i32_0 = arith.constant 0 : i32
    %c0_i32_1 = arith.constant 0 : i32
    return %c0_i32, %c0_i32_0 : i32, i32
  }
  func.func @transform_4(%arg0: i32) -> (i32, i32) {
    %c0_i32 = arith.constant 0 : i32
    %c0_i32_0 = arith.constant 0 : i32
    return %c0_i32, %arg0 : i32, i32
  }
  func.func @transform_5(%arg0: i32) -> (i32, i32) {
    %c0_i32 = arith.constant 0 : i32
    %c0_i32_0 = arith.constant 0 : i32
    return %c0_i32, %arg0 : i32, i32
  }
}

module attributes {stable_mosaic.version = 11 : i64} {
  func.func @_conv_mm_kernel(%arg0: i32, %arg1: memref<8x196xbf16, #tpu.memory_space<vmem>>, %arg2: memref<196x128xbf16, #tpu.memory_space<vmem>>, %arg3: memref<8x1xf32, #tpu.memory_space<vmem>>, %arg4: memref<8x1xf32, #tpu.memory_space<vmem>>, %arg5: memref<8x128xf32, #tpu.memory_space<vmem>>) attributes {dimension_semantics = [#tpu.dimension_semantics<parallel>], iteration_bounds = array<i64: 1>, scalar_prefetch = 0 : i64, scratch_operands = 0 : i64, tpu.core_type = #tpu.core_type<tc>, window_params = [{pipeline_mode = #tpu.pipeline_mode<synchronous>, transform_indices = @transform_0, window_bounds = array<i64: 8, 196>}, {transform_indices = @transform_1, window_bounds = array<i64: 196, 128>}, {pipeline_mode = #tpu.pipeline_mode<synchronous>, transform_indices = @transform_2, window_bounds = array<i64: 8, 1>}, {pipeline_mode = #tpu.pipeline_mode<synchronous>, transform_indices = @transform_3, window_bounds = array<i64: 8, 1>}, {transform_indices = @transform_4, window_bounds = array<i64: 8, 128>}]} {
    %c0 = arith.constant 0 : index
    %c0_0 = arith.constant 0 : index
    %0 = vector.load %arg1[%c0, %c0_0] : memref<8x196xbf16, #tpu.memory_space<vmem>>, vector<8x196xbf16>
    %c0_1 = arith.constant 0 : index
    %c0_2 = arith.constant 0 : index
    %1 = vector.load %arg2[%c0_1, %c0_2] : memref<196x128xbf16, #tpu.memory_space<vmem>>, vector<196x128xbf16>
    %cst = arith.constant dense<0.000000e+00> : vector<8x128xf32>
    %2 = tpu.matmul %0, %1, %cst {dimension_numbers = #tpu.dot_dimension_numbers<[1], [0], [0], [1], [0, 0, 1, 1], [], []>} : vector<8x196xbf16>, vector<196x128xbf16>, vector<8x128xf32> -> vector<8x128xf32>
    %c0_3 = arith.constant 0 : index
    %c0_4 = arith.constant 0 : index
    %3 = vector.load %arg3[%c0_3, %c0_4] : memref<8x1xf32, #tpu.memory_space<vmem>>, vector<8x1xf32>
    %4 = vector.broadcast %3 : vector<8x1xf32> to vector<8x128xf32>
    %5 = arith.mulf %2, %4 : vector<8x128xf32>
    %c0_5 = arith.constant 0 : index
    %c0_6 = arith.constant 0 : index
    %6 = vector.load %arg4[%c0_5, %c0_6] : memref<8x1xf32, #tpu.memory_space<vmem>>, vector<8x1xf32>
    %7 = vector.broadcast %6 : vector<8x1xf32> to vector<8x128xf32>
    %8 = arith.addf %5, %7 : vector<8x128xf32>
    %cst_7 = arith.constant 0.000000e+00 : f32
    %9 = vector.broadcast %cst_7 : f32 to vector<8x128xf32>
    %10 = arith.maximumf %8, %9 : vector<8x128xf32>
    %c0_8 = arith.constant 0 : index
    %c0_9 = arith.constant 0 : index
    %11 = vector.load %arg5[%c0_8, %c0_9] : memref<8x128xf32, #tpu.memory_space<vmem>>, vector<8x128xf32>
    tpu.vector_store %arg5[%c0_8, %c0_9], %10 {strides = array<i32>} : memref<8x128xf32, #tpu.memory_space<vmem>>, vector<8x128xf32>,
    return
  }
  func.func @transform_0(%arg0: i32) -> (i32, i32) {
    %c0_i32 = arith.constant 0 : i32
    %c0_i32_0 = arith.constant 0 : i32
    %c0_i32_1 = arith.constant 0 : i32
    return %c0_i32, %c0_i32_0 : i32, i32
  }
  func.func @transform_1(%arg0: i32) -> (i32, i32) {
    %c0_i32 = arith.constant 0 : i32
    %c0_i32_0 = arith.constant 0 : i32
    return %c0_i32, %arg0 : i32, i32
  }
  func.func @transform_2(%arg0: i32) -> (i32, i32) {
    %c0_i32 = arith.constant 0 : i32
    %c0_i32_0 = arith.constant 0 : i32
    %c0_i32_1 = arith.constant 0 : i32
    return %c0_i32, %c0_i32_0 : i32, i32
  }
  func.func @transform_3(%arg0: i32) -> (i32, i32) {
    %c0_i32 = arith.constant 0 : i32
    %c0_i32_0 = arith.constant 0 : i32
    %c0_i32_1 = arith.constant 0 : i32
    return %c0_i32, %c0_i32_0 : i32, i32
  }
  func.func @transform_4(%arg0: i32) -> (i32, i32) {
    %c0_i32 = arith.constant 0 : i32
    %c0_i32_0 = arith.constant 0 : i32
    return %c0_i32, %arg0 : i32, i32
  }
}

module attributes {stable_mosaic.version = 11 : i64} {
  func.func @_conv_mm_kernel(%arg0: i32, %arg1: memref<8x392xbf16, #tpu.memory_space<vmem>>, %arg2: memref<392x128xbf16, #tpu.memory_space<vmem>>, %arg3: memref<8x1xf32, #tpu.memory_space<vmem>>, %arg4: memref<8x1xf32, #tpu.memory_space<vmem>>, %arg5: memref<8x4xbf16, #tpu.memory_space<vmem>>, %arg6: memref<4x128xbf16, #tpu.memory_space<vmem>>, %arg7: memref<8x1xf32, #tpu.memory_space<vmem>>, %arg8: memref<8x128xf32, #tpu.memory_space<vmem>>) attributes {dimension_semantics = [#tpu.dimension_semantics<parallel>], iteration_bounds = array<i64: 1>, scalar_prefetch = 0 : i64, scratch_operands = 0 : i64, tpu.core_type = #tpu.core_type<tc>, window_params = [{pipeline_mode = #tpu.pipeline_mode<synchronous>, transform_indices = @transform_0, window_bounds = array<i64: 8, 392>}, {transform_indices = @transform_1, window_bounds = array<i64: 392, 128>}, {pipeline_mode = #tpu.pipeline_mode<synchronous>, transform_indices = @transform_2, window_bounds = array<i64: 8, 1>}, {pipeline_mode = #tpu.pipeline_mode<synchronous>, transform_indices = @transform_3, window_bounds = array<i64: 8, 1>}, {pipeline_mode = #tpu.pipeline_mode<synchronous>, transform_indices = @transform_4, window_bounds = array<i64: 8, 4>}, {transform_indices = @transform_5, window_bounds = array<i64: 4, 128>}, {pipeline_mode = #tpu.pipeline_mode<synchronous>, transform_indices = @transform_6, window_bounds = array<i64: 8, 1>}, {transform_indices = @transform_7, window_bounds = array<i64: 8, 128>}]} {
    %c0 = arith.constant 0 : index
    %c0_0 = arith.constant 0 : index
    %0 = vector.load %arg1[%c0, %c0_0] : memref<8x392xbf16, #tpu.memory_space<vmem>>, vector<8x392xbf16>
    %c0_1 = arith.constant 0 : index
    %c0_2 = arith.constant 0 : index
    %1 = vector.load %arg2[%c0_1, %c0_2] : memref<392x128xbf16, #tpu.memory_space<vmem>>, vector<392x128xbf16>
    %cst = arith.constant dense<0.000000e+00> : vector<8x128xf32>
    %2 = tpu.matmul %0, %1, %cst {dimension_numbers = #tpu.dot_dimension_numbers<[1], [0], [0], [1], [0, 0, 1, 1], [], []>} : vector<8x392xbf16>, vector<392x128xbf16>, vector<8x128xf32> -> vector<8x128xf32>
    %c0_3 = arith.constant 0 : index
    %c0_4 = arith.constant 0 : index
    %3 = vector.load %arg3[%c0_3, %c0_4] : memref<8x1xf32, #tpu.memory_space<vmem>>, vector<8x1xf32>
    %4 = vector.broadcast %3 : vector<8x1xf32> to vector<8x128xf32>
    %5 = arith.mulf %2, %4 : vector<8x128xf32>
    %c0_5 = arith.constant 0 : index
    %c0_6 = arith.constant 0 : index
    %6 = vector.load %arg4[%c0_5, %c0_6] : memref<8x1xf32, #tpu.memory_space<vmem>>, vector<8x1xf32>
    %7 = vector.broadcast %6 : vector<8x1xf32> to vector<8x128xf32>
    %8 = arith.addf %5, %7 : vector<8x128xf32>
    %cst_7 = arith.constant 0.000000e+00 : f32
    %9 = vector.broadcast %cst_7 : f32 to vector<8x128xf32>
    %10 = arith.maximumf %8, %9 : vector<8x128xf32>
    %c0_8 = arith.constant 0 : index
    %c0_9 = arith.constant 0 : index
    %11 = vector.load %arg5[%c0_8, %c0_9] : memref<8x4xbf16, #tpu.memory_space<vmem>>, vector<8x4xbf16>
    %c0_10 = arith.constant 0 : index
    %c0_11 = arith.constant 0 : index
    %12 = vector.load %arg6[%c0_10, %c0_11] : memref<4x128xbf16, #tpu.memory_space<vmem>>, vector<4x128xbf16>
    %cst_12 = arith.constant dense<0.000000e+00> : vector<8x128xf32>
    %13 = tpu.matmul %11, %12, %cst_12 {dimension_numbers = #tpu.dot_dimension_numbers<[1], [0], [0], [1], [0, 0, 1, 1], [], []>} : vector<8x4xbf16>, vector<4x128xbf16>, vector<8x128xf32> -> vector<8x128xf32>
    %14 = arith.addf %10, %13 : vector<8x128xf32>
    %c0_13 = arith.constant 0 : index
    %c0_14 = arith.constant 0 : index
    %15 = vector.load %arg7[%c0_13, %c0_14] : memref<8x1xf32, #tpu.memory_space<vmem>>, vector<8x1xf32>
    %16 = vector.broadcast %15 : vector<8x1xf32> to vector<8x128xf32>
    %17 = arith.addf %14, %16 : vector<8x128xf32>
    %c0_15 = arith.constant 0 : index
    %c0_16 = arith.constant 0 : index
    %18 = vector.load %arg8[%c0_15, %c0_16] : memref<8x128xf32, #tpu.memory_space<vmem>>, vector<8x128xf32>
    tpu.vector_store %arg8[%c0_15, %c0_16], %17 {strides = array<i32>} : memref<8x128xf32, #tpu.memory_space<vmem>>, vector<8x128xf32>,
    return
  }
  func.func @transform_0(%arg0: i32) -> (i32, i32) {
    %c0_i32 = arith.constant 0 : i32
    %c0_i32_0 = arith.constant 0 : i32
    %c0_i32_1 = arith.constant 0 : i32
    return %c0_i32, %c0_i32_0 : i32, i32
  }
  func.func @transform_1(%arg0: i32) -> (i32, i32) {
    %c0_i32 = arith.constant 0 : i32
    %c0_i32_0 = arith.constant 0 : i32
    return %c0_i32, %arg0 : i32, i32
  }
  func.func @transform_2(%arg0: i32) -> (i32, i32) {
    %c0_i32 = arith.constant 0 : i32
    %c0_i32_0 = arith.constant 0 : i32
    %c0_i32_1 = arith.constant 0 : i32
    return %c0_i32, %c0_i32_0 : i32, i32
  }
  func.func @transform_3(%arg0: i32) -> (i32, i32) {
    %c0_i32 = arith.constant 0 : i32
    %c0_i32_0 = arith.constant 0 : i32
    %c0_i32_1 = arith.constant 0 : i32
    return %c0_i32, %c0_i32_0 : i32, i32
  }
  func.func @transform_4(%arg0: i32) -> (i32, i32) {
    %c0_i32 = arith.constant 0 : i32
    %c0_i32_0 = arith.constant 0 : i32
    %c0_i32_1 = arith.constant 0 : i32
    return %c0_i32, %c0_i32_0 : i32, i32
  }
  func.func @transform_5(%arg0: i32) -> (i32, i32) {
    %c0_i32 = arith.constant 0 : i32
    %c0_i32_0 = arith.constant 0 : i32
    return %c0_i32, %arg0 : i32, i32
  }
  func.func @transform_6(%arg0: i32) -> (i32, i32) {
    %c0_i32 = arith.constant 0 : i32
    %c0_i32_0 = arith.constant 0 : i32
    %c0_i32_1 = arith.constant 0 : i32
    return %c0_i32, %c0_i32_0 : i32, i32
  }
  func.func @transform_7(%arg0: i32) -> (i32, i32) {
    %c0_i32 = arith.constant 0 : i32
    %c0_i32_0 = arith.constant 0 : i32
    return %c0_i32, %arg0 : i32, i32
  }
}

module attributes {stable_mosaic.version = 11 : i64} {
  func.func @_conv_mm_kernel(%arg0: i32, %arg1: memref<16x200xbf16, #tpu.memory_space<vmem>>, %arg2: memref<200x32xbf16, #tpu.memory_space<vmem>>, %arg3: memref<16x1xf32, #tpu.memory_space<vmem>>, %arg4: memref<16x1xf32, #tpu.memory_space<vmem>>, %arg5: memref<16x32xf32, #tpu.memory_space<vmem>>) attributes {dimension_semantics = [#tpu.dimension_semantics<parallel>], iteration_bounds = array<i64: 1>, scalar_prefetch = 0 : i64, scratch_operands = 0 : i64, tpu.core_type = #tpu.core_type<tc>, window_params = [{pipeline_mode = #tpu.pipeline_mode<synchronous>, transform_indices = @transform_0, window_bounds = array<i64: 16, 200>}, {transform_indices = @transform_1, window_bounds = array<i64: 200, 32>}, {pipeline_mode = #tpu.pipeline_mode<synchronous>, transform_indices = @transform_2, window_bounds = array<i64: 16, 1>}, {pipeline_mode = #tpu.pipeline_mode<synchronous>, transform_indices = @transform_3, window_bounds = array<i64: 16, 1>}, {transform_indices = @transform_4, window_bounds = array<i64: 16, 32>}]} {
    %c0 = arith.constant 0 : index
    %c0_0 = arith.constant 0 : index
    %0 = vector.load %arg1[%c0, %c0_0] : memref<16x200xbf16, #tpu.memory_space<vmem>>, vector<16x200xbf16>
    %c0_1 = arith.constant 0 : index
    %c0_2 = arith.constant 0 : index
    %1 = vector.load %arg2[%c0_1, %c0_2] : memref<200x32xbf16, #tpu.memory_space<vmem>>, vector<200x32xbf16>
    %cst = arith.constant dense<0.000000e+00> : vector<16x32xf32>
    %2 = tpu.matmul %0, %1, %cst {dimension_numbers = #tpu.dot_dimension_numbers<[1], [0], [0], [1], [0, 0, 1, 1], [], []>} : vector<16x200xbf16>, vector<200x32xbf16>, vector<16x32xf32> -> vector<16x32xf32>
    %c0_3 = arith.constant 0 : index
    %c0_4 = arith.constant 0 : index
    %3 = vector.load %arg3[%c0_3, %c0_4] : memref<16x1xf32, #tpu.memory_space<vmem>>, vector<16x1xf32>
    %4 = vector.broadcast %3 : vector<16x1xf32> to vector<16x32xf32>
    %5 = arith.mulf %2, %4 : vector<16x32xf32>
    %c0_5 = arith.constant 0 : index
    %c0_6 = arith.constant 0 : index
    %6 = vector.load %arg4[%c0_5, %c0_6] : memref<16x1xf32, #tpu.memory_space<vmem>>, vector<16x1xf32>
    %7 = vector.broadcast %6 : vector<16x1xf32> to vector<16x32xf32>
    %8 = arith.addf %5, %7 : vector<16x32xf32>
    %cst_7 = arith.constant 0.000000e+00 : f32
    %9 = vector.broadcast %cst_7 : f32 to vector<16x32xf32>
    %10 = arith.maximumf %8, %9 : vector<16x32xf32>
    %c0_8 = arith.constant 0 : index
    %c0_9 = arith.constant 0 : index
    %11 = vector.load %arg5[%c0_8, %c0_9] : memref<16x32xf32, #tpu.memory_space<vmem>>, vector<16x32xf32>
    tpu.vector_store %arg5[%c0_8, %c0_9], %10 {strides = array<i32>} : memref<16x32xf32, #tpu.memory_space<vmem>>, vector<16x32xf32>,
    return
  }
  func.func @transform_0(%arg0: i32) -> (i32, i32) {
    %c0_i32 = arith.constant 0 : i32
    %c0_i32_0 = arith.constant 0 : i32
    %c0_i32_1 = arith.constant 0 : i32
    return %c0_i32, %c0_i32_0 : i32, i32
  }
  func.func @transform_1(%arg0: i32) -> (i32, i32) {
    %c0_i32 = arith.constant 0 : i32
    %c0_i32_0 = arith.constant 0 : i32
    return %c0_i32, %arg0 : i32, i32
  }
  func.func @transform_2(%arg0: i32) -> (i32, i32) {
    %c0_i32 = arith.constant 0 : i32
    %c0_i32_0 = arith.constant 0 : i32
    %c0_i32_1 = arith.constant 0 : i32
    return %c0_i32, %c0_i32_0 : i32, i32
  }
  func.func @transform_3(%arg0: i32) -> (i32, i32) {
    %c0_i32 = arith.constant 0 : i32
    %c0_i32_0 = arith.constant 0 : i32
    %c0_i32_1 = arith.constant 0 : i32
    return %c0_i32, %c0_i32_0 : i32, i32
  }
  func.func @transform_4(%arg0: i32) -> (i32, i32) {
    %c0_i32 = arith.constant 0 : i32
    %c0_i32_0 = arith.constant 0 : i32
    return %c0_i32, %arg0 : i32, i32
  }
}

module attributes {stable_mosaic.version = 11 : i64} {
  func.func @_conv_mm_kernel(%arg0: i32, %arg1: memref<16x400xbf16, #tpu.memory_space<vmem>>, %arg2: memref<400x32xbf16, #tpu.memory_space<vmem>>, %arg3: memref<16x1xf32, #tpu.memory_space<vmem>>, %arg4: memref<16x1xf32, #tpu.memory_space<vmem>>, %arg5: memref<16x8xbf16, #tpu.memory_space<vmem>>, %arg6: memref<8x32xbf16, #tpu.memory_space<vmem>>, %arg7: memref<16x1xf32, #tpu.memory_space<vmem>>, %arg8: memref<16x32xf32, #tpu.memory_space<vmem>>) attributes {dimension_semantics = [#tpu.dimension_semantics<parallel>], iteration_bounds = array<i64: 1>, scalar_prefetch = 0 : i64, scratch_operands = 0 : i64, tpu.core_type = #tpu.core_type<tc>, window_params = [{pipeline_mode = #tpu.pipeline_mode<synchronous>, transform_indices = @transform_0, window_bounds = array<i64: 16, 400>}, {transform_indices = @transform_1, window_bounds = array<i64: 400, 32>}, {pipeline_mode = #tpu.pipeline_mode<synchronous>, transform_indices = @transform_2, window_bounds = array<i64: 16, 1>}, {pipeline_mode = #tpu.pipeline_mode<synchronous>, transform_indices = @transform_3, window_bounds = array<i64: 16, 1>}, {pipeline_mode = #tpu.pipeline_mode<synchronous>, transform_indices = @transform_4, window_bounds = array<i64: 16, 8>}, {transform_indices = @transform_5, window_bounds = array<i64: 8, 32>}, {pipeline_mode = #tpu.pipeline_mode<synchronous>, transform_indices = @transform_6, window_bounds = array<i64: 16, 1>}, {transform_indices = @transform_7, window_bounds = array<i64: 16, 32>}]} {
    %c0 = arith.constant 0 : index
    %c0_0 = arith.constant 0 : index
    %0 = vector.load %arg1[%c0, %c0_0] : memref<16x400xbf16, #tpu.memory_space<vmem>>, vector<16x400xbf16>
    %c0_1 = arith.constant 0 : index
    %c0_2 = arith.constant 0 : index
    %1 = vector.load %arg2[%c0_1, %c0_2] : memref<400x32xbf16, #tpu.memory_space<vmem>>, vector<400x32xbf16>
    %cst = arith.constant dense<0.000000e+00> : vector<16x32xf32>
    %2 = tpu.matmul %0, %1, %cst {dimension_numbers = #tpu.dot_dimension_numbers<[1], [0], [0], [1], [0, 0, 1, 1], [], []>} : vector<16x400xbf16>, vector<400x32xbf16>, vector<16x32xf32> -> vector<16x32xf32>
    %c0_3 = arith.constant 0 : index
    %c0_4 = arith.constant 0 : index
    %3 = vector.load %arg3[%c0_3, %c0_4] : memref<16x1xf32, #tpu.memory_space<vmem>>, vector<16x1xf32>
    %4 = vector.broadcast %3 : vector<16x1xf32> to vector<16x32xf32>
    %5 = arith.mulf %2, %4 : vector<16x32xf32>
    %c0_5 = arith.constant 0 : index
    %c0_6 = arith.constant 0 : index
    %6 = vector.load %arg4[%c0_5, %c0_6] : memref<16x1xf32, #tpu.memory_space<vmem>>, vector<16x1xf32>
    %7 = vector.broadcast %6 : vector<16x1xf32> to vector<16x32xf32>
    %8 = arith.addf %5, %7 : vector<16x32xf32>
    %cst_7 = arith.constant 0.000000e+00 : f32
    %9 = vector.broadcast %cst_7 : f32 to vector<16x32xf32>
    %10 = arith.maximumf %8, %9 : vector<16x32xf32>
    %c0_8 = arith.constant 0 : index
    %c0_9 = arith.constant 0 : index
    %11 = vector.load %arg5[%c0_8, %c0_9] : memref<16x8xbf16, #tpu.memory_space<vmem>>, vector<16x8xbf16>
    %c0_10 = arith.constant 0 : index
    %c0_11 = arith.constant 0 : index
    %12 = vector.load %arg6[%c0_10, %c0_11] : memref<8x32xbf16, #tpu.memory_space<vmem>>, vector<8x32xbf16>
    %cst_12 = arith.constant dense<0.000000e+00> : vector<16x32xf32>
    %13 = tpu.matmul %11, %12, %cst_12 {dimension_numbers = #tpu.dot_dimension_numbers<[1], [0], [0], [1], [0, 0, 1, 1], [], []>} : vector<16x8xbf16>, vector<8x32xbf16>, vector<16x32xf32> -> vector<16x32xf32>
    %14 = arith.addf %10, %13 : vector<16x32xf32>
    %c0_13 = arith.constant 0 : index
    %c0_14 = arith.constant 0 : index
    %15 = vector.load %arg7[%c0_13, %c0_14] : memref<16x1xf32, #tpu.memory_space<vmem>>, vector<16x1xf32>
    %16 = vector.broadcast %15 : vector<16x1xf32> to vector<16x32xf32>
    %17 = arith.addf %14, %16 : vector<16x32xf32>
    %c0_15 = arith.constant 0 : index
    %c0_16 = arith.constant 0 : index
    %18 = vector.load %arg8[%c0_15, %c0_16] : memref<16x32xf32, #tpu.memory_space<vmem>>, vector<16x32xf32>
    tpu.vector_store %arg8[%c0_15, %c0_16], %17 {strides = array<i32>} : memref<16x32xf32, #tpu.memory_space<vmem>>, vector<16x32xf32>,
    return
  }
  func.func @transform_0(%arg0: i32) -> (i32, i32) {
    %c0_i32 = arith.constant 0 : i32
    %c0_i32_0 = arith.constant 0 : i32
    %c0_i32_1 = arith.constant 0 : i32
    return %c0_i32, %c0_i32_0 : i32, i32
  }
  func.func @transform_1(%arg0: i32) -> (i32, i32) {
    %c0_i32 = arith.constant 0 : i32
    %c0_i32_0 = arith.constant 0 : i32
    return %c0_i32, %arg0 : i32, i32
  }
  func.func @transform_2(%arg0: i32) -> (i32, i32) {
    %c0_i32 = arith.constant 0 : i32
    %c0_i32_0 = arith.constant 0 : i32
    %c0_i32_1 = arith.constant 0 : i32
    return %c0_i32, %c0_i32_0 : i32, i32
  }
  func.func @transform_3(%arg0: i32) -> (i32, i32) {
    %c0_i32 = arith.constant 0 : i32
    %c0_i32_0 = arith.constant 0 : i32
    %c0_i32_1 = arith.constant 0 : i32
    return %c0_i32, %c0_i32_0 : i32, i32
  }
  func.func @transform_4(%arg0: i32) -> (i32, i32) {
    %c0_i32 = arith.constant 0 : i32
    %c0_i32_0 = arith.constant 0 : i32
    %c0_i32_1 = arith.constant 0 : i32
    return %c0_i32, %c0_i32_0 : i32, i32
  }
  func.func @transform_5(%arg0: i32) -> (i32, i32) {
    %c0_i32 = arith.constant 0 : i32
    %c0_i32_0 = arith.constant 0 : i32
    return %c0_i32, %arg0 : i32, i32
  }
  func.func @transform_6(%arg0: i32) -> (i32, i32) {
    %c0_i32 = arith.constant 0 : i32
    %c0_i32_0 = arith.constant 0 : i32
    %c0_i32_1 = arith.constant 0 : i32
    return %c0_i32, %c0_i32_0 : i32, i32
  }
  func.func @transform_7(%arg0: i32) -> (i32, i32) {
    %c0_i32 = arith.constant 0 : i32
    %c0_i32_0 = arith.constant 0 : i32
    return %c0_i32, %arg0 : i32, i32
  }
}

module attributes {stable_mosaic.version = 11 : i64} {
  func.func @_conv_mm_kernel(%arg0: i32, %arg1: memref<32x144xbf16, #tpu.memory_space<vmem>>, %arg2: memref<144x8xbf16, #tpu.memory_space<vmem>>, %arg3: memref<32x1xf32, #tpu.memory_space<vmem>>, %arg4: memref<32x1xf32, #tpu.memory_space<vmem>>, %arg5: memref<32x8xf32, #tpu.memory_space<vmem>>) attributes {dimension_semantics = [#tpu.dimension_semantics<parallel>], iteration_bounds = array<i64: 1>, scalar_prefetch = 0 : i64, scratch_operands = 0 : i64, tpu.core_type = #tpu.core_type<tc>, window_params = [{pipeline_mode = #tpu.pipeline_mode<synchronous>, transform_indices = @transform_0, window_bounds = array<i64: 32, 144>}, {transform_indices = @transform_1, window_bounds = array<i64: 144, 8>}, {pipeline_mode = #tpu.pipeline_mode<synchronous>, transform_indices = @transform_2, window_bounds = array<i64: 32, 1>}, {pipeline_mode = #tpu.pipeline_mode<synchronous>, transform_indices = @transform_3, window_bounds = array<i64: 32, 1>}, {transform_indices = @transform_4, window_bounds = array<i64: 32, 8>}]} {
    %c0 = arith.constant 0 : index
    %c0_0 = arith.constant 0 : index
    %0 = vector.load %arg1[%c0, %c0_0] : memref<32x144xbf16, #tpu.memory_space<vmem>>, vector<32x144xbf16>
    %c0_1 = arith.constant 0 : index
    %c0_2 = arith.constant 0 : index
    %1 = vector.load %arg2[%c0_1, %c0_2] : memref<144x8xbf16, #tpu.memory_space<vmem>>, vector<144x8xbf16>
    %cst = arith.constant dense<0.000000e+00> : vector<32x8xf32>
    %2 = tpu.matmul %0, %1, %cst {dimension_numbers = #tpu.dot_dimension_numbers<[1], [0], [0], [1], [0, 0, 1, 1], [], []>} : vector<32x144xbf16>, vector<144x8xbf16>, vector<32x8xf32> -> vector<32x8xf32>
    %c0_3 = arith.constant 0 : index
    %c0_4 = arith.constant 0 : index
    %3 = vector.load %arg3[%c0_3, %c0_4] : memref<32x1xf32, #tpu.memory_space<vmem>>, vector<32x1xf32>
    %4 = vector.broadcast %3 : vector<32x1xf32> to vector<32x8xf32>
    %5 = arith.mulf %2, %4 : vector<32x8xf32>
    %c0_5 = arith.constant 0 : index
    %c0_6 = arith.constant 0 : index
    %6 = vector.load %arg4[%c0_5, %c0_6] : memref<32x1xf32, #tpu.memory_space<vmem>>, vector<32x1xf32>
    %7 = vector.broadcast %6 : vector<32x1xf32> to vector<32x8xf32>
    %8 = arith.addf %5, %7 : vector<32x8xf32>
    %cst_7 = arith.constant 0.000000e+00 : f32
    %9 = vector.broadcast %cst_7 : f32 to vector<32x8xf32>
    %10 = arith.maximumf %8, %9 : vector<32x8xf32>
    %c0_8 = arith.constant 0 : index
    %c0_9 = arith.constant 0 : index
    %11 = vector.load %arg5[%c0_8, %c0_9] : memref<32x8xf32, #tpu.memory_space<vmem>>, vector<32x8xf32>
    tpu.vector_store %arg5[%c0_8, %c0_9], %10 {strides = array<i32>} : memref<32x8xf32, #tpu.memory_space<vmem>>, vector<32x8xf32>,
    return
  }
  func.func @transform_0(%arg0: i32) -> (i32, i32) {
    %c0_i32 = arith.constant 0 : i32
    %c0_i32_0 = arith.constant 0 : i32
    %c0_i32_1 = arith.constant 0 : i32
    return %c0_i32, %c0_i32_0 : i32, i32
  }
  func.func @transform_1(%arg0: i32) -> (i32, i32) {
    %c0_i32 = arith.constant 0 : i32
    %c0_i32_0 = arith.constant 0 : i32
    return %c0_i32, %arg0 : i32, i32
  }
  func.func @transform_2(%arg0: i32) -> (i32, i32) {
    %c0_i32 = arith.constant 0 : i32
    %c0_i32_0 = arith.constant 0 : i32
    %c0_i32_1 = arith.constant 0 : i32
    return %c0_i32, %c0_i32_0 : i32, i32
  }
  func.func @transform_3(%arg0: i32) -> (i32, i32) {
    %c0_i32 = arith.constant 0 : i32
    %c0_i32_0 = arith.constant 0 : i32
    %c0_i32_1 = arith.constant 0 : i32
    return %c0_i32, %c0_i32_0 : i32, i32
  }
  func.func @transform_4(%arg0: i32) -> (i32, i32) {
    %c0_i32 = arith.constant 0 : i32
    %c0_i32_0 = arith.constant 0 : i32
    return %c0_i32, %arg0 : i32, i32
  }
}

module attributes {stable_mosaic.version = 11 : i64} {
  func.func @_conv_mm_kernel(%arg0: i32, %arg1: memref<32x288xbf16, #tpu.memory_space<vmem>>, %arg2: memref<288x8xbf16, #tpu.memory_space<vmem>>, %arg3: memref<32x1xf32, #tpu.memory_space<vmem>>, %arg4: memref<32x1xf32, #tpu.memory_space<vmem>>, %arg5: memref<32x16xbf16, #tpu.memory_space<vmem>>, %arg6: memref<16x8xbf16, #tpu.memory_space<vmem>>, %arg7: memref<32x1xf32, #tpu.memory_space<vmem>>, %arg8: memref<32x8xf32, #tpu.memory_space<vmem>>) attributes {dimension_semantics = [#tpu.dimension_semantics<parallel>], iteration_bounds = array<i64: 1>, scalar_prefetch = 0 : i64, scratch_operands = 0 : i64, tpu.core_type = #tpu.core_type<tc>, window_params = [{pipeline_mode = #tpu.pipeline_mode<synchronous>, transform_indices = @transform_0, window_bounds = array<i64: 32, 288>}, {transform_indices = @transform_1, window_bounds = array<i64: 288, 8>}, {pipeline_mode = #tpu.pipeline_mode<synchronous>, transform_indices = @transform_2, window_bounds = array<i64: 32, 1>}, {pipeline_mode = #tpu.pipeline_mode<synchronous>, transform_indices = @transform_3, window_bounds = array<i64: 32, 1>}, {pipeline_mode = #tpu.pipeline_mode<synchronous>, transform_indices = @transform_4, window_bounds = array<i64: 32, 16>}, {transform_indices = @transform_5, window_bounds = array<i64: 16, 8>}, {pipeline_mode = #tpu.pipeline_mode<synchronous>, transform_indices = @transform_6, window_bounds = array<i64: 32, 1>}, {transform_indices = @transform_7, window_bounds = array<i64: 32, 8>}]} {
    %c0 = arith.constant 0 : index
    %c0_0 = arith.constant 0 : index
    %0 = vector.load %arg1[%c0, %c0_0] : memref<32x288xbf16, #tpu.memory_space<vmem>>, vector<32x288xbf16>
    %c0_1 = arith.constant 0 : index
    %c0_2 = arith.constant 0 : index
    %1 = vector.load %arg2[%c0_1, %c0_2] : memref<288x8xbf16, #tpu.memory_space<vmem>>, vector<288x8xbf16>
    %cst = arith.constant dense<0.000000e+00> : vector<32x8xf32>
    %2 = tpu.matmul %0, %1, %cst {dimension_numbers = #tpu.dot_dimension_numbers<[1], [0], [0], [1], [0, 0, 1, 1], [], []>} : vector<32x288xbf16>, vector<288x8xbf16>, vector<32x8xf32> -> vector<32x8xf32>
    %c0_3 = arith.constant 0 : index
    %c0_4 = arith.constant 0 : index
    %3 = vector.load %arg3[%c0_3, %c0_4] : memref<32x1xf32, #tpu.memory_space<vmem>>, vector<32x1xf32>
    %4 = vector.broadcast %3 : vector<32x1xf32> to vector<32x8xf32>
    %5 = arith.mulf %2, %4 : vector<32x8xf32>
    %c0_5 = arith.constant 0 : index
    %c0_6 = arith.constant 0 : index
    %6 = vector.load %arg4[%c0_5, %c0_6] : memref<32x1xf32, #tpu.memory_space<vmem>>, vector<32x1xf32>
    %7 = vector.broadcast %6 : vector<32x1xf32> to vector<32x8xf32>
    %8 = arith.addf %5, %7 : vector<32x8xf32>
    %cst_7 = arith.constant 0.000000e+00 : f32
    %9 = vector.broadcast %cst_7 : f32 to vector<32x8xf32>
    %10 = arith.maximumf %8, %9 : vector<32x8xf32>
    %c0_8 = arith.constant 0 : index
    %c0_9 = arith.constant 0 : index
    %11 = vector.load %arg5[%c0_8, %c0_9] : memref<32x16xbf16, #tpu.memory_space<vmem>>, vector<32x16xbf16>
    %c0_10 = arith.constant 0 : index
    %c0_11 = arith.constant 0 : index
    %12 = vector.load %arg6[%c0_10, %c0_11] : memref<16x8xbf16, #tpu.memory_space<vmem>>, vector<16x8xbf16>
    %cst_12 = arith.constant dense<0.000000e+00> : vector<32x8xf32>
    %13 = tpu.matmul %11, %12, %cst_12 {dimension_numbers = #tpu.dot_dimension_numbers<[1], [0], [0], [1], [0, 0, 1, 1], [], []>} : vector<32x16xbf16>, vector<16x8xbf16>, vector<32x8xf32> -> vector<32x8xf32>
    %14 = arith.addf %10, %13 : vector<32x8xf32>
    %c0_13 = arith.constant 0 : index
    %c0_14 = arith.constant 0 : index
    %15 = vector.load %arg7[%c0_13, %c0_14] : memref<32x1xf32, #tpu.memory_space<vmem>>, vector<32x1xf32>
    %16 = vector.broadcast %15 : vector<32x1xf32> to vector<32x8xf32>
    %17 = arith.addf %14, %16 : vector<32x8xf32>
    %c0_15 = arith.constant 0 : index
    %c0_16 = arith.constant 0 : index
    %18 = vector.load %arg8[%c0_15, %c0_16] : memref<32x8xf32, #tpu.memory_space<vmem>>, vector<32x8xf32>
    tpu.vector_store %arg8[%c0_15, %c0_16], %17 {strides = array<i32>} : memref<32x8xf32, #tpu.memory_space<vmem>>, vector<32x8xf32>,
    return
  }
  func.func @transform_0(%arg0: i32) -> (i32, i32) {
    %c0_i32 = arith.constant 0 : i32
    %c0_i32_0 = arith.constant 0 : i32
    %c0_i32_1 = arith.constant 0 : i32
    return %c0_i32, %c0_i32_0 : i32, i32
  }
  func.func @transform_1(%arg0: i32) -> (i32, i32) {
    %c0_i32 = arith.constant 0 : i32
    %c0_i32_0 = arith.constant 0 : i32
    return %c0_i32, %arg0 : i32, i32
  }
  func.func @transform_2(%arg0: i32) -> (i32, i32) {
    %c0_i32 = arith.constant 0 : i32
    %c0_i32_0 = arith.constant 0 : i32
    %c0_i32_1 = arith.constant 0 : i32
    return %c0_i32, %c0_i32_0 : i32, i32
  }
  func.func @transform_3(%arg0: i32) -> (i32, i32) {
    %c0_i32 = arith.constant 0 : i32
    %c0_i32_0 = arith.constant 0 : i32
    %c0_i32_1 = arith.constant 0 : i32
    return %c0_i32, %c0_i32_0 : i32, i32
  }
  func.func @transform_4(%arg0: i32) -> (i32, i32) {
    %c0_i32 = arith.constant 0 : i32
    %c0_i32_0 = arith.constant 0 : i32
    %c0_i32_1 = arith.constant 0 : i32
    return %c0_i32, %c0_i32_0 : i32, i32
  }
  func.func @transform_5(%arg0: i32) -> (i32, i32) {
    %c0_i32 = arith.constant 0 : i32
    %c0_i32_0 = arith.constant 0 : i32
    return %c0_i32, %arg0 : i32, i32
  }
  func.func @transform_6(%arg0: i32) -> (i32, i32) {
    %c0_i32 = arith.constant 0 : i32
    %c0_i32_0 = arith.constant 0 : i32
    %c0_i32_1 = arith.constant 0 : i32
    return %c0_i32, %c0_i32_0 : i32, i32
  }
  func.func @transform_7(%arg0: i32) -> (i32, i32) {
    %c0_i32 = arith.constant 0 : i32
    %c0_i32_0 = arith.constant 0 : i32
    return %c0_i32, %arg0 : i32, i32
  }
}

module attributes {stable_mosaic.version = 11 : i64} {
  func.func @_conv_mm_kernel(%arg0: i32, %arg1: memref<64x288xbf16, #tpu.memory_space<vmem>>, %arg2: memref<288x2xbf16, #tpu.memory_space<vmem>>, %arg3: memref<64x1xf32, #tpu.memory_space<vmem>>, %arg4: memref<64x1xf32, #tpu.memory_space<vmem>>, %arg5: memref<64x2xf32, #tpu.memory_space<vmem>>) attributes {dimension_semantics = [#tpu.dimension_semantics<parallel>], iteration_bounds = array<i64: 1>, scalar_prefetch = 0 : i64, scratch_operands = 0 : i64, tpu.core_type = #tpu.core_type<tc>, window_params = [{pipeline_mode = #tpu.pipeline_mode<synchronous>, transform_indices = @transform_0, window_bounds = array<i64: 64, 288>}, {transform_indices = @transform_1, window_bounds = array<i64: 288, 2>}, {pipeline_mode = #tpu.pipeline_mode<synchronous>, transform_indices = @transform_2, window_bounds = array<i64: 64, 1>}, {pipeline_mode = #tpu.pipeline_mode<synchronous>, transform_indices = @transform_3, window_bounds = array<i64: 64, 1>}, {transform_indices = @transform_4, window_bounds = array<i64: 64, 2>}]} {
    %c0 = arith.constant 0 : index
    %c0_0 = arith.constant 0 : index
    %0 = vector.load %arg1[%c0, %c0_0] : memref<64x288xbf16, #tpu.memory_space<vmem>>, vector<64x288xbf16>
    %c0_1 = arith.constant 0 : index
    %c0_2 = arith.constant 0 : index
    %1 = vector.load %arg2[%c0_1, %c0_2] : memref<288x2xbf16, #tpu.memory_space<vmem>>, vector<288x2xbf16>
    %cst = arith.constant dense<0.000000e+00> : vector<64x2xf32>
    %2 = tpu.matmul %0, %1, %cst {dimension_numbers = #tpu.dot_dimension_numbers<[1], [0], [0], [1], [0, 0, 1, 1], [], []>} : vector<64x288xbf16>, vector<288x2xbf16>, vector<64x2xf32> -> vector<64x2xf32>
    %c0_3 = arith.constant 0 : index
    %c0_4 = arith.constant 0 : index
    %3 = vector.load %arg3[%c0_3, %c0_4] : memref<64x1xf32, #tpu.memory_space<vmem>>, vector<64x1xf32>
    %4 = vector.broadcast %3 : vector<64x1xf32> to vector<64x2xf32>
    %5 = arith.mulf %2, %4 : vector<64x2xf32>
    %c0_5 = arith.constant 0 : index
    %c0_6 = arith.constant 0 : index
    %6 = vector.load %arg4[%c0_5, %c0_6] : memref<64x1xf32, #tpu.memory_space<vmem>>, vector<64x1xf32>
    %7 = vector.broadcast %6 : vector<64x1xf32> to vector<64x2xf32>
    %8 = arith.addf %5, %7 : vector<64x2xf32>
    %cst_7 = arith.constant 0.000000e+00 : f32
    %9 = vector.broadcast %cst_7 : f32 to vector<64x2xf32>
    %10 = arith.maximumf %8, %9 : vector<64x2xf32>
    %c0_8 = arith.constant 0 : index
    %c0_9 = arith.constant 0 : index
    %11 = vector.load %arg5[%c0_8, %c0_9] : memref<64x2xf32, #tpu.memory_space<vmem>>, vector<64x2xf32>
    tpu.vector_store %arg5[%c0_8, %c0_9], %10 {strides = array<i32>} : memref<64x2xf32, #tpu.memory_space<vmem>>, vector<64x2xf32>,
    return
  }
  func.func @transform_0(%arg0: i32) -> (i32, i32) {
    %c0_i32 = arith.constant 0 : i32
    %c0_i32_0 = arith.constant 0 : i32
    %c0_i32_1 = arith.constant 0 : i32
    return %c0_i32, %c0_i32_0 : i32, i32
  }
  func.func @transform_1(%arg0: i32) -> (i32, i32) {
    %c0_i32 = arith.constant 0 : i32
    %c0_i32_0 = arith.constant 0 : i32
    return %c0_i32, %arg0 : i32, i32
  }
  func.func @transform_2(%arg0: i32) -> (i32, i32) {
    %c0_i32 = arith.constant 0 : i32
    %c0_i32_0 = arith.constant 0 : i32
    %c0_i32_1 = arith.constant 0 : i32
    return %c0_i32, %c0_i32_0 : i32, i32
  }
  func.func @transform_3(%arg0: i32) -> (i32, i32) {
    %c0_i32 = arith.constant 0 : i32
    %c0_i32_0 = arith.constant 0 : i32
    %c0_i32_1 = arith.constant 0 : i32
    return %c0_i32, %c0_i32_0 : i32, i32
  }
  func.func @transform_4(%arg0: i32) -> (i32, i32) {
    %c0_i32 = arith.constant 0 : i32
    %c0_i32_0 = arith.constant 0 : i32
    return %c0_i32, %arg0 : i32, i32
  }
}

module attributes {stable_mosaic.version = 11 : i64} {
  func.func @_conv_mm_kernel(%arg0: i32, %arg1: memref<64x576xbf16, #tpu.memory_space<vmem>>, %arg2: memref<576x2xbf16, #tpu.memory_space<vmem>>, %arg3: memref<64x1xf32, #tpu.memory_space<vmem>>, %arg4: memref<64x1xf32, #tpu.memory_space<vmem>>, %arg5: memref<64x32xbf16, #tpu.memory_space<vmem>>, %arg6: memref<32x2xbf16, #tpu.memory_space<vmem>>, %arg7: memref<64x1xf32, #tpu.memory_space<vmem>>, %arg8: memref<64x2xf32, #tpu.memory_space<vmem>>) attributes {dimension_semantics = [#tpu.dimension_semantics<parallel>], iteration_bounds = array<i64: 1>, scalar_prefetch = 0 : i64, scratch_operands = 0 : i64, tpu.core_type = #tpu.core_type<tc>, window_params = [{pipeline_mode = #tpu.pipeline_mode<synchronous>, transform_indices = @transform_0, window_bounds = array<i64: 64, 576>}, {transform_indices = @transform_1, window_bounds = array<i64: 576, 2>}, {pipeline_mode = #tpu.pipeline_mode<synchronous>, transform_indices = @transform_2, window_bounds = array<i64: 64, 1>}, {pipeline_mode = #tpu.pipeline_mode<synchronous>, transform_indices = @transform_3, window_bounds = array<i64: 64, 1>}, {pipeline_mode = #tpu.pipeline_mode<synchronous>, transform_indices = @transform_4, window_bounds = array<i64: 64, 32>}, {transform_indices = @transform_5, window_bounds = array<i64: 32, 2>}, {pipeline_mode = #tpu.pipeline_mode<synchronous>, transform_indices = @transform_6, window_bounds = array<i64: 64, 1>}, {transform_indices = @transform_7, window_bounds = array<i64: 64, 2>}]} {
    %c0 = arith.constant 0 : index
    %c0_0 = arith.constant 0 : index
    %0 = vector.load %arg1[%c0, %c0_0] : memref<64x576xbf16, #tpu.memory_space<vmem>>, vector<64x576xbf16>
    %c0_1 = arith.constant 0 : index
    %c0_2 = arith.constant 0 : index
    %1 = vector.load %arg2[%c0_1, %c0_2] : memref<576x2xbf16, #tpu.memory_space<vmem>>, vector<576x2xbf16>
    %cst = arith.constant dense<0.000000e+00> : vector<64x2xf32>
    %2 = tpu.matmul %0, %1, %cst {dimension_numbers = #tpu.dot_dimension_numbers<[1], [0], [0], [1], [0, 0, 1, 1], [], []>} : vector<64x576xbf16>, vector<576x2xbf16>, vector<64x2xf32> -> vector<64x2xf32>
    %c0_3 = arith.constant 0 : index
    %c0_4 = arith.constant 0 : index
    %3 = vector.load %arg3[%c0_3, %c0_4] : memref<64x1xf32, #tpu.memory_space<vmem>>, vector<64x1xf32>
    %4 = vector.broadcast %3 : vector<64x1xf32> to vector<64x2xf32>
    %5 = arith.mulf %2, %4 : vector<64x2xf32>
    %c0_5 = arith.constant 0 : index
    %c0_6 = arith.constant 0 : index
    %6 = vector.load %arg4[%c0_5, %c0_6] : memref<64x1xf32, #tpu.memory_space<vmem>>, vector<64x1xf32>
    %7 = vector.broadcast %6 : vector<64x1xf32> to vector<64x2xf32>
    %8 = arith.addf %5, %7 : vector<64x2xf32>
    %cst_7 = arith.constant 0.000000e+00 : f32
    %9 = vector.broadcast %cst_7 : f32 to vector<64x2xf32>
    %10 = arith.maximumf %8, %9 : vector<64x2xf32>
    %c0_8 = arith.constant 0 : index
    %c0_9 = arith.constant 0 : index
    %11 = vector.load %arg5[%c0_8, %c0_9] : memref<64x32xbf16, #tpu.memory_space<vmem>>, vector<64x32xbf16>
    %c0_10 = arith.constant 0 : index
    %c0_11 = arith.constant 0 : index
    %12 = vector.load %arg6[%c0_10, %c0_11] : memref<32x2xbf16, #tpu.memory_space<vmem>>, vector<32x2xbf16>
    %cst_12 = arith.constant dense<0.000000e+00> : vector<64x2xf32>
    %13 = tpu.matmul %11, %12, %cst_12 {dimension_numbers = #tpu.dot_dimension_numbers<[1], [0], [0], [1], [0, 0, 1, 1], [], []>} : vector<64x32xbf16>, vector<32x2xbf16>, vector<64x2xf32> -> vector<64x2xf32>
    %14 = arith.addf %10, %13 : vector<64x2xf32>
    %c0_13 = arith.constant 0 : index
    %c0_14 = arith.constant 0 : index
    %15 = vector.load %arg7[%c0_13, %c0_14] : memref<64x1xf32, #tpu.memory_space<vmem>>, vector<64x1xf32>
    %16 = vector.broadcast %15 : vector<64x1xf32> to vector<64x2xf32>
    %17 = arith.addf %14, %16 : vector<64x2xf32>
    %c0_15 = arith.constant 0 : index
    %c0_16 = arith.constant 0 : index
    %18 = vector.load %arg8[%c0_15, %c0_16] : memref<64x2xf32, #tpu.memory_space<vmem>>, vector<64x2xf32>
    tpu.vector_store %arg8[%c0_15, %c0_16], %17 {strides = array<i32>} : memref<64x2xf32, #tpu.memory_space<vmem>>, vector<64x2xf32>,
    return
  }
  func.func @transform_0(%arg0: i32) -> (i32, i32) {
    %c0_i32 = arith.constant 0 : i32
    %c0_i32_0 = arith.constant 0 : i32
    %c0_i32_1 = arith.constant 0 : i32
    return %c0_i32, %c0_i32_0 : i32, i32
  }
  func.func @transform_1(%arg0: i32) -> (i32, i32) {
    %c0_i32 = arith.constant 0 : i32
    %c0_i32_0 = arith.constant 0 : i32
    return %c0_i32, %arg0 : i32, i32
  }
  func.func @transform_2(%arg0: i32) -> (i32, i32) {
    %c0_i32 = arith.constant 0 : i32
    %c0_i32_0 = arith.constant 0 : i32
    %c0_i32_1 = arith.constant 0 : i32
    return %c0_i32, %c0_i32_0 : i32, i32
  }
  func.func @transform_3(%arg0: i32) -> (i32, i32) {
    %c0_i32 = arith.constant 0 : i32
    %c0_i32_0 = arith.constant 0 : i32
    %c0_i32_1 = arith.constant 0 : i32
    return %c0_i32, %c0_i32_0 : i32, i32
  }
  func.func @transform_4(%arg0: i32) -> (i32, i32) {
    %c0_i32 = arith.constant 0 : i32
    %c0_i32_0 = arith.constant 0 : i32
    %c0_i32_1 = arith.constant 0 : i32
    return %c0_i32, %c0_i32_0 : i32, i32
  }
  func.func @transform_5(%arg0: i32) -> (i32, i32) {
    %c0_i32 = arith.constant 0 : i32
    %c0_i32_0 = arith.constant 0 : i32
    return %c0_i32, %arg0 : i32, i32
  }
  func.func @transform_6(%arg0: i32) -> (i32, i32) {
    %c0_i32 = arith.constant 0 : i32
    %c0_i32_0 = arith.constant 0 : i32
    %c0_i32_1 = arith.constant 0 : i32
    return %c0_i32, %c0_i32_0 : i32, i32
  }
  func.func @transform_7(%arg0: i32) -> (i32, i32) {
    %c0_i32 = arith.constant 0 : i32
    %c0_i32_0 = arith.constant 0 : i32
    return %c0_i32, %arg0 : i32, i32
  }
}

module attributes {stable_mosaic.version = 11 : i64} {
  func.func @_conv_mm_kernel(%arg0: i32, %arg1: memref<32x576xbf16, #tpu.memory_space<vmem>>, %arg2: memref<576x8xbf16, #tpu.memory_space<vmem>>, %arg3: memref<32x1xf32, #tpu.memory_space<vmem>>, %arg4: memref<32x1xf32, #tpu.memory_space<vmem>>, %arg5: memref<32x8xf32, #tpu.memory_space<vmem>>) attributes {dimension_semantics = [#tpu.dimension_semantics<parallel>], iteration_bounds = array<i64: 1>, scalar_prefetch = 0 : i64, scratch_operands = 0 : i64, tpu.core_type = #tpu.core_type<tc>, window_params = [{pipeline_mode = #tpu.pipeline_mode<synchronous>, transform_indices = @transform_0, window_bounds = array<i64: 32, 576>}, {transform_indices = @transform_1, window_bounds = array<i64: 576, 8>}, {pipeline_mode = #tpu.pipeline_mode<synchronous>, transform_indices = @transform_2, window_bounds = array<i64: 32, 1>}, {pipeline_mode = #tpu.pipeline_mode<synchronous>, transform_indices = @transform_3, window_bounds = array<i64: 32, 1>}, {transform_indices = @transform_4, window_bounds = array<i64: 32, 8>}]} {
    %c0 = arith.constant 0 : index
    %c0_0 = arith.constant 0 : index
    %0 = vector.load %arg1[%c0, %c0_0] : memref<32x576xbf16, #tpu.memory_space<vmem>>, vector<32x576xbf16>
    %c0_1 = arith.constant 0 : index
    %c0_2 = arith.constant 0 : index
    %1 = vector.load %arg2[%c0_1, %c0_2] : memref<576x8xbf16, #tpu.memory_space<vmem>>, vector<576x8xbf16>
    %cst = arith.constant dense<0.000000e+00> : vector<32x8xf32>
    %2 = tpu.matmul %0, %1, %cst {dimension_numbers = #tpu.dot_dimension_numbers<[1], [0], [0], [1], [0, 0, 1, 1], [], []>} : vector<32x576xbf16>, vector<576x8xbf16>, vector<32x8xf32> -> vector<32x8xf32>
    %c0_3 = arith.constant 0 : index
    %c0_4 = arith.constant 0 : index
    %3 = vector.load %arg3[%c0_3, %c0_4] : memref<32x1xf32, #tpu.memory_space<vmem>>, vector<32x1xf32>
    %4 = vector.broadcast %3 : vector<32x1xf32> to vector<32x8xf32>
    %5 = arith.mulf %2, %4 : vector<32x8xf32>
    %c0_5 = arith.constant 0 : index
    %c0_6 = arith.constant 0 : index
    %6 = vector.load %arg4[%c0_5, %c0_6] : memref<32x1xf32, #tpu.memory_space<vmem>>, vector<32x1xf32>
    %7 = vector.broadcast %6 : vector<32x1xf32> to vector<32x8xf32>
    %8 = arith.addf %5, %7 : vector<32x8xf32>
    %cst_7 = arith.constant 0.000000e+00 : f32
    %9 = vector.broadcast %cst_7 : f32 to vector<32x8xf32>
    %10 = arith.maximumf %8, %9 : vector<32x8xf32>
    %c0_8 = arith.constant 0 : index
    %c0_9 = arith.constant 0 : index
    %11 = vector.load %arg5[%c0_8, %c0_9] : memref<32x8xf32, #tpu.memory_space<vmem>>, vector<32x8xf32>
    tpu.vector_store %arg5[%c0_8, %c0_9], %10 {strides = array<i32>} : memref<32x8xf32, #tpu.memory_space<vmem>>, vector<32x8xf32>,
    return
  }
  func.func @transform_0(%arg0: i32) -> (i32, i32) {
    %c0_i32 = arith.constant 0 : i32
    %c0_i32_0 = arith.constant 0 : i32
    %c0_i32_1 = arith.constant 0 : i32
    return %c0_i32, %c0_i32_0 : i32, i32
  }
  func.func @transform_1(%arg0: i32) -> (i32, i32) {
    %c0_i32 = arith.constant 0 : i32
    %c0_i32_0 = arith.constant 0 : i32
    return %c0_i32, %arg0 : i32, i32
  }
  func.func @transform_2(%arg0: i32) -> (i32, i32) {
    %c0_i32 = arith.constant 0 : i32
    %c0_i32_0 = arith.constant 0 : i32
    %c0_i32_1 = arith.constant 0 : i32
    return %c0_i32, %c0_i32_0 : i32, i32
  }
  func.func @transform_3(%arg0: i32) -> (i32, i32) {
    %c0_i32 = arith.constant 0 : i32
    %c0_i32_0 = arith.constant 0 : i32
    %c0_i32_1 = arith.constant 0 : i32
    return %c0_i32, %c0_i32_0 : i32, i32
  }
  func.func @transform_4(%arg0: i32) -> (i32, i32) {
    %c0_i32 = arith.constant 0 : i32
    %c0_i32_0 = arith.constant 0 : i32
    return %c0_i32, %arg0 : i32, i32
  }
}

module attributes {stable_mosaic.version = 11 : i64} {
  func.func @_conv_mm_kernel(%arg0: i32, %arg1: memref<32x288xbf16, #tpu.memory_space<vmem>>, %arg2: memref<288x8xbf16, #tpu.memory_space<vmem>>, %arg3: memref<32x1xf32, #tpu.memory_space<vmem>>, %arg4: memref<32x1xf32, #tpu.memory_space<vmem>>, %arg5: memref<32x64xbf16, #tpu.memory_space<vmem>>, %arg6: memref<64x8xbf16, #tpu.memory_space<vmem>>, %arg7: memref<32x1xf32, #tpu.memory_space<vmem>>, %arg8: memref<32x8xf32, #tpu.memory_space<vmem>>) attributes {dimension_semantics = [#tpu.dimension_semantics<parallel>], iteration_bounds = array<i64: 1>, scalar_prefetch = 0 : i64, scratch_operands = 0 : i64, tpu.core_type = #tpu.core_type<tc>, window_params = [{pipeline_mode = #tpu.pipeline_mode<synchronous>, transform_indices = @transform_0, window_bounds = array<i64: 32, 288>}, {transform_indices = @transform_1, window_bounds = array<i64: 288, 8>}, {pipeline_mode = #tpu.pipeline_mode<synchronous>, transform_indices = @transform_2, window_bounds = array<i64: 32, 1>}, {pipeline_mode = #tpu.pipeline_mode<synchronous>, transform_indices = @transform_3, window_bounds = array<i64: 32, 1>}, {pipeline_mode = #tpu.pipeline_mode<synchronous>, transform_indices = @transform_4, window_bounds = array<i64: 32, 64>}, {transform_indices = @transform_5, window_bounds = array<i64: 64, 8>}, {pipeline_mode = #tpu.pipeline_mode<synchronous>, transform_indices = @transform_6, window_bounds = array<i64: 32, 1>}, {transform_indices = @transform_7, window_bounds = array<i64: 32, 8>}]} {
    %c0 = arith.constant 0 : index
    %c0_0 = arith.constant 0 : index
    %0 = vector.load %arg1[%c0, %c0_0] : memref<32x288xbf16, #tpu.memory_space<vmem>>, vector<32x288xbf16>
    %c0_1 = arith.constant 0 : index
    %c0_2 = arith.constant 0 : index
    %1 = vector.load %arg2[%c0_1, %c0_2] : memref<288x8xbf16, #tpu.memory_space<vmem>>, vector<288x8xbf16>
    %cst = arith.constant dense<0.000000e+00> : vector<32x8xf32>
    %2 = tpu.matmul %0, %1, %cst {dimension_numbers = #tpu.dot_dimension_numbers<[1], [0], [0], [1], [0, 0, 1, 1], [], []>} : vector<32x288xbf16>, vector<288x8xbf16>, vector<32x8xf32> -> vector<32x8xf32>
    %c0_3 = arith.constant 0 : index
    %c0_4 = arith.constant 0 : index
    %3 = vector.load %arg3[%c0_3, %c0_4] : memref<32x1xf32, #tpu.memory_space<vmem>>, vector<32x1xf32>
    %4 = vector.broadcast %3 : vector<32x1xf32> to vector<32x8xf32>
    %5 = arith.mulf %2, %4 : vector<32x8xf32>
    %c0_5 = arith.constant 0 : index
    %c0_6 = arith.constant 0 : index
    %6 = vector.load %arg4[%c0_5, %c0_6] : memref<32x1xf32, #tpu.memory_space<vmem>>, vector<32x1xf32>
    %7 = vector.broadcast %6 : vector<32x1xf32> to vector<32x8xf32>
    %8 = arith.addf %5, %7 : vector<32x8xf32>
    %cst_7 = arith.constant 0.000000e+00 : f32
    %9 = vector.broadcast %cst_7 : f32 to vector<32x8xf32>
    %10 = arith.maximumf %8, %9 : vector<32x8xf32>
    %c0_8 = arith.constant 0 : index
    %c0_9 = arith.constant 0 : index
    %11 = vector.load %arg5[%c0_8, %c0_9] : memref<32x64xbf16, #tpu.memory_space<vmem>>, vector<32x64xbf16>
    %c0_10 = arith.constant 0 : index
    %c0_11 = arith.constant 0 : index
    %12 = vector.load %arg6[%c0_10, %c0_11] : memref<64x8xbf16, #tpu.memory_space<vmem>>, vector<64x8xbf16>
    %cst_12 = arith.constant dense<0.000000e+00> : vector<32x8xf32>
    %13 = tpu.matmul %11, %12, %cst_12 {dimension_numbers = #tpu.dot_dimension_numbers<[1], [0], [0], [1], [0, 0, 1, 1], [], []>} : vector<32x64xbf16>, vector<64x8xbf16>, vector<32x8xf32> -> vector<32x8xf32>
    %14 = arith.addf %10, %13 : vector<32x8xf32>
    %c0_13 = arith.constant 0 : index
    %c0_14 = arith.constant 0 : index
    %15 = vector.load %arg7[%c0_13, %c0_14] : memref<32x1xf32, #tpu.memory_space<vmem>>, vector<32x1xf32>
    %16 = vector.broadcast %15 : vector<32x1xf32> to vector<32x8xf32>
    %17 = arith.addf %14, %16 : vector<32x8xf32>
    %c0_15 = arith.constant 0 : index
    %c0_16 = arith.constant 0 : index
    %18 = vector.load %arg8[%c0_15, %c0_16] : memref<32x8xf32, #tpu.memory_space<vmem>>, vector<32x8xf32>
    tpu.vector_store %arg8[%c0_15, %c0_16], %17 {strides = array<i32>} : memref<32x8xf32, #tpu.memory_space<vmem>>, vector<32x8xf32>,
    return
  }
  func.func @transform_0(%arg0: i32) -> (i32, i32) {
    %c0_i32 = arith.constant 0 : i32
    %c0_i32_0 = arith.constant 0 : i32
    %c0_i32_1 = arith.constant 0 : i32
    return %c0_i32, %c0_i32_0 : i32, i32
  }
  func.func @transform_1(%arg0: i32) -> (i32, i32) {
    %c0_i32 = arith.constant 0 : i32
    %c0_i32_0 = arith.constant 0 : i32
    return %c0_i32, %arg0 : i32, i32
  }
  func.func @transform_2(%arg0: i32) -> (i32, i32) {
    %c0_i32 = arith.constant 0 : i32
    %c0_i32_0 = arith.constant 0 : i32
    %c0_i32_1 = arith.constant 0 : i32
    return %c0_i32, %c0_i32_0 : i32, i32
  }
  func.func @transform_3(%arg0: i32) -> (i32, i32) {
    %c0_i32 = arith.constant 0 : i32
    %c0_i32_0 = arith.constant 0 : i32
    %c0_i32_1 = arith.constant 0 : i32
    return %c0_i32, %c0_i32_0 : i32, i32
  }
  func.func @transform_4(%arg0: i32) -> (i32, i32) {
    %c0_i32 = arith.constant 0 : i32
    %c0_i32_0 = arith.constant 0 : i32
    %c0_i32_1 = arith.constant 0 : i32
    return %c0_i32, %c0_i32_0 : i32, i32
  }
  func.func @transform_5(%arg0: i32) -> (i32, i32) {
    %c0_i32 = arith.constant 0 : i32
    %c0_i32_0 = arith.constant 0 : i32
    return %c0_i32, %arg0 : i32, i32
  }
  func.func @transform_6(%arg0: i32) -> (i32, i32) {
    %c0_i32 = arith.constant 0 : i32
    %c0_i32_0 = arith.constant 0 : i32
    %c0_i32_1 = arith.constant 0 : i32
    return %c0_i32, %c0_i32_0 : i32, i32
  }
  func.func @transform_7(%arg0: i32) -> (i32, i32) {
    %c0_i32 = arith.constant 0 : i32
    %c0_i32_0 = arith.constant 0 : i32
    return %c0_i32, %arg0 : i32, i32
  }
}

module attributes {stable_mosaic.version = 11 : i64} {
  func.func @_conv_mm_kernel(%arg0: i32, %arg1: memref<16x288xbf16, #tpu.memory_space<vmem>>, %arg2: memref<288x32xbf16, #tpu.memory_space<vmem>>, %arg3: memref<16x1xf32, #tpu.memory_space<vmem>>, %arg4: memref<16x1xf32, #tpu.memory_space<vmem>>, %arg5: memref<16x32xf32, #tpu.memory_space<vmem>>) attributes {dimension_semantics = [#tpu.dimension_semantics<parallel>], iteration_bounds = array<i64: 1>, scalar_prefetch = 0 : i64, scratch_operands = 0 : i64, tpu.core_type = #tpu.core_type<tc>, window_params = [{pipeline_mode = #tpu.pipeline_mode<synchronous>, transform_indices = @transform_0, window_bounds = array<i64: 16, 288>}, {transform_indices = @transform_1, window_bounds = array<i64: 288, 32>}, {pipeline_mode = #tpu.pipeline_mode<synchronous>, transform_indices = @transform_2, window_bounds = array<i64: 16, 1>}, {pipeline_mode = #tpu.pipeline_mode<synchronous>, transform_indices = @transform_3, window_bounds = array<i64: 16, 1>}, {transform_indices = @transform_4, window_bounds = array<i64: 16, 32>}]} {
    %c0 = arith.constant 0 : index
    %c0_0 = arith.constant 0 : index
    %0 = vector.load %arg1[%c0, %c0_0] : memref<16x288xbf16, #tpu.memory_space<vmem>>, vector<16x288xbf16>
    %c0_1 = arith.constant 0 : index
    %c0_2 = arith.constant 0 : index
    %1 = vector.load %arg2[%c0_1, %c0_2] : memref<288x32xbf16, #tpu.memory_space<vmem>>, vector<288x32xbf16>
    %cst = arith.constant dense<0.000000e+00> : vector<16x32xf32>
    %2 = tpu.matmul %0, %1, %cst {dimension_numbers = #tpu.dot_dimension_numbers<[1], [0], [0], [1], [0, 0, 1, 1], [], []>} : vector<16x288xbf16>, vector<288x32xbf16>, vector<16x32xf32> -> vector<16x32xf32>
    %c0_3 = arith.constant 0 : index
    %c0_4 = arith.constant 0 : index
    %3 = vector.load %arg3[%c0_3, %c0_4] : memref<16x1xf32, #tpu.memory_space<vmem>>, vector<16x1xf32>
    %4 = vector.broadcast %3 : vector<16x1xf32> to vector<16x32xf32>
    %5 = arith.mulf %2, %4 : vector<16x32xf32>
    %c0_5 = arith.constant 0 : index
    %c0_6 = arith.constant 0 : index
    %6 = vector.load %arg4[%c0_5, %c0_6] : memref<16x1xf32, #tpu.memory_space<vmem>>, vector<16x1xf32>
    %7 = vector.broadcast %6 : vector<16x1xf32> to vector<16x32xf32>
    %8 = arith.addf %5, %7 : vector<16x32xf32>
    %cst_7 = arith.constant 0.000000e+00 : f32
    %9 = vector.broadcast %cst_7 : f32 to vector<16x32xf32>
    %10 = arith.maximumf %8, %9 : vector<16x32xf32>
    %c0_8 = arith.constant 0 : index
    %c0_9 = arith.constant 0 : index
    %11 = vector.load %arg5[%c0_8, %c0_9] : memref<16x32xf32, #tpu.memory_space<vmem>>, vector<16x32xf32>
    tpu.vector_store %arg5[%c0_8, %c0_9], %10 {strides = array<i32>} : memref<16x32xf32, #tpu.memory_space<vmem>>, vector<16x32xf32>,
    return
  }
  func.func @transform_0(%arg0: i32) -> (i32, i32) {
    %c0_i32 = arith.constant 0 : i32
    %c0_i32_0 = arith.constant 0 : i32
    %c0_i32_1 = arith.constant 0 : i32
    return %c0_i32, %c0_i32_0 : i32, i32
  }
  func.func @transform_1(%arg0: i32) -> (i32, i32) {
    %c0_i32 = arith.constant 0 : i32
    %c0_i32_0 = arith.constant 0 : i32
    return %c0_i32, %arg0 : i32, i32
  }
  func.func @transform_2(%arg0: i32) -> (i32, i32) {
    %c0_i32 = arith.constant 0 : i32
    %c0_i32_0 = arith.constant 0 : i32
    %c0_i32_1 = arith.constant 0 : i32
    return %c0_i32, %c0_i32_0 : i32, i32
  }
  func.func @transform_3(%arg0: i32) -> (i32, i32) {
    %c0_i32 = arith.constant 0 : i32
    %c0_i32_0 = arith.constant 0 : i32
    %c0_i32_1 = arith.constant 0 : i32
    return %c0_i32, %c0_i32_0 : i32, i32
  }
  func.func @transform_4(%arg0: i32) -> (i32, i32) {
    %c0_i32 = arith.constant 0 : i32
    %c0_i32_0 = arith.constant 0 : i32
    return %c0_i32, %arg0 : i32, i32
  }
}

module attributes {stable_mosaic.version = 11 : i64} {
  func.func @_conv_mm_kernel(%arg0: i32, %arg1: memref<16x144xbf16, #tpu.memory_space<vmem>>, %arg2: memref<144x32xbf16, #tpu.memory_space<vmem>>, %arg3: memref<16x1xf32, #tpu.memory_space<vmem>>, %arg4: memref<16x1xf32, #tpu.memory_space<vmem>>, %arg5: memref<16x32xbf16, #tpu.memory_space<vmem>>, %arg6: memref<32x32xbf16, #tpu.memory_space<vmem>>, %arg7: memref<16x1xf32, #tpu.memory_space<vmem>>, %arg8: memref<16x32xf32, #tpu.memory_space<vmem>>) attributes {dimension_semantics = [#tpu.dimension_semantics<parallel>], iteration_bounds = array<i64: 1>, scalar_prefetch = 0 : i64, scratch_operands = 0 : i64, tpu.core_type = #tpu.core_type<tc>, window_params = [{pipeline_mode = #tpu.pipeline_mode<synchronous>, transform_indices = @transform_0, window_bounds = array<i64: 16, 144>}, {transform_indices = @transform_1, window_bounds = array<i64: 144, 32>}, {pipeline_mode = #tpu.pipeline_mode<synchronous>, transform_indices = @transform_2, window_bounds = array<i64: 16, 1>}, {pipeline_mode = #tpu.pipeline_mode<synchronous>, transform_indices = @transform_3, window_bounds = array<i64: 16, 1>}, {pipeline_mode = #tpu.pipeline_mode<synchronous>, transform_indices = @transform_4, window_bounds = array<i64: 16, 32>}, {transform_indices = @transform_5, window_bounds = array<i64: 32, 32>}, {pipeline_mode = #tpu.pipeline_mode<synchronous>, transform_indices = @transform_6, window_bounds = array<i64: 16, 1>}, {transform_indices = @transform_7, window_bounds = array<i64: 16, 32>}]} {
    %c0 = arith.constant 0 : index
    %c0_0 = arith.constant 0 : index
    %0 = vector.load %arg1[%c0, %c0_0] : memref<16x144xbf16, #tpu.memory_space<vmem>>, vector<16x144xbf16>
    %c0_1 = arith.constant 0 : index
    %c0_2 = arith.constant 0 : index
    %1 = vector.load %arg2[%c0_1, %c0_2] : memref<144x32xbf16, #tpu.memory_space<vmem>>, vector<144x32xbf16>
    %cst = arith.constant dense<0.000000e+00> : vector<16x32xf32>
    %2 = tpu.matmul %0, %1, %cst {dimension_numbers = #tpu.dot_dimension_numbers<[1], [0], [0], [1], [0, 0, 1, 1], [], []>} : vector<16x144xbf16>, vector<144x32xbf16>, vector<16x32xf32> -> vector<16x32xf32>
    %c0_3 = arith.constant 0 : index
    %c0_4 = arith.constant 0 : index
    %3 = vector.load %arg3[%c0_3, %c0_4] : memref<16x1xf32, #tpu.memory_space<vmem>>, vector<16x1xf32>
    %4 = vector.broadcast %3 : vector<16x1xf32> to vector<16x32xf32>
    %5 = arith.mulf %2, %4 : vector<16x32xf32>
    %c0_5 = arith.constant 0 : index
    %c0_6 = arith.constant 0 : index
    %6 = vector.load %arg4[%c0_5, %c0_6] : memref<16x1xf32, #tpu.memory_space<vmem>>, vector<16x1xf32>
    %7 = vector.broadcast %6 : vector<16x1xf32> to vector<16x32xf32>
    %8 = arith.addf %5, %7 : vector<16x32xf32>
    %cst_7 = arith.constant 0.000000e+00 : f32
    %9 = vector.broadcast %cst_7 : f32 to vector<16x32xf32>
    %10 = arith.maximumf %8, %9 : vector<16x32xf32>
    %c0_8 = arith.constant 0 : index
    %c0_9 = arith.constant 0 : index
    %11 = vector.load %arg5[%c0_8, %c0_9] : memref<16x32xbf16, #tpu.memory_space<vmem>>, vector<16x32xbf16>
    %c0_10 = arith.constant 0 : index
    %c0_11 = arith.constant 0 : index
    %12 = vector.load %arg6[%c0_10, %c0_11] : memref<32x32xbf16, #tpu.memory_space<vmem>>, vector<32x32xbf16>
    %cst_12 = arith.constant dense<0.000000e+00> : vector<16x32xf32>
    %13 = tpu.matmul %11, %12, %cst_12 {dimension_numbers = #tpu.dot_dimension_numbers<[1], [0], [0], [1], [0, 0, 1, 1], [], []>} : vector<16x32xbf16>, vector<32x32xbf16>, vector<16x32xf32> -> vector<16x32xf32>
    %14 = arith.addf %10, %13 : vector<16x32xf32>
    %c0_13 = arith.constant 0 : index
    %c0_14 = arith.constant 0 : index
    %15 = vector.load %arg7[%c0_13, %c0_14] : memref<16x1xf32, #tpu.memory_space<vmem>>, vector<16x1xf32>
    %16 = vector.broadcast %15 : vector<16x1xf32> to vector<16x32xf32>
    %17 = arith.addf %14, %16 : vector<16x32xf32>
    %c0_15 = arith.constant 0 : index
    %c0_16 = arith.constant 0 : index
    %18 = vector.load %arg8[%c0_15, %c0_16] : memref<16x32xf32, #tpu.memory_space<vmem>>, vector<16x32xf32>
    tpu.vector_store %arg8[%c0_15, %c0_16], %17 {strides = array<i32>} : memref<16x32xf32, #tpu.memory_space<vmem>>, vector<16x32xf32>,
    return
  }
  func.func @transform_0(%arg0: i32) -> (i32, i32) {
    %c0_i32 = arith.constant 0 : i32
    %c0_i32_0 = arith.constant 0 : i32
    %c0_i32_1 = arith.constant 0 : i32
    return %c0_i32, %c0_i32_0 : i32, i32
  }
  func.func @transform_1(%arg0: i32) -> (i32, i32) {
    %c0_i32 = arith.constant 0 : i32
    %c0_i32_0 = arith.constant 0 : i32
    return %c0_i32, %arg0 : i32, i32
  }
  func.func @transform_2(%arg0: i32) -> (i32, i32) {
    %c0_i32 = arith.constant 0 : i32
    %c0_i32_0 = arith.constant 0 : i32
    %c0_i32_1 = arith.constant 0 : i32
    return %c0_i32, %c0_i32_0 : i32, i32
  }
  func.func @transform_3(%arg0: i32) -> (i32, i32) {
    %c0_i32 = arith.constant 0 : i32
    %c0_i32_0 = arith.constant 0 : i32
    %c0_i32_1 = arith.constant 0 : i32
    return %c0_i32, %c0_i32_0 : i32, i32
  }
  func.func @transform_4(%arg0: i32) -> (i32, i32) {
    %c0_i32 = arith.constant 0 : i32
    %c0_i32_0 = arith.constant 0 : i32
    %c0_i32_1 = arith.constant 0 : i32
    return %c0_i32, %c0_i32_0 : i32, i32
  }
  func.func @transform_5(%arg0: i32) -> (i32, i32) {
    %c0_i32 = arith.constant 0 : i32
    %c0_i32_0 = arith.constant 0 : i32
    return %c0_i32, %arg0 : i32, i32
  }
  func.func @transform_6(%arg0: i32) -> (i32, i32) {
    %c0_i32 = arith.constant 0 : i32
    %c0_i32_0 = arith.constant 0 : i32
    %c0_i32_1 = arith.constant 0 : i32
    return %c0_i32, %c0_i32_0 : i32, i32
  }
  func.func @transform_7(%arg0: i32) -> (i32, i32) {
    %c0_i32 = arith.constant 0 : i32
    %c0_i32_0 = arith.constant 0 : i32
    return %c0_i32, %arg0 : i32, i32
  }
}

module attributes {stable_mosaic.version = 11 : i64} {
  func.func @_conv_mm_kernel(%arg0: i32, %arg1: memref<8x144xbf16, #tpu.memory_space<vmem>>, %arg2: memref<144x128xbf16, #tpu.memory_space<vmem>>, %arg3: memref<8x1xf32, #tpu.memory_space<vmem>>, %arg4: memref<8x1xf32, #tpu.memory_space<vmem>>, %arg5: memref<8x128xf32, #tpu.memory_space<vmem>>) attributes {dimension_semantics = [#tpu.dimension_semantics<parallel>], iteration_bounds = array<i64: 1>, scalar_prefetch = 0 : i64, scratch_operands = 0 : i64, tpu.core_type = #tpu.core_type<tc>, window_params = [{pipeline_mode = #tpu.pipeline_mode<synchronous>, transform_indices = @transform_0, window_bounds = array<i64: 8, 144>}, {transform_indices = @transform_1, window_bounds = array<i64: 144, 128>}, {pipeline_mode = #tpu.pipeline_mode<synchronous>, transform_indices = @transform_2, window_bounds = array<i64: 8, 1>}, {pipeline_mode = #tpu.pipeline_mode<synchronous>, transform_indices = @transform_3, window_bounds = array<i64: 8, 1>}, {transform_indices = @transform_4, window_bounds = array<i64: 8, 128>}]} {
    %c0 = arith.constant 0 : index
    %c0_0 = arith.constant 0 : index
    %0 = vector.load %arg1[%c0, %c0_0] : memref<8x144xbf16, #tpu.memory_space<vmem>>, vector<8x144xbf16>
    %c0_1 = arith.constant 0 : index
    %c0_2 = arith.constant 0 : index
    %1 = vector.load %arg2[%c0_1, %c0_2] : memref<144x128xbf16, #tpu.memory_space<vmem>>, vector<144x128xbf16>
    %cst = arith.constant dense<0.000000e+00> : vector<8x128xf32>
    %2 = tpu.matmul %0, %1, %cst {dimension_numbers = #tpu.dot_dimension_numbers<[1], [0], [0], [1], [0, 0, 1, 1], [], []>} : vector<8x144xbf16>, vector<144x128xbf16>, vector<8x128xf32> -> vector<8x128xf32>
    %c0_3 = arith.constant 0 : index
    %c0_4 = arith.constant 0 : index
    %3 = vector.load %arg3[%c0_3, %c0_4] : memref<8x1xf32, #tpu.memory_space<vmem>>, vector<8x1xf32>
    %4 = vector.broadcast %3 : vector<8x1xf32> to vector<8x128xf32>
    %5 = arith.mulf %2, %4 : vector<8x128xf32>
    %c0_5 = arith.constant 0 : index
    %c0_6 = arith.constant 0 : index
    %6 = vector.load %arg4[%c0_5, %c0_6] : memref<8x1xf32, #tpu.memory_space<vmem>>, vector<8x1xf32>
    %7 = vector.broadcast %6 : vector<8x1xf32> to vector<8x128xf32>
    %8 = arith.addf %5, %7 : vector<8x128xf32>
    %cst_7 = arith.constant 0.000000e+00 : f32
    %9 = vector.broadcast %cst_7 : f32 to vector<8x128xf32>
    %10 = arith.maximumf %8, %9 : vector<8x128xf32>
    %c0_8 = arith.constant 0 : index
    %c0_9 = arith.constant 0 : index
    %11 = vector.load %arg5[%c0_8, %c0_9] : memref<8x128xf32, #tpu.memory_space<vmem>>, vector<8x128xf32>
    tpu.vector_store %arg5[%c0_8, %c0_9], %10 {strides = array<i32>} : memref<8x128xf32, #tpu.memory_space<vmem>>, vector<8x128xf32>,
    return
  }
  func.func @transform_0(%arg0: i32) -> (i32, i32) {
    %c0_i32 = arith.constant 0 : i32
    %c0_i32_0 = arith.constant 0 : i32
    %c0_i32_1 = arith.constant 0 : i32
    return %c0_i32, %c0_i32_0 : i32, i32
  }
  func.func @transform_1(%arg0: i32) -> (i32, i32) {
    %c0_i32 = arith.constant 0 : i32
    %c0_i32_0 = arith.constant 0 : i32
    return %c0_i32, %arg0 : i32, i32
  }
  func.func @transform_2(%arg0: i32) -> (i32, i32) {
    %c0_i32 = arith.constant 0 : i32
    %c0_i32_0 = arith.constant 0 : i32
    %c0_i32_1 = arith.constant 0 : i32
    return %c0_i32, %c0_i32_0 : i32, i32
  }
  func.func @transform_3(%arg0: i32) -> (i32, i32) {
    %c0_i32 = arith.constant 0 : i32
    %c0_i32_0 = arith.constant 0 : i32
    %c0_i32_1 = arith.constant 0 : i32
    return %c0_i32, %c0_i32_0 : i32, i32
  }
  func.func @transform_4(%arg0: i32) -> (i32, i32) {
    %c0_i32 = arith.constant 0 : i32
    %c0_i32_0 = arith.constant 0 : i32
    return %c0_i32, %arg0 : i32, i32
  }
}

module attributes {stable_mosaic.version = 11 : i64} {
  func.func @_conv_mm_kernel(%arg0: i32, %arg1: memref<8x72xbf16, #tpu.memory_space<vmem>>, %arg2: memref<72x128xbf16, #tpu.memory_space<vmem>>, %arg3: memref<8x1xf32, #tpu.memory_space<vmem>>, %arg4: memref<8x1xf32, #tpu.memory_space<vmem>>, %arg5: memref<8x16xbf16, #tpu.memory_space<vmem>>, %arg6: memref<16x128xbf16, #tpu.memory_space<vmem>>, %arg7: memref<8x1xf32, #tpu.memory_space<vmem>>, %arg8: memref<8x128xf32, #tpu.memory_space<vmem>>) attributes {dimension_semantics = [#tpu.dimension_semantics<parallel>], iteration_bounds = array<i64: 1>, scalar_prefetch = 0 : i64, scratch_operands = 0 : i64, tpu.core_type = #tpu.core_type<tc>, window_params = [{pipeline_mode = #tpu.pipeline_mode<synchronous>, transform_indices = @transform_0, window_bounds = array<i64: 8, 72>}, {transform_indices = @transform_1, window_bounds = array<i64: 72, 128>}, {pipeline_mode = #tpu.pipeline_mode<synchronous>, transform_indices = @transform_2, window_bounds = array<i64: 8, 1>}, {pipeline_mode = #tpu.pipeline_mode<synchronous>, transform_indices = @transform_3, window_bounds = array<i64: 8, 1>}, {pipeline_mode = #tpu.pipeline_mode<synchronous>, transform_indices = @transform_4, window_bounds = array<i64: 8, 16>}, {transform_indices = @transform_5, window_bounds = array<i64: 16, 128>}, {pipeline_mode = #tpu.pipeline_mode<synchronous>, transform_indices = @transform_6, window_bounds = array<i64: 8, 1>}, {transform_indices = @transform_7, window_bounds = array<i64: 8, 128>}]} {
    %c0 = arith.constant 0 : index
    %c0_0 = arith.constant 0 : index
    %0 = vector.load %arg1[%c0, %c0_0] : memref<8x72xbf16, #tpu.memory_space<vmem>>, vector<8x72xbf16>
    %c0_1 = arith.constant 0 : index
    %c0_2 = arith.constant 0 : index
    %1 = vector.load %arg2[%c0_1, %c0_2] : memref<72x128xbf16, #tpu.memory_space<vmem>>, vector<72x128xbf16>
    %cst = arith.constant dense<0.000000e+00> : vector<8x128xf32>
    %2 = tpu.matmul %0, %1, %cst {dimension_numbers = #tpu.dot_dimension_numbers<[1], [0], [0], [1], [0, 0, 1, 1], [], []>} : vector<8x72xbf16>, vector<72x128xbf16>, vector<8x128xf32> -> vector<8x128xf32>
    %c0_3 = arith.constant 0 : index
    %c0_4 = arith.constant 0 : index
    %3 = vector.load %arg3[%c0_3, %c0_4] : memref<8x1xf32, #tpu.memory_space<vmem>>, vector<8x1xf32>
    %4 = vector.broadcast %3 : vector<8x1xf32> to vector<8x128xf32>
    %5 = arith.mulf %2, %4 : vector<8x128xf32>
    %c0_5 = arith.constant 0 : index
    %c0_6 = arith.constant 0 : index
    %6 = vector.load %arg4[%c0_5, %c0_6] : memref<8x1xf32, #tpu.memory_space<vmem>>, vector<8x1xf32>
    %7 = vector.broadcast %6 : vector<8x1xf32> to vector<8x128xf32>
    %8 = arith.addf %5, %7 : vector<8x128xf32>
    %cst_7 = arith.constant 0.000000e+00 : f32
    %9 = vector.broadcast %cst_7 : f32 to vector<8x128xf32>
    %10 = arith.maximumf %8, %9 : vector<8x128xf32>
    %c0_8 = arith.constant 0 : index
    %c0_9 = arith.constant 0 : index
    %11 = vector.load %arg5[%c0_8, %c0_9] : memref<8x16xbf16, #tpu.memory_space<vmem>>, vector<8x16xbf16>
    %c0_10 = arith.constant 0 : index
    %c0_11 = arith.constant 0 : index
    %12 = vector.load %arg6[%c0_10, %c0_11] : memref<16x128xbf16, #tpu.memory_space<vmem>>, vector<16x128xbf16>
    %cst_12 = arith.constant dense<0.000000e+00> : vector<8x128xf32>
    %13 = tpu.matmul %11, %12, %cst_12 {dimension_numbers = #tpu.dot_dimension_numbers<[1], [0], [0], [1], [0, 0, 1, 1], [], []>} : vector<8x16xbf16>, vector<16x128xbf16>, vector<8x128xf32> -> vector<8x128xf32>
    %14 = arith.addf %10, %13 : vector<8x128xf32>
    %c0_13 = arith.constant 0 : index
    %c0_14 = arith.constant 0 : index
    %15 = vector.load %arg7[%c0_13, %c0_14] : memref<8x1xf32, #tpu.memory_space<vmem>>, vector<8x1xf32>
    %16 = vector.broadcast %15 : vector<8x1xf32> to vector<8x128xf32>
    %17 = arith.addf %14, %16 : vector<8x128xf32>
    %c0_15 = arith.constant 0 : index
    %c0_16 = arith.constant 0 : index
    %18 = vector.load %arg8[%c0_15, %c0_16] : memref<8x128xf32, #tpu.memory_space<vmem>>, vector<8x128xf32>
    tpu.vector_store %arg8[%c0_15, %c0_16], %17 {strides = array<i32>} : memref<8x128xf32, #tpu.memory_space<vmem>>, vector<8x128xf32>,
    return
  }
  func.func @transform_0(%arg0: i32) -> (i32, i32) {
    %c0_i32 = arith.constant 0 : i32
    %c0_i32_0 = arith.constant 0 : i32
    %c0_i32_1 = arith.constant 0 : i32
    return %c0_i32, %c0_i32_0 : i32, i32
  }
  func.func @transform_1(%arg0: i32) -> (i32, i32) {
    %c0_i32 = arith.constant 0 : i32
    %c0_i32_0 = arith.constant 0 : i32
    return %c0_i32, %arg0 : i32, i32
  }
  func.func @transform_2(%arg0: i32) -> (i32, i32) {
    %c0_i32 = arith.constant 0 : i32
    %c0_i32_0 = arith.constant 0 : i32
    %c0_i32_1 = arith.constant 0 : i32
    return %c0_i32, %c0_i32_0 : i32, i32
  }
  func.func @transform_3(%arg0: i32) -> (i32, i32) {
    %c0_i32 = arith.constant 0 : i32
    %c0_i32_0 = arith.constant 0 : i32
    %c0_i32_1 = arith.constant 0 : i32
    return %c0_i32, %c0_i32_0 : i32, i32
  }
  func.func @transform_4(%arg0: i32) -> (i32, i32) {
    %c0_i32 = arith.constant 0 : i32
    %c0_i32_0 = arith.constant 0 : i32
    %c0_i32_1 = arith.constant 0 : i32
    return %c0_i32, %c0_i32_0 : i32, i32
  }
  func.func @transform_5(%arg0: i32) -> (i32, i32) {
    %c0_i32 = arith.constant 0 : i32
    %c0_i32_0 = arith.constant 0 : i32
    return %c0_i32, %arg0 : i32, i32
  }
  func.func @transform_6(%arg0: i32) -> (i32, i32) {
    %c0_i32 = arith.constant 0 : i32
    %c0_i32_0 = arith.constant 0 : i32
    %c0_i32_1 = arith.constant 0 : i32
    return %c0_i32, %c0_i32_0 : i32, i32
  }
  func.func @transform_7(%arg0: i32) -> (i32, i32) {
    %c0_i32 = arith.constant 0 : i32
    %c0_i32_0 = arith.constant 0 : i32
    return %c0_i32, %arg0 : i32, i32
  }
}

module attributes {stable_mosaic.version = 11 : i64} {
  func.func @_conv_mm_kernel(%arg0: i32, %arg1: memref<4x72xbf16, #tpu.memory_space<vmem>>, %arg2: memref<72x256xbf16, #tpu.memory_space<vmem>>, %arg3: memref<4x1xf32, #tpu.memory_space<vmem>>, %arg4: memref<4x1xf32, #tpu.memory_space<vmem>>, %arg5: memref<4x256xf32, #tpu.memory_space<vmem>>) attributes {dimension_semantics = [#tpu.dimension_semantics<parallel>], iteration_bounds = array<i64: 2>, scalar_prefetch = 0 : i64, scratch_operands = 0 : i64, tpu.core_type = #tpu.core_type<tc>, window_params = [{pipeline_mode = #tpu.pipeline_mode<synchronous>, transform_indices = @transform_0, window_bounds = array<i64: 4, 72>}, {transform_indices = @transform_1, window_bounds = array<i64: 72, 256>}, {pipeline_mode = #tpu.pipeline_mode<synchronous>, transform_indices = @transform_2, window_bounds = array<i64: 4, 1>}, {pipeline_mode = #tpu.pipeline_mode<synchronous>, transform_indices = @transform_3, window_bounds = array<i64: 4, 1>}, {transform_indices = @transform_4, window_bounds = array<i64: 4, 256>}]} {
    %c0 = arith.constant 0 : index
    %c0_0 = arith.constant 0 : index
    %0 = vector.load %arg1[%c0, %c0_0] : memref<4x72xbf16, #tpu.memory_space<vmem>>, vector<4x72xbf16>
    %c0_1 = arith.constant 0 : index
    %c0_2 = arith.constant 0 : index
    %1 = vector.load %arg2[%c0_1, %c0_2] : memref<72x256xbf16, #tpu.memory_space<vmem>>, vector<72x256xbf16>
    %cst = arith.constant dense<0.000000e+00> : vector<4x256xf32>
    %2 = tpu.matmul %0, %1, %cst {dimension_numbers = #tpu.dot_dimension_numbers<[1], [0], [0], [1], [0, 0, 1, 1], [], []>} : vector<4x72xbf16>, vector<72x256xbf16>, vector<4x256xf32> -> vector<4x256xf32>
    %c0_3 = arith.constant 0 : index
    %c0_4 = arith.constant 0 : index
    %3 = vector.load %arg3[%c0_3, %c0_4] : memref<4x1xf32, #tpu.memory_space<vmem>>, vector<4x1xf32>
    %4 = vector.broadcast %3 : vector<4x1xf32> to vector<4x256xf32>
    %5 = arith.mulf %2, %4 : vector<4x256xf32>
    %c0_5 = arith.constant 0 : index
    %c0_6 = arith.constant 0 : index
    %6 = vector.load %arg4[%c0_5, %c0_6] : memref<4x1xf32, #tpu.memory_space<vmem>>, vector<4x1xf32>
    %7 = vector.broadcast %6 : vector<4x1xf32> to vector<4x256xf32>
    %8 = arith.addf %5, %7 : vector<4x256xf32>
    %cst_7 = arith.constant 0.000000e+00 : f32
    %9 = vector.broadcast %cst_7 : f32 to vector<4x256xf32>
    %10 = arith.maximumf %8, %9 : vector<4x256xf32>
    %c0_8 = arith.constant 0 : index
    %c0_9 = arith.constant 0 : index
    %11 = vector.load %arg5[%c0_8, %c0_9] : memref<4x256xf32, #tpu.memory_space<vmem>>, vector<4x256xf32>
    tpu.vector_store %arg5[%c0_8, %c0_9], %10 {strides = array<i32>} : memref<4x256xf32, #tpu.memory_space<vmem>>, vector<4x256xf32>,
    return
  }
  func.func @transform_0(%arg0: i32) -> (i32, i32) {
    %c0_i32 = arith.constant 0 : i32
    %c0_i32_0 = arith.constant 0 : i32
    %c0_i32_1 = arith.constant 0 : i32
    return %c0_i32, %c0_i32_0 : i32, i32
  }
  func.func @transform_1(%arg0: i32) -> (i32, i32) {
    %c0_i32 = arith.constant 0 : i32
    %c0_i32_0 = arith.constant 0 : i32
    return %c0_i32, %arg0 : i32, i32
  }
  func.func @transform_2(%arg0: i32) -> (i32, i32) {
    %c0_i32 = arith.constant 0 : i32
    %c0_i32_0 = arith.constant 0 : i32
    %c0_i32_1 = arith.constant 0 : i32
    return %c0_i32, %c0_i32_0 : i32, i32
  }
  func.func @transform_3(%arg0: i32) -> (i32, i32) {
    %c0_i32 = arith.constant 0 : i32
    %c0_i32_0 = arith.constant 0 : i32
    %c0_i32_1 = arith.constant 0 : i32
    return %c0_i32, %c0_i32_0 : i32, i32
  }
  func.func @transform_4(%arg0: i32) -> (i32, i32) {
    %c0_i32 = arith.constant 0 : i32
    %c0_i32_0 = arith.constant 0 : i32
    return %c0_i32, %arg0 : i32, i32
  }
}

module attributes {stable_mosaic.version = 11 : i64} {
  func.func @_conv_mm_kernel(%arg0: i32, %arg1: memref<4x36xbf16, #tpu.memory_space<vmem>>, %arg2: memref<36x256xbf16, #tpu.memory_space<vmem>>, %arg3: memref<4x1xf32, #tpu.memory_space<vmem>>, %arg4: memref<4x1xf32, #tpu.memory_space<vmem>>, %arg5: memref<4x8xbf16, #tpu.memory_space<vmem>>, %arg6: memref<8x256xbf16, #tpu.memory_space<vmem>>, %arg7: memref<4x1xf32, #tpu.memory_space<vmem>>, %arg8: memref<4x256xf32, #tpu.memory_space<vmem>>) attributes {dimension_semantics = [#tpu.dimension_semantics<parallel>], iteration_bounds = array<i64: 2>, scalar_prefetch = 0 : i64, scratch_operands = 0 : i64, tpu.core_type = #tpu.core_type<tc>, window_params = [{pipeline_mode = #tpu.pipeline_mode<synchronous>, transform_indices = @transform_0, window_bounds = array<i64: 4, 36>}, {transform_indices = @transform_1, window_bounds = array<i64: 36, 256>}, {pipeline_mode = #tpu.pipeline_mode<synchronous>, transform_indices = @transform_2, window_bounds = array<i64: 4, 1>}, {pipeline_mode = #tpu.pipeline_mode<synchronous>, transform_indices = @transform_3, window_bounds = array<i64: 4, 1>}, {pipeline_mode = #tpu.pipeline_mode<synchronous>, transform_indices = @transform_4, window_bounds = array<i64: 4, 8>}, {transform_indices = @transform_5, window_bounds = array<i64: 8, 256>}, {pipeline_mode = #tpu.pipeline_mode<synchronous>, transform_indices = @transform_6, window_bounds = array<i64: 4, 1>}, {transform_indices = @transform_7, window_bounds = array<i64: 4, 256>}]} {
    %c0 = arith.constant 0 : index
    %c0_0 = arith.constant 0 : index
    %0 = vector.load %arg1[%c0, %c0_0] : memref<4x36xbf16, #tpu.memory_space<vmem>>, vector<4x36xbf16>
    %c0_1 = arith.constant 0 : index
    %c0_2 = arith.constant 0 : index
    %1 = vector.load %arg2[%c0_1, %c0_2] : memref<36x256xbf16, #tpu.memory_space<vmem>>, vector<36x256xbf16>
    %cst = arith.constant dense<0.000000e+00> : vector<4x256xf32>
    %2 = tpu.matmul %0, %1, %cst {dimension_numbers = #tpu.dot_dimension_numbers<[1], [0], [0], [1], [0, 0, 1, 1], [], []>} : vector<4x36xbf16>, vector<36x256xbf16>, vector<4x256xf32> -> vector<4x256xf32>
    %c0_3 = arith.constant 0 : index
    %c0_4 = arith.constant 0 : index
    %3 = vector.load %arg3[%c0_3, %c0_4] : memref<4x1xf32, #tpu.memory_space<vmem>>, vector<4x1xf32>
    %4 = vector.broadcast %3 : vector<4x1xf32> to vector<4x256xf32>
    %5 = arith.mulf %2, %4 : vector<4x256xf32>
    %c0_5 = arith.constant 0 : index
    %c0_6 = arith.constant 0 : index
    %6 = vector.load %arg4[%c0_5, %c0_6] : memref<4x1xf32, #tpu.memory_space<vmem>>, vector<4x1xf32>
    %7 = vector.broadcast %6 : vector<4x1xf32> to vector<4x256xf32>
    %8 = arith.addf %5, %7 : vector<4x256xf32>
    %cst_7 = arith.constant 0.000000e+00 : f32
    %9 = vector.broadcast %cst_7 : f32 to vector<4x256xf32>
    %10 = arith.maximumf %8, %9 : vector<4x256xf32>
    %c0_8 = arith.constant 0 : index
    %c0_9 = arith.constant 0 : index
    %11 = vector.load %arg5[%c0_8, %c0_9] : memref<4x8xbf16, #tpu.memory_space<vmem>>, vector<4x8xbf16>
    %c0_10 = arith.constant 0 : index
    %c0_11 = arith.constant 0 : index
    %12 = vector.load %arg6[%c0_10, %c0_11] : memref<8x256xbf16, #tpu.memory_space<vmem>>, vector<8x256xbf16>
    %cst_12 = arith.constant dense<0.000000e+00> : vector<4x256xf32>
    %13 = tpu.matmul %11, %12, %cst_12 {dimension_numbers = #tpu.dot_dimension_numbers<[1], [0], [0], [1], [0, 0, 1, 1], [], []>} : vector<4x8xbf16>, vector<8x256xbf16>, vector<4x256xf32> -> vector<4x256xf32>
    %14 = arith.addf %10, %13 : vector<4x256xf32>
    %c0_13 = arith.constant 0 : index
    %c0_14 = arith.constant 0 : index
    %15 = vector.load %arg7[%c0_13, %c0_14] : memref<4x1xf32, #tpu.memory_space<vmem>>, vector<4x1xf32>
    %16 = vector.broadcast %15 : vector<4x1xf32> to vector<4x256xf32>
    %17 = arith.addf %14, %16 : vector<4x256xf32>
    %c0_15 = arith.constant 0 : index
    %c0_16 = arith.constant 0 : index
    %18 = vector.load %arg8[%c0_15, %c0_16] : memref<4x256xf32, #tpu.memory_space<vmem>>, vector<4x256xf32>
    tpu.vector_store %arg8[%c0_15, %c0_16], %17 {strides = array<i32>} : memref<4x256xf32, #tpu.memory_space<vmem>>, vector<4x256xf32>,
    return
  }
  func.func @transform_0(%arg0: i32) -> (i32, i32) {
    %c0_i32 = arith.constant 0 : i32
    %c0_i32_0 = arith.constant 0 : i32
    %c0_i32_1 = arith.constant 0 : i32
    return %c0_i32, %c0_i32_0 : i32, i32
  }
  func.func @transform_1(%arg0: i32) -> (i32, i32) {
    %c0_i32 = arith.constant 0 : i32
    %c0_i32_0 = arith.constant 0 : i32
    return %c0_i32, %arg0 : i32, i32
  }
  func.func @transform_2(%arg0: i32) -> (i32, i32) {
    %c0_i32 = arith.constant 0 : i32
    %c0_i32_0 = arith.constant 0 : i32
    %c0_i32_1 = arith.constant 0 : i32
    return %c0_i32, %c0_i32_0 : i32, i32
  }
  func.func @transform_3(%arg0: i32) -> (i32, i32) {
    %c0_i32 = arith.constant 0 : i32
    %c0_i32_0 = arith.constant 0 : i32
    %c0_i32_1 = arith.constant 0 : i32
    return %c0_i32, %c0_i32_0 : i32, i32
  }
  func.func @transform_4(%arg0: i32) -> (i32, i32) {
    %c0_i32 = arith.constant 0 : i32
    %c0_i32_0 = arith.constant 0 : i32
    %c0_i32_1 = arith.constant 0 : i32
    return %c0_i32, %c0_i32_0 : i32, i32
  }
  func.func @transform_5(%arg0: i32) -> (i32, i32) {
    %c0_i32 = arith.constant 0 : i32
    %c0_i32_0 = arith.constant 0 : i32
    return %c0_i32, %arg0 : i32, i32
  }
  func.func @transform_6(%arg0: i32) -> (i32, i32) {
    %c0_i32 = arith.constant 0 : i32
    %c0_i32_0 = arith.constant 0 : i32
    %c0_i32_1 = arith.constant 0 : i32
    return %c0_i32, %c0_i32_0 : i32, i32
  }
  func.func @transform_7(%arg0: i32) -> (i32, i32) {
    %c0_i32 = arith.constant 0 : i32
    %c0_i32_0 = arith.constant 0 : i32
    return %c0_i32, %arg0 : i32, i32
  }
}

module attributes {stable_mosaic.version = 11 : i64} {
  func.func @_conv_mm_kernel(%arg0: i32, %arg1: memref<1x4xbf16, #tpu.memory_space<vmem>>, %arg2: memref<4x256xbf16, #tpu.memory_space<vmem>>, %arg3: memref<1x1xf32, #tpu.memory_space<vmem>>, %arg4: memref<1x1xf32, #tpu.memory_space<vmem>>, %arg5: memref<1x256xf32, #tpu.memory_space<vmem>>) attributes {dimension_semantics = [#tpu.dimension_semantics<parallel>], iteration_bounds = array<i64: 2>, scalar_prefetch = 0 : i64, scratch_operands = 0 : i64, tpu.core_type = #tpu.core_type<tc>, window_params = [{pipeline_mode = #tpu.pipeline_mode<synchronous>, transform_indices = @transform_0, window_bounds = array<i64: 1, 4>}, {transform_indices = @transform_1, window_bounds = array<i64: 4, 256>}, {pipeline_mode = #tpu.pipeline_mode<synchronous>, transform_indices = @transform_2, window_bounds = array<i64: 1, 1>}, {pipeline_mode = #tpu.pipeline_mode<synchronous>, transform_indices = @transform_3, window_bounds = array<i64: 1, 1>}, {transform_indices = @transform_4, window_bounds = array<i64: 1, 256>}]} {
    %c0 = arith.constant 0 : index
    %c0_0 = arith.constant 0 : index
    %0 = vector.load %arg1[%c0, %c0_0] : memref<1x4xbf16, #tpu.memory_space<vmem>>, vector<1x4xbf16>
    %c0_1 = arith.constant 0 : index
    %c0_2 = arith.constant 0 : index
    %1 = vector.load %arg2[%c0_1, %c0_2] : memref<4x256xbf16, #tpu.memory_space<vmem>>, vector<4x256xbf16>
    %cst = arith.constant dense<0.000000e+00> : vector<1x256xf32>
    %2 = tpu.matmul %0, %1, %cst {dimension_numbers = #tpu.dot_dimension_numbers<[1], [0], [0], [1], [0, 0, 1, 1], [], []>} : vector<1x4xbf16>, vector<4x256xbf16>, vector<1x256xf32> -> vector<1x256xf32>
    %c0_3 = arith.constant 0 : index
    %c0_4 = arith.constant 0 : index
    %3 = vector.load %arg3[%c0_3, %c0_4] : memref<1x1xf32, #tpu.memory_space<vmem>>, vector<1x1xf32>
    %4 = vector.broadcast %3 : vector<1x1xf32> to vector<1x256xf32>
    %5 = arith.mulf %2, %4 : vector<1x256xf32>
    %c0_5 = arith.constant 0 : index
    %c0_6 = arith.constant 0 : index
    %6 = vector.load %arg4[%c0_5, %c0_6] : memref<1x1xf32, #tpu.memory_space<vmem>>, vector<1x1xf32>
    %7 = vector.broadcast %6 : vector<1x1xf32> to vector<1x256xf32>
    %8 = arith.addf %5, %7 : vector<1x256xf32>
    %cst_7 = arith.constant 0.000000e+00 : f32
    %9 = vector.broadcast %cst_7 : f32 to vector<1x256xf32>
    %10 = arith.maximumf %8, %9 : vector<1x256xf32>
    %c0_8 = arith.constant 0 : index
    %c0_9 = arith.constant 0 : index
    %11 = vector.load %arg5[%c0_8, %c0_9] : memref<1x256xf32, #tpu.memory_space<vmem>>, vector<1x256xf32>
    tpu.vector_store %arg5[%c0_8, %c0_9], %10 {strides = array<i32>} : memref<1x256xf32, #tpu.memory_space<vmem>>, vector<1x256xf32>,
    return
  }
  func.func @transform_0(%arg0: i32) -> (i32, i32) {
    %c0_i32 = arith.constant 0 : i32
    %c0_i32_0 = arith.constant 0 : i32
    %c0_i32_1 = arith.constant 0 : i32
    return %c0_i32, %c0_i32_0 : i32, i32
  }
  func.func @transform_1(%arg0: i32) -> (i32, i32) {
    %c0_i32 = arith.constant 0 : i32
    %c0_i32_0 = arith.constant 0 : i32
    return %c0_i32, %arg0 : i32, i32
  }
  func.func @transform_2(%arg0: i32) -> (i32, i32) {
    %c0_i32 = arith.constant 0 : i32
    %c0_i32_0 = arith.constant 0 : i32
    %c0_i32_1 = arith.constant 0 : i32
    return %c0_i32, %c0_i32_0 : i32, i32
  }
  func.func @transform_3(%arg0: i32) -> (i32, i32) {
    %c0_i32 = arith.constant 0 : i32
    %c0_i32_0 = arith.constant 0 : i32
    %c0_i32_1 = arith.constant 0 : i32
    return %c0_i32, %c0_i32_0 : i32, i32
  }
  func.func @transform_4(%arg0: i32) -> (i32, i32) {
    %c0_i32 = arith.constant 0 : i32
    %c0_i32_0 = arith.constant 0 : i32
    return %c0_i32, %arg0 : i32, i32
  }
}

module attributes {stable_mosaic.version = 11 : i64} {
  func.func @_conv_mm_kernel(%arg0: i32, %arg1: memref<1x8xbf16, #tpu.memory_space<vmem>>, %arg2: memref<8x128xbf16, #tpu.memory_space<vmem>>, %arg3: memref<1x1xf32, #tpu.memory_space<vmem>>, %arg4: memref<1x1xf32, #tpu.memory_space<vmem>>, %arg5: memref<1x128xf32, #tpu.memory_space<vmem>>) attributes {dimension_semantics = [#tpu.dimension_semantics<parallel>], iteration_bounds = array<i64: 1>, scalar_prefetch = 0 : i64, scratch_operands = 0 : i64, tpu.core_type = #tpu.core_type<tc>, window_params = [{pipeline_mode = #tpu.pipeline_mode<synchronous>, transform_indices = @transform_0, window_bounds = array<i64: 1, 8>}, {transform_indices = @transform_1, window_bounds = array<i64: 8, 128>}, {pipeline_mode = #tpu.pipeline_mode<synchronous>, transform_indices = @transform_2, window_bounds = array<i64: 1, 1>}, {pipeline_mode = #tpu.pipeline_mode<synchronous>, transform_indices = @transform_3, window_bounds = array<i64: 1, 1>}, {transform_indices = @transform_4, window_bounds = array<i64: 1, 128>}]} {
    %c0 = arith.constant 0 : index
    %c0_0 = arith.constant 0 : index
    %0 = vector.load %arg1[%c0, %c0_0] : memref<1x8xbf16, #tpu.memory_space<vmem>>, vector<1x8xbf16>
    %c0_1 = arith.constant 0 : index
    %c0_2 = arith.constant 0 : index
    %1 = vector.load %arg2[%c0_1, %c0_2] : memref<8x128xbf16, #tpu.memory_space<vmem>>, vector<8x128xbf16>
    %cst = arith.constant dense<0.000000e+00> : vector<1x128xf32>
    %2 = tpu.matmul %0, %1, %cst {dimension_numbers = #tpu.dot_dimension_numbers<[1], [0], [0], [1], [0, 0, 1, 1], [], []>} : vector<1x8xbf16>, vector<8x128xbf16>, vector<1x128xf32> -> vector<1x128xf32>
    %c0_3 = arith.constant 0 : index
    %c0_4 = arith.constant 0 : index
    %3 = vector.load %arg3[%c0_3, %c0_4] : memref<1x1xf32, #tpu.memory_space<vmem>>, vector<1x1xf32>
    %4 = vector.broadcast %3 : vector<1x1xf32> to vector<1x128xf32>
    %5 = arith.mulf %2, %4 : vector<1x128xf32>
    %c0_5 = arith.constant 0 : index
    %c0_6 = arith.constant 0 : index
    %6 = vector.load %arg4[%c0_5, %c0_6] : memref<1x1xf32, #tpu.memory_space<vmem>>, vector<1x1xf32>
    %7 = vector.broadcast %6 : vector<1x1xf32> to vector<1x128xf32>
    %8 = arith.addf %5, %7 : vector<1x128xf32>
    %cst_7 = arith.constant 0.000000e+00 : f32
    %9 = vector.broadcast %cst_7 : f32 to vector<1x128xf32>
    %10 = arith.maximumf %8, %9 : vector<1x128xf32>
    %c0_8 = arith.constant 0 : index
    %c0_9 = arith.constant 0 : index
    %11 = vector.load %arg5[%c0_8, %c0_9] : memref<1x128xf32, #tpu.memory_space<vmem>>, vector<1x128xf32>
    tpu.vector_store %arg5[%c0_8, %c0_9], %10 {strides = array<i32>} : memref<1x128xf32, #tpu.memory_space<vmem>>, vector<1x128xf32>,
    return
  }
  func.func @transform_0(%arg0: i32) -> (i32, i32) {
    %c0_i32 = arith.constant 0 : i32
    %c0_i32_0 = arith.constant 0 : i32
    %c0_i32_1 = arith.constant 0 : i32
    return %c0_i32, %c0_i32_0 : i32, i32
  }
  func.func @transform_1(%arg0: i32) -> (i32, i32) {
    %c0_i32 = arith.constant 0 : i32
    %c0_i32_0 = arith.constant 0 : i32
    return %c0_i32, %arg0 : i32, i32
  }
  func.func @transform_2(%arg0: i32) -> (i32, i32) {
    %c0_i32 = arith.constant 0 : i32
    %c0_i32_0 = arith.constant 0 : i32
    %c0_i32_1 = arith.constant 0 : i32
    return %c0_i32, %c0_i32_0 : i32, i32
  }
  func.func @transform_3(%arg0: i32) -> (i32, i32) {
    %c0_i32 = arith.constant 0 : i32
    %c0_i32_0 = arith.constant 0 : i32
    %c0_i32_1 = arith.constant 0 : i32
    return %c0_i32, %c0_i32_0 : i32, i32
  }
  func.func @transform_4(%arg0: i32) -> (i32, i32) {
    %c0_i32 = arith.constant 0 : i32
    %c0_i32_0 = arith.constant 0 : i32
    return %c0_i32, %arg0 : i32, i32
  }
}

module attributes {stable_mosaic.version = 11 : i64} {
  func.func @_conv_mm_kernel(%arg0: i32, %arg1: memref<1x16xbf16, #tpu.memory_space<vmem>>, %arg2: memref<16x32xbf16, #tpu.memory_space<vmem>>, %arg3: memref<1x1xf32, #tpu.memory_space<vmem>>, %arg4: memref<1x1xf32, #tpu.memory_space<vmem>>, %arg5: memref<1x32xf32, #tpu.memory_space<vmem>>) attributes {dimension_semantics = [#tpu.dimension_semantics<parallel>], iteration_bounds = array<i64: 1>, scalar_prefetch = 0 : i64, scratch_operands = 0 : i64, tpu.core_type = #tpu.core_type<tc>, window_params = [{pipeline_mode = #tpu.pipeline_mode<synchronous>, transform_indices = @transform_0, window_bounds = array<i64: 1, 16>}, {transform_indices = @transform_1, window_bounds = array<i64: 16, 32>}, {pipeline_mode = #tpu.pipeline_mode<synchronous>, transform_indices = @transform_2, window_bounds = array<i64: 1, 1>}, {pipeline_mode = #tpu.pipeline_mode<synchronous>, transform_indices = @transform_3, window_bounds = array<i64: 1, 1>}, {transform_indices = @transform_4, window_bounds = array<i64: 1, 32>}]} {
    %c0 = arith.constant 0 : index
    %c0_0 = arith.constant 0 : index
    %0 = vector.load %arg1[%c0, %c0_0] : memref<1x16xbf16, #tpu.memory_space<vmem>>, vector<1x16xbf16>
    %c0_1 = arith.constant 0 : index
    %c0_2 = arith.constant 0 : index
    %1 = vector.load %arg2[%c0_1, %c0_2] : memref<16x32xbf16, #tpu.memory_space<vmem>>, vector<16x32xbf16>
    %cst = arith.constant dense<0.000000e+00> : vector<1x32xf32>
    %2 = tpu.matmul %0, %1, %cst {dimension_numbers = #tpu.dot_dimension_numbers<[1], [0], [0], [1], [0, 0, 1, 1], [], []>} : vector<1x16xbf16>, vector<16x32xbf16>, vector<1x32xf32> -> vector<1x32xf32>
    %c0_3 = arith.constant 0 : index
    %c0_4 = arith.constant 0 : index
    %3 = vector.load %arg3[%c0_3, %c0_4] : memref<1x1xf32, #tpu.memory_space<vmem>>, vector<1x1xf32>
    %4 = vector.broadcast %3 : vector<1x1xf32> to vector<1x32xf32>
    %5 = arith.mulf %2, %4 : vector<1x32xf32>
    %c0_5 = arith.constant 0 : index
    %c0_6 = arith.constant 0 : index
    %6 = vector.load %arg4[%c0_5, %c0_6] : memref<1x1xf32, #tpu.memory_space<vmem>>, vector<1x1xf32>
    %7 = vector.broadcast %6 : vector<1x1xf32> to vector<1x32xf32>
    %8 = arith.addf %5, %7 : vector<1x32xf32>
    %cst_7 = arith.constant 0.000000e+00 : f32
    %9 = vector.broadcast %cst_7 : f32 to vector<1x32xf32>
    %10 = arith.maximumf %8, %9 : vector<1x32xf32>
    %c0_8 = arith.constant 0 : index
    %c0_9 = arith.constant 0 : index
    %11 = vector.load %arg5[%c0_8, %c0_9] : memref<1x32xf32, #tpu.memory_space<vmem>>, vector<1x32xf32>
    tpu.vector_store %arg5[%c0_8, %c0_9], %10 {strides = array<i32>} : memref<1x32xf32, #tpu.memory_space<vmem>>, vector<1x32xf32>,
    return
  }
  func.func @transform_0(%arg0: i32) -> (i32, i32) {
    %c0_i32 = arith.constant 0 : i32
    %c0_i32_0 = arith.constant 0 : i32
    %c0_i32_1 = arith.constant 0 : i32
    return %c0_i32, %c0_i32_0 : i32, i32
  }
  func.func @transform_1(%arg0: i32) -> (i32, i32) {
    %c0_i32 = arith.constant 0 : i32
    %c0_i32_0 = arith.constant 0 : i32
    return %c0_i32, %arg0 : i32, i32
  }
  func.func @transform_2(%arg0: i32) -> (i32, i32) {
    %c0_i32 = arith.constant 0 : i32
    %c0_i32_0 = arith.constant 0 : i32
    %c0_i32_1 = arith.constant 0 : i32
    return %c0_i32, %c0_i32_0 : i32, i32
  }
  func.func @transform_3(%arg0: i32) -> (i32, i32) {
    %c0_i32 = arith.constant 0 : i32
    %c0_i32_0 = arith.constant 0 : i32
    %c0_i32_1 = arith.constant 0 : i32
    return %c0_i32, %c0_i32_0 : i32, i32
  }
  func.func @transform_4(%arg0: i32) -> (i32, i32) {
    %c0_i32 = arith.constant 0 : i32
    %c0_i32_0 = arith.constant 0 : i32
    return %c0_i32, %arg0 : i32, i32
  }
}

module attributes {stable_mosaic.version = 11 : i64} {
  func.func @_conv_mm_kernel(%arg0: i32, %arg1: memref<1x32xbf16, #tpu.memory_space<vmem>>, %arg2: memref<32x8xbf16, #tpu.memory_space<vmem>>, %arg3: memref<1x1xf32, #tpu.memory_space<vmem>>, %arg4: memref<1x1xf32, #tpu.memory_space<vmem>>, %arg5: memref<1x8xf32, #tpu.memory_space<vmem>>) attributes {dimension_semantics = [#tpu.dimension_semantics<parallel>], iteration_bounds = array<i64: 1>, scalar_prefetch = 0 : i64, scratch_operands = 0 : i64, tpu.core_type = #tpu.core_type<tc>, window_params = [{pipeline_mode = #tpu.pipeline_mode<synchronous>, transform_indices = @transform_0, window_bounds = array<i64: 1, 32>}, {transform_indices = @transform_1, window_bounds = array<i64: 32, 8>}, {pipeline_mode = #tpu.pipeline_mode<synchronous>, transform_indices = @transform_2, window_bounds = array<i64: 1, 1>}, {pipeline_mode = #tpu.pipeline_mode<synchronous>, transform_indices = @transform_3, window_bounds = array<i64: 1, 1>}, {transform_indices = @transform_4, window_bounds = array<i64: 1, 8>}]} {
    %c0 = arith.constant 0 : index
    %c0_0 = arith.constant 0 : index
    %0 = vector.load %arg1[%c0, %c0_0] : memref<1x32xbf16, #tpu.memory_space<vmem>>, vector<1x32xbf16>
    %c0_1 = arith.constant 0 : index
    %c0_2 = arith.constant 0 : index
    %1 = vector.load %arg2[%c0_1, %c0_2] : memref<32x8xbf16, #tpu.memory_space<vmem>>, vector<32x8xbf16>
    %cst = arith.constant dense<0.000000e+00> : vector<1x8xf32>
    %2 = tpu.matmul %0, %1, %cst {dimension_numbers = #tpu.dot_dimension_numbers<[1], [0], [0], [1], [0, 0, 1, 1], [], []>} : vector<1x32xbf16>, vector<32x8xbf16>, vector<1x8xf32> -> vector<1x8xf32>
    %c0_3 = arith.constant 0 : index
    %c0_4 = arith.constant 0 : index
    %3 = vector.load %arg3[%c0_3, %c0_4] : memref<1x1xf32, #tpu.memory_space<vmem>>, vector<1x1xf32>
    %4 = vector.broadcast %3 : vector<1x1xf32> to vector<1x8xf32>
    %5 = arith.mulf %2, %4 : vector<1x8xf32>
    %c0_5 = arith.constant 0 : index
    %c0_6 = arith.constant 0 : index
    %6 = vector.load %arg4[%c0_5, %c0_6] : memref<1x1xf32, #tpu.memory_space<vmem>>, vector<1x1xf32>
    %7 = vector.broadcast %6 : vector<1x1xf32> to vector<1x8xf32>
    %8 = arith.addf %5, %7 : vector<1x8xf32>
    %cst_7 = arith.constant 0.000000e+00 : f32
    %9 = vector.broadcast %cst_7 : f32 to vector<1x8xf32>
    %10 = arith.maximumf %8, %9 : vector<1x8xf32>
    %c0_8 = arith.constant 0 : index
    %c0_9 = arith.constant 0 : index
    %11 = vector.load %arg5[%c0_8, %c0_9] : memref<1x8xf32, #tpu.memory_space<vmem>>, vector<1x8xf32>
    tpu.vector_store %arg5[%c0_8, %c0_9], %10 {strides = array<i32>} : memref<1x8xf32, #tpu.memory_space<vmem>>, vector<1x8xf32>,
    return
  }
  func.func @transform_0(%arg0: i32) -> (i32, i32) {
    %c0_i32 = arith.constant 0 : i32
    %c0_i32_0 = arith.constant 0 : i32
    %c0_i32_1 = arith.constant 0 : i32
    return %c0_i32, %c0_i32_0 : i32, i32
  }
  func.func @transform_1(%arg0: i32) -> (i32, i32) {
    %c0_i32 = arith.constant 0 : i32
    %c0_i32_0 = arith.constant 0 : i32
    return %c0_i32, %arg0 : i32, i32
  }
  func.func @transform_2(%arg0: i32) -> (i32, i32) {
    %c0_i32 = arith.constant 0 : i32
    %c0_i32_0 = arith.constant 0 : i32
    %c0_i32_1 = arith.constant 0 : i32
    return %c0_i32, %c0_i32_0 : i32, i32
  }
  func.func @transform_3(%arg0: i32) -> (i32, i32) {
    %c0_i32 = arith.constant 0 : i32
    %c0_i32_0 = arith.constant 0 : i32
    %c0_i32_1 = arith.constant 0 : i32
    return %c0_i32, %c0_i32_0 : i32, i32
  }
  func.func @transform_4(%arg0: i32) -> (i32, i32) {
    %c0_i32 = arith.constant 0 : i32
    %c0_i32_0 = arith.constant 0 : i32
    return %c0_i32, %arg0 : i32, i32
  }
}

module attributes {stable_mosaic.version = 11 : i64} {
  func.func @_conv_mm_kernel(%arg0: i32, %arg1: memref<1x64xbf16, #tpu.memory_space<vmem>>, %arg2: memref<64x2xbf16, #tpu.memory_space<vmem>>, %arg3: memref<1x1xf32, #tpu.memory_space<vmem>>, %arg4: memref<1x1xf32, #tpu.memory_space<vmem>>, %arg5: memref<1x2xf32, #tpu.memory_space<vmem>>) attributes {dimension_semantics = [#tpu.dimension_semantics<parallel>], iteration_bounds = array<i64: 1>, scalar_prefetch = 0 : i64, scratch_operands = 0 : i64, tpu.core_type = #tpu.core_type<tc>, window_params = [{pipeline_mode = #tpu.pipeline_mode<synchronous>, transform_indices = @transform_0, window_bounds = array<i64: 1, 64>}, {transform_indices = @transform_1, window_bounds = array<i64: 64, 2>}, {pipeline_mode = #tpu.pipeline_mode<synchronous>, transform_indices = @transform_2, window_bounds = array<i64: 1, 1>}, {pipeline_mode = #tpu.pipeline_mode<synchronous>, transform_indices = @transform_3, window_bounds = array<i64: 1, 1>}, {transform_indices = @transform_4, window_bounds = array<i64: 1, 2>}]} {
    %c0 = arith.constant 0 : index
    %c0_0 = arith.constant 0 : index
    %0 = vector.load %arg1[%c0, %c0_0] : memref<1x64xbf16, #tpu.memory_space<vmem>>, vector<1x64xbf16>
    %c0_1 = arith.constant 0 : index
    %c0_2 = arith.constant 0 : index
    %1 = vector.load %arg2[%c0_1, %c0_2] : memref<64x2xbf16, #tpu.memory_space<vmem>>, vector<64x2xbf16>
    %cst = arith.constant dense<0.000000e+00> : vector<1x2xf32>
    %2 = tpu.matmul %0, %1, %cst {dimension_numbers = #tpu.dot_dimension_numbers<[1], [0], [0], [1], [0, 0, 1, 1], [], []>} : vector<1x64xbf16>, vector<64x2xbf16>, vector<1x2xf32> -> vector<1x2xf32>
    %c0_3 = arith.constant 0 : index
    %c0_4 = arith.constant 0 : index
    %3 = vector.load %arg3[%c0_3, %c0_4] : memref<1x1xf32, #tpu.memory_space<vmem>>, vector<1x1xf32>
    %4 = vector.broadcast %3 : vector<1x1xf32> to vector<1x2xf32>
    %5 = arith.mulf %2, %4 : vector<1x2xf32>
    %c0_5 = arith.constant 0 : index
    %c0_6 = arith.constant 0 : index
    %6 = vector.load %arg4[%c0_5, %c0_6] : memref<1x1xf32, #tpu.memory_space<vmem>>, vector<1x1xf32>
    %7 = vector.broadcast %6 : vector<1x1xf32> to vector<1x2xf32>
    %8 = arith.addf %5, %7 : vector<1x2xf32>
    %cst_7 = arith.constant 0.000000e+00 : f32
    %9 = vector.broadcast %cst_7 : f32 to vector<1x2xf32>
    %10 = arith.maximumf %8, %9 : vector<1x2xf32>
    %c0_8 = arith.constant 0 : index
    %c0_9 = arith.constant 0 : index
    %11 = vector.load %arg5[%c0_8, %c0_9] : memref<1x2xf32, #tpu.memory_space<vmem>>, vector<1x2xf32>
    tpu.vector_store %arg5[%c0_8, %c0_9], %10 {strides = array<i32>} : memref<1x2xf32, #tpu.memory_space<vmem>>, vector<1x2xf32>,
    return
  }
  func.func @transform_0(%arg0: i32) -> (i32, i32) {
    %c0_i32 = arith.constant 0 : i32
    %c0_i32_0 = arith.constant 0 : i32
    %c0_i32_1 = arith.constant 0 : i32
    return %c0_i32, %c0_i32_0 : i32, i32
  }
  func.func @transform_1(%arg0: i32) -> (i32, i32) {
    %c0_i32 = arith.constant 0 : i32
    %c0_i32_0 = arith.constant 0 : i32
    return %c0_i32, %arg0 : i32, i32
  }
  func.func @transform_2(%arg0: i32) -> (i32, i32) {
    %c0_i32 = arith.constant 0 : i32
    %c0_i32_0 = arith.constant 0 : i32
    %c0_i32_1 = arith.constant 0 : i32
    return %c0_i32, %c0_i32_0 : i32, i32
  }
  func.func @transform_3(%arg0: i32) -> (i32, i32) {
    %c0_i32 = arith.constant 0 : i32
    %c0_i32_0 = arith.constant 0 : i32
    %c0_i32_1 = arith.constant 0 : i32
    return %c0_i32, %c0_i32_0 : i32, i32
  }
  func.func @transform_4(%arg0: i32) -> (i32, i32) {
    %c0_i32 = arith.constant 0 : i32
    %c0_i32_0 = arith.constant 0 : i32
    return %c0_i32, %arg0 : i32, i32
  }
}

module attributes {stable_mosaic.version = 11 : i64} {
  func.func @_conv_mm_kernel(%arg0: i32, %arg1: memref<3x5xbf16, #tpu.memory_space<vmem>>, %arg2: memref<5x256xbf16, #tpu.memory_space<vmem>>, %arg3: memref<3x1xf32, #tpu.memory_space<vmem>>, %arg4: memref<3x1xf32, #tpu.memory_space<vmem>>, %arg5: memref<3x256xf32, #tpu.memory_space<vmem>>) attributes {dimension_semantics = [#tpu.dimension_semantics<parallel>], iteration_bounds = array<i64: 2>, scalar_prefetch = 0 : i64, scratch_operands = 0 : i64, tpu.core_type = #tpu.core_type<tc>, window_params = [{pipeline_mode = #tpu.pipeline_mode<synchronous>, transform_indices = @transform_0, window_bounds = array<i64: 3, 5>}, {transform_indices = @transform_1, window_bounds = array<i64: 5, 256>}, {pipeline_mode = #tpu.pipeline_mode<synchronous>, transform_indices = @transform_2, window_bounds = array<i64: 3, 1>}, {pipeline_mode = #tpu.pipeline_mode<synchronous>, transform_indices = @transform_3, window_bounds = array<i64: 3, 1>}, {transform_indices = @transform_4, window_bounds = array<i64: 3, 256>}]} {
    %c0 = arith.constant 0 : index
    %c0_0 = arith.constant 0 : index
    %0 = vector.load %arg1[%c0, %c0_0] : memref<3x5xbf16, #tpu.memory_space<vmem>>, vector<3x5xbf16>
    %c0_1 = arith.constant 0 : index
    %c0_2 = arith.constant 0 : index
    %1 = vector.load %arg2[%c0_1, %c0_2] : memref<5x256xbf16, #tpu.memory_space<vmem>>, vector<5x256xbf16>
    %cst = arith.constant dense<0.000000e+00> : vector<3x256xf32>
    %2 = tpu.matmul %0, %1, %cst {dimension_numbers = #tpu.dot_dimension_numbers<[1], [0], [0], [1], [0, 0, 1, 1], [], []>} : vector<3x5xbf16>, vector<5x256xbf16>, vector<3x256xf32> -> vector<3x256xf32>
    %c0_3 = arith.constant 0 : index
    %c0_4 = arith.constant 0 : index
    %3 = vector.load %arg3[%c0_3, %c0_4] : memref<3x1xf32, #tpu.memory_space<vmem>>, vector<3x1xf32>
    %4 = vector.broadcast %3 : vector<3x1xf32> to vector<3x256xf32>
    %5 = arith.mulf %2, %4 : vector<3x256xf32>
    %c0_5 = arith.constant 0 : index
    %c0_6 = arith.constant 0 : index
    %6 = vector.load %arg4[%c0_5, %c0_6] : memref<3x1xf32, #tpu.memory_space<vmem>>, vector<3x1xf32>
    %7 = vector.broadcast %6 : vector<3x1xf32> to vector<3x256xf32>
    %8 = arith.addf %5, %7 : vector<3x256xf32>
    %c0_7 = arith.constant 0 : index
    %c0_8 = arith.constant 0 : index
    %9 = vector.load %arg5[%c0_7, %c0_8] : memref<3x256xf32, #tpu.memory_space<vmem>>, vector<3x256xf32>
    tpu.vector_store %arg5[%c0_7, %c0_8], %8 {strides = array<i32>} : memref<3x256xf32, #tpu.memory_space<vmem>>, vector<3x256xf32>,
    return
  }
  func.func @transform_0(%arg0: i32) -> (i32, i32) {
    %c0_i32 = arith.constant 0 : i32
    %c0_i32_0 = arith.constant 0 : i32
    %c0_i32_1 = arith.constant 0 : i32
    return %c0_i32, %c0_i32_0 : i32, i32
  }
  func.func @transform_1(%arg0: i32) -> (i32, i32) {
    %c0_i32 = arith.constant 0 : i32
    %c0_i32_0 = arith.constant 0 : i32
    return %c0_i32, %arg0 : i32, i32
  }
  func.func @transform_2(%arg0: i32) -> (i32, i32) {
    %c0_i32 = arith.constant 0 : i32
    %c0_i32_0 = arith.constant 0 : i32
    %c0_i32_1 = arith.constant 0 : i32
    return %c0_i32, %c0_i32_0 : i32, i32
  }
  func.func @transform_3(%arg0: i32) -> (i32, i32) {
    %c0_i32 = arith.constant 0 : i32
    %c0_i32_0 = arith.constant 0 : i32
    %c0_i32_1 = arith.constant 0 : i32
    return %c0_i32, %c0_i32_0 : i32, i32
  }
  func.func @transform_4(%arg0: i32) -> (i32, i32) {
    %c0_i32 = arith.constant 0 : i32
    %c0_i32_0 = arith.constant 0 : i32
    return %c0_i32, %arg0 : i32, i32
  }
}

</mosaic_0001>

<bundles_post_ra>
// kernel: unet_forward.29
= control target key start
LH: loop header
LB: loop body
LE: loop exit
PB: predicated region body
PF: predicated region fallthrough
CT: control target
= control target key end

     0   :  { %s717_s15 = smov 0   ;;  %s719_s16 = smov 0   ;;  %s841_s0 = inlined_call_operand.vmem [shape: bf16[4,147], index: 0, kind: input, shape index: {}]   ;;  %s842_s1 = inlined_call_operand.vmem [shape: bf16[147,512], index: 1, kind: input, shape index: {}]   ;;  %s843_s2 = inlined_call_operand.vmem [shape: f32[4,1], index: 2, kind: input, shape index: {}]   ;;  %s844_s3 = inlined_call_operand.vmem [shape: f32[4,1], index: 3, kind: input, shape index: {}]   ;;  %s845_s4 = inlined_call_operand.vmem [shape: f32[4,512], index: 4, kind: output, shape index: {}]  }
   0x1   :  { %s721_s17 = smov 0  }
   0x2 LB: > { %s574_s18 = sadd.s32 4294967295, %s688_s17   ;;  %s734_s19 = sadd.s32 1, %s688_s17   ;;  %s688_s17 = sphi %s721_s17, %s848_s17   ;;  %s684_s16 = sphi %s719_s16, %s847_s16   ;;  %s680_s15 = sphi %s717_s15, %s846_s15  }
   0x3   : > { %s39_s20 = ssub.s32 %s688_s17, %s734_s19  ;;  %s42_s21 = sadd.s32 1, %s684_s16 }
   0x4   : > { %p40_p0 = scmp.eq.s32.totalorder %s39_s20, 0  ;;  %p49_p1 = scmp.ne.s32.totalorder %s684_s16, %s680_s15 }
   0x5   : > { %p50_p2 = scmp.eq.s32.totalorder %s688_s17, 0  ;;  %p577_p4 = scmp.ge.s32.totalorder %s688_s17, 2 }
   0x6   : > { %s743_s22 = scalar_select %p40_p0, %s684_s16, %s42_s21  }
   0x7   : > { %p51_p3 = por %p50_p2, %p49_p1  ;;  %152 = sbr.rel (%p577_p4) target bundleno = 26 (0x1a), region = 28 }
   0xc   : > { %155 = sbr.rel (!%p51_p3) target bundleno = 26 (0x1a), region = 32  ;;  %s157_s23 = sand.u32 (%p51_p3), 1, %s684_s16  }
   0xd   : > { %s607_s24 = sshll.u32 (%p51_p3), %s688_s17, 3  ;;  %s608_s25 = smul.u32 (%p51_p3), 152, %s157_s23 }
   0xe   : > { %s751_s28 = scalar_lea.vmem (%p51_p3), %s842_s1, %s607_s24 }
   0xf   : > { %v227_v0 = vld [vmem:[%s751_s28] sm:$0xff] (%p51_p3)  ;;  %v229_v1 = vld [vmem:[%s751_s28 + $0x10] sm:$0xff] (%p51_p3)  ;;  %s759_s29 = scalar_lea.vmem (%p51_p3), [#allocation2], %s608_s25 }
  0x10   : > { %v231_v2 = vld [vmem:[%s751_s28 + $0x20] sm:$0xff] (%p51_p3)  ;;  %v233_v3 = vld [vmem:[%s751_s28 + $0x30] sm:$0xff] (%p51_p3)  ;;  %228 = vst [vmem:[%s759_s29] sm:$0xff] (%p51_p3), %v227_v0  ;;  %230 = vst [vmem:[%s759_s29 + $0x8] sm:$0xff] (%p51_p3), %v229_v1 }
  0x11   : > { %v235_v4 = vld [vmem:[%s751_s28 + $0x40] sm:$0xff]  ;;  %v237_v5 = vld [vmem:[%s751_s28 + $0x50] sm:$0xff]  ;;  %232 = vst [vmem:[%s759_s29 + $0x10] sm:$0xff] %v231_v2  ;;  %234 = vst [vmem:[%s759_s29 + $0x18] sm:$0xff] %v233_v3 }
  0x12   : > { %236 = vst [vmem:[%s759_s29 + $0x20] sm:$0xff] %v235_v4  ;;  %238 = vst [vmem:[%s759_s29 + $0x28] sm:$0xff] %v237_v5  ;;  %v239_v6 = vld [vmem:[%s751_s28 + $0x60] sm:$0xff]  ;;  %v241_v7 = vld [vmem:[%s751_s28 + $0x70] sm:$0xff] }
  0x13   : > { %v243_v8 = vld [vmem:[%s751_s28 + $0x80] sm:$0xff]  ;;  %240 = vst [vmem:[%s759_s29 + $0x30] sm:$0xff] %v239_v6  ;;  %242 = vst [vmem:[%s759_s29 + $0x38] sm:$0xff] %v241_v7  ;;  %v245_v9 = vld [vmem:[%s751_s28 + $0x90] sm:$0xff] }
  0x14   : > { %244 = vst [vmem:[%s759_s29 + $0x40] sm:$0xff] %v243_v8  ;;  %v247_v10 = vld [vmem:[%s751_s28 + $0xa0] sm:$0xff]  ;;  %v249_v11 = vld [vmem:[%s751_s28 + $0xb0] sm:$0xff]  ;;  %246 = vst [vmem:[%s759_s29 + $0x48] sm:$0xff] %v245_v9 }
  0x15   : > { %248 = vst [vmem:[%s759_s29 + $0x50] sm:$0xff] %v247_v10  ;;  %250 = vst [vmem:[%s759_s29 + $0x58] sm:$0xff] %v249_v11  ;;  %v251_v12 = vld [vmem:[%s751_s28 + $0xc0] sm:$0xff]  ;;  %v253_v13 = vld [vmem:[%s751_s28 + $0xd0] sm:$0xff] }
  0x16   : > { %v255_v14 = vld [vmem:[%s751_s28 + $0xe0] sm:$0xff]  ;;  %252 = vst [vmem:[%s759_s29 + $0x60] sm:$0xff] %v251_v12  ;;  %254 = vst [vmem:[%s759_s29 + $0x68] sm:$0xff] %v253_v13  ;;  %v257_v15 = vld [vmem:[%s751_s28 + $0xf0] sm:$0xff] }
  0x17   : > { %256 = vst [vmem:[%s759_s29 + $0x70] sm:$0xff] %v255_v14  ;;  %v259_v16 = vld [vmem:[%s751_s28 + $0x100] sm:$0xff]  ;;  %v261_v17 = vld [vmem:[%s751_s28 + $0x110] sm:$0xff]  ;;  %258 = vst [vmem:[%s759_s29 + $0x78] sm:$0xff] %v257_v15 }
  0x18   : > { %260 = vst [vmem:[%s759_s29 + $0x80] sm:$0xff] %v259_v16  ;;  %262 = vst [vmem:[%s759_s29 + $0x88] sm:$0xff] %v261_v17  ;;  %v263_v18 = vld [vmem:[%s751_s28 + $0x120] sm:$0xff] }
  0x19   : > { %264 = vst [vmem:[%s759_s29 + $0x90] sm:$0xff] %v263_v18 }
  0x1a PF: > { %p580_p5 = scmp.ge.s32.totalorder %s688_s17, 1  ;;  %p269_p6 = scmp.lt.s32.totalorder %s688_s17, 3 }
  0x1c   : > { %p270_p7 = pnand %p580_p5, %p269_p6 }
  0x1d   : > { %s276_s30 = sand.u32 (!%p270_p7), 1, %s680_s15   ;;  %s581_s13 = sshll.u32 (!%p270_p7), %s574_s18, 1 }
  0x1e   : > { %273 = sbr.rel (%p270_p7) target bundleno = 281 (0x119), region = 70  ;;  %p303_p8 = scmp.lt.s32.totalorder (!%p270_p7), %s581_s13, 3 }
  0x1f   : > { %s609_s5 = smul.u32 (!%p270_p7), 152, %s276_s30 }
  0x21   : > { %s805_s12 = scalar_lea.vmem (!%p270_p7), [#allocation2], %s609_s5 }
  0x23   : > { %v583_v19 = vld.sshfl [vmem:[%s841_s0] sm:$0x33 pattern:$0x76325410]  ;;  %vm434_vm0 = vcmask 154624   ;;  %v690_v22 = vmov 0  }
  0x24   : > { %v337_v20 = vcombine.high %v583_v19, %v583_v19  ;;  %v489_v21 = vld [vmem:[%s843_s2] sm:$0xf]  ;;  %636 = vset.pattern.permute.xlu0 %v690_v22  ;;  %v637_v24 = vld [vmem:[%s805_s12 + $0x74] ss:$8 sps:$4 sm:$0xff]   ;;  %v639_v25 = vld [vmem:[%s805_s12 + $0x70] ss:$8 sps:$4 sm:$0xff]  }
  0x25   : > { %v497_v23 = vld [vmem:[%s844_s3] sm:$0xf]  ;;  %492 = vperm.xlu0 %636, %v489_v21   ;;  %448 = vmatprep.subr.bf16.mxu0 %v637_v24  ;;  %v640_v26 = vld [vmem:[%s805_s12 + $0x64] ss:$8 sps:$4 sm:$0xff]   ;;  %v643_v28 = vld [vmem:[%s805_s12 + $0x54] ss:$8 sps:$4 sm:$0xff]  }
  0x26   : > { %604 = vmatprep.mubr.msk.bf16.mxu0 %vm434_vm0, %v337_v20  ;;  %449 = vmatpush1.bf16.msra.mxu0 %v639_v25  ;;  %v642_v27 = vld [vmem:[%s805_s12 + $0x60] ss:$8 sps:$4 sm:$0xff]   ;;  %v645_v29 = vld [vmem:[%s805_s12 + $0x50] ss:$8 sps:$4 sm:$0xff]   ;;  %v646_v30 = vld [vmem:[%s805_s12 + $0x44] ss:$8 sps:$4 sm:$0xff]  }
  0x27   : > { %450 = vmatprep.subr.bf16.mxu0 %v640_v26  ;;  %v648_v31 = vld [vmem:[%s805_s12 + $0x40] ss:$8 sps:$4 sm:$0xff]   ;;  %v649_v32 = vld [vmem:[%s805_s12 + $0x34] ss:$8 sps:$4 sm:$0xff]   ;;  %v651_v33 = vld [vmem:[%s805_s12 + $0x30] ss:$8 sps:$4 sm:$0xff]  }
  0x28   : > { %v652_v34 = vld [vmem:[%s805_s12 + $0x24] ss:$8 sps:$4 sm:$0xff]   ;;  %v654_v35 = vld [vmem:[%s805_s12 + $0x20] ss:$8 sps:$4 sm:$0xff]   ;;  %vm438_vm1 = vcmask 1040384   ;;  %vm439_vm2 = vcmask 1041408  }
  0x29   : > { %500 = vperm.xlu0 %636, %v497_v23   ;;  %v655_v36 = vld [vmem:[%s805_s12 + $0x14] ss:$8 sps:$4 sm:$0xff]   ;;  %v691_v38 = vmov 65535   ;;  %v657_v40 = vld [vmem:[%s805_s12 + $0x10] ss:$8 sps:$4 sm:$0xff]   ;;  %s850_s13 = smov (!%p303_p8, %s581_s13), 3 }
  0x2a   : > { %451 = vmatpush1.bf16.msra.mxu0 %v642_v27  ;;  %v328_v37 = vld [vmem:[%s805_s12 + $0x90] sm:$0x33]  ;;  %v440_v39 = vsel %vm438_vm1, 4294967295, %v691_v38  ;;  %v658_v41 = vld [vmem:[%s805_s12 + $0x4] ss:$8 sps:$4 sm:$0xff]   ;;  %s582_s14 = sshll.u32 %s850_s13, 2 }
  0x2b   : > { %452 = vmatprep.subr.bf16.mxu0 %v643_v28  ;;  %v603_v42 = vcombine.high %v328_v37, %v328_v37  ;;  %v441_v43 = vsel %vm439_vm2, %v440_v39, 0  ;;  %v660_v44 = vld [vmem:[%s805_s12] ss:$8 sps:$4 sm:$0xff]   ;;  %v602_v45 = vcombine.low %v328_v37, %v328_v37  ;;  %v663_v48 = vld [vmem:[%s805_s12 + $0x84] ss:$8 sps:$4 sm:$0xff]   ;;  %s306_s17 = scalar_lea.vmem %s845_s4, %s582_s14 }
  0x2c   : > { %v665_v49 = vld [vmem:[%s805_s12 + $0x80] ss:$8 sps:$4 sm:$0xff]  }
  0x2d   : > { %v446_v46 = vand.u32 %v603_v42, %v441_v43  ;;  %v443_v47 = vand.u32 %v602_v45, %v441_v43 }
  0x2e   : > { %453 = vmatpush1.bf16.msra.mxu0 %v645_v29 }
  0x2f   : > { %454 = vmatprep.subr.bf16.mxu0 %v646_v30 }
  0x32   : > { %455 = vmatpush1.bf16.msra.mxu0 %v648_v31 }
  0x33   : > { %456 = vmatprep.subr.bf16.mxu0 %v649_v32 }
  0x36   : > { %457 = vmatpush1.bf16.msra.mxu0 %v651_v33 }
  0x37   : > { %458 = vmatprep.subr.bf16.mxu0 %v652_v34 }
  0x3a   : > { %459 = vmatpush1.bf16.msra.mxu0 %v654_v35 }
  0x3b   : > { %460 = vmatprep.subr.bf16.mxu0 %v655_v36 }
  0x3e   : > { %461 = vmatpush1.bf16.msra.mxu0 %v657_v40 }
  0x3f   : > { %462 = vmatprep.subr.bf16.mxu0 %v658_v41 }
  0x42   : > { %463 = vmatpush1.bf16.msra.mxu0 %v660_v44 }
  0x43   : > { %476 = vmatprep.subr.bf16.mxu0 %v446_v46 }
  0x46   : > { %477 = vmatpush2.bf16.msra.mxu0 %v443_v47 }
  0x47   : > { %478 = vmatprep.subr.bf16.mxu0 %v663_v48 }
  0x4a   : > { %479 = vmatpush2.bf16.msra.mxu0 %v665_v49 }
  0x4d   : > { %481 = vmatmul.mubr.bf16.vlgmr.msra.gmra.mxu0 %v583_v19 }
  0xa0   : > { %v493_v50 = vpop.permute.xlu0 %492 }
  0xa4   : > { %v501_v53 = vpop.permute.xlu0 %500 }
 0x10d   : > { %v482_v51 = vpop.f32.mrf.mxu0 }
 0x10e   : > { %v495_v52 = vmul.f32 %v493_v50, %v482_v51 }
 0x10f   : > { %v484_v54 = vpop.f32.mrf.mxu0 }
 0x110   : > { %v503_v55 = vadd.f32 %v501_v53, %v495_v52  ;;  %v496_v56 = vmul.f32 %v493_v50, %v484_v54 }
 0x111   : > { %v486_v57 = vpop.f32.mrf.mxu0 }
 0x112   : > { %v504_v58 = vadd.f32 %v501_v53, %v496_v56  ;;  %v505_v60 = vmax.f32 %v503_v55, 0.0 }
 0x113   : > { %v487_v59 = vpop.f32.mrf.mxu0 }
 0x114   : > { %v506_v61 = vmax.f32 %v504_v58, 0.0 }
 0x116   : > { %v509_v62 = vcombine.low %v505_v60, %v506_v61 }
 0x118   : > { %511 = vst [vmem:[%s306_s17] sm:$0xff] %v509_v62 }
 0x119 PF: > { %p11_p9 = scmp.ge.s32.totalorder %s734_s19, 4   ;;  %s846_s15 = smov %s684_s16 }
 0x11a   : > { %s847_s16 = smov %s743_s22  ;;  %s848_s17 = smov %s734_s19 }
 0x11b   :  { %13 = sbr.rel (!%p11_p9) target bundleno = 2 (0x2), region = 109 }

// kernel: unet_forward.30
= control target key start
LH: loop header
LB: loop body
LE: loop exit
PB: predicated region body
PF: predicated region fallthrough
CT: control target
= control target key end

     0   :  { %s1040_s15 = smov 0   ;;  %s1042_s16 = smov 0   ;;  %s1235_s0 = inlined_call_operand.vmem [shape: bf16[4,324], index: 0, kind: input, shape index: {}]   ;;  %s1236_s1 = inlined_call_operand.vmem [shape: bf16[324,512], index: 1, kind: input, shape index: {}]   ;;  %s1237_s2 = inlined_call_operand.vmem [shape: f32[4,1], index: 2, kind: input, shape index: {}]   ;;  %s1238_s3 = inlined_call_operand.vmem [shape: f32[4,1], index: 3, kind: input, shape index: {}]   ;;  %s1239_s4 = inlined_call_operand.vmem [shape: f32[4,512], index: 4, kind: output, shape index: {}]  }
   0x1   :  { %s1044_s17 = smov 0  }
   0x2 LB: > { %s841_s18 = sadd.s32 4294967295, %s1011_s17   ;;  %s1057_s19 = sadd.s32 1, %s1011_s17   ;;  %s1011_s17 = sphi %s1044_s17, %s1242_s17   ;;  %s1007_s16 = sphi %s1042_s16, %s1241_s16   ;;  %s1003_s15 = sphi %s1040_s15, %s1240_s15  }
   0x3   : > { %s39_s20 = ssub.s32 %s1011_s17, %s1057_s19  ;;  %s42_s21 = sadd.s32 1, %s1007_s16 }
   0x4   : > { %p40_p0 = scmp.eq.s32.totalorder %s39_s20, 0  ;;  %p49_p1 = scmp.ne.s32.totalorder %s1007_s16, %s1003_s15 }
   0x5   : > { %p50_p2 = scmp.eq.s32.totalorder %s1011_s17, 0  ;;  %p844_p4 = scmp.ge.s32.totalorder %s1011_s17, 2 }
   0x6   : > { %s1066_s22 = scalar_select %p40_p0, %s1007_s16, %s42_s21  }
   0x7   : > { %p51_p3 = por %p50_p2, %p49_p1  ;;  %152 = sbr.rel (%p844_p4) target bundleno = 37 (0x25), region = 28 }
   0xc   : > { %155 = sbr.rel (!%p51_p3) target bundleno = 37 (0x25), region = 32  ;;  %s157_s23 = sand.u32 (%p51_p3), 1, %s1007_s16  }
   0xd   : > { %s896_s24 = sshll.u32 (%p51_p3), %s1011_s17, 3  ;;  %s897_s25 = smul.u32 (%p51_p3), 328, %s157_s23 }
   0xe   : > { %s1074_s28 = scalar_lea.vmem (%p51_p3), %s1236_s1, %s896_s24 }
   0xf   : > { %v271_v0 = vld [vmem:[%s1074_s28] sm:$0xff] (%p51_p3)  ;;  %v273_v1 = vld [vmem:[%s1074_s28 + $0x10] sm:$0xff] (%p51_p3)  ;;  %s1082_s29 = scalar_lea.vmem (%p51_p3), [#allocation2], %s897_s25 }
  0x10   : > { %v275_v2 = vld [vmem:[%s1074_s28 + $0x20] sm:$0xff] (%p51_p3)  ;;  %v277_v3 = vld [vmem:[%s1074_s28 + $0x30] sm:$0xff] (%p51_p3)  ;;  %272 = vst [vmem:[%s1082_s29] sm:$0xff] (%p51_p3), %v271_v0  ;;  %274 = vst [vmem:[%s1082_s29 + $0x8] sm:$0xff] (%p51_p3), %v273_v1 }
  0x11   : > { %v279_v4 = vld [vmem:[%s1074_s28 + $0x40] sm:$0xff]  ;;  %v281_v5 = vld [vmem:[%s1074_s28 + $0x50] sm:$0xff]  ;;  %276 = vst [vmem:[%s1082_s29 + $0x10] sm:$0xff] %v275_v2  ;;  %278 = vst [vmem:[%s1082_s29 + $0x18] sm:$0xff] %v277_v3 }
  0x12   : > { %280 = vst [vmem:[%s1082_s29 + $0x20] sm:$0xff] %v279_v4  ;;  %282 = vst [vmem:[%s1082_s29 + $0x28] sm:$0xff] %v281_v5  ;;  %v283_v6 = vld [vmem:[%s1074_s28 + $0x60] sm:$0xff]  ;;  %v285_v7 = vld [vmem:[%s1074_s28 + $0x70] sm:$0xff] }
  0x13   : > { %v287_v8 = vld [vmem:[%s1074_s28 + $0x80] sm:$0xff]  ;;  %284 = vst [vmem:[%s1082_s29 + $0x30] sm:$0xff] %v283_v6  ;;  %286 = vst [vmem:[%s1082_s29 + $0x38] sm:$0xff] %v285_v7  ;;  %v289_v9 = vld [vmem:[%s1074_s28 + $0x90] sm:$0xff] }
  0x14   : > { %288 = vst [vmem:[%s1082_s29 + $0x40] sm:$0xff] %v287_v8  ;;  %v291_v10 = vld [vmem:[%s1074_s28 + $0xa0] sm:$0xff]  ;;  %v293_v11 = vld [vmem:[%s1074_s28 + $0xb0] sm:$0xff]  ;;  %290 = vst [vmem:[%s1082_s29 + $0x48] sm:$0xff] %v289_v9 }
  0x15   : > { %292 = vst [vmem:[%s1082_s29 + $0x50] sm:$0xff] %v291_v10  ;;  %294 = vst [vmem:[%s1082_s29 + $0x58] sm:$0xff] %v293_v11  ;;  %v295_v12 = vld [vmem:[%s1074_s28 + $0xc0] sm:$0xff]  ;;  %v297_v13 = vld [vmem:[%s1074_s28 + $0xd0] sm:$0xff] }
  0x16   : > { %v299_v14 = vld [vmem:[%s1074_s28 + $0xe0] sm:$0xff]  ;;  %296 = vst [vmem:[%s1082_s29 + $0x60] sm:$0xff] %v295_v12  ;;  %298 = vst [vmem:[%s1082_s29 + $0x68] sm:$0xff] %v297_v13  ;;  %v301_v15 = vld [vmem:[%s1074_s28 + $0xf0] sm:$0xff] }
  0x17   : > { %300 = vst [vmem:[%s1082_s29 + $0x70] sm:$0xff] %v299_v14  ;;  %v303_v16 = vld [vmem:[%s1074_s28 + $0x100] sm:$0xff]  ;;  %v305_v17 = vld [vmem:[%s1074_s28 + $0x110] sm:$0xff]  ;;  %302 = vst [vmem:[%s1082_s29 + $0x78] sm:$0xff] %v301_v15 }
  0x18   : > { %304 = vst [vmem:[%s1082_s29 + $0x80] sm:$0xff] %v303_v16  ;;  %306 = vst [vmem:[%s1082_s29 + $0x88] sm:$0xff] %v305_v17  ;;  %v307_v18 = vld [vmem:[%s1074_s28 + $0x120] sm:$0xff]  ;;  %v309_v19 = vld [vmem:[%s1074_s28 + $0x130] sm:$0xff] }
  0x19   : > { %v311_v20 = vld [vmem:[%s1074_s28 + $0x140] sm:$0xff]  ;;  %308 = vst [vmem:[%s1082_s29 + $0x90] sm:$0xff] %v307_v18  ;;  %310 = vst [vmem:[%s1082_s29 + $0x98] sm:$0xff] %v309_v19  ;;  %v313_v21 = vld [vmem:[%s1074_s28 + $0x150] sm:$0xff] }
  0x1a   : > { %312 = vst [vmem:[%s1082_s29 + $0xa0] sm:$0xff] %v311_v20  ;;  %v315_v22 = vld [vmem:[%s1074_s28 + $0x160] sm:$0xff]  ;;  %v317_v23 = vld [vmem:[%s1074_s28 + $0x170] sm:$0xff]  ;;  %314 = vst [vmem:[%s1082_s29 + $0xa8] sm:$0xff] %v313_v21 }
  0x1b   : > { %316 = vst [vmem:[%s1082_s29 + $0xb0] sm:$0xff] %v315_v22  ;;  %318 = vst [vmem:[%s1082_s29 + $0xb8] sm:$0xff] %v317_v23  ;;  %v319_v24 = vld [vmem:[%s1074_s28 + $0x180] sm:$0xff]  ;;  %v321_v25 = vld [vmem:[%s1074_s28 + $0x190] sm:$0xff] }
  0x1c   : > { %v323_v26 = vld [vmem:[%s1074_s28 + $0x1a0] sm:$0xff]  ;;  %320 = vst [vmem:[%s1082_s29 + $0xc0] sm:$0xff] %v319_v24  ;;  %322 = vst [vmem:[%s1082_s29 + $0xc8] sm:$0xff] %v321_v25  ;;  %v325_v27 = vld [vmem:[%s1074_s28 + $0x1b0] sm:$0xff] }
  0x1d   : > { %324 = vst [vmem:[%s1082_s29 + $0xd0] sm:$0xff] %v323_v26  ;;  %v327_v28 = vld [vmem:[%s1074_s28 + $0x1c0] sm:$0xff]  ;;  %v329_v29 = vld [vmem:[%s1074_s28 + $0x1d0] sm:$0xff]  ;;  %326 = vst [vmem:[%s1082_s29 + $0xd8] sm:$0xff] %v325_v27 }
  0x1e   : > { %328 = vst [vmem:[%s1082_s29 + $0xe0] sm:$0xff] %v327_v28  ;;  %330 = vst [vmem:[%s1082_s29 + $0xe8] sm:$0xff] %v329_v29  ;;  %v331_v30 = vld [vmem:[%s1074_s28 + $0x1e0] sm:$0xff]  ;;  %v333_v31 = vld [vmem:[%s1074_s28 + $0x1f0] sm:$0xff] }
  0x1f   : > { %v335_v32 = vld [vmem:[%s1074_s28 + $0x200] sm:$0xff]  ;;  %332 = vst [vmem:[%s1082_s29 + $0xf0] sm:$0xff] %v331_v30  ;;  %334 = vst [vmem:[%s1082_s29 + $0xf8] sm:$0xff] %v333_v31  ;;  %v337_v33 = vld [vmem:[%s1074_s28 + $0x210] sm:$0xff] }
  0x20   : > { %336 = vst [vmem:[%s1082_s29 + $0x100] sm:$0xff] %v335_v32  ;;  %v339_v34 = vld [vmem:[%s1074_s28 + $0x220] sm:$0xff]  ;;  %v341_v35 = vld [vmem:[%s1074_s28 + $0x230] sm:$0xff]  ;;  %338 = vst [vmem:[%s1082_s29 + $0x108] sm:$0xff] %v337_v33 }
  0x21   : > { %340 = vst [vmem:[%s1082_s29 + $0x110] sm:$0xff] %v339_v34  ;;  %342 = vst [vmem:[%s1082_s29 + $0x118] sm:$0xff] %v341_v35  ;;  %v343_v36 = vld [vmem:[%s1074_s28 + $0x240] sm:$0xff]  ;;  %v345_v37 = vld [vmem:[%s1074_s28 + $0x250] sm:$0xff] }
  0x22   : > { %v347_v38 = vld [vmem:[%s1074_s28 + $0x260] sm:$0xff]  ;;  %344 = vst [vmem:[%s1082_s29 + $0x120] sm:$0xff] %v343_v36  ;;  %346 = vst [vmem:[%s1082_s29 + $0x128] sm:$0xff] %v345_v37  ;;  %v349_v39 = vld [vmem:[%s1074_s28 + $0x270] sm:$0xff] }
  0x23   : > { %348 = vst [vmem:[%s1082_s29 + $0x130] sm:$0xff] %v347_v38  ;;  %v351_v40 = vld [vmem:[%s1074_s28 + $0x280] sm:$0xff]  ;;  %350 = vst [vmem:[%s1082_s29 + $0x138] sm:$0xff] %v349_v39 }
  0x24   : > { %352 = vst [vmem:[%s1082_s29 + $0x140] sm:$0xff] %v351_v40 }
  0x25 PF: > { %p847_p5 = scmp.ge.s32.totalorder %s1011_s17, 1  ;;  %p357_p6 = scmp.lt.s32.totalorder %s1011_s17, 3 }
  0x27   : > { %p358_p7 = pnand %p847_p5, %p357_p6 }
  0x28   : > { %s364_s30 = sand.u32 (!%p358_p7), 1, %s1003_s15   ;;  %s848_s13 = sshll.u32 (!%p358_p7), %s841_s18, 1 }
  0x29   : > { %361 = sbr.rel (%p358_p7) target bundleno = 318 (0x13e), region = 70  ;;  %p391_p8 = scmp.lt.s32.totalorder (!%p358_p7), %s848_s13, 3 }
  0x2a   : > { %s898_s5 = smul.u32 (!%p358_p7), 328, %s364_s30 }
  0x2c   : > { %s1169_s10 = scalar_lea.vmem (!%p358_p7), [#allocation2], %s898_s5 }
  0x2e   : > { %v444_v41 = vlaneseq  ;;  %v1013_v42 = vmov 0   ;;  %v756_v43 = vld [vmem:[%s1237_s2] sm:$0xf]  ;;  %v1014_v44 = vmov 1983009808   ;;  %vm667_vm0 = vcmask 1041408  }
  0x2f   : > { %747 = vmatprep.mubr.bf16.mxu1 %v1013_v42  ;;  %925 = vset.pattern.permute.xlu0 %v1013_v42  ;;  %v442_v45 = vunpack.c.l.s4 %v1014_v44  ;;  %v764_v47 = vld [vmem:[%s1238_s3] sm:$0xf]  ;;  %v926_v48 = vld [vmem:[%s1169_s10 + $0x74] ss:$8 sps:$4 sm:$0xff]   ;;  %v929_v51 = vld [vmem:[%s1169_s10 + $0x64] ss:$8 sps:$4 sm:$0xff]  }
  0x30   : > { %v445_v46 = vshrl.u32 %v444_v41, 7  ;;  %759 = vperm.xlu0 %925, %v756_v43   ;;  %v928_v50 = vld [vmem:[%s1169_s10 + $0x70] ss:$8 sps:$4 sm:$0xff]   ;;  %674 = vmatprep.subr.bf16.mxu0 %v926_v48  ;;  %v931_v53 = vld [vmem:[%s1169_s10 + $0x60] ss:$8 sps:$4 sm:$0xff]   ;;  %vm663_vm1 = vcmask 556032  }
  0x31   : > { %v443_v49 = vunpack.c.0.s8 %v442_v45  ;;  %675 = vmatpush1.bf16.msra.mxu0 %v928_v50  ;;  %v397_v54 = vld [vmem:[%s1235_s0] sm:$0x3f]  ;;  %s1244_s13 = smov (!%p391_p8, %s848_s13), 3 }
  0x32   : > { %676 = vmatprep.subr.bf16.mxu0 %v929_v51  ;;  %v932_v55 = vld [vmem:[%s1169_s10 + $0x54] ss:$8 sps:$4 sm:$0xff]   ;;  %v934_v58 = vld [vmem:[%s1169_s10 + $0x50] ss:$8 sps:$4 sm:$0xff]   ;;  %v935_v59 = vld [vmem:[%s1169_s10 + $0x44] ss:$8 sps:$4 sm:$0xff]   ;;  %v440_v17 = vcombine.high %v397_v54, %v397_v54 }
  0x33   : > { %v446_v52 = vsub.s32 %v443_v49, %v445_v46  ;;  %v937_v60 = vld [vmem:[%s1169_s10 + $0x40] ss:$8 sps:$4 sm:$0xff]   ;;  %v938_v61 = vld [vmem:[%s1169_s10 + $0x34] ss:$8 sps:$4 sm:$0xff]   ;;  %v940_v63 = vld [vmem:[%s1169_s10 + $0x30] ss:$8 sps:$4 sm:$0xff]  }
  0x34   : > { %767 = vperm.xlu0 %925, %v764_v47   ;;  %v438_v62 = vld [vmem:[%s1169_s10 + $0x140] sm:$0x33]  ;;  %v961_v2 = vld [vmem:[%s1169_s10 + $0x134] ss:$8 sps:$4 sm:$0xff]   ;;  %v963_v5 = vld [vmem:[%s1169_s10 + $0x130] ss:$8 sps:$4 sm:$0xff]  }
  0x35   : > { %v1179_v56 = vrot.slane %v397_v54, %v446_v52  ;;  %677 = vmatpush1.bf16.msra.mxu0 %v931_v53  ;;  %v891_v0 = vcombine.high %v438_v62, %v438_v62  ;;  %v890_v1 = vcombine.low %v438_v62, %v438_v62  ;;  %v941_v3 = vld [vmem:[%s1169_s10 + $0x24] ss:$8 sps:$4 sm:$0xff]   ;;  %v943_v7 = vld [vmem:[%s1169_s10 + $0x20] ss:$8 sps:$4 sm:$0xff]   ;;  %v944_v8 = vld [vmem:[%s1169_s10 + $0x14] ss:$8 sps:$4 sm:$0xff]   ;;  %v454_v21 = vrot.slane %v440_v17, %v446_v52 }
  0x36   : > { %678 = vmatprep.subr.bf16.mxu0 %v932_v55  ;;  %v967_v6 = vld [vmem:[%s1169_s10 + $0x124] ss:$8 sps:$4 sm:$0xff]   ;;  %v969_v9 = vld [vmem:[%s1169_s10 + $0x120] ss:$8 sps:$4 sm:$0xff]   ;;  %v973_v10 = vld [vmem:[%s1169_s10 + $0x114] ss:$8 sps:$4 sm:$0xff]  }
  0x37   : > { %v455_v57 = vcombine.high %v1179_v56, %v1179_v56  ;;  %892 = vmatprep.subr.msk.bf16.mxu1 %vm667_vm0, %v891_v0  ;;  %v669_v4 = vsel %vm667_vm0, %v890_v1, 0  ;;  %v946_v11 = vld [vmem:[%s1169_s10 + $0x10] ss:$8 sps:$4 sm:$0xff]   ;;  %v947_v12 = vld [vmem:[%s1169_s10 + $0x4] ss:$8 sps:$4 sm:$0xff]   ;;  %s849_s14 = sshll.u32 %s1244_s13, 2 }
  0x38   : > { %722 = vmatpush1.bf16.msra.mxu1 %v669_v4  ;;  %v975_v13 = vld [vmem:[%s1169_s10 + $0x110] ss:$8 sps:$4 sm:$0xff]   ;;  %v979_v14 = vld [vmem:[%s1169_s10 + $0x104] ss:$8 sps:$4 sm:$0xff]   ;;  %v949_v15 = vld [vmem:[%s1169_s10] ss:$8 sps:$4 sm:$0xff]   ;;  %s394_s18 = scalar_lea.vmem %s1239_s4, %s849_s14 }
  0x39   : > { %706 = vmatprep.mubr.bf16.mxu0 %v455_v57  ;;  %679 = vmatpush1.bf16.msra.mxu0 %v934_v58  ;;  %v950_v16 = vld [vmem:[%s1169_s10 + $0xf4] ss:$8 sps:$4 sm:$0xff]   ;;  %v981_v18 = vld [vmem:[%s1169_s10 + $0x100] ss:$8 sps:$4 sm:$0xff]   ;;  %v952_v19 = vld [vmem:[%s1169_s10 + $0xf0] ss:$8 sps:$4 sm:$0xff]  }
  0x3a   : > { %680 = vmatprep.subr.bf16.mxu0 %v935_v59  ;;  %723 = vmatprep.subr.bf16.mxu1 %v961_v2  ;;  %v953_v20 = vld [vmem:[%s1169_s10 + $0xe4] ss:$8 sps:$4 sm:$0xff]   ;;  %v955_v22 = vld [vmem:[%s1169_s10 + $0xe0] ss:$8 sps:$4 sm:$0xff]   ;;  %v958_v23 = vld [vmem:[%s1169_s10 + $0xd4] ss:$8 sps:$4 sm:$0xff]  }
  0x3b   : > { %v960_v24 = vld [vmem:[%s1169_s10 + $0xd0] ss:$8 sps:$4 sm:$0xff]   ;;  %v964_v25 = vld [vmem:[%s1169_s10 + $0xc4] ss:$8 sps:$4 sm:$0xff]   ;;  %v966_v26 = vld [vmem:[%s1169_s10 + $0xc0] ss:$8 sps:$4 sm:$0xff]  }
  0x3c   : > { %724 = vmatpush1.bf16.msra.mxu1 %v963_v5  ;;  %v970_v27 = vld [vmem:[%s1169_s10 + $0xb4] ss:$8 sps:$4 sm:$0xff]   ;;  %v972_v28 = vld [vmem:[%s1169_s10 + $0xb0] ss:$8 sps:$4 sm:$0xff]   ;;  %v976_v29 = vld [vmem:[%s1169_s10 + $0xa4] ss:$8 sps:$4 sm:$0xff]  }
  0x3d   : > { %681 = vmatpush1.bf16.msra.mxu0 %v937_v60  ;;  %725 = vmatprep.subr.bf16.mxu1 %v967_v6  ;;  %v978_v30 = vld [vmem:[%s1169_s10 + $0xa0] ss:$8 sps:$4 sm:$0xff]   ;;  %v982_v31 = vld [vmem:[%s1169_s10 + $0x94] ss:$8 sps:$4 sm:$0xff]   ;;  %v984_v32 = vld [vmem:[%s1169_s10 + $0x90] ss:$8 sps:$4 sm:$0xff]  }
  0x3e   : > { %682 = vmatprep.subr.bf16.mxu0 %v938_v61  ;;  %v986_v33 = vld [vmem:[%s1169_s10 + $0x84] ss:$8 sps:$4 sm:$0xff]   ;;  %v988_v34 = vld [vmem:[%s1169_s10 + $0x80] ss:$8 sps:$4 sm:$0xff]  }
  0x40   : > { %726 = vmatpush1.bf16.msra.mxu1 %v969_v9 }
  0x41   : > { %683 = vmatpush1.bf16.msra.mxu0 %v940_v63  ;;  %727 = vmatprep.subr.bf16.mxu1 %v973_v10 }
  0x42   : > { %684 = vmatprep.subr.bf16.mxu0 %v941_v3 }
  0x44   : > { %728 = vmatpush1.bf16.msra.mxu1 %v975_v13 }
  0x45   : > { %685 = vmatpush1.bf16.msra.mxu0 %v943_v7  ;;  %729 = vmatprep.subr.bf16.mxu1 %v979_v14 }
  0x46   : > { %686 = vmatprep.subr.bf16.mxu0 %v944_v8 }
  0x48   : > { %730 = vmatpush1.bf16.msra.mxu1 %v981_v18 }
  0x49   : > { %687 = vmatpush1.bf16.msra.mxu0 %v946_v11 }
  0x4a   : > { %688 = vmatprep.subr.bf16.mxu0 %v947_v12 }
  0x4b   : > { %893 = vmatmul.mubr.msk.bf16.vlgmr.msra.gmra.mxu1 %vm663_vm1, %v454_v21 }
  0x4d   : > { %689 = vmatpush1.bf16.msra.mxu0 %v949_v15 }
  0x4e   : > { %690 = vmatprep.subr.bf16.mxu0 %v950_v16 }
  0x51   : > { %691 = vmatpush2.bf16.msra.mxu0 %v952_v19 }
  0x52   : > { %692 = vmatprep.subr.bf16.mxu0 %v953_v20 }
  0x55   : > { %693 = vmatpush2.bf16.msra.mxu0 %v955_v22 }
  0x56   : > { %694 = vmatprep.subr.bf16.mxu0 %v958_v23 }
  0x59   : > { %695 = vmatpush2.bf16.msra.mxu0 %v960_v24 }
  0x5a   : > { %696 = vmatprep.subr.bf16.mxu0 %v964_v25 }
  0x5d   : > { %697 = vmatpush2.bf16.msra.mxu0 %v966_v26 }
  0x5e   : > { %698 = vmatprep.subr.bf16.mxu0 %v970_v27 }
  0x61   : > { %699 = vmatpush2.bf16.msra.mxu0 %v972_v28 }
  0x62   : > { %700 = vmatprep.subr.bf16.mxu0 %v976_v29 }
  0x65   : > { %701 = vmatpush2.bf16.msra.mxu0 %v978_v30 }
  0x66   : > { %702 = vmatprep.subr.bf16.mxu0 %v982_v31 }
  0x69   : > { %703 = vmatpush2.bf16.msra.mxu0 %v984_v32 }
  0x6a   : > { %704 = vmatprep.subr.bf16.mxu0 %v986_v33 }
  0x6d   : > { %705 = vmatpush2.bf16.msra.mxu0 %v988_v34 }
  0x70   : > { %707 = vmatmul.mubr.bf16.vlgmr.msra.gmra.mxu0 %v1179_v56 }
  0xab   : > { %v760_v39 = vpop.permute.xlu0 %759 }
  0xaf   : > { %v768_v45 = vpop.permute.xlu0 %767 }
 0x10b   : > { %v749_v35 = vpop.f32.mrf.mxu1 }
 0x10d   : > { %v751_v36 = vpop.f32.mrf.mxu1 }
 0x10f   : > { %v753_v37 = vpop.f32.mrf.mxu1 }
 0x111   : > { %v754_v38 = vpop.f32.mrf.mxu1 }
 0x130   : > { %v708_v40 = vpop.f32.mrf.mxu0 }
 0x131   : > { %v750_v41 = vadd.f32 %v749_v35, %v708_v40 }
 0x132   : > { %v710_v42 = vpop.f32.mrf.mxu0 }
 0x133   : > { %v762_v43 = vmul.f32 %v760_v39, %v750_v41  ;;  %v752_v44 = vadd.f32 %v751_v36, %v710_v42 }
 0x134   : > { %v712_v46 = vpop.f32.mrf.mxu0 }
 0x135   : > { %v770_v47 = vadd.f32 %v768_v45, %v762_v43  ;;  %v763_v48 = vmul.f32 %v760_v39, %v752_v44 }
 0x136   : > { %v713_v49 = vpop.f32.mrf.mxu0 }
 0x137   : > { %v771_v50 = vadd.f32 %v768_v45, %v763_v48  ;;  %v772_v51 = vmax.f32 %v770_v47, 0.0 }
 0x139   : > { %v773_v52 = vmax.f32 %v771_v50, 0.0 }
 0x13b   : > { %v776_v53 = vcombine.low %v772_v51, %v773_v52 }
 0x13d   : > { %778 = vst [vmem:[%s394_s18] sm:$0xff] %v776_v53 }
 0x13e PF: > { %p11_p9 = scmp.ge.s32.totalorder %s1057_s19, 4   ;;  %s1240_s15 = smov %s1007_s16 }
 0x13f   : > { %s1241_s16 = smov %s1066_s22  ;;  %s1242_s17 = smov %s1057_s19 }
 0x140   :  { %13 = sbr.rel (!%p11_p9) target bundleno = 2 (0x2), region = 109 }

// kernel: unet_forward.31
= control target key start
LH: loop header
LB: loop body
LE: loop exit
PB: predicated region body
PF: predicated region fallthrough
CT: control target
= control target key end

     0   :  { %s1115_s18 = smov 0   ;;  %s1117_s19 = smov 0   ;;  %s1313_s0 = inlined_call_operand.vmem [shape: bf16[4,324], index: 0, kind: input, shape index: {}]   ;;  %s1314_s1 = inlined_call_operand.vmem [shape: bf16[324,512], index: 1, kind: input, shape index: {}]   ;;  %s1315_s2 = inlined_call_operand.vmem [shape: f32[4,1], index: 2, kind: input, shape index: {}]   ;;  %s1316_s3 = inlined_call_operand.vmem [shape: f32[4,1], index: 3, kind: input, shape index: {}]   ;;  %s1317_s4 = inlined_call_operand.vmem [shape: f32[4,512], index: 4, kind: input, shape index: {}]   ;;  %s1318_s5 = inlined_call_operand.vmem [shape: f32[4,512], index: 5, kind: output, shape index: {}]  }
   0x1   :  { %s1119_s20 = smov 0  }
   0x2 LB: > { %s908_s21 = sadd.s32 4294967295, %s1081_s20   ;;  %s1132_s22 = sadd.s32 1, %s1081_s20   ;;  %s1081_s20 = sphi %s1119_s20, %s1321_s20   ;;  %s1077_s19 = sphi %s1117_s19, %s1320_s19   ;;  %s1073_s18 = sphi %s1115_s18, %s1319_s18  }
   0x3   : > { %s40_s23 = ssub.s32 %s1081_s20, %s1132_s22  ;;  %s43_s24 = sadd.s32 1, %s1077_s19 }
   0x4   : > { %p41_p0 = scmp.eq.s32.totalorder %s40_s23, 0  ;;  %p50_p1 = scmp.ne.s32.totalorder %s1077_s19, %s1073_s18 }
   0x5   : > { %p51_p2 = scmp.eq.s32.totalorder %s1081_s20, 0  ;;  %p911_p4 = scmp.ge.s32.totalorder %s1081_s20, 2 }
   0x6   : > { %s1141_s25 = scalar_select %p41_p0, %s1077_s19, %s43_s24  }
   0x7   : > { %p52_p3 = por %p51_p2, %p50_p1  ;;  %179 = sbr.rel (%p911_p4) target bundleno = 37 (0x25), region = 28 }
   0xc   : > { %182 = sbr.rel (!%p52_p3) target bundleno = 37 (0x25), region = 32  ;;  %s184_s26 = sand.u32 (%p52_p3), 1, %s1077_s19  }
   0xd   : > { %s965_s27 = sshll.u32 (%p52_p3), %s1081_s20, 3  ;;  %s966_s28 = smul.u32 (%p52_p3), 328, %s184_s26 }
   0xe   : > { %s1149_s6 = scalar_lea.vmem (%p52_p3), %s1314_s1, %s965_s27 }
   0xf   : > { %v298_v0 = vld [vmem:[%s1149_s6] sm:$0xff] (%p52_p3)  ;;  %v300_v1 = vld [vmem:[%s1149_s6 + $0x10] sm:$0xff] (%p52_p3)  ;;  %s1157_s7 = scalar_lea.vmem (%p52_p3), [#allocation2], %s966_s28 }
  0x10   : > { %v302_v2 = vld [vmem:[%s1149_s6 + $0x20] sm:$0xff] (%p52_p3)  ;;  %v304_v3 = vld [vmem:[%s1149_s6 + $0x30] sm:$0xff] (%p52_p3)  ;;  %299 = vst [vmem:[%s1157_s7] sm:$0xff] (%p52_p3), %v298_v0  ;;  %301 = vst [vmem:[%s1157_s7 + $0x8] sm:$0xff] (%p52_p3), %v300_v1 }
  0x11   : > { %v306_v4 = vld [vmem:[%s1149_s6 + $0x40] sm:$0xff]  ;;  %v308_v5 = vld [vmem:[%s1149_s6 + $0x50] sm:$0xff]  ;;  %303 = vst [vmem:[%s1157_s7 + $0x10] sm:$0xff] %v302_v2  ;;  %305 = vst [vmem:[%s1157_s7 + $0x18] sm:$0xff] %v304_v3 }
  0x12   : > { %307 = vst [vmem:[%s1157_s7 + $0x20] sm:$0xff] %v306_v4  ;;  %309 = vst [vmem:[%s1157_s7 + $0x28] sm:$0xff] %v308_v5  ;;  %v310_v6 = vld [vmem:[%s1149_s6 + $0x60] sm:$0xff]  ;;  %v312_v7 = vld [vmem:[%s1149_s6 + $0x70] sm:$0xff] }
  0x13   : > { %v314_v8 = vld [vmem:[%s1149_s6 + $0x80] sm:$0xff]  ;;  %311 = vst [vmem:[%s1157_s7 + $0x30] sm:$0xff] %v310_v6  ;;  %313 = vst [vmem:[%s1157_s7 + $0x38] sm:$0xff] %v312_v7  ;;  %v316_v9 = vld [vmem:[%s1149_s6 + $0x90] sm:$0xff] }
  0x14   : > { %315 = vst [vmem:[%s1157_s7 + $0x40] sm:$0xff] %v314_v8  ;;  %v318_v10 = vld [vmem:[%s1149_s6 + $0xa0] sm:$0xff]  ;;  %v320_v11 = vld [vmem:[%s1149_s6 + $0xb0] sm:$0xff]  ;;  %317 = vst [vmem:[%s1157_s7 + $0x48] sm:$0xff] %v316_v9 }
  0x15   : > { %319 = vst [vmem:[%s1157_s7 + $0x50] sm:$0xff] %v318_v10  ;;  %321 = vst [vmem:[%s1157_s7 + $0x58] sm:$0xff] %v320_v11  ;;  %v322_v12 = vld [vmem:[%s1149_s6 + $0xc0] sm:$0xff]  ;;  %v324_v13 = vld [vmem:[%s1149_s6 + $0xd0] sm:$0xff] }
  0x16   : > { %v326_v14 = vld [vmem:[%s1149_s6 + $0xe0] sm:$0xff]  ;;  %323 = vst [vmem:[%s1157_s7 + $0x60] sm:$0xff] %v322_v12  ;;  %325 = vst [vmem:[%s1157_s7 + $0x68] sm:$0xff] %v324_v13  ;;  %v328_v15 = vld [vmem:[%s1149_s6 + $0xf0] sm:$0xff] }
  0x17   : > { %327 = vst [vmem:[%s1157_s7 + $0x70] sm:$0xff] %v326_v14  ;;  %v330_v16 = vld [vmem:[%s1149_s6 + $0x100] sm:$0xff]  ;;  %v332_v17 = vld [vmem:[%s1149_s6 + $0x110] sm:$0xff]  ;;  %329 = vst [vmem:[%s1157_s7 + $0x78] sm:$0xff] %v328_v15 }
  0x18   : > { %331 = vst [vmem:[%s1157_s7 + $0x80] sm:$0xff] %v330_v16  ;;  %333 = vst [vmem:[%s1157_s7 + $0x88] sm:$0xff] %v332_v17  ;;  %v334_v18 = vld [vmem:[%s1149_s6 + $0x120] sm:$0xff]  ;;  %v336_v19 = vld [vmem:[%s1149_s6 + $0x130] sm:$0xff] }
  0x19   : > { %v338_v20 = vld [vmem:[%s1149_s6 + $0x140] sm:$0xff]  ;;  %335 = vst [vmem:[%s1157_s7 + $0x90] sm:$0xff] %v334_v18  ;;  %337 = vst [vmem:[%s1157_s7 + $0x98] sm:$0xff] %v336_v19  ;;  %v340_v21 = vld [vmem:[%s1149_s6 + $0x150] sm:$0xff] }
  0x1a   : > { %339 = vst [vmem:[%s1157_s7 + $0xa0] sm:$0xff] %v338_v20  ;;  %v342_v22 = vld [vmem:[%s1149_s6 + $0x160] sm:$0xff]  ;;  %v344_v23 = vld [vmem:[%s1149_s6 + $0x170] sm:$0xff]  ;;  %341 = vst [vmem:[%s1157_s7 + $0xa8] sm:$0xff] %v340_v21 }
  0x1b   : > { %343 = vst [vmem:[%s1157_s7 + $0xb0] sm:$0xff] %v342_v22  ;;  %345 = vst [vmem:[%s1157_s7 + $0xb8] sm:$0xff] %v344_v23  ;;  %v346_v24 = vld [vmem:[%s1149_s6 + $0x180] sm:$0xff]  ;;  %v348_v25 = vld [vmem:[%s1149_s6 + $0x190] sm:$0xff] }
  0x1c   : > { %v350_v26 = vld [vmem:[%s1149_s6 + $0x1a0] sm:$0xff]  ;;  %347 = vst [vmem:[%s1157_s7 + $0xc0] sm:$0xff] %v346_v24  ;;  %349 = vst [vmem:[%s1157_s7 + $0xc8] sm:$0xff] %v348_v25  ;;  %v352_v27 = vld [vmem:[%s1149_s6 + $0x1b0] sm:$0xff] }
  0x1d   : > { %351 = vst [vmem:[%s1157_s7 + $0xd0] sm:$0xff] %v350_v26  ;;  %v354_v28 = vld [vmem:[%s1149_s6 + $0x1c0] sm:$0xff]  ;;  %v356_v29 = vld [vmem:[%s1149_s6 + $0x1d0] sm:$0xff]  ;;  %353 = vst [vmem:[%s1157_s7 + $0xd8] sm:$0xff] %v352_v27 }
  0x1e   : > { %355 = vst [vmem:[%s1157_s7 + $0xe0] sm:$0xff] %v354_v28  ;;  %357 = vst [vmem:[%s1157_s7 + $0xe8] sm:$0xff] %v356_v29  ;;  %v358_v30 = vld [vmem:[%s1149_s6 + $0x1e0] sm:$0xff]  ;;  %v360_v31 = vld [vmem:[%s1149_s6 + $0x1f0] sm:$0xff] }
  0x1f   : > { %v362_v32 = vld [vmem:[%s1149_s6 + $0x200] sm:$0xff]  ;;  %359 = vst [vmem:[%s1157_s7 + $0xf0] sm:$0xff] %v358_v30  ;;  %361 = vst [vmem:[%s1157_s7 + $0xf8] sm:$0xff] %v360_v31  ;;  %v364_v33 = vld [vmem:[%s1149_s6 + $0x210] sm:$0xff] }
  0x20   : > { %363 = vst [vmem:[%s1157_s7 + $0x100] sm:$0xff] %v362_v32  ;;  %v366_v34 = vld [vmem:[%s1149_s6 + $0x220] sm:$0xff]  ;;  %v368_v35 = vld [vmem:[%s1149_s6 + $0x230] sm:$0xff]  ;;  %365 = vst [vmem:[%s1157_s7 + $0x108] sm:$0xff] %v364_v33 }
  0x21   : > { %367 = vst [vmem:[%s1157_s7 + $0x110] sm:$0xff] %v366_v34  ;;  %369 = vst [vmem:[%s1157_s7 + $0x118] sm:$0xff] %v368_v35  ;;  %v370_v36 = vld [vmem:[%s1149_s6 + $0x240] sm:$0xff]  ;;  %v372_v37 = vld [vmem:[%s1149_s6 + $0x250] sm:$0xff] }
  0x22   : > { %v374_v38 = vld [vmem:[%s1149_s6 + $0x260] sm:$0xff]  ;;  %371 = vst [vmem:[%s1157_s7 + $0x120] sm:$0xff] %v370_v36  ;;  %373 = vst [vmem:[%s1157_s7 + $0x128] sm:$0xff] %v372_v37  ;;  %v376_v39 = vld [vmem:[%s1149_s6 + $0x270] sm:$0xff] }
  0x23   : > { %375 = vst [vmem:[%s1157_s7 + $0x130] sm:$0xff] %v374_v38  ;;  %v378_v40 = vld [vmem:[%s1149_s6 + $0x280] sm:$0xff]  ;;  %377 = vst [vmem:[%s1157_s7 + $0x138] sm:$0xff] %v376_v39 }
  0x24   : > { %379 = vst [vmem:[%s1157_s7 + $0x140] sm:$0xff] %v378_v40 }
  0x25 PF: > { %p914_p5 = scmp.ge.s32.totalorder %s1081_s20, 1  ;;  %p393_p6 = scmp.lt.s32.totalorder %s1081_s20, 3 }
  0x27   : > { %p394_p7 = pnand %p914_p5, %p393_p6 }
  0x28   : > { %s400_s8 = sand.u32 (!%p394_p7), 1, %s1073_s18   ;;  %s915_s17 = sshll.u32 (!%p394_p7), %s908_s21, 1 }
  0x29   : > { %397 = sbr.rel (%p394_p7) target bundleno = 320 (0x140), region = 74  ;;  %p434_p8 = scmp.lt.s32.totalorder (!%p394_p7), %s915_s17, 3 }
  0x2a   : > { %s967_s9 = smul.u32 (!%p394_p7), 328, %s400_s8 }
  0x2c   : > { %s1244_s14 = scalar_lea.vmem (!%p394_p7), [#allocation2], %s967_s9 }
  0x2e   : > { %v493_v41 = vlaneseq  ;;  %v1083_v42 = vmov 0   ;;  %v805_v43 = vld [vmem:[%s1315_s2] sm:$0xf]  ;;  %v1084_v44 = vmov 1983009808   ;;  %vm716_vm0 = vcmask 1041408  }
  0x2f   : > { %796 = vmatprep.mubr.bf16.mxu1 %v1083_v42  ;;  %994 = vset.pattern.permute.xlu0 %v1083_v42  ;;  %v491_v45 = vunpack.c.l.s4 %v1084_v44  ;;  %v813_v47 = vld [vmem:[%s1316_s3] sm:$0xf]  ;;  %v995_v48 = vld [vmem:[%s1244_s14 + $0x74] ss:$8 sps:$4 sm:$0xff]   ;;  %v998_v51 = vld [vmem:[%s1244_s14 + $0x64] ss:$8 sps:$4 sm:$0xff]  }
  0x30   : > { %v494_v46 = vshrl.u32 %v493_v41, 7  ;;  %808 = vperm.xlu0 %994, %v805_v43   ;;  %v997_v50 = vld [vmem:[%s1244_s14 + $0x70] ss:$8 sps:$4 sm:$0xff]   ;;  %723 = vmatprep.subr.bf16.mxu0 %v995_v48  ;;  %v1000_v53 = vld [vmem:[%s1244_s14 + $0x60] ss:$8 sps:$4 sm:$0xff]   ;;  %vm712_vm1 = vcmask 556032  }
  0x31   : > { %v492_v49 = vunpack.c.0.s8 %v491_v45  ;;  %724 = vmatpush1.bf16.msra.mxu0 %v997_v50  ;;  %v446_v54 = vld [vmem:[%s1313_s0] sm:$0x3f]  ;;  %s1323_s17 = smov (!%p434_p8, %s915_s17), 3 }
  0x32   : > { %725 = vmatprep.subr.bf16.mxu0 %v998_v51  ;;  %v1001_v55 = vld [vmem:[%s1244_s14 + $0x54] ss:$8 sps:$4 sm:$0xff]   ;;  %v1003_v58 = vld [vmem:[%s1244_s14 + $0x50] ss:$8 sps:$4 sm:$0xff]   ;;  %v1004_v59 = vld [vmem:[%s1244_s14 + $0x44] ss:$8 sps:$4 sm:$0xff]   ;;  %v489_v17 = vcombine.high %v446_v54, %v446_v54 }
  0x33   : > { %v495_v52 = vsub.s32 %v492_v49, %v494_v46  ;;  %v1006_v60 = vld [vmem:[%s1244_s14 + $0x40] ss:$8 sps:$4 sm:$0xff]   ;;  %v1007_v61 = vld [vmem:[%s1244_s14 + $0x34] ss:$8 sps:$4 sm:$0xff]   ;;  %v1009_v63 = vld [vmem:[%s1244_s14 + $0x30] ss:$8 sps:$4 sm:$0xff]  }
  0x34   : > { %816 = vperm.xlu0 %994, %v813_v47   ;;  %v487_v62 = vld [vmem:[%s1244_s14 + $0x140] sm:$0x33]  ;;  %v1030_v2 = vld [vmem:[%s1244_s14 + $0x134] ss:$8 sps:$4 sm:$0xff]   ;;  %v1032_v5 = vld [vmem:[%s1244_s14 + $0x130] ss:$8 sps:$4 sm:$0xff]  }
  0x35   : > { %v1254_v56 = vrot.slane %v446_v54, %v495_v52  ;;  %726 = vmatpush1.bf16.msra.mxu0 %v1000_v53  ;;  %v960_v0 = vcombine.high %v487_v62, %v487_v62  ;;  %v959_v1 = vcombine.low %v487_v62, %v487_v62  ;;  %v1010_v3 = vld [vmem:[%s1244_s14 + $0x24] ss:$8 sps:$4 sm:$0xff]   ;;  %v1012_v7 = vld [vmem:[%s1244_s14 + $0x20] ss:$8 sps:$4 sm:$0xff]   ;;  %v1013_v8 = vld [vmem:[%s1244_s14 + $0x14] ss:$8 sps:$4 sm:$0xff]   ;;  %v503_v21 = vrot.slane %v489_v17, %v495_v52 }
  0x36   : > { %727 = vmatprep.subr.bf16.mxu0 %v1001_v55  ;;  %v1036_v6 = vld [vmem:[%s1244_s14 + $0x124] ss:$8 sps:$4 sm:$0xff]   ;;  %v1038_v9 = vld [vmem:[%s1244_s14 + $0x120] ss:$8 sps:$4 sm:$0xff]   ;;  %v1042_v10 = vld [vmem:[%s1244_s14 + $0x114] ss:$8 sps:$4 sm:$0xff]  }
  0x37   : > { %v504_v57 = vcombine.high %v1254_v56, %v1254_v56  ;;  %961 = vmatprep.subr.msk.bf16.mxu1 %vm716_vm0, %v960_v0  ;;  %v718_v4 = vsel %vm716_vm0, %v959_v1, 0  ;;  %v1015_v11 = vld [vmem:[%s1244_s14 + $0x10] ss:$8 sps:$4 sm:$0xff]   ;;  %v1016_v12 = vld [vmem:[%s1244_s14 + $0x4] ss:$8 sps:$4 sm:$0xff]   ;;  %s916_s18 = sshll.u32 %s1323_s17, 2 }
  0x38   : > { %771 = vmatpush1.bf16.msra.mxu1 %v718_v4  ;;  %v1044_v13 = vld [vmem:[%s1244_s14 + $0x110] ss:$8 sps:$4 sm:$0xff]   ;;  %v1048_v14 = vld [vmem:[%s1244_s14 + $0x104] ss:$8 sps:$4 sm:$0xff]   ;;  %v1018_v15 = vld [vmem:[%s1244_s14] ss:$8 sps:$4 sm:$0xff]   ;;  %s437_s26 = scalar_lea.vmem %s1317_s4, %s916_s18  ;;  %s443_s27 = scalar_lea.vmem %s1318_s5, %s916_s18 }
  0x39   : > { %755 = vmatprep.mubr.bf16.mxu0 %v504_v57  ;;  %728 = vmatpush1.bf16.msra.mxu0 %v1003_v58  ;;  %v1019_v16 = vld [vmem:[%s1244_s14 + $0xf4] ss:$8 sps:$4 sm:$0xff]   ;;  %v1050_v18 = vld [vmem:[%s1244_s14 + $0x100] ss:$8 sps:$4 sm:$0xff]   ;;  %v1021_v19 = vld [vmem:[%s1244_s14 + $0xf0] ss:$8 sps:$4 sm:$0xff]  }
  0x3a   : > { %729 = vmatprep.subr.bf16.mxu0 %v1004_v59  ;;  %772 = vmatprep.subr.bf16.mxu1 %v1030_v2  ;;  %v1022_v20 = vld [vmem:[%s1244_s14 + $0xe4] ss:$8 sps:$4 sm:$0xff]   ;;  %v1024_v22 = vld [vmem:[%s1244_s14 + $0xe0] ss:$8 sps:$4 sm:$0xff]   ;;  %v1027_v23 = vld [vmem:[%s1244_s14 + $0xd4] ss:$8 sps:$4 sm:$0xff]  }
  0x3b   : > { %v1029_v24 = vld [vmem:[%s1244_s14 + $0xd0] ss:$8 sps:$4 sm:$0xff]   ;;  %v1033_v25 = vld [vmem:[%s1244_s14 + $0xc4] ss:$8 sps:$4 sm:$0xff]   ;;  %v1035_v26 = vld [vmem:[%s1244_s14 + $0xc0] ss:$8 sps:$4 sm:$0xff]  }
  0x3c   : > { %773 = vmatpush1.bf16.msra.mxu1 %v1032_v5  ;;  %v1039_v27 = vld [vmem:[%s1244_s14 + $0xb4] ss:$8 sps:$4 sm:$0xff]   ;;  %v1041_v28 = vld [vmem:[%s1244_s14 + $0xb0] ss:$8 sps:$4 sm:$0xff]   ;;  %v1045_v29 = vld [vmem:[%s1244_s14 + $0xa4] ss:$8 sps:$4 sm:$0xff]  }
  0x3d   : > { %730 = vmatpush1.bf16.msra.mxu0 %v1006_v60  ;;  %774 = vmatprep.subr.bf16.mxu1 %v1036_v6  ;;  %v1047_v30 = vld [vmem:[%s1244_s14 + $0xa0] ss:$8 sps:$4 sm:$0xff]   ;;  %v1051_v31 = vld [vmem:[%s1244_s14 + $0x94] ss:$8 sps:$4 sm:$0xff]   ;;  %v1053_v32 = vld [vmem:[%s1244_s14 + $0x90] ss:$8 sps:$4 sm:$0xff]  }
  0x3e   : > { %731 = vmatprep.subr.bf16.mxu0 %v1007_v61  ;;  %v1055_v33 = vld [vmem:[%s1244_s14 + $0x84] ss:$8 sps:$4 sm:$0xff]   ;;  %v1057_v34 = vld [vmem:[%s1244_s14 + $0x80] ss:$8 sps:$4 sm:$0xff]  }
  0x3f   : > { %v823_v46 = vld [vmem:[%s437_s26] sm:$0xff] }
  0x40   : > { %775 = vmatpush1.bf16.msra.mxu1 %v1038_v9  ;;  %v825_v52 = vcombine.high %v823_v46, %v823_v46 }
  0x41   : > { %732 = vmatpush1.bf16.msra.mxu0 %v1009_v63  ;;  %776 = vmatprep.subr.bf16.mxu1 %v1042_v10 }
  0x42   : > { %733 = vmatprep.subr.bf16.mxu0 %v1010_v3 }
  0x44   : > { %777 = vmatpush1.bf16.msra.mxu1 %v1044_v13 }
  0x45   : > { %734 = vmatpush1.bf16.msra.mxu0 %v1012_v7  ;;  %778 = vmatprep.subr.bf16.mxu1 %v1048_v14 }
  0x46   : > { %735 = vmatprep.subr.bf16.mxu0 %v1013_v8 }
  0x48   : > { %779 = vmatpush1.bf16.msra.mxu1 %v1050_v18 }
  0x49   : > { %736 = vmatpush1.bf16.msra.mxu0 %v1015_v11 }
  0x4a   : > { %737 = vmatprep.subr.bf16.mxu0 %v1016_v12 }
  0x4b   : > { %962 = vmatmul.mubr.msk.bf16.vlgmr.msra.gmra.mxu1 %vm712_vm1, %v503_v21 }
  0x4d   : > { %738 = vmatpush1.bf16.msra.mxu0 %v1018_v15 }
  0x4e   : > { %739 = vmatprep.subr.bf16.mxu0 %v1019_v16 }
  0x51   : > { %740 = vmatpush2.bf16.msra.mxu0 %v1021_v19 }
  0x52   : > { %741 = vmatprep.subr.bf16.mxu0 %v1022_v20 }
  0x55   : > { %742 = vmatpush2.bf16.msra.mxu0 %v1024_v22 }
  0x56   : > { %743 = vmatprep.subr.bf16.mxu0 %v1027_v23 }
  0x59   : > { %744 = vmatpush2.bf16.msra.mxu0 %v1029_v24 }
  0x5a   : > { %745 = vmatprep.subr.bf16.mxu0 %v1033_v25 }
  0x5d   : > { %746 = vmatpush2.bf16.msra.mxu0 %v1035_v26 }
  0x5e   : > { %747 = vmatprep.subr.bf16.mxu0 %v1039_v27 }
  0x61   : > { %748 = vmatpush2.bf16.msra.mxu0 %v1041_v28 }
  0x62   : > { %749 = vmatprep.subr.bf16.mxu0 %v1045_v29 }
  0x65   : > { %750 = vmatpush2.bf16.msra.mxu0 %v1047_v30 }
  0x66   : > { %751 = vmatprep.subr.bf16.mxu0 %v1051_v31 }
  0x69   : > { %752 = vmatpush2.bf16.msra.mxu0 %v1053_v32 }
  0x6a   : > { %753 = vmatprep.subr.bf16.mxu0 %v1055_v33 }
  0x6d   : > { %754 = vmatpush2.bf16.msra.mxu0 %v1057_v34 }
  0x70   : > { %756 = vmatmul.mubr.bf16.vlgmr.msra.gmra.mxu0 %v1254_v56 }
  0xab   : > { %v809_v39 = vpop.permute.xlu0 %808 }
  0xaf   : > { %v817_v45 = vpop.permute.xlu0 %816 }
 0x10b   : > { %v798_v35 = vpop.f32.mrf.mxu1 }
 0x10d   : > { %v800_v36 = vpop.f32.mrf.mxu1 }
 0x10f   : > { %v802_v37 = vpop.f32.mrf.mxu1 }
 0x111   : > { %v803_v38 = vpop.f32.mrf.mxu1 }
 0x130   : > { %v757_v40 = vpop.f32.mrf.mxu0 }
 0x131   : > { %v799_v41 = vadd.f32 %v798_v35, %v757_v40 }
 0x132   : > { %v759_v42 = vpop.f32.mrf.mxu0 }
 0x133   : > { %v811_v43 = vmul.f32 %v809_v39, %v799_v41  ;;  %v801_v44 = vadd.f32 %v800_v36, %v759_v42 }
 0x134   : > { %v761_v47 = vpop.f32.mrf.mxu0 }
 0x135   : > { %v819_v48 = vadd.f32 %v817_v45, %v811_v43  ;;  %v812_v49 = vmul.f32 %v809_v39, %v801_v44 }
 0x136   : > { %v762_v50 = vpop.f32.mrf.mxu0 }
 0x137   : > { %v821_v51 = vmax.f32 %v819_v48, 0.0  ;;  %v820_v53 = vadd.f32 %v817_v45, %v812_v49 }
 0x139   : > { %v822_v54 = vmax.f32 %v820_v53, 0.0  ;;  %v827_v55 = vadd.f32 %v823_v46, %v821_v51 }
 0x13b   : > { %v828_v56 = vadd.f32 %v825_v52, %v822_v54 }
 0x13d   : > { %v831_v57 = vcombine.low %v827_v55, %v828_v56 }
 0x13f   : > { %833 = vst [vmem:[%s443_s27] sm:$0xff] %v831_v57 }
 0x140 PF: > { %p12_p9 = scmp.ge.s32.totalorder %s1132_s22, 4   ;;  %s1319_s18 = smov %s1077_s19 }
 0x141   : > { %s1320_s19 = smov %s1141_s25  ;;  %s1321_s20 = smov %s1132_s22 }
 0x142   :  { %14 = sbr.rel (!%p12_p9) target bundleno = 2 (0x2), region = 116 }

// kernel: unet_forward.32
= control target key start
LH: loop header
LB: loop body
LE: loop exit
PB: predicated region body
PF: predicated region fallthrough
CT: control target
= control target key end

     0   :  { %v226_v0 = vmov 0   ;;  %vm125_vm0 = vcmask 556032   ;;  %vm129_vm1 = vcmask 1041408   ;;  %s303_s1 = inlined_call_operand.vmem [shape: bf16[196,128], index: 1, kind: input, shape index: {}]   ;;  %s304_s0 = inlined_call_operand.vmem [shape: bf16[8,196], index: 0, kind: input, shape index: {}]   ;;  %s305_s2 = inlined_call_operand.vmem [shape: f32[8,1], index: 2, kind: input, shape index: {}]   ;;  %s306_s3 = inlined_call_operand.vmem [shape: f32[8,1], index: 3, kind: input, shape index: {}]   ;;  %s307_s4 = inlined_call_operand.vmem [shape: f32[8,128], index: 4, kind: output, shape index: {}]  }
   0x1   :  { %133 = vmatprep.subr.bf16.mxu0 %v226_v0  ;;  %v211_v1 = vld [vmem:[%s303_s1 + $0x38] sm:$0xff]   ;;  %210 = vset.pattern.permute.xlu0 %v226_v0  ;;  %v212_v2 = vld [vmem:[%s303_s1 + $0x30] sm:$0xff]   ;;  %v213_v3 = vld [vmem:[%s303_s1 + $0x28] sm:$0xff]  }
   0x2   :  { %134 = vmatpush1.bf16.msra.mxu0 %v211_v1  ;;  %v214_v4 = vld [vmem:[%s303_s1 + $0x20] sm:$0xff]   ;;  %v215_v8 = vld [vmem:[%s303_s1 + $0x18] sm:$0xff]   ;;  %v216_v10 = vld [vmem:[%s303_s1 + $0x10] sm:$0xff]  }
   0x3   :  { %135 = vmatprep.subr.bf16.mxu0 %v226_v0  ;;  %v18_v5 = vld [vmem:[%s304_s0] sm:$0xff]  ;;  %v217_v11 = vld [vmem:[%s303_s1 + $0x8] sm:$0xff]   ;;  %v220_v15 = vld [vmem:[%s303_s1 + $0x58] sm:$0xff]  }
   0x4   :  { %v194_v6 = vcombine.high %v18_v5, %v18_v5  ;;  %v173_v7 = vld [vmem:[%s305_s2] sm:$0xff]  ;;  %v221_v16 = vld [vmem:[%s303_s1 + $0x50] sm:$0xff]   ;;  %v222_v17 = vld [vmem:[%s303_s1 + $0x48] sm:$0xff]   ;;  %v193_v19 = vcombine.low %v18_v5, %v18_v5 }
   0x5   :  { %176 = vperm.xlu0 %210, %v173_v7   ;;  %v180_v9 = vld [vmem:[%s306_s3] sm:$0xff] }
   0x6   :  { %136 = vmatpush1.bf16.msra.mxu0 %v212_v2  ;;  %208 = vmatprep.mubr.msk.bf16.mxu0 %vm125_vm0, %v194_v6  ;;  %v218_v12 = vld [vmem:[%s303_s1] sm:$0xff]  }
   0x7   :  { %137 = vmatprep.subr.bf16.mxu0 %v226_v0  ;;  %v219_v13 = vld [vmem:[%s303_s1 + $0x60] ss:$0 sps:$4 sm:$0x33]  }
   0x8   :  { %v131_v14 = vsel %vm129_vm1, %v219_v13, 0  ;;  %v223_v18 = vld [vmem:[%s303_s1 + $0x40] sm:$0xff]  }
   0x9   :  { %183 = vperm.xlu0 %210, %v180_v9  }
   0xa   :  { %138 = vmatpush1.bf16.msra.mxu0 %v213_v3 }
   0xb   :  { %139 = vmatprep.subr.bf16.mxu0 %v226_v0 }
   0xe   :  { %140 = vmatpush1.bf16.msra.mxu0 %v214_v4 }
   0xf   :  { %141 = vmatprep.subr.bf16.mxu0 %v226_v0 }
  0x12   :  { %142 = vmatpush1.bf16.msra.mxu0 %v215_v8 }
  0x13   :  { %143 = vmatprep.subr.bf16.mxu0 %v226_v0 }
  0x16   :  { %144 = vmatpush1.bf16.msra.mxu0 %v216_v10 }
  0x17   :  { %145 = vmatprep.subr.bf16.mxu0 %v226_v0 }
  0x1a   :  { %146 = vmatpush1.bf16.msra.mxu0 %v217_v11 }
  0x1b   :  { %147 = vmatprep.subr.bf16.mxu0 %v226_v0 }
  0x1e   :  { %148 = vmatpush1.bf16.msra.mxu0 %v218_v12 }
  0x1f   :  { %155 = vmatprep.subr.bf16.mxu0 %v226_v0 }
  0x22   :  { %156 = vmatpush2.bf16.msra.mxu0 %v131_v14 }
  0x23   :  { %157 = vmatprep.subr.bf16.mxu0 %v226_v0 }
  0x26   :  { %158 = vmatpush2.bf16.msra.mxu0 %v220_v15 }
  0x27   :  { %159 = vmatprep.subr.bf16.mxu0 %v226_v0 }
  0x2a   :  { %160 = vmatpush2.bf16.msra.mxu0 %v221_v16 }
  0x2b   :  { %161 = vmatprep.subr.bf16.mxu0 %v226_v0 }
  0x2e   :  { %162 = vmatpush2.bf16.msra.mxu0 %v222_v17 }
  0x2f   :  { %163 = vmatprep.subr.bf16.mxu0 %v226_v0 }
  0x32   :  { %164 = vmatpush2.bf16.msra.mxu0 %v223_v18 }
  0x35   :  { %166 = vmatmul.mubr.bf16.vlgmr.msra.gmra.mxu0 %v193_v19 }
  0x80   :  { %v177_v20 = vpop.permute.xlu0 %176 }
  0x84   :  { %v184_v23 = vpop.permute.xlu0 %183 }
  0xf5   :  { %v167_v21 = vpop.f32.mrf.mxu0 }
  0xf6   :  { %v179_v22 = vmul.f32 %v177_v20, %v167_v21 }
  0xf7   :  { %v169_v24 = vpop.f32.mrf.mxu0 }
  0xf8   :  { %v186_v25 = vadd.f32 %v184_v23, %v179_v22 }
  0xf9   :  { %v170_v26 = vpop.f32.mrf.mxu0 }
  0xfa   :  { %v187_v27 = vmax.f32 %v186_v25, 0.0 }
  0xfb   :  { %v171_v28 = vpop.f32.mrf.mxu0 }
  0xfc   :  { %188 = vst [vmem:[%s307_s4] sm:$0xff] %v187_v27 }

// kernel: unet_forward.33
= control target key start
LH: loop header
LB: loop body
LE: loop exit
PB: predicated region body
PF: predicated region fallthrough
CT: control target
= control target key end

     0   :  { %v499_v0 = vmov 0   ;;  %vm238_vm0 = vcmask 64512   ;;  %vm242_vm1 = vcmask 1043456   ;;  %vm347_vm2 = vcmask 1041408   ;;  %s652_s1 = inlined_call_operand.vmem [shape: bf16[392,128], index: 1, kind: input, shape index: {}]   ;;  %s653_s0 = inlined_call_operand.vmem [shape: bf16[8,392], index: 0, kind: input, shape index: {}]   ;;  %s654_s2 = inlined_call_operand.vmem [shape: f32[8,1], index: 2, kind: input, shape index: {}]   ;;  %s655_s6 = inlined_call_operand.vmem [shape: f32[8,1], index: 6, kind: input, shape index: {}]   ;;  %s656_s5 = inlined_call_operand.vmem [shape: bf16[4,128], index: 5, kind: input, shape index: {}]   ;;  %s657_s3 = inlined_call_operand.vmem [shape: f32[8,1], index: 3, kind: input, shape index: {}]   ;;  %s658_s4 = inlined_call_operand.vmem [shape: bf16[8,4], index: 4, kind: input, shape index: {}]   ;;  %s659_s7 = inlined_call_operand.vmem [shape: f32[8,128], index: 7, kind: output, shape index: {}]  }
   0x1   :  { %286 = vmatprep.subr.bf16.mxu1 %v499_v0  ;;  %v470_v1 = vld [vmem:[%s652_s1 + $0x78] sm:$0xff]   ;;  %468 = vset.pattern.permute.xlu0 %v499_v0  ;;  %v473_v4 = vld [vmem:[%s652_s1 + $0x70] sm:$0xff]   ;;  %v476_v7 = vld [vmem:[%s652_s1 + $0x68] sm:$0xff]   ;;  %v500_v36 = vmov 0.0   ;;  %vm501_vm3 = vmmov 0   ;;  %vm343_vm4 = vcmask 31744  }
   0x2   :  { %v471_v2 = vld [vmem:[%s652_s1 + $0xb8] sm:$0xff]   ;;  %469 = vset.pattern.permute.xlu1 %v499_v0  ;;  %435 = vmatprep.subr.bf16.mxu0 %v470_v1  ;;  %v474_v5 = vld [vmem:[%s652_s1 + $0xb0] sm:$0xff]   ;;  %v477_v8 = vld [vmem:[%s652_s1 + $0xa8] sm:$0xff]  }
   0x3   :  { %v472_v3 = vld [vmem:[%s652_s1 + $0x38] sm:$0xff]   ;;  %287 = vmatpush1.bf16.msra.mxu1 %v471_v2  ;;  %v475_v6 = vld [vmem:[%s652_s1 + $0x30] sm:$0xff]   ;;  %v478_v9 = vld [vmem:[%s652_s1 + $0x28] sm:$0xff]  }
   0x4   :  { %436 = vmatpush3.bf16.msra.mxu0 %v472_v3  ;;  %288 = vmatprep.subr.bf16.mxu1 %v499_v0  ;;  %v479_v10 = vld [vmem:[%s652_s1 + $0x60] sm:$0xff]   ;;  %v482_v13 = vld [vmem:[%s652_s1 + $0x58] sm:$0xff]   ;;  %v485_v16 = vld [vmem:[%s652_s1 + $0x50] sm:$0xff]  }
   0x5   :  { %437 = vmatprep.subr.bf16.mxu0 %v473_v4  ;;  %v480_v11 = vld [vmem:[%s652_s1 + $0xa0] sm:$0xff]   ;;  %v483_v14 = vld [vmem:[%s652_s1 + $0x98] sm:$0xff]   ;;  %v486_v17 = vld [vmem:[%s652_s1 + $0x90] sm:$0xff]  }
   0x6   :  { %v481_v12 = vld [vmem:[%s652_s1 + $0x20] sm:$0xff]   ;;  %v484_v15 = vld [vmem:[%s652_s1 + $0x18] sm:$0xff]   ;;  %v487_v18 = vld [vmem:[%s652_s1 + $0x10] sm:$0xff]  }
   0x7   :  { %289 = vmatpush1.bf16.msra.mxu1 %v474_v5  ;;  %v488_v19 = vld [vmem:[%s652_s1 + $0x48] sm:$0xff]   ;;  %v27_v22 = vld [vmem:[%s653_s0] sm:$0xff] }
   0x8   :  { %438 = vmatpush3.bf16.msra.mxu0 %v475_v6  ;;  %290 = vmatprep.subr.bf16.mxu1 %v499_v0  ;;  %v489_v20 = vld [vmem:[%s652_s1 + $0x88] sm:$0xff]   ;;  %v491_v23 = vld [vmem:[%s652_s1 + $0x40] sm:$0xff]   ;;  %v405_v24 = vcombine.high %v27_v22, %v27_v22  ;;  %v404_v33 = vcombine.low %v27_v22, %v27_v22 }
   0x9   :  { %439 = vmatprep.subr.bf16.mxu0 %v476_v7  ;;  %v490_v21 = vld [vmem:[%s652_s1 + $0x8] sm:$0xff]   ;;  %v492_v27 = vld [vmem:[%s652_s1 + $0x80] sm:$0xff]  }
   0xa   :  { %v28_v25 = vld [vmem:[%s653_s0 + $0x8] sm:$0xff]  ;;  %278 = vmatprep.mubr.bf16.mxu0 %v405_v24  ;;  %v326_v28 = vld [vmem:[%s654_s2] sm:$0xff] }
   0xb   :  { %291 = vmatpush1.bf16.msra.mxu1 %v477_v8  ;;  %v407_v26 = vcombine.high %v28_v25, %v28_v25  ;;  %v392_v29 = vld [vmem:[%s655_s6] sm:$0xff]  ;;  %329 = vperm.xlu0 %468, %v326_v28   ;;  %v406_v38 = vcombine.low %v28_v25, %v28_v25 }
   0xc   :  { %440 = vmatpush3.bf16.msra.mxu0 %v478_v9  ;;  %292 = vmatprep.subr.bf16.mxu1 %v499_v0  ;;  %v493_v30 = vld [vmem:[%s652_s1] sm:$0xff]  }
   0xd   :  { %441 = vmatprep.subr.bf16.mxu0 %v479_v10  ;;  %v496_v31 = vld [vmem:[%s652_s1 + $0xc0] ss:$0 sps:$4 sm:$0xff]   ;;  %433 = vmatprep.mubr.msk.bf16.mxu1 %vm238_vm0, %v407_v26 }
   0xe   :  { %v342_v32 = vld [vmem:[%s656_s5] sm:$0x3]  ;;  %395 = vperm.xlu1 %469, %v392_v29   ;;  %v244_v35 = vsel %vm242_vm1, %v496_v31, 0 }
   0xf   :  { %293 = vmatpush1.bf16.msra.mxu1 %v480_v11  ;;  %v333_v34 = vld [vmem:[%s657_s3] sm:$0xff]  ;;  %v349_v37 = vsel %vm347_vm2, %v342_v32, 0 }
  0x10   :  { %442 = vmatpush3.bf16.msra.mxu0 %v481_v12  ;;  %294 = vmatprep.subr.bf16.mxu1 %v499_v0  ;;  %v341_v39 = vld [vmem:[%s658_s4] sm:$0xf] }
  0x11   :  { %443 = vmatprep.subr.bf16.mxu0 %v482_v13  ;;  %336 = vperm.xlu0 %468, %v333_v34  }
  0x13   :  { %295 = vmatpush1.bf16.msra.mxu1 %v483_v14 }
  0x14   :  { %444 = vmatpush3.bf16.msra.mxu0 %v484_v15  ;;  %296 = vmatprep.subr.bf16.mxu1 %v499_v0 }
  0x15   :  { %445 = vmatprep.subr.bf16.mxu0 %v485_v16 }
  0x17   :  { %297 = vmatpush1.bf16.msra.mxu1 %v486_v17 }
  0x18   :  { %446 = vmatpush3.bf16.msra.mxu0 %v487_v18  ;;  %298 = vmatprep.subr.bf16.mxu1 %v499_v0 }
  0x19   :  { %447 = vmatprep.subr.bf16.mxu0 %v488_v19 }
  0x1b   :  { %299 = vmatpush1.bf16.msra.mxu1 %v489_v20 }
  0x1c   :  { %448 = vmatpush3.bf16.msra.mxu0 %v490_v21  ;;  %300 = vmatprep.subr.bf16.mxu1 %v499_v0 }
  0x1d   :  { %449 = vmatprep.subr.bf16.mxu0 %v491_v23 }
  0x1f   :  { %301 = vmatpush1.bf16.msra.mxu1 %v492_v27 }
  0x20   :  { %450 = vmatpush3.bf16.msra.mxu0 %v493_v30  ;;  %316 = vmatprep.subr.bf16.mxu1 %v499_v0 }
  0x21   :  { %459 = vmatprep.subr.bf16.mxu0 %v500_v36 }
  0x23   :  { %279 = vmatmul.mubr.bf16.vlgmr.msra.gmra.mxu0 %v404_v33  ;;  %317 = vmatpush2.bf16.msra.mxu1 %v244_v35 }
  0x24   :  { %460 = vmatpush3.bf16.msra.mxu0 %v349_v37  ;;  %461 = vmatprep.mubr.msk.bf16.mxu0 %vm501_vm3, %v500_v36 }
  0x26   :  { %319 = vmatmul.mubr.bf16.vlgmr.msra.gmra.mxu1 %v406_v38 }
  0x2b   :  { %462 = vmatmul.mubr.msk.bf16.vlgmr.msra.gmra.mxu0 %vm343_vm4, %v341_v39 }
  0x86   :  { %v330_v41 = vpop.permute.xlu0 %329 }
  0x89   :  { %v396_v58 = vpop.permute.xlu1 %395 }
  0x8c   :  { %v337_v51 = vpop.permute.xlu0 %336 }
  0xe3   :  { %v451_v40 = vpop.f32.mrf.mxu0 }
  0xe5   :  { %v452_v42 = vpop.f32.mrf.mxu0 }
  0xe6   :  { %v453_v43 = vadd.f32 %v452_v42, %v451_v40  ;;  %v320_v44 = vpop.f32.mrf.mxu1 }
  0xe7   :  { %v454_v45 = vpop.f32.mrf.mxu0 }
  0xe8   :  { %v321_v46 = vadd.f32 %v453_v43, %v320_v44  ;;  %v322_v47 = vpop.f32.mrf.mxu1 }
  0xe9   :  { %v455_v48 = vpop.f32.mrf.mxu0 }
  0xea   :  { %v332_v49 = vmul.f32 %v330_v41, %v321_v46  ;;  %v323_v50 = vpop.f32.mrf.mxu1 }
  0xeb   :  { %v385_v52 = vpop.f32.mrf.mxu0 }
  0xec   :  { %v339_v53 = vadd.f32 %v337_v51, %v332_v49  ;;  %v324_v54 = vpop.f32.mrf.mxu1 }
  0xed   :  { %v463_v55 = vpop.f32.mrf.mxu0 }
  0xee   :  { %v340_v56 = vmax.f32 %v339_v53, 0.0 }
  0xef   :  { %v388_v57 = vpop.f32.mrf.mxu0 }
  0xf0   :  { %v391_v59 = vadd.f32 %v385_v52, %v340_v56 }
  0xf1   :  { %v464_v60 = vpop.f32.mrf.mxu0 }
  0xf2   :  { %v398_v61 = vadd.f32 %v396_v58, %v391_v59 }
  0xf4   :  { %399 = vst [vmem:[%s659_s7] sm:$0xff] %v398_v61 }

// kernel: unet_forward.34
= control target key start
LH: loop header
LB: loop body
LE: loop exit
PB: predicated region body
PF: predicated region fallthrough
CT: control target
= control target key end

     0   :  { %v250_v0 = vmov 0   ;;  %vm129_vm0 = vcmask 588800   ;;  %vm133_vm1 = vcmask 1043456   ;;  %vm208_vm2 = vcmask 261120   ;;  %s339_s1 = inlined_call_operand.vmem [shape: bf16[200,32], index: 1, kind: input, shape index: {}]   ;;  %s340_s0 = inlined_call_operand.vmem [shape: bf16[16,200], index: 0, kind: input, shape index: {}]   ;;  %s341_s2 = inlined_call_operand.vmem [shape: f32[16,1], index: 2, kind: input, shape index: {}]   ;;  %s342_s3 = inlined_call_operand.vmem [shape: f32[16,1], index: 3, kind: input, shape index: {}]   ;;  %s343_s4 = inlined_call_operand.vmem [shape: f32[16,32], index: 4, kind: output, shape index: {}]  }
   0x1   :  { %137 = vmatprep.subr.bf16.mxu0 %v250_v0  ;;  %v234_v1 = vld [vmem:[%s339_s1 + $0x38] sm:$0xff]   ;;  %232 = vset.pattern.permute.xlu0 %v250_v0  ;;  %v235_v2 = vld [vmem:[%s339_s1 + $0x30] sm:$0xff]   ;;  %v236_v3 = vld [vmem:[%s339_s1 + $0x28] sm:$0xff]  }
   0x2   :  { %233 = vset.pattern.permute.xlu1 %v250_v0  ;;  %138 = vmatpush1.bf16.msra.mxu0 %v234_v1  ;;  %v237_v4 = vld [vmem:[%s339_s1 + $0x20] sm:$0xff]   ;;  %v238_v6 = vld [vmem:[%s339_s1 + $0x18] sm:$0xff]   ;;  %v179_v9 = vld [vmem:[%s341_s2 + $0x8] sm:$0xff] }
   0x3   :  { %139 = vmatprep.subr.bf16.mxu0 %v250_v0  ;;  %v249_v5 = vld [vmem:[%s340_s0 + $0x4] ss:$8 sps:$4 sm:$0xff]   ;;  %v239_v11 = vld [vmem:[%s339_s1 + $0x10] sm:$0xff]   ;;  %v242_v14 = vld [vmem:[%s339_s1 + $0x60] ss:$0 sps:$4 sm:$0xff]  }
   0x4   :  { %v178_v7 = vld [vmem:[%s341_s2] sm:$0xff]  ;;  %230 = vmatprep.mubr.msk.bf16.mxu0 %vm129_vm0, %v249_v5  ;;  %v193_v10 = vld [vmem:[%s342_s3 + $0x8] sm:$0xff]  ;;  %v135_v15 = vsel %vm133_vm1, %v242_v14, 0  ;;  %v243_v16 = vld [vmem:[%s339_s1 + $0x58] sm:$0xff]  }
   0x5   :  { %v192_v8 = vld [vmem:[%s342_s3] sm:$0xff]  ;;  %182 = vperm.xlu0 %232, %v178_v7   ;;  %v240_v12 = vld [vmem:[%s339_s1 + $0x8] sm:$0xff]   ;;  %v244_v17 = vld [vmem:[%s339_s1 + $0x50] sm:$0xff]  }
   0x6   :  { %140 = vmatpush1.bf16.msra.mxu0 %v235_v2  ;;  %196 = vperm.xlu1 %233, %v192_v8   ;;  %v241_v13 = vld [vmem:[%s339_s1] sm:$0xff]   ;;  %v245_v18 = vld [vmem:[%s339_s1 + $0x48] sm:$0xff]  }
   0x7   :  { %141 = vmatprep.subr.bf16.mxu0 %v250_v0  ;;  %v246_v19 = vld [vmem:[%s339_s1 + $0x40] sm:$0xff]  }
   0x8   :  { %v247_v20 = vld [vmem:[%s340_s0] ss:$8 sps:$4 sm:$0xff]  }
   0x9   :  { %187 = vperm.xlu0 %232, %v179_v9  }
   0xa   :  { %142 = vmatpush1.bf16.msra.mxu0 %v236_v3  ;;  %201 = vperm.xlu1 %233, %v193_v10  }
   0xb   :  { %143 = vmatprep.subr.bf16.mxu0 %v250_v0 }
   0xe   :  { %144 = vmatpush1.bf16.msra.mxu0 %v237_v4 }
   0xf   :  { %145 = vmatprep.subr.bf16.mxu0 %v250_v0 }
  0x12   :  { %146 = vmatpush1.bf16.msra.mxu0 %v238_v6 }
  0x13   :  { %147 = vmatprep.subr.bf16.mxu0 %v250_v0 }
  0x16   :  { %148 = vmatpush1.bf16.msra.mxu0 %v239_v11 }
  0x17   :  { %149 = vmatprep.subr.bf16.mxu0 %v250_v0 }
  0x1a   :  { %150 = vmatpush1.bf16.msra.mxu0 %v240_v12 }
  0x1b   :  { %151 = vmatprep.subr.bf16.mxu0 %v250_v0 }
  0x1e   :  { %152 = vmatpush1.bf16.msra.mxu0 %v241_v13 }
  0x1f   :  { %159 = vmatprep.subr.bf16.mxu0 %v250_v0 }
  0x22   :  { %160 = vmatpush2.bf16.msra.mxu0 %v135_v15 }
  0x23   :  { %161 = vmatprep.subr.bf16.mxu0 %v250_v0 }
  0x26   :  { %162 = vmatpush2.bf16.msra.mxu0 %v243_v16 }
  0x27   :  { %163 = vmatprep.subr.bf16.mxu0 %v250_v0 }
  0x2a   :  { %164 = vmatpush2.bf16.msra.mxu0 %v244_v17 }
  0x2b   :  { %165 = vmatprep.subr.bf16.mxu0 %v250_v0 }
  0x2e   :  { %166 = vmatpush2.bf16.msra.mxu0 %v245_v18 }
  0x2f   :  { %167 = vmatprep.subr.bf16.mxu0 %v250_v0 }
  0x32   :  { %168 = vmatpush2.bf16.msra.mxu0 %v246_v19 }
  0x35   :  { %170 = vmatmul.mubr.bf16.vlgmr.msra.gmra.mxu0 %v247_v20 }
  0x80   :  { %v183_v21 = vpop.permute.xlu0 %182 }
  0x81   :  { %v197_v22 = vpop.permute.xlu1 %196 }
  0x84   :  { %v188_v27 = vpop.permute.xlu0 %187 }
  0x85   :  { %v202_v31 = vpop.permute.xlu1 %201 }
  0xf5   :  { %v171_v23 = vpop.f32.mrf.mxu0 }
  0xf6   :  { %v190_v24 = vmul.f32 %v183_v21, %v171_v23 }
  0xf7   :  { %v173_v25 = vpop.f32.mrf.mxu0 }
  0xf8   :  { %v204_v26 = vadd.f32 %v197_v22, %v190_v24 }
  0xf9   :  { %v174_v28 = vpop.f32.mrf.mxu0 }
  0xfa   :  { %v206_v29 = vmax.f32 %v204_v26, 0.0  ;;  %v191_v30 = vmul.f32 %v188_v27, %v174_v28 }
  0xfb   :  { %v176_v32 = vpop.f32.mrf.mxu0 }
  0xfc   :  { %209 = vst.msk [vmem:[%s343_s4] sm:$0xff] %vm208_vm2, %v206_v29  ;;  %v205_v33 = vadd.f32 %v202_v31, %v191_v30 }
  0xfe   :  { %v207_v34 = vmax.f32 %v205_v33, 0.0 }
 0x100   :  { %210 = vst.msk [vmem:[%s343_s4 + $0x8] sm:$0xff] %vm208_vm2, %v207_v34 }

// kernel: unet_forward.35
= control target key start
LH: loop header
LB: loop body
LE: loop exit
PB: predicated region body
PF: predicated region fallthrough
CT: control target
= control target key end

     0   :  { %v545_v0 = vmov 0   ;;  %vm250_vm0 = vcmask 130048   ;;  %vm378_vm1 = vcmask 1043456   ;;  %v546_v34 = vmov 0.0   ;;  %s716_s1 = inlined_call_operand.vmem [shape: bf16[400,32], index: 1, kind: input, shape index: {}]   ;;  %s717_s0 = inlined_call_operand.vmem [shape: bf16[16,400], index: 0, kind: input, shape index: {}]   ;;  %s718_s2 = inlined_call_operand.vmem [shape: f32[16,1], index: 2, kind: input, shape index: {}]   ;;  %s719_s3 = inlined_call_operand.vmem [shape: f32[16,1], index: 3, kind: input, shape index: {}]   ;;  %s720_s5 = inlined_call_operand.vmem [shape: bf16[8,32], index: 5, kind: input, shape index: {}]   ;;  %s721_s4 = inlined_call_operand.vmem [shape: bf16[16,8], index: 4, kind: input, shape index: {}]   ;;  %s722_s6 = inlined_call_operand.vmem [shape: f32[16,1], index: 6, kind: input, shape index: {}]   ;;  %s723_s7 = inlined_call_operand.vmem [shape: f32[16,32], index: 7, kind: output, shape index: {}]  }
   0x1   :  { %295 = vmatprep.subr.bf16.mxu1 %v545_v0  ;;  %v513_v1 = vld [vmem:[%s716_s1 + $0x78] sm:$0xff]   ;;  %511 = vset.pattern.permute.xlu0 %v545_v0  ;;  %v516_v4 = vld [vmem:[%s716_s1 + $0x70] sm:$0xff]   ;;  %v519_v7 = vld [vmem:[%s716_s1 + $0x68] sm:$0xff]   ;;  %vm547_vm2 = vmmov 0   ;;  %vm374_vm3 = vcmask 64512   ;;  %vm439_vm4 = vcmask 261120  }
   0x2   :  { %v514_v2 = vld [vmem:[%s716_s1 + $0xb8] sm:$0xff]   ;;  %512 = vset.pattern.permute.xlu1 %v545_v0  ;;  %478 = vmatprep.subr.bf16.mxu0 %v513_v1  ;;  %v517_v5 = vld [vmem:[%s716_s1 + $0xb0] sm:$0xff]   ;;  %v520_v8 = vld [vmem:[%s716_s1 + $0xa8] sm:$0xff]  }
   0x3   :  { %v515_v3 = vld [vmem:[%s716_s1 + $0x38] sm:$0xff]   ;;  %296 = vmatpush1.bf16.msra.mxu1 %v514_v2  ;;  %v518_v6 = vld [vmem:[%s716_s1 + $0x30] sm:$0xff]   ;;  %v521_v9 = vld [vmem:[%s716_s1 + $0x28] sm:$0xff]  }
   0x4   :  { %479 = vmatpush3.bf16.msra.mxu0 %v515_v3  ;;  %297 = vmatprep.subr.bf16.mxu1 %v545_v0  ;;  %v522_v10 = vld [vmem:[%s716_s1 + $0x60] sm:$0xff]   ;;  %v525_v13 = vld [vmem:[%s716_s1 + $0x58] sm:$0xff]   ;;  %v528_v16 = vld [vmem:[%s716_s1 + $0x50] sm:$0xff]  }
   0x5   :  { %480 = vmatprep.subr.bf16.mxu0 %v516_v4  ;;  %v523_v11 = vld [vmem:[%s716_s1 + $0xa0] sm:$0xff]   ;;  %v526_v14 = vld [vmem:[%s716_s1 + $0x98] sm:$0xff]   ;;  %v529_v17 = vld [vmem:[%s716_s1 + $0x90] sm:$0xff]  }
   0x6   :  { %v524_v12 = vld [vmem:[%s716_s1 + $0x20] sm:$0xff]   ;;  %v527_v15 = vld [vmem:[%s716_s1 + $0x18] sm:$0xff]   ;;  %v530_v18 = vld [vmem:[%s716_s1 + $0x10] sm:$0xff]  }
   0x7   :  { %298 = vmatpush1.bf16.msra.mxu1 %v517_v5  ;;  %v531_v19 = vld [vmem:[%s716_s1 + $0x48] sm:$0xff]   ;;  %v534_v22 = vld [vmem:[%s716_s1 + $0x40] sm:$0xff]  }
   0x8   :  { %481 = vmatpush3.bf16.msra.mxu0 %v518_v6  ;;  %299 = vmatprep.subr.bf16.mxu1 %v545_v0  ;;  %v532_v20 = vld [vmem:[%s716_s1 + $0x88] sm:$0xff]   ;;  %v539_v23 = vld [vmem:[%s717_s0 + $0x4] ss:$16 sps:$4 sm:$0xff]   ;;  %v537_v29 = vld [vmem:[%s717_s0] ss:$16 sps:$4 sm:$0xff]  }
   0x9   :  { %482 = vmatprep.subr.bf16.mxu0 %v519_v7  ;;  %v533_v21 = vld [vmem:[%s716_s1 + $0x8] sm:$0xff]   ;;  %v535_v24 = vld [vmem:[%s716_s1 + $0x80] sm:$0xff]   ;;  %286 = vmatprep.mubr.bf16.mxu0 %v539_v23 }
   0xa   :  { %v543_v25 = vld [vmem:[%s717_s0 + $0xc] ss:$16 sps:$4 sm:$0xff]   ;;  %v536_v26 = vld [vmem:[%s716_s1] sm:$0xff]   ;;  %v541_v36 = vld [vmem:[%s717_s0 + $0x8] ss:$16 sps:$4 sm:$0xff]  }
   0xb   :  { %300 = vmatpush1.bf16.msra.mxu1 %v520_v8  ;;  %475 = vmatprep.mubr.msk.bf16.mxu1 %vm250_vm0, %v543_v25  ;;  %v336_v27 = vld [vmem:[%s718_s2] sm:$0xff]  ;;  %v337_v32 = vld [vmem:[%s718_s2 + $0x8] sm:$0xff] }
   0xc   :  { %483 = vmatpush3.bf16.msra.mxu0 %v521_v9  ;;  %301 = vmatprep.subr.bf16.mxu1 %v545_v0  ;;  %v350_v28 = vld [vmem:[%s719_s3] sm:$0xff]  ;;  %v351_v33 = vld [vmem:[%s719_s3 + $0x8] sm:$0xff] }
   0xd   :  { %484 = vmatprep.subr.bf16.mxu0 %v522_v10  ;;  %v368_v30 = vld [vmem:[%s720_s5] sm:$0xf]  ;;  %340 = vperm.xlu0 %511, %v336_v27   ;;  %v426_v38 = vld [vmem:[%s722_s6 + $0x8] sm:$0xff] }
   0xe   :  { %354 = vperm.xlu1 %512, %v350_v28   ;;  %v540_v31 = vld [vmem:[%s716_s1 + $0xc0] sm:$0xff]   ;;  %v380_v35 = vsel %vm378_vm1, %v368_v30, 0 }
   0xf   :  { %302 = vmatpush1.bf16.msra.mxu1 %v523_v11  ;;  %v425_v37 = vld [vmem:[%s722_s6] sm:$0xff] }
  0x10   :  { %485 = vmatpush3.bf16.msra.mxu0 %v524_v12  ;;  %303 = vmatprep.subr.bf16.mxu1 %v545_v0  ;;  %v544_v39 = vld [vmem:[%s721_s4] sm:$0xff]  }
  0x11   :  { %486 = vmatprep.subr.bf16.mxu0 %v525_v13  ;;  %345 = vperm.xlu0 %511, %v337_v32  }
  0x12   :  { %359 = vperm.xlu1 %512, %v351_v33  }
  0x13   :  { %304 = vmatpush1.bf16.msra.mxu1 %v526_v14 }
  0x14   :  { %487 = vmatpush3.bf16.msra.mxu0 %v527_v15  ;;  %305 = vmatprep.subr.bf16.mxu1 %v545_v0 }
  0x15   :  { %488 = vmatprep.subr.bf16.mxu0 %v528_v16  ;;  %429 = vperm.xlu0 %511, %v425_v37  }
  0x16   :  { %434 = vperm.xlu1 %512, %v426_v38  }
  0x17   :  { %306 = vmatpush1.bf16.msra.mxu1 %v529_v17 }
  0x18   :  { %489 = vmatpush3.bf16.msra.mxu0 %v530_v18  ;;  %307 = vmatprep.subr.bf16.mxu1 %v545_v0 }
  0x19   :  { %490 = vmatprep.subr.bf16.mxu0 %v531_v19 }
  0x1b   :  { %308 = vmatpush1.bf16.msra.mxu1 %v532_v20 }
  0x1c   :  { %491 = vmatpush3.bf16.msra.mxu0 %v533_v21  ;;  %309 = vmatprep.subr.bf16.mxu1 %v545_v0 }
  0x1d   :  { %492 = vmatprep.subr.bf16.mxu0 %v534_v22 }
  0x1f   :  { %310 = vmatpush1.bf16.msra.mxu1 %v535_v24 }
  0x20   :  { %493 = vmatpush3.bf16.msra.mxu0 %v536_v26  ;;  %325 = vmatprep.subr.bf16.mxu1 %v545_v0 }
  0x21   :  { %502 = vmatprep.subr.bf16.mxu0 %v546_v34 }
  0x23   :  { %287 = vmatmul.mubr.bf16.vlgmr.msra.gmra.mxu0 %v537_v29  ;;  %326 = vmatpush2.bf16.msra.mxu1 %v540_v31 }
  0x24   :  { %503 = vmatpush3.bf16.msra.mxu0 %v380_v35  ;;  %504 = vmatprep.mubr.msk.bf16.mxu0 %vm547_vm2, %v546_v34 }
  0x26   :  { %328 = vmatmul.mubr.bf16.vlgmr.msra.gmra.mxu1 %v541_v36 }
  0x2b   :  { %505 = vmatmul.mubr.msk.bf16.vlgmr.msra.gmra.mxu0 %vm374_vm3, %v544_v39 }
  0x88   :  { %v341_v41 = vpop.permute.xlu0 %340 }
  0x89   :  { %v355_v48 = vpop.permute.xlu1 %354 }
  0x8c   :  { %v346_v53 = vpop.permute.xlu0 %345 }
  0x8d   :  { %v360_v61 = vpop.permute.xlu1 %359 }
  0x90   :  { %v430_v1 = vpop.permute.xlu0 %429 }
  0x91   :  { %v435_v6 = vpop.permute.xlu1 %434 }
  0xe3   :  { %v494_v40 = vpop.f32.mrf.mxu0 }
  0xe5   :  { %v495_v42 = vpop.f32.mrf.mxu0 }
  0xe6   :  { %v496_v43 = vadd.f32 %v495_v42, %v494_v40  ;;  %v329_v44 = vpop.f32.mrf.mxu1 }
  0xe7   :  { %v497_v45 = vpop.f32.mrf.mxu0 }
  0xe8   :  { %v330_v46 = vadd.f32 %v496_v43, %v329_v44  ;;  %v331_v47 = vpop.f32.mrf.mxu1 }
  0xe9   :  { %v498_v49 = vpop.f32.mrf.mxu0 }
  0xea   :  { %v348_v50 = vmul.f32 %v341_v41, %v330_v46  ;;  %v499_v51 = vadd.f32 %v498_v49, %v497_v45  ;;  %v332_v52 = vpop.f32.mrf.mxu1 }
  0xeb   :  { %v416_v54 = vpop.f32.mrf.mxu0 }
  0xec   :  { %v333_v55 = vadd.f32 %v499_v51, %v332_v52  ;;  %v362_v56 = vadd.f32 %v355_v48, %v348_v50  ;;  %v334_v57 = vpop.f32.mrf.mxu1 }
  0xed   :  { %v506_v58 = vpop.f32.mrf.mxu0 }
  0xee   :  { %v349_v59 = vmul.f32 %v346_v53, %v333_v55  ;;  %v364_v60 = vmax.f32 %v362_v56, 0.0 }
  0xef   :  { %v419_v62 = vpop.f32.mrf.mxu0 }
  0xf0   :  { %v423_v63 = vadd.f32 %v416_v54, %v364_v60  ;;  %v363_v0 = vadd.f32 %v360_v61, %v349_v59 }
  0xf1   :  { %v507_v2 = vpop.f32.mrf.mxu0 }
  0xf2   :  { %v437_v3 = vadd.f32 %v430_v1, %v423_v63  ;;  %v365_v4 = vmax.f32 %v363_v0, 0.0 }
  0xf4   :  { %440 = vst.msk [vmem:[%s723_s7] sm:$0xff] %vm439_vm4, %v437_v3  ;;  %v424_v5 = vadd.f32 %v419_v62, %v365_v4 }
  0xf6   :  { %v438_v7 = vadd.f32 %v435_v6, %v424_v5 }
  0xf8   :  { %441 = vst.msk [vmem:[%s723_s7 + $0x8] sm:$0xff] %vm439_vm4, %v438_v7 }

// kernel: unet_forward.36
= control target key start
LH: loop header
LB: loop body
LE: loop exit
PB: predicated region body
PF: predicated region fallthrough
CT: control target
= control target key end

     0   :  { %v288_v0 = vmov 0   ;;  %vm112_vm0 = vcmask 130048   ;;  %vm228_vm1 = vcmask 64512   ;;  %s413_s1 = inlined_call_operand.vmem [shape: bf16[144,8], index: 1, kind: input, shape index: {}]   ;;  %s414_s0 = inlined_call_operand.vmem [shape: bf16[32,144], index: 0, kind: input, shape index: {}]   ;;  %s415_s2 = inlined_call_operand.vmem [shape: f32[32,1], index: 2, kind: input, shape index: {}]   ;;  %s416_s3 = inlined_call_operand.vmem [shape: f32[32,1], index: 3, kind: input, shape index: {}]   ;;  %s417_s4 = inlined_call_operand.vmem [shape: f32[32,8], index: 4, kind: output, shape index: {}]  }
   0x1   :  { %119 = vmatprep.subr.bf16.mxu0 %v288_v0  ;;  %252 = vmatprep.subr.bf16.mxu1 %v288_v0  ;;  %v273_v1 = vld [vmem:[%s413_s1 + $0x38] sm:$0xff]   ;;  %v274_v2 = vld [vmem:[%s413_s1 + $0x30] sm:$0xff]   ;;  %v275_v3 = vld [vmem:[%s413_s1 + $0x28] sm:$0xff]  }
   0x2   :  { %272 = vset.pattern.permute.xlu1 %v288_v0  ;;  %271 = vset.pattern.permute.xlu0 %v288_v0  ;;  %v276_v4 = vld [vmem:[%s413_s1 + $0x20] sm:$0xff]   ;;  %v287_v6 = vld [vmem:[%s414_s0 + $0x14] ss:$8 sps:$4 sm:$0xff]   ;;  %v169_v11 = vld [vmem:[%s415_s2 + $0x8] sm:$0xff] }
   0x3   :  { %120 = vmatpush1.bf16.msra.mxu0 %v273_v1  ;;  %261 = vmatpush1.bf16.msra.mxu1 %v273_v1  ;;  %v284_v5 = vld [vmem:[%s414_s0 + $0x4] ss:$8 sps:$4 sm:$0xff]   ;;  %v170_v7 = vld [vmem:[%s415_s2 + $0x10] sm:$0xff]  ;;  %v171_v9 = vld [vmem:[%s415_s2 + $0x18] sm:$0xff] }
   0x4   :  { %121 = vmatprep.subr.bf16.mxu0 %v288_v0  ;;  %253 = vmatprep.subr.bf16.mxu1 %v288_v0  ;;  %v168_v8 = vld [vmem:[%s415_s2] sm:$0xff]  ;;  %v277_v10 = vld [vmem:[%s413_s1 + $0x18] sm:$0xff]   ;;  %v197_v12 = vld [vmem:[%s416_s3 + $0x8] sm:$0xff] }
   0x5   :  { %250 = vmatprep.mubr.msk.bf16.mxu0 %vm112_vm0, %v284_v5  ;;  %184 = vperm.xlu1 %272, %v170_v7   ;;  %v278_v13 = vld [vmem:[%s413_s1 + $0x10] sm:$0xff]   ;;  %v196_v14 = vld [vmem:[%s416_s3] sm:$0xff]  ;;  %v199_v15 = vld [vmem:[%s416_s3 + $0x18] sm:$0xff] }
   0x6   :  { %251 = vmatprep.mubr.msk.bf16.mxu1 %vm112_vm0, %v287_v6  ;;  %174 = vperm.xlu0 %271, %v168_v8   ;;  %v279_v16 = vld [vmem:[%s413_s1 + $0x8] sm:$0xff]   ;;  %v198_v17 = vld [vmem:[%s416_s3 + $0x10] sm:$0xff]  ;;  %v280_v18 = vld [vmem:[%s413_s1] sm:$0xff]  }
   0x7   :  { %122 = vmatpush1.bf16.msra.mxu0 %v274_v2  ;;  %262 = vmatpush1.bf16.msra.mxu1 %v274_v2  ;;  %v281_v19 = vld [vmem:[%s413_s1 + $0x40] sm:$0xff]   ;;  %v285_v21 = vld [vmem:[%s414_s0 + $0x10] ss:$8 sps:$4 sm:$0xff]  }
   0x8   :  { %123 = vmatprep.subr.bf16.mxu0 %v288_v0  ;;  %254 = vmatprep.subr.bf16.mxu1 %v288_v0  ;;  %v282_v20 = vld [vmem:[%s414_s0] ss:$8 sps:$4 sm:$0xff]  }
   0x9   :  { %189 = vperm.xlu1 %272, %v171_v9  }
   0xa   :  { %179 = vperm.xlu0 %271, %v169_v11  }
   0xb   :  { %124 = vmatpush1.bf16.msra.mxu0 %v275_v3  ;;  %263 = vmatpush1.bf16.msra.mxu1 %v275_v3 }
   0xc   :  { %125 = vmatprep.subr.bf16.mxu0 %v288_v0  ;;  %255 = vmatprep.subr.bf16.mxu1 %v288_v0 }
   0xd   :  { %207 = vperm.xlu1 %272, %v197_v12  }
   0xe   :  { %202 = vperm.xlu0 %271, %v196_v14  }
   0xf   :  { %126 = vmatpush1.bf16.msra.mxu0 %v276_v4  ;;  %264 = vmatpush1.bf16.msra.mxu1 %v276_v4 }
  0x10   :  { %127 = vmatprep.subr.bf16.mxu0 %v288_v0  ;;  %256 = vmatprep.subr.bf16.mxu1 %v288_v0 }
  0x11   :  { %217 = vperm.xlu1 %272, %v199_v15  }
  0x12   :  { %212 = vperm.xlu0 %271, %v198_v17  }
  0x13   :  { %128 = vmatpush1.bf16.msra.mxu0 %v277_v10  ;;  %265 = vmatpush1.bf16.msra.mxu1 %v277_v10 }
  0x14   :  { %129 = vmatprep.subr.bf16.mxu0 %v288_v0  ;;  %257 = vmatprep.subr.bf16.mxu1 %v288_v0 }
  0x17   :  { %130 = vmatpush1.bf16.msra.mxu0 %v278_v13  ;;  %266 = vmatpush1.bf16.msra.mxu1 %v278_v13 }
  0x18   :  { %131 = vmatprep.subr.bf16.mxu0 %v288_v0  ;;  %258 = vmatprep.subr.bf16.mxu1 %v288_v0 }
  0x1b   :  { %132 = vmatpush1.bf16.msra.mxu0 %v279_v16  ;;  %267 = vmatpush1.bf16.msra.mxu1 %v279_v16 }
  0x1c   :  { %133 = vmatprep.subr.bf16.mxu0 %v288_v0  ;;  %259 = vmatprep.subr.bf16.mxu1 %v288_v0 }
  0x1f   :  { %134 = vmatpush1.bf16.msra.mxu0 %v280_v18  ;;  %268 = vmatpush1.bf16.msra.mxu1 %v280_v18 }
  0x20   :  { %149 = vmatprep.subr.bf16.mxu0 %v288_v0  ;;  %260 = vmatprep.subr.bf16.mxu1 %v288_v0 }
  0x23   :  { %150 = vmatpush2.bf16.msra.mxu0 %v281_v19  ;;  %269 = vmatpush2.bf16.msra.mxu1 %v281_v19 }
  0x26   :  { %152 = vmatmul.mubr.bf16.vlgmr.msra.gmra.mxu0 %v282_v20  ;;  %160 = vmatmul.mubr.bf16.vlgmr.msra.gmra.mxu1 %v285_v21 }
  0x80   :  { %v185_v23 = vpop.permute.xlu1 %184 }
  0x81   :  { %v175_v22 = vpop.permute.xlu0 %174 }
  0x84   :  { %v190_v25 = vpop.permute.xlu1 %189 }
  0x85   :  { %v180_v24 = vpop.permute.xlu0 %179 }
  0x88   :  { %v208_v27 = vpop.permute.xlu1 %207 }
  0x89   :  { %v203_v26 = vpop.permute.xlu0 %202 }
  0x8c   :  { %v218_v39 = vpop.permute.xlu1 %217 }
  0x8d   :  { %v213_v30 = vpop.permute.xlu0 %212 }
  0xe6   :  { %v153_v28 = vpop.f32.mrf.mxu0  ;;  %v161_v29 = vpop.f32.mrf.mxu1 }
  0xe7   :  { %v192_v31 = vmul.f32 %v175_v22, %v153_v28  ;;  %v194_v32 = vmul.f32 %v185_v23, %v161_v29 }
  0xe8   :  { %v155_v33 = vpop.f32.mrf.mxu0  ;;  %v163_v34 = vpop.f32.mrf.mxu1 }
  0xe9   :  { %v220_v35 = vadd.f32 %v203_v26, %v192_v31  ;;  %v222_v36 = vadd.f32 %v213_v30, %v194_v32 }
  0xea   :  { %v156_v37 = vpop.f32.mrf.mxu0  ;;  %v164_v38 = vpop.f32.mrf.mxu1 }
  0xeb   :  { %v224_v40 = vmax.f32 %v220_v35, 0.0  ;;  %v226_v41 = vmax.f32 %v222_v36, 0.0  ;;  %v193_v42 = vmul.f32 %v180_v24, %v156_v37  ;;  %v195_v43 = vmul.f32 %v190_v25, %v164_v38 }
  0xec   :  { %v158_v44 = vpop.f32.mrf.mxu0  ;;  %v166_v45 = vpop.f32.mrf.mxu1 }
  0xed   :  { %229 = vst.msk [vmem:[%s417_s4] sm:$0xff] %vm228_vm1, %v224_v40  ;;  %231 = vst.msk [vmem:[%s417_s4 + $0x10] sm:$0xff] %vm228_vm1, %v226_v41  ;;  %v221_v46 = vadd.f32 %v208_v27, %v193_v42  ;;  %v223_v47 = vadd.f32 %v218_v39, %v195_v43 }
  0xef   :  { %v225_v48 = vmax.f32 %v221_v46, 0.0  ;;  %v227_v49 = vmax.f32 %v223_v47, 0.0 }
  0xf1   :  { %230 = vst.msk [vmem:[%s417_s4 + $0x8] sm:$0xff] %vm228_vm1, %v225_v48  ;;  %232 = vst.msk [vmem:[%s417_s4 + $0x18] sm:$0xff] %vm228_vm1, %v227_v49 }

// kernel: unet_forward.37
= control target key start
LH: loop header
LB: loop body
LE: loop exit
PB: predicated region body
PF: predicated region fallthrough
CT: control target
= control target key end

     0   :  { %v605_v1 = vmov 0   ;;  %vm209_vm0 = vcmask 261120   ;;  %vm396_vm1 = vcmask 130048   ;;  %vm484_vm2 = vcmask 64512   ;;  %s783_s1 = inlined_call_operand.vmem [shape: bf16[288,8], index: 1, kind: input, shape index: {}]   ;;  %s784_s0 = inlined_call_operand.vmem [shape: bf16[32,288], index: 0, kind: input, shape index: {}]   ;;  %s785_s5 = inlined_call_operand.vmem [shape: bf16[16,8], index: 5, kind: input, shape index: {}]   ;;  %s786_s4 = inlined_call_operand.vmem [shape: bf16[32,16], index: 4, kind: input, shape index: {}]   ;;  %s787_s2 = inlined_call_operand.vmem [shape: f32[32,1], index: 2, kind: input, shape index: {}]   ;;  %s788_s3 = inlined_call_operand.vmem [shape: f32[32,1], index: 3, kind: input, shape index: {}]   ;;  %s789_s6 = inlined_call_operand.vmem [shape: f32[32,1], index: 6, kind: input, shape index: {}]   ;;  %s790_s7 = inlined_call_operand.vmem [shape: f32[32,8], index: 7, kind: output, shape index: {}]  }
   0x1   :  { %v576_v0 = vld [vmem:[%s783_s1 + $0x78] sm:$0xff]   ;;  %575 = vset.pattern.permute.xlu1 %v605_v1  ;;  %574 = vset.pattern.permute.xlu0 %v605_v1  ;;  %v578_v3 = vld [vmem:[%s783_s1 + $0x70] sm:$0xff]   ;;  %v580_v5 = vld [vmem:[%s783_s1 + $0x68] sm:$0xff]  }
   0x2   :  { %v577_v2 = vld [vmem:[%s783_s1 + $0x38] sm:$0xff]   ;;  %524 = vmatprep.subr.bf16.mxu0 %v576_v0  ;;  %v579_v4 = vld [vmem:[%s783_s1 + $0x30] sm:$0xff]   ;;  %v581_v6 = vld [vmem:[%s783_s1 + $0x28] sm:$0xff]  }
   0x3   :  { %525 = vmatpush3.bf16.msra.mxu0 %v577_v2  ;;  %v582_v7 = vld [vmem:[%s783_s1 + $0x60] sm:$0xff]   ;;  %v584_v9 = vld [vmem:[%s783_s1 + $0x58] sm:$0xff]   ;;  %v590_v10 = vld [vmem:[%s783_s1 + $0x88] sm:$0xff]  }
   0x4   :  { %526 = vmatprep.subr.bf16.mxu0 %v578_v3  ;;  %v583_v8 = vld [vmem:[%s783_s1 + $0x20] sm:$0xff]   ;;  %v585_v11 = vld [vmem:[%s783_s1 + $0x18] sm:$0xff]   ;;  %v586_v12 = vld [vmem:[%s783_s1 + $0x50] sm:$0xff]   ;;  %559 = vmatprep.subr.bf16.mxu1 %v590_v10 }
   0x5   :  { %v587_v13 = vld [vmem:[%s783_s1 + $0x10] sm:$0xff]   ;;  %560 = vmatpush3.bf16.msra.mxu1 %v590_v10  ;;  %v593_v14 = vld [vmem:[%s783_s1 + $0x80] sm:$0xff]   ;;  %v588_v15 = vld [vmem:[%s783_s1 + $0x48] sm:$0xff]  }
   0x6   :  { %561 = vmatprep.subr.bf16.mxu1 %v593_v14  ;;  %v596_v16 = vld [vmem:[%s784_s0 + $0x4] ss:$12 sps:$4 sm:$0xff]   ;;  %v597_v17 = vld [vmem:[%s784_s0 + $0x8] ss:$12 sps:$4 sm:$0xff]   ;;  %v598_v18 = vld [vmem:[%s784_s0 + $0x20] ss:$12 sps:$4 sm:$0xff]  }
   0x7   :  { %527 = vmatpush3.bf16.msra.mxu0 %v579_v4  ;;  %248 = vmatprep.mubr.bf16.mxu0 %v596_v16  ;;  %v599_v19 = vld [vmem:[%s785_s5] sm:$0xff]   ;;  %v589_v20 = vld [vmem:[%s783_s1 + $0x8] sm:$0xff]   ;;  %v316_v23 = vld [vmem:[%s787_s2 + $0x10] sm:$0xff] }
   0x8   :  { %528 = vmatprep.subr.bf16.mxu0 %v580_v5  ;;  %563 = vmatprep.mubr.msk.bf16.mxu1 %vm209_vm0, %v597_v17  ;;  %v591_v21 = vld [vmem:[%s783_s1 + $0x40] sm:$0xff]   ;;  %v604_v26 = vld [vmem:[%s786_s4 + $0x8] sm:$0xff]   ;;  %v317_v27 = vld [vmem:[%s787_s2 + $0x18] sm:$0xff] }
   0x9   :  { %562 = vmatpush3.bf16.msra.mxu1 %v593_v14  ;;  %v603_v22 = vld [vmem:[%s786_s4] sm:$0xff]   ;;  %330 = vperm.xlu1 %575, %v316_v23   ;;  %v315_v28 = vld [vmem:[%s787_s2 + $0x8] sm:$0xff]  ;;  %v345_v33 = vld [vmem:[%s788_s3 + $0x18] sm:$0xff] }
   0xa   :  { %567 = vmatprep.subr.bf16.mxu1 %v599_v19  ;;  %v314_v24 = vld [vmem:[%s787_s2] sm:$0xff]  ;;  %v600_v30 = vld [vmem:[%s784_s0 + $0x1c] ss:$12 sps:$4 sm:$0xff]   ;;  %v344_v34 = vld [vmem:[%s788_s3 + $0x10] sm:$0xff] }
   0xb   :  { %529 = vmatpush3.bf16.msra.mxu0 %v581_v6  ;;  %v592_v25 = vld [vmem:[%s783_s1] sm:$0xff]   ;;  %320 = vperm.xlu0 %574, %v314_v24   ;;  %v343_v31 = vld [vmem:[%s788_s3 + $0x8] sm:$0xff]  ;;  %v459_v38 = vld [vmem:[%s789_s6 + $0x18] sm:$0xff] }
   0xc   :  { %530 = vmatprep.subr.bf16.mxu0 %v582_v7  ;;  %564 = vmatmul.mubr.msk.bf16.vlgmr.msra.gmra.mxu1 %vm209_vm0, %v598_v18  ;;  %v594_v29 = vld [vmem:[%s784_s0] ss:$12 sps:$4 sm:$0xff]   ;;  %v602_v35 = vld [vmem:[%s784_s0 + $0x18] ss:$12 sps:$4 sm:$0xff]   ;;  %v458_v39 = vld [vmem:[%s789_s6 + $0x10] sm:$0xff] }
   0xd   :  { %568 = vmatpush3.bf16.msra.mxu1 %v599_v19  ;;  %569 = vmatprep.mubr.msk.bf16.mxu1 %vm396_vm1, %v603_v22  ;;  %v342_v32 = vld [vmem:[%s788_s3] sm:$0xff]  ;;  %v457_v36 = vld [vmem:[%s789_s6 + $0x8] sm:$0xff] }
   0xe   :  { %335 = vperm.xlu1 %575, %v317_v27   ;;  %v456_v37 = vld [vmem:[%s789_s6] sm:$0xff] }
   0xf   :  { %531 = vmatpush3.bf16.msra.mxu0 %v583_v8  ;;  %325 = vperm.xlu0 %574, %v315_v28  }
  0x10   :  { %532 = vmatprep.subr.bf16.mxu0 %v584_v9 }
  0x12   :  { %353 = vperm.xlu1 %575, %v343_v31  }
  0x13   :  { %533 = vmatpush3.bf16.msra.mxu0 %v585_v11  ;;  %348 = vperm.xlu0 %574, %v342_v32  }
  0x14   :  { %534 = vmatprep.subr.bf16.mxu0 %v586_v12  ;;  %570 = vmatmul.mubr.msk.bf16.vlgmr.msra.gmra.mxu1 %vm396_vm1, %v604_v26 }
  0x16   :  { %363 = vperm.xlu1 %575, %v345_v33  }
  0x17   :  { %535 = vmatpush3.bf16.msra.mxu0 %v587_v13  ;;  %358 = vperm.xlu0 %574, %v344_v34  }
  0x18   :  { %536 = vmatprep.subr.bf16.mxu0 %v588_v15 }
  0x1a   :  { %467 = vperm.xlu1 %575, %v457_v36  }
  0x1b   :  { %537 = vmatpush3.bf16.msra.mxu0 %v589_v20  ;;  %462 = vperm.xlu0 %574, %v456_v37  }
  0x1c   :  { %538 = vmatprep.subr.bf16.mxu0 %v591_v21 }
  0x1e   :  { %477 = vperm.xlu1 %575, %v459_v38  }
  0x1f   :  { %539 = vmatpush3.bf16.msra.mxu0 %v592_v25  ;;  %472 = vperm.xlu0 %574, %v458_v39  }
  0x22   :  { %249 = vmatmul.mubr.bf16.vlgmr.msra.gmra.mxu0 %v594_v29 }
  0x23   :  { %256 = vmatprep.mubr.bf16.mxu0 %v600_v30 }
  0x2a   :  { %257 = vmatmul.mubr.bf16.gmra.mxu0 %v602_v35 }
  0x84   :  { %v331_v43 = vpop.permute.xlu1 %330 }
  0x86   :  { %v321_v40 = vpop.permute.xlu0 %320 }
  0x89   :  { %v336_v47 = vpop.permute.xlu1 %335 }
  0x8a   :  { %v326_v45 = vpop.permute.xlu0 %325 }
  0x8d   :  { %v354_v54 = vpop.permute.xlu1 %353 }
  0x8e   :  { %v349_v49 = vpop.permute.xlu0 %348 }
  0x91   :  { %v364_v5 = vpop.permute.xlu1 %363 }
  0x92   :  { %v359_v58 = vpop.permute.xlu0 %358 }
  0x95   :  { %v468_v20 = vpop.permute.xlu1 %467 }
  0x96   :  { %v463_v7 = vpop.permute.xlu0 %462 }
  0x99   :  { %v478_v30 = vpop.permute.xlu1 %477 }
  0x9a   :  { %v473_v26 = vpop.permute.xlu0 %472 }
  0xcc   :  { %v565_v41 = vpop.f32.mrf.mxu1 }
  0xce   :  { %v299_v42 = vpop.f32.mrf.mxu1 }
  0xd0   :  { %v566_v44 = vpop.f32.mrf.mxu1 }
  0xd2   :  { %v302_v46 = vpop.f32.mrf.mxu1 }
  0xd4   :  { %v571_v51 = vpop.f32.mrf.mxu1 }
  0xd6   :  { %v437_v57 = vpop.f32.mrf.mxu1 }
  0xd8   :  { %v572_v1 = vpop.f32.mrf.mxu1 }
  0xda   :  { %v440_v12 = vpop.f32.mrf.mxu1 }
  0xe2   :  { %v540_v48 = vpop.f32.mrf.mxu0 }
  0xe4   :  { %v541_v50 = vpop.f32.mrf.mxu0 }
  0xe5   :  { %v542_v52 = vadd.f32 %v541_v50, %v540_v48 }
  0xe6   :  { %v543_v53 = vpop.f32.mrf.mxu0 }
  0xe7   :  { %v300_v55 = vadd.f32 %v542_v52, %v299_v42 }
  0xe8   :  { %v544_v56 = vpop.f32.mrf.mxu0 }
  0xe9   :  { %v338_v59 = vmul.f32 %v321_v40, %v300_v55  ;;  %v545_v60 = vadd.f32 %v544_v56, %v543_v53 }
  0xea   :  { %v546_v61 = vpop.f32.mrf.mxu0 }
  0xeb   :  { %v303_v62 = vadd.f32 %v545_v60, %v302_v46  ;;  %v366_v63 = vadd.f32 %v349_v49, %v338_v59 }
  0xec   :  { %v547_v0 = vpop.f32.mrf.mxu0 }
  0xed   :  { %v339_v2 = vmul.f32 %v326_v45, %v303_v62  ;;  %v548_v3 = vadd.f32 %v547_v0, %v546_v61  ;;  %v370_v4 = vmax.f32 %v366_v63, 0.0 }
  0xee   :  { %v549_v6 = vpop.f32.mrf.mxu0 }
  0xef   :  { %v308_v8 = vadd.f32 %v565_v41, %v548_v3  ;;  %v452_v9 = vadd.f32 %v437_v57, %v370_v4  ;;  %v367_v10 = vadd.f32 %v354_v54, %v339_v2 }
  0xf0   :  { %v550_v11 = vpop.f32.mrf.mxu0 }
  0xf1   :  { %v340_v13 = vmul.f32 %v331_v43, %v308_v8  ;;  %v480_v14 = vadd.f32 %v463_v7, %v452_v9  ;;  %v551_v15 = vadd.f32 %v550_v11, %v549_v6  ;;  %v371_v16 = vmax.f32 %v367_v10, 0.0 }
  0xf3   :  { %v368_v17 = vadd.f32 %v359_v58, %v340_v13  ;;  %485 = vst.msk [vmem:[%s790_s7] sm:$0xff] %vm484_vm2, %v480_v14  ;;  %v311_v18 = vadd.f32 %v566_v44, %v551_v15  ;;  %v453_v19 = vadd.f32 %v440_v12, %v371_v16 }
  0xf5   :  { %v372_v21 = vmax.f32 %v368_v17, 0.0  ;;  %v341_v22 = vmul.f32 %v336_v47, %v311_v18  ;;  %v481_v23 = vadd.f32 %v468_v20, %v453_v19 }
  0xf7   :  { %v454_v24 = vadd.f32 %v571_v51, %v372_v21  ;;  %v369_v25 = vadd.f32 %v364_v5, %v341_v22  ;;  %486 = vst.msk [vmem:[%s790_s7 + $0x8] sm:$0xff] %vm484_vm2, %v481_v23 }
  0xf9   :  { %v482_v27 = vadd.f32 %v473_v26, %v454_v24  ;;  %v373_v28 = vmax.f32 %v369_v25, 0.0 }
  0xfb   :  { %487 = vst.msk [vmem:[%s790_s7 + $0x10] sm:$0xff] %vm484_vm2, %v482_v27  ;;  %v455_v29 = vadd.f32 %v572_v1, %v373_v28 }
  0xfd   :  { %v483_v31 = vadd.f32 %v478_v30, %v455_v29 }
  0xff   :  { %488 = vst.msk [vmem:[%s790_s7 + $0x18] sm:$0xff] %vm484_vm2, %v483_v31 }

// kernel: unet_forward.38
= control target key start
LH: loop header
LB: loop body
LE: loop exit
PB: predicated region body
PF: predicated region fallthrough
CT: control target
= control target key end

     0   :  { %v659_v1 = vmov 0   ;;  %vm238_vm0 = vcmask 261120   ;;  %vm501_vm1 = vcmask 15360   ;;  %s868_s1 = inlined_call_operand.vmem [shape: bf16[288,2], index: 1, kind: input, shape index: {}]   ;;  %s869_s0 = inlined_call_operand.vmem [shape: bf16[64,288], index: 0, kind: input, shape index: {}]   ;;  %s870_s2 = inlined_call_operand.vmem [shape: f32[64,1], index: 2, kind: input, shape index: {}]   ;;  %s871_s3 = inlined_call_operand.vmem [shape: f32[64,1], index: 3, kind: input, shape index: {}]   ;;  %s872_s4 = inlined_call_operand.vmem [shape: f32[64,2], index: 4, kind: output, shape index: {}]  }
   0x1   :  { %v625_v0 = vld [vmem:[%s868_s1 + $0x78] sm:$0xff]   ;;  %624 = vset.pattern.permute.xlu1 %v659_v1  ;;  %623 = vset.pattern.permute.xlu0 %v659_v1  ;;  %v627_v3 = vld [vmem:[%s868_s1 + $0x70] sm:$0xff]   ;;  %v629_v5 = vld [vmem:[%s868_s1 + $0x68] sm:$0xff]  }
   0x2   :  { %v626_v2 = vld [vmem:[%s868_s1 + $0x38] sm:$0xff]   ;;  %548 = vmatprep.subr.bf16.mxu0 %v625_v0  ;;  %606 = vmatprep.subr.bf16.mxu1 %v625_v0  ;;  %v628_v4 = vld [vmem:[%s868_s1 + $0x30] sm:$0xff]   ;;  %v630_v6 = vld [vmem:[%s868_s1 + $0x28] sm:$0xff]  }
   0x3   :  { %549 = vmatpush3.bf16.msra.mxu0 %v626_v2  ;;  %614 = vmatpush3.bf16.msra.mxu1 %v626_v2  ;;  %v631_v7 = vld [vmem:[%s868_s1 + $0x60] sm:$0xff]   ;;  %v633_v9 = vld [vmem:[%s868_s1 + $0x58] sm:$0xff]   ;;  %v635_v11 = vld [vmem:[%s868_s1 + $0x50] sm:$0xff]  }
   0x4   :  { %550 = vmatprep.subr.bf16.mxu0 %v627_v3  ;;  %607 = vmatprep.subr.bf16.mxu1 %v627_v3  ;;  %v632_v8 = vld [vmem:[%s868_s1 + $0x20] sm:$0xff]   ;;  %v634_v10 = vld [vmem:[%s868_s1 + $0x18] sm:$0xff]   ;;  %v636_v14 = vld [vmem:[%s868_s1 + $0x10] sm:$0xff]  }
   0x5   :  { %v643_v12 = vld [vmem:[%s869_s0 + $0x4] ss:$12 sps:$4 sm:$0xff]   ;;  %v646_v13 = vld [vmem:[%s869_s0 + $0x4c] ss:$12 sps:$4 sm:$0xff]   ;;  %v644_v23 = vld [vmem:[%s869_s0 + $0x48] ss:$12 sps:$4 sm:$0xff]  }
   0x6   :  { %v637_v15 = vld [vmem:[%s868_s1 + $0x48] sm:$0xff]   ;;  %283 = vmatprep.mubr.bf16.mxu0 %v643_v12  ;;  %307 = vmatprep.mubr.bf16.mxu1 %v646_v13  ;;  %v639_v17 = vld [vmem:[%s868_s1 + $0x40] sm:$0xff]   ;;  %v383_v19 = vld [vmem:[%s870_s2 + $0x10] sm:$0xff] }
   0x7   :  { %551 = vmatpush3.bf16.msra.mxu0 %v628_v4  ;;  %615 = vmatpush3.bf16.msra.mxu1 %v628_v4  ;;  %v638_v16 = vld [vmem:[%s868_s1 + $0x8] sm:$0xff]   ;;  %v640_v18 = vld [vmem:[%s868_s1] sm:$0xff]   ;;  %v384_v24 = vld [vmem:[%s870_s2 + $0x18] sm:$0xff] }
   0x8   :  { %552 = vmatprep.subr.bf16.mxu0 %v629_v5  ;;  %608 = vmatprep.subr.bf16.mxu1 %v629_v5  ;;  %v381_v20 = vld [vmem:[%s870_s2] sm:$0xff]  ;;  %v647_v21 = vld [vmem:[%s868_s1 + $0x88] sm:$0xff]   ;;  %v388_v33 = vld [vmem:[%s870_s2 + $0x38] sm:$0xff] }
   0x9   :  { %v641_v22 = vld [vmem:[%s869_s0] ss:$12 sps:$4 sm:$0xff]   ;;  %401 = vperm.xlu1 %624, %v383_v19   ;;  %391 = vperm.xlu0 %623, %v381_v20   ;;  %v649_v26 = vld [vmem:[%s869_s0 + $0x1c] ss:$12 sps:$4 sm:$0xff]   ;;  %v652_v31 = vld [vmem:[%s869_s0 + $0x18] ss:$12 sps:$4 sm:$0xff]  }
   0xa   :  { %v382_v25 = vld [vmem:[%s870_s2 + $0x8] sm:$0xff]  ;;  %v648_v27 = vld [vmem:[%s868_s1 + $0x80] sm:$0xff]   ;;  %v387_v34 = vld [vmem:[%s870_s2 + $0x30] sm:$0xff] }
   0xb   :  { %553 = vmatpush3.bf16.msra.mxu0 %v630_v6  ;;  %616 = vmatpush3.bf16.msra.mxu1 %v630_v6  ;;  %v651_v28 = vld [vmem:[%s869_s0 + $0x8] ss:$12 sps:$4 sm:$0xff]   ;;  %v385_v30 = vld [vmem:[%s870_s2 + $0x20] sm:$0xff]  ;;  %v657_v39 = vld [vmem:[%s869_s0 + $0x30] ss:$12 sps:$4 sm:$0xff]  }
   0xc   :  { %554 = vmatprep.subr.bf16.mxu0 %v631_v7  ;;  %609 = vmatprep.subr.bf16.mxu1 %v631_v7  ;;  %v386_v29 = vld [vmem:[%s870_s2 + $0x28] sm:$0xff]  ;;  %v654_v35 = vld [vmem:[%s869_s0 + $0x34] ss:$12 sps:$4 sm:$0xff]   ;;  %v656_v36 = vld [vmem:[%s869_s0 + $0x38] ss:$12 sps:$4 sm:$0xff]  }
   0xd   :  { %406 = vperm.xlu1 %624, %v384_v24   ;;  %396 = vperm.xlu0 %623, %v382_v25   ;;  %v653_v32 = vld [vmem:[%s869_s0 + $0x20] ss:$12 sps:$4 sm:$0xff]   ;;  %v658_v40 = vld [vmem:[%s869_s0 + $0x50] ss:$12 sps:$4 sm:$0xff]  }
   0xe   :  { %v438_v37 = vld [vmem:[%s871_s3 + $0x8] sm:$0xff]  ;;  %v437_v38 = vld [vmem:[%s871_s3] sm:$0xff]  ;;  %v440_v41 = vld [vmem:[%s871_s3 + $0x18] sm:$0xff] }
   0xf   :  { %555 = vmatpush3.bf16.msra.mxu0 %v632_v8  ;;  %617 = vmatpush3.bf16.msra.mxu1 %v632_v8  ;;  %v439_v42 = vld [vmem:[%s871_s3 + $0x10] sm:$0xff]  ;;  %v442_v43 = vld [vmem:[%s871_s3 + $0x28] sm:$0xff]  ;;  %v441_v44 = vld [vmem:[%s871_s3 + $0x20] sm:$0xff] }
  0x10   :  { %556 = vmatprep.subr.bf16.mxu0 %v633_v9  ;;  %610 = vmatprep.subr.bf16.mxu1 %v633_v9  ;;  %v444_v45 = vld [vmem:[%s871_s3 + $0x38] sm:$0xff]  ;;  %v443_v46 = vld [vmem:[%s871_s3 + $0x30] sm:$0xff] }
  0x11   :  { %416 = vperm.xlu1 %624, %v386_v29   ;;  %411 = vperm.xlu0 %623, %v385_v30  }
  0x13   :  { %557 = vmatpush3.bf16.msra.mxu0 %v634_v10  ;;  %618 = vmatpush3.bf16.msra.mxu1 %v634_v10 }
  0x14   :  { %558 = vmatprep.subr.bf16.mxu0 %v635_v11  ;;  %611 = vmatprep.subr.bf16.mxu1 %v635_v11 }
  0x15   :  { %426 = vperm.xlu1 %624, %v388_v33   ;;  %421 = vperm.xlu0 %623, %v387_v34  }
  0x17   :  { %559 = vmatpush3.bf16.msra.mxu0 %v636_v14  ;;  %619 = vmatpush3.bf16.msra.mxu1 %v636_v14 }
  0x18   :  { %560 = vmatprep.subr.bf16.mxu0 %v637_v15  ;;  %612 = vmatprep.subr.bf16.mxu1 %v637_v15 }
  0x19   :  { %452 = vperm.xlu1 %624, %v438_v37   ;;  %447 = vperm.xlu0 %623, %v437_v38  }
  0x1b   :  { %561 = vmatpush3.bf16.msra.mxu0 %v638_v16  ;;  %620 = vmatpush3.bf16.msra.mxu1 %v638_v16 }
  0x1c   :  { %562 = vmatprep.subr.bf16.mxu0 %v639_v17  ;;  %613 = vmatprep.subr.bf16.mxu1 %v639_v17 }
  0x1d   :  { %462 = vperm.xlu1 %624, %v440_v41   ;;  %457 = vperm.xlu0 %623, %v439_v42  }
  0x1f   :  { %563 = vmatpush3.bf16.msra.mxu0 %v640_v18  ;;  %621 = vmatpush3.bf16.msra.mxu1 %v640_v18 }
  0x20   :  { %594 = vmatprep.subr.bf16.mxu1 %v647_v21 }
  0x21   :  { %472 = vperm.xlu1 %624, %v442_v43   ;;  %467 = vperm.xlu0 %623, %v441_v44  }
  0x22   :  { %284 = vmatmul.mubr.bf16.vlgmr.msra.gmra.mxu0 %v641_v22  ;;  %308 = vmatmul.mubr.bf16.vlgmr.msra.gmra.mxu1 %v644_v23 }
  0x23   :  { %595 = vmatpush3.bf16.msra.mxu1 %v647_v21  ;;  %291 = vmatprep.mubr.bf16.mxu0 %v649_v26 }
  0x24   :  { %596 = vmatprep.subr.bf16.mxu1 %v648_v27  ;;  %598 = vmatprep.mubr.msk.bf16.mxu1 %vm238_vm0, %v651_v28 }
  0x25   :  { %482 = vperm.xlu1 %624, %v444_v45   ;;  %477 = vperm.xlu0 %623, %v443_v46  }
  0x27   :  { %597 = vmatpush3.bf16.msra.mxu1 %v648_v27 }
  0x2a   :  { %292 = vmatmul.mubr.bf16.gmra.mxu0 %v652_v31  ;;  %599 = vmatmul.mubr.msk.bf16.vlgmr.msra.gmra.mxu1 %vm238_vm0, %v653_v32 }
  0x2b   :  { %299 = vmatprep.mubr.bf16.mxu0 %v654_v35  ;;  %602 = vmatprep.mubr.msk.bf16.mxu1 %vm238_vm0, %v656_v36 }
  0x32   :  { %300 = vmatmul.mubr.bf16.gmra.mxu0 %v657_v39  ;;  %603 = vmatmul.mubr.msk.bf16.gmra.mxu1 %vm238_vm0, %v658_v40 }
  0x84   :  { %v392_v47 = vpop.permute.xlu0 %391  ;;  %v402_v48 = vpop.permute.xlu1 %401 }
  0x88   :  { %v397_v49 = vpop.permute.xlu0 %396  ;;  %v407_v50 = vpop.permute.xlu1 %406 }
  0x8c   :  { %v827_v51 = vpop.permute.xlu0 %411  ;;  %v829_v52 = vpop.permute.xlu1 %416 }
  0x90   :  { %v422_v53 = vpop.permute.xlu0 %421  ;;  %v831_v54 = vpop.permute.xlu1 %426 }
  0x94   :  { %v448_v59 = vpop.permute.xlu0 %447  ;;  %v453_v62 = vpop.permute.xlu1 %452 }
  0x98   :  { %v458_v3 = vpop.permute.xlu0 %457  ;;  %v463_v7 = vpop.permute.xlu1 %462 }
  0x9c   :  { %v468_v17 = vpop.permute.xlu0 %467  ;;  %v473_v25 = vpop.permute.xlu1 %472 }
  0xa0   :  { %v478_v41 = vpop.permute.xlu0 %477 }
  0xe2   :  { %v564_v55 = vpop.f32.mrf.mxu0  ;;  %v582_v56 = vpop.f32.mrf.mxu1 }
  0xe4   :  { %v565_v57 = vpop.f32.mrf.mxu0  ;;  %v583_v58 = vpop.f32.mrf.mxu1 }
  0xe5   :  { %v566_v4 = vadd.f32 %v565_v57, %v564_v55  ;;  %v584_v22 = vadd.f32 %v583_v58, %v582_v56  ;;  %v483_v55 = vpop.permute.xlu1 %482 }
  0xe6   :  { %v567_v60 = vpop.f32.mrf.mxu0  ;;  %v585_v61 = vpop.f32.mrf.mxu1 }
  0xe8   :  { %v568_v63 = vpop.f32.mrf.mxu0  ;;  %v586_v0 = vpop.f32.mrf.mxu1 }
  0xe9   :  { %v569_v12 = vadd.f32 %v568_v63, %v567_v60  ;;  %v587_v30 = vadd.f32 %v586_v0, %v585_v61 }
  0xea   :  { %v570_v1 = vpop.f32.mrf.mxu0  ;;  %v600_v2 = vpop.f32.mrf.mxu1 }
  0xec   :  { %v571_v5 = vpop.f32.mrf.mxu0  ;;  %v350_v6 = vpop.f32.mrf.mxu1 }
  0xed   :  { %v572_v8 = vadd.f32 %v571_v5, %v570_v1  ;;  %v351_v9 = vadd.f32 %v566_v4, %v350_v6 }
  0xee   :  { %v573_v10 = vpop.f32.mrf.mxu0  ;;  %v601_v11 = vpop.f32.mrf.mxu1 }
  0xef   :  { %v359_v13 = vadd.f32 %v600_v2, %v572_v8  ;;  %v429_v14 = vmul.f32 %v392_v47, %v351_v9 }
  0xf0   :  { %v574_v15 = vpop.f32.mrf.mxu0  ;;  %v353_v16 = vpop.f32.mrf.mxu1 }
  0xf1   :  { %v431_v18 = vmul.f32 %v402_v48, %v359_v13  ;;  %v485_v19 = vadd.f32 %v448_v59, %v429_v14  ;;  %v575_v20 = vadd.f32 %v574_v15, %v573_v10  ;;  %v354_v21 = vadd.f32 %v569_v12, %v353_v16 }
  0xf2   :  { %v576_v23 = vpop.f32.mrf.mxu0  ;;  %v604_v24 = vpop.f32.mrf.mxu1 }
  0xf3   :  { %v487_v26 = vadd.f32 %v458_v3, %v431_v18  ;;  %v493_v27 = vmax.f32 %v485_v19, 0.0  ;;  %v362_v28 = vadd.f32 %v601_v11, %v575_v20  ;;  %v430_v29 = vmul.f32 %v397_v49, %v354_v21 }
  0xf4   :  { %v375_v31 = vadd.f32 %v604_v24, %v584_v22  ;;  %v577_v32 = vpop.f32.mrf.mxu0  ;;  %v366_v33 = vpop.f32.mrf.mxu1 }
  0xf5   :  { %v495_v34 = vmax.f32 %v487_v26, 0.0  ;;  %502 = vst.msk [vmem:[%s872_s4] sm:$0xff] %vm501_vm1, %v493_v27  ;;  %v432_v35 = vmul.f32 %v407_v50, %v362_v28  ;;  %v486_v36 = vadd.f32 %v453_v62, %v430_v29  ;;  %v578_v37 = vadd.f32 %v577_v32, %v576_v23 }
  0xf6   :  { %v435_v38 = vmul.f32 %v422_v53, %v375_v31  ;;  %v579_v39 = vpop.f32.mrf.mxu0  ;;  %v605_v40 = vpop.f32.mrf.mxu1 }
  0xf7   :  { %504 = vst.msk [vmem:[%s872_s4 + $0x10] sm:$0xff] %vm501_vm1, %v495_v34  ;;  %v488_v42 = vadd.f32 %v463_v7, %v432_v35  ;;  %v494_v43 = vmax.f32 %v486_v36, 0.0  ;;  %v367_v44 = vadd.f32 %v578_v37, %v366_v33  ;;  %v378_v45 = vadd.f32 %v605_v40, %v587_v30 }
  0xf8   :  { %v491_v46 = vadd.f32 %v478_v41, %v435_v38  ;;  %v580_v47 = vpop.f32.mrf.mxu0  ;;  %v369_v57 = vpop.f32.mrf.mxu1 }
  0xf9   :  { %v496_v48 = vmax.f32 %v488_v42, 0.0  ;;  %503 = vst.msk [vmem:[%s872_s4 + $0x8] sm:$0xff] %vm501_vm1, %v494_v43  ;;  %v433_v49 = vmul.f32 %v827_v51, %v367_v44  ;;  %v436_v50 = vmul.f32 %v831_v54, %v378_v45  ;;  %v581_v53 = vadd.f32 %v580_v47, %v579_v39 }
  0xfa   :  { %v499_v56 = vmax.f32 %v491_v46, 0.0 }
  0xfb   :  { %505 = vst.msk [vmem:[%s872_s4 + $0x18] sm:$0xff] %vm501_vm1, %v496_v48  ;;  %v489_v58 = vadd.f32 %v468_v17, %v433_v49  ;;  %v492_v59 = vadd.f32 %v483_v55, %v436_v50  ;;  %v370_v60 = vadd.f32 %v581_v53, %v369_v57 }
  0xfc   :  { %508 = vst.msk [vmem:[%s872_s4 + $0x30] sm:$0xff] %vm501_vm1, %v499_v56 }
  0xfd   :  { %v497_v51 = vmax.f32 %v489_v58, 0.0  ;;  %v500_v61 = vmax.f32 %v492_v59, 0.0  ;;  %v434_v54 = vmul.f32 %v829_v52, %v370_v60 }
  0xff   :  { %506 = vst.msk [vmem:[%s872_s4 + $0x20] sm:$0xff] %vm501_vm1, %v497_v51  ;;  %509 = vst.msk [vmem:[%s872_s4 + $0x38] sm:$0xff] %vm501_vm1, %v500_v61  ;;  %v490_v62 = vadd.f32 %v473_v25, %v434_v54 }
 0x101   :  { %v498_v63 = vmax.f32 %v490_v62, 0.0 }
 0x103   :  { %507 = vst.msk [vmem:[%s872_s4 + $0x28] sm:$0xff] %vm501_vm1, %v498_v63 }

// kernel: unet_forward.39
= control target key start
LH: loop header
LB: loop body
LE: loop exit
PB: predicated region body
PF: predicated region fallthrough
CT: control target
= control target key end

     0   :  { %v1231_v1 = vmov 0   ;;  %vm439_vm0 = vcmask 523264   ;;  %vm811_vm1 = vcmask 261120   ;;  %vm953_vm2 = vcmask 15360   ;;  %s1618_s1 = inlined_call_operand.vmem [shape: bf16[576,2], index: 1, kind: input, shape index: {}]   ;;  %s1619_s0 = inlined_call_operand.vmem [shape: bf16[64,576], index: 0, kind: input, shape index: {}]   ;;  %s1620_s5 = inlined_call_operand.vmem [shape: bf16[32,2], index: 5, kind: input, shape index: {}]   ;;  %s1621_s4 = inlined_call_operand.vmem [shape: bf16[64,32], index: 4, kind: input, shape index: {}]   ;;  %s1622_s2 = inlined_call_operand.vmem [shape: f32[64,1], index: 2, kind: input, shape index: {}]   ;;  %s1623_s3 = inlined_call_operand.vmem [shape: f32[64,1], index: 3, kind: input, shape index: {}]   ;;  %s1624_s6 = inlined_call_operand.vmem [shape: f32[64,1], index: 6, kind: input, shape index: {}]   ;;  %s1625_s7 = inlined_call_operand.vmem [shape: f32[64,2], index: 7, kind: output, shape index: {}]  }
   0x1   :  { %v1161_v0 = vld [vmem:[%s1618_s1 + $0x78] sm:$0xff]   ;;  %1160 = vset.pattern.permute.xlu1 %v1231_v1  ;;  %1159 = vset.pattern.permute.xlu0 %v1231_v1  ;;  %v1165_v5 = vld [vmem:[%s1618_s1 + $0x70] sm:$0xff]   ;;  %v1169_v9 = vld [vmem:[%s1618_s1 + $0x68] sm:$0xff]  }
   0x2   :  { %v1162_v2 = vld [vmem:[%s1618_s1 + $0xf8] sm:$0xff]   ;;  %1036 = vmatprep.subr.bf16.mxu0 %v1161_v0  ;;  %v1166_v6 = vld [vmem:[%s1618_s1 + $0xf0] sm:$0xff]   ;;  %v1170_v10 = vld [vmem:[%s1618_s1 + $0xe8] sm:$0xff]  }
   0x3   :  { %v1163_v3 = vld [vmem:[%s1618_s1 + $0x38] sm:$0xff]   ;;  %1076 = vmatprep.subr.bf16.mxu1 %v1162_v2  ;;  %v1167_v7 = vld [vmem:[%s1618_s1 + $0x30] sm:$0xff]   ;;  %v1171_v11 = vld [vmem:[%s1618_s1 + $0x28] sm:$0xff]  }
   0x4   :  { %v1164_v4 = vld [vmem:[%s1618_s1 + $0xb8] sm:$0xff]   ;;  %1037 = vmatpush3.bf16.msra.mxu0 %v1163_v3  ;;  %v1168_v8 = vld [vmem:[%s1618_s1 + $0xb0] sm:$0xff]   ;;  %v1172_v12 = vld [vmem:[%s1618_s1 + $0xa8] sm:$0xff]  }
   0x5   :  { %1077 = vmatpush3.bf16.msra.mxu1 %v1164_v4  ;;  %1038 = vmatprep.subr.bf16.mxu0 %v1165_v5  ;;  %v1173_v13 = vld [vmem:[%s1618_s1 + $0x60] sm:$0xff]   ;;  %v1177_v17 = vld [vmem:[%s1618_s1 + $0x58] sm:$0xff]   ;;  %v1181_v21 = vld [vmem:[%s1618_s1 + $0x50] sm:$0xff]  }
   0x6   :  { %1078 = vmatprep.subr.bf16.mxu1 %v1166_v6  ;;  %v1174_v14 = vld [vmem:[%s1618_s1 + $0xe0] sm:$0xff]   ;;  %v1178_v18 = vld [vmem:[%s1618_s1 + $0xd8] sm:$0xff]   ;;  %v1182_v22 = vld [vmem:[%s1618_s1 + $0xd0] sm:$0xff]  }
   0x7   :  { %v1175_v15 = vld [vmem:[%s1618_s1 + $0x20] sm:$0xff]   ;;  %v1179_v19 = vld [vmem:[%s1618_s1 + $0x18] sm:$0xff]   ;;  %v1183_v23 = vld [vmem:[%s1618_s1 + $0x10] sm:$0xff]  }
   0x8   :  { %1039 = vmatpush3.bf16.msra.mxu0 %v1167_v7  ;;  %v1176_v16 = vld [vmem:[%s1618_s1 + $0xa0] sm:$0xff]   ;;  %v1180_v20 = vld [vmem:[%s1618_s1 + $0x98] sm:$0xff]   ;;  %v1184_v24 = vld [vmem:[%s1618_s1 + $0x90] sm:$0xff]  }
   0x9   :  { %1079 = vmatpush3.bf16.msra.mxu1 %v1168_v8  ;;  %1040 = vmatprep.subr.bf16.mxu0 %v1169_v9  ;;  %v1185_v25 = vld [vmem:[%s1618_s1 + $0x48] sm:$0xff]   ;;  %v1189_v29 = vld [vmem:[%s1618_s1 + $0x40] sm:$0xff]   ;;  %v1199_v37 = vld [vmem:[%s1618_s1 + $0x118] sm:$0xff]  }
   0xa   :  { %1080 = vmatprep.subr.bf16.mxu1 %v1170_v10  ;;  %v1186_v26 = vld [vmem:[%s1618_s1 + $0xc8] sm:$0xff]   ;;  %v1190_v30 = vld [vmem:[%s1618_s1 + $0xc0] sm:$0xff]   ;;  %v1206_v42 = vld [vmem:[%s1618_s1 + $0x110] sm:$0xff]  }
   0xb   :  { %v1187_v27 = vld [vmem:[%s1618_s1 + $0x8] sm:$0xff]   ;;  %v1191_v31 = vld [vmem:[%s1618_s1] sm:$0xff]   ;;  %v1210_v45 = vld [vmem:[%s1619_s0 + $0x5c] ss:$20 sps:$4 sm:$0xff]  }
   0xc   :  { %1041 = vmatpush3.bf16.msra.mxu0 %v1171_v11  ;;  %v1188_v28 = vld [vmem:[%s1618_s1 + $0x88] sm:$0xff]   ;;  %v1192_v32 = vld [vmem:[%s1618_s1 + $0x80] sm:$0xff]   ;;  %v1215_v51 = vld [vmem:[%s1619_s0 + $0x7c] ss:$20 sps:$4 sm:$0xff]  }
   0xd   :  { %1081 = vmatpush3.bf16.msra.mxu1 %v1172_v12  ;;  %1042 = vmatprep.subr.bf16.mxu0 %v1173_v13  ;;  %v1193_v33 = vld [vmem:[%s1619_s0] ss:$20 sps:$4 sm:$0xff]   ;;  %v1195_v34 = vld [vmem:[%s1619_s0 + $0x4] ss:$20 sps:$4 sm:$0xff]   ;;  %v1196_v35 = vld [vmem:[%s1619_s0 + $0x8] ss:$20 sps:$4 sm:$0xff]  }
   0xe   :  { %1082 = vmatprep.subr.bf16.mxu1 %v1174_v14  ;;  %v1198_v36 = vld [vmem:[%s1619_s0 + $0xc] ss:$20 sps:$4 sm:$0xff]   ;;  %484 = vmatprep.mubr.bf16.mxu0 %v1195_v34  ;;  %v1202_v39 = vld [vmem:[%s1619_s0 + $0x34] ss:$20 sps:$4 sm:$0xff]   ;;  %v1205_v41 = vld [vmem:[%s1619_s0 + $0x30] ss:$20 sps:$4 sm:$0xff]  }
   0xf   :  { %549 = vmatprep.mubr.bf16.mxu1 %v1198_v36  ;;  %v1200_v38 = vld [vmem:[%s1619_s0 + $0x2c] ss:$20 sps:$4 sm:$0xff]   ;;  %v1204_v40 = vld [vmem:[%s1619_s0 + $0x28] ss:$20 sps:$4 sm:$0xff]   ;;  %v1212_v47 = vld [vmem:[%s1619_s0 + $0x50] ss:$20 sps:$4 sm:$0xff]  }
  0x10   :  { %1043 = vmatpush3.bf16.msra.mxu0 %v1175_v15  ;;  %v1207_v43 = vld [vmem:[%s1620_s5 + $0x8] sm:$0xff]   ;;  %v1221_v49 = vld [vmem:[%s1618_s1 + $0x100] sm:$0xff]   ;;  %v649_v53 = vld [vmem:[%s1622_s2 + $0x10] sm:$0xff] }
  0x11   :  { %1083 = vmatpush3.bf16.msra.mxu1 %v1176_v16  ;;  %1044 = vmatprep.subr.bf16.mxu0 %v1177_v17  ;;  %v1208_v44 = vld [vmem:[%s1619_s0 + $0x54] ss:$20 sps:$4 sm:$0xff]   ;;  %v1213_v48 = vld [vmem:[%s1619_s0 + $0x58] ss:$20 sps:$4 sm:$0xff]   ;;  %v1222_v50 = vld [vmem:[%s1620_s5] sm:$0xff]  }
  0x12   :  { %1084 = vmatprep.subr.bf16.mxu1 %v1178_v18  ;;  %v1214_v46 = vld [vmem:[%s1618_s1 + $0x108] sm:$0xff]   ;;  %v1217_v52 = vld [vmem:[%s1619_s0 + $0x84] ss:$20 sps:$4 sm:$0xff]   ;;  %667 = vperm.xlu1 %1160, %v649_v53   ;;  %v1220_v56 = vld [vmem:[%s1619_s0 + $0x80] ss:$20 sps:$4 sm:$0xff]  }
  0x13   :  { %v647_v54 = vld [vmem:[%s1622_s2] sm:$0xff]  ;;  %v1219_v55 = vld [vmem:[%s1619_s0 + $0x78] ss:$20 sps:$4 sm:$0xff]   ;;  %v653_v1 = vld [vmem:[%s1622_s2 + $0x30] sm:$0xff] }
  0x14   :  { %1045 = vmatpush3.bf16.msra.mxu0 %v1179_v19  ;;  %657 = vperm.xlu0 %1159, %v647_v54   ;;  %v650_v57 = vld [vmem:[%s1622_s2 + $0x18] sm:$0xff]  ;;  %v648_v58 = vld [vmem:[%s1622_s2 + $0x8] sm:$0xff]  ;;  %v1223_v59 = vld [vmem:[%s1619_s0 + $0x10] ss:$20 sps:$4 sm:$0xff]  }
  0x15   :  { %1085 = vmatpush3.bf16.msra.mxu1 %v1180_v20  ;;  %1046 = vmatprep.subr.bf16.mxu0 %v1181_v21  ;;  %v1225_v60 = vld [vmem:[%s1621_s4] sm:$0xff]   ;;  %v652_v61 = vld [vmem:[%s1622_s2 + $0x28] sm:$0xff]  ;;  %v654_v63 = vld [vmem:[%s1622_s2 + $0x38] sm:$0xff] }
  0x16   :  { %1086 = vmatprep.subr.bf16.mxu1 %v1182_v22  ;;  %672 = vperm.xlu1 %1160, %v650_v57   ;;  %v651_v62 = vld [vmem:[%s1622_s2 + $0x20] sm:$0xff]  ;;  %v1224_v0 = vld [vmem:[%s1619_s0 + $0x38] ss:$20 sps:$4 sm:$0xff]   ;;  %v1229_v4 = vld [vmem:[%s1621_s4 + $0x10] sm:$0xff]  }
  0x17   :  { %v1226_v2 = vld [vmem:[%s1621_s4 + $0x8] sm:$0xff]   ;;  %v1227_v3 = vld [vmem:[%s1619_s0 + $0x60] ss:$20 sps:$4 sm:$0xff]   ;;  %v706_v7 = vld [vmem:[%s1623_s3 + $0x18] sm:$0xff] }
  0x18   :  { %1047 = vmatpush3.bf16.msra.mxu0 %v1183_v23  ;;  %662 = vperm.xlu0 %1159, %v648_v58   ;;  %v704_v5 = vld [vmem:[%s1623_s3 + $0x8] sm:$0xff]  ;;  %v703_v6 = vld [vmem:[%s1623_s3] sm:$0xff]  ;;  %v705_v9 = vld [vmem:[%s1623_s3 + $0x10] sm:$0xff] }
  0x19   :  { %1087 = vmatpush3.bf16.msra.mxu1 %v1184_v24  ;;  %1048 = vmatprep.subr.bf16.mxu0 %v1185_v25  ;;  %v1228_v8 = vld [vmem:[%s1619_s0 + $0x88] ss:$20 sps:$4 sm:$0xff]   ;;  %v707_v12 = vld [vmem:[%s1623_s3 + $0x20] sm:$0xff]  ;;  %v709_v14 = vld [vmem:[%s1623_s3 + $0x30] sm:$0xff] }
  0x1a   :  { %1088 = vmatprep.subr.bf16.mxu1 %v1186_v26  ;;  %682 = vperm.xlu1 %1160, %v652_v61   ;;  %v1230_v10 = vld [vmem:[%s1621_s4 + $0x18] sm:$0xff]   ;;  %v708_v11 = vld [vmem:[%s1623_s3 + $0x28] sm:$0xff]  ;;  %v897_v16 = vld [vmem:[%s1624_s6] sm:$0xff] }
  0x1b   :  { %v710_v13 = vld [vmem:[%s1623_s3 + $0x38] sm:$0xff]  ;;  %v898_v15 = vld [vmem:[%s1624_s6 + $0x8] sm:$0xff]  ;;  %v899_v18 = vld [vmem:[%s1624_s6 + $0x10] sm:$0xff] }
  0x1c   :  { %1049 = vmatpush3.bf16.msra.mxu0 %v1187_v27  ;;  %677 = vperm.xlu0 %1159, %v651_v62   ;;  %v900_v17 = vld [vmem:[%s1624_s6 + $0x18] sm:$0xff]  ;;  %v902_v19 = vld [vmem:[%s1624_s6 + $0x28] sm:$0xff]  ;;  %v901_v20 = vld [vmem:[%s1624_s6 + $0x20] sm:$0xff] }
  0x1d   :  { %1089 = vmatpush3.bf16.msra.mxu1 %v1188_v28  ;;  %1050 = vmatprep.subr.bf16.mxu0 %v1189_v29  ;;  %v904_v21 = vld [vmem:[%s1624_s6 + $0x38] sm:$0xff]  ;;  %v903_v22 = vld [vmem:[%s1624_s6 + $0x30] sm:$0xff] }
  0x1e   :  { %1090 = vmatprep.subr.bf16.mxu1 %v1190_v30  ;;  %692 = vperm.xlu1 %1160, %v654_v63  }
  0x20   :  { %1051 = vmatpush3.bf16.msra.mxu0 %v1191_v31  ;;  %687 = vperm.xlu0 %1159, %v653_v1  }
  0x21   :  { %1091 = vmatpush3.bf16.msra.mxu1 %v1192_v32  ;;  %1130 = vmatprep.subr.bf16.mxu0 %v1199_v37 }
  0x22   :  { %1146 = vmatprep.subr.bf16.mxu1 %v1207_v43  ;;  %718 = vperm.xlu1 %1160, %v704_v5  }
  0x23   :  { %485 = vmatmul.mubr.bf16.vlgmr.msra.gmra.mxu0 %v1193_v33 }
  0x24   :  { %550 = vmatmul.mubr.bf16.vlgmr.msra.gmra.mxu1 %v1196_v35  ;;  %1131 = vmatpush3.bf16.msra.mxu0 %v1199_v37 }
  0x25   :  { %492 = vmatprep.mubr.bf16.mxu0 %v1200_v38  ;;  %557 = vmatprep.mubr.bf16.mxu1 %v1202_v39 }
  0x26   :  { %1132 = vmatprep.subr.bf16.mxu0 %v1206_v42  ;;  %1147 = vmatpush3.bf16.msra.mxu1 %v1207_v43 }
  0x27   :  { %1148 = vmatprep.subr.bf16.mxu1 %v1222_v50  ;;  %713 = vperm.xlu0 %1159, %v703_v6  }
  0x28   :  { %1133 = vmatpush3.bf16.msra.mxu0 %v1206_v42  ;;  %728 = vperm.xlu1 %1160, %v706_v7  }
  0x29   :  { %1134 = vmatprep.subr.bf16.mxu0 %v1214_v46 }
  0x2a   :  { %1149 = vmatpush3.bf16.msra.mxu1 %v1222_v50 }
  0x2b   :  { %493 = vmatmul.mubr.bf16.gmra.mxu0 %v1204_v40  ;;  %723 = vperm.xlu0 %1159, %v705_v9  }
  0x2c   :  { %558 = vmatmul.mubr.bf16.gmra.mxu1 %v1205_v41  ;;  %500 = vmatprep.mubr.bf16.mxu0 %v1208_v44 }
  0x2d   :  { %565 = vmatprep.mubr.bf16.mxu1 %v1210_v45  ;;  %1135 = vmatpush3.bf16.msra.mxu0 %v1214_v46 }
  0x2e   :  { %1136 = vmatprep.subr.bf16.mxu0 %v1221_v49  ;;  %738 = vperm.xlu1 %1160, %v708_v11  }
  0x2f   :  { %733 = vperm.xlu0 %1159, %v707_v12  }
  0x31   :  { %1137 = vmatpush3.bf16.msra.mxu0 %v1221_v49 }
  0x32   :  { %748 = vperm.xlu1 %1160, %v710_v13  }
  0x33   :  { %501 = vmatmul.mubr.bf16.gmra.mxu0 %v1212_v47  ;;  %743 = vperm.xlu0 %1159, %v709_v14  }
  0x34   :  { %566 = vmatmul.mubr.bf16.gmra.mxu1 %v1213_v48  ;;  %508 = vmatprep.mubr.bf16.mxu0 %v1215_v51 }
  0x35   :  { %573 = vmatprep.mubr.bf16.mxu1 %v1217_v52 }
  0x36   :  { %912 = vperm.xlu1 %1160, %v898_v15  }
  0x37   :  { %907 = vperm.xlu0 %1159, %v897_v16  }
  0x3a   :  { %922 = vperm.xlu1 %1160, %v900_v17  }
  0x3b   :  { %509 = vmatmul.mubr.bf16.gmra.mxu0 %v1219_v55  ;;  %917 = vperm.xlu0 %1159, %v899_v18  }
  0x3c   :  { %574 = vmatmul.mubr.bf16.gmra.mxu1 %v1220_v56  ;;  %1138 = vmatprep.mubr.msk.bf16.mxu0 %vm439_vm0, %v1223_v59 }
  0x3d   :  { %1150 = vmatprep.mubr.msk.bf16.mxu1 %vm811_vm1, %v1225_v60 }
  0x3e   :  { %932 = vperm.xlu1 %1160, %v902_v19  }
  0x3f   :  { %927 = vperm.xlu0 %1159, %v901_v20  }
  0x42   :  { %942 = vperm.xlu1 %1160, %v904_v21  }
  0x43   :  { %1139 = vmatmul.mubr.msk.bf16.vlgmr.msra.gmra.mxu0 %vm439_vm0, %v1224_v0  ;;  %937 = vperm.xlu0 %1159, %v903_v22  }
  0x44   :  { %1151 = vmatmul.mubr.msk.bf16.vlgmr.msra.gmra.mxu1 %vm811_vm1, %v1226_v2  ;;  %1142 = vmatprep.mubr.msk.bf16.mxu0 %vm439_vm0, %v1227_v3 }
  0x45   :  { %1154 = vmatprep.mubr.msk.bf16.mxu1 %vm811_vm1, %v1229_v4 }
  0x4b   :  { %1143 = vmatmul.mubr.msk.bf16.gmra.mxu0 %vm439_vm0, %v1228_v8 }
  0x4c   :  { %1155 = vmatmul.mubr.msk.bf16.gmra.mxu1 %vm811_vm1, %v1230_v10 }
  0x8d   :  { %v1540_v24 = vpop.permute.xlu1 %667 }
  0x8f   :  { %v1538_v23 = vpop.permute.xlu0 %657 }
  0x91   :  { %v1544_v26 = vpop.permute.xlu1 %672 }
  0x93   :  { %v1542_v25 = vpop.permute.xlu0 %662 }
  0x95   :  { %v1548_v28 = vpop.permute.xlu1 %682 }
  0x97   :  { %v1546_v27 = vpop.permute.xlu0 %677 }
  0x99   :  { %v1552_v35 = vpop.permute.xlu1 %692 }
  0x9b   :  { %v1550_v32 = vpop.permute.xlu0 %687 }
  0x9d   :  { %v1556_v43 = vpop.permute.xlu1 %718 }
  0xa2   :  { %v1554_v40 = vpop.permute.xlu0 %713 }
  0xa3   :  { %v1558_v51 = vpop.permute.xlu1 %728 }
  0xa6   :  { %v724_v48 = vpop.permute.xlu0 %723 }
  0xa9   :  { %v1562_v59 = vpop.permute.xlu1 %738 }
  0xaa   :  { %v1560_v56 = vpop.permute.xlu0 %733 }
  0xad   :  { %v1566_v5 = vpop.permute.xlu1 %748 }
  0xae   :  { %v1564_v0 = vpop.permute.xlu0 %743 }
  0xb1   :  { %v1568_v22 = vpop.permute.xlu1 %912 }
  0xb2   :  { %v908_v15 = vpop.permute.xlu0 %907 }
  0xe3   :  { %v1052_v29 = vpop.f32.mrf.mxu0 }
  0xe4   :  { %v1092_v30 = vpop.f32.mrf.mxu1 }
  0xe5   :  { %v1053_v31 = vpop.f32.mrf.mxu0 }
  0xe6   :  { %v1093_v33 = vpop.f32.mrf.mxu1  ;;  %v1054_v6 = vadd.f32 %v1053_v31, %v1052_v29 }
  0xe7   :  { %v1055_v34 = vpop.f32.mrf.mxu0  ;;  %v1094_v7 = vadd.f32 %v1093_v33, %v1092_v30 }
  0xe8   :  { %v1095_v36 = vpop.f32.mrf.mxu1 }
  0xe9   :  { %v1056_v37 = vpop.f32.mrf.mxu0  ;;  %v552_v19 = vadd.f32 %v1094_v7, %v1054_v6 }
  0xea   :  { %v1096_v38 = vpop.f32.mrf.mxu1  ;;  %v1057_v16 = vadd.f32 %v1056_v37, %v1055_v34 }
  0xeb   :  { %v1058_v39 = vpop.f32.mrf.mxu0  ;;  %v1097_v17 = vadd.f32 %v1096_v38, %v1095_v36 }
  0xec   :  { %v1098_v41 = vpop.f32.mrf.mxu1 }
  0xed   :  { %v1059_v42 = vpop.f32.mrf.mxu0  ;;  %v555_v34 = vadd.f32 %v1097_v17, %v1057_v16 }
  0xee   :  { %v1099_v44 = vpop.f32.mrf.mxu1  ;;  %v1060_v1 = vadd.f32 %v1059_v42, %v1058_v39 }
  0xef   :  { %v1061_v45 = vpop.f32.mrf.mxu0  ;;  %v1100_v2 = vadd.f32 %v1099_v44, %v1098_v41 }
  0xf0   :  { %v1101_v46 = vpop.f32.mrf.mxu1 }
  0xf1   :  { %v1062_v47 = vpop.f32.mrf.mxu0  ;;  %v560_v13 = vadd.f32 %v1100_v2, %v1060_v1  ;;  %v918_v2 = vpop.permute.xlu0 %917 }
  0xf2   :  { %v1102_v49 = vpop.f32.mrf.mxu1  ;;  %v1063_v10 = vadd.f32 %v1062_v47, %v1061_v45 }
  0xf3   :  { %v1064_v50 = vpop.f32.mrf.mxu0  ;;  %v1103_v11 = vadd.f32 %v1102_v49, %v1101_v46 }
  0xf4   :  { %v1104_v52 = vpop.f32.mrf.mxu1 }
  0xf5   :  { %v1065_v53 = vpop.f32.mrf.mxu0  ;;  %v563_v30 = vadd.f32 %v1103_v11, %v1063_v10  ;;  %v923_v10 = vpop.permute.xlu1 %922 }
  0xf6   :  { %v1105_v54 = vpop.f32.mrf.mxu1  ;;  %v1066_v37 = vadd.f32 %v1065_v53, %v1064_v50  ;;  %v928_v16 = vpop.permute.xlu0 %927 }
  0xf7   :  { %v1067_v55 = vpop.f32.mrf.mxu0  ;;  %v1106_v38 = vadd.f32 %v1105_v54, %v1104_v52 }
  0xf8   :  { %v1107_v57 = vpop.f32.mrf.mxu1 }
  0xf9   :  { %v1068_v58 = vpop.f32.mrf.mxu0  ;;  %v568_v54 = vadd.f32 %v1106_v38, %v1066_v37 }
  0xfa   :  { %v1108_v60 = vpop.f32.mrf.mxu1 }
  0xfb   :  { %v1070_v61 = vpop.f32.mrf.mxu0 }
  0xfc   :  { %v1110_v62 = vpop.f32.mrf.mxu1 }
  0xfd   :  { %v1071_v63 = vpop.f32.mrf.mxu0 }
  0xfe   :  { %v1111_v3 = vpop.f32.mrf.mxu1  ;;  %v1072_v33 = vadd.f32 %v1071_v63, %v1070_v61  ;;  %v1069_v63 = vadd.f32 %v1068_v58, %v1067_v55 }
  0xff   :  { %v1073_v4 = vpop.f32.mrf.mxu0  ;;  %v1112_v41 = vadd.f32 %v1111_v3, %v1110_v62  ;;  %v1109_v3 = vadd.f32 %v1108_v60, %v1107_v57 }
 0x100   :  { %v1113_v8 = vpop.f32.mrf.mxu1 }
 0x101   :  { %v1074_v9 = vpop.f32.mrf.mxu0 }
 0x102   :  { %v1114_v12 = vpop.f32.mrf.mxu1  ;;  %v1075_v47 = vadd.f32 %v1074_v9, %v1073_v4 }
 0x103   :  { %v1140_v14 = vpop.f32.mrf.mxu0  ;;  %v1115_v49 = vadd.f32 %v1114_v12, %v1113_v8 }
 0x104   :  { %v625_v18 = vadd.f32 %v1140_v14, %v560_v13  ;;  %v1152_v20 = vpop.f32.mrf.mxu1  ;;  %v571_v14 = vadd.f32 %v1109_v3, %v1069_v63 }
 0x105   :  { %v616_v21 = vpop.f32.mrf.mxu0  ;;  %v579_v8 = vadd.f32 %v1115_v49, %v1075_v47 }
 0x106   :  { %v697_v39 = vmul.f32 %v1540_v24, %v625_v18  ;;  %v617_v29 = vadd.f32 %v616_v21, %v552_v19  ;;  %v858_v31 = vpop.f32.mrf.mxu1 }
 0x107   :  { %v1141_v42 = vpop.f32.mrf.mxu0 }
 0x108   :  { %v695_v44 = vmul.f32 %v1538_v23, %v617_v29  ;;  %v753_v45 = vadd.f32 %v724_v48, %v697_v39  ;;  %v628_v46 = vadd.f32 %v1141_v42, %v563_v30  ;;  %v1153_v36 = vpop.f32.mrf.mxu1  ;;  %v576_v23 = vadd.f32 %v1112_v41, %v1072_v33 }
 0x109   :  { %v619_v1 = vpop.f32.mrf.mxu0 }
 0x10a   :  { %v761_v6 = vmax.f32 %v753_v45, 0.0  ;;  %v698_v24 = vmul.f32 %v1544_v26, %v628_v46  ;;  %v751_v7 = vadd.f32 %v1554_v40, %v695_v44  ;;  %v620_v61 = vadd.f32 %v619_v1, %v555_v34  ;;  %v861_v62 = vpop.f32.mrf.mxu1 }
 0x10b   :  { %v1144_v48 = vpop.f32.mrf.mxu0 }
 0x10c   :  { %v891_v11 = vadd.f32 %v1152_v20, %v761_v6  ;;  %v759_v13 = vmax.f32 %v751_v7, 0.0  ;;  %v696_v50 = vmul.f32 %v1542_v25, %v620_v61  ;;  %v754_v52 = vadd.f32 %v1558_v51, %v698_v24  ;;  %v1156_v26 = vpop.f32.mrf.mxu1 }
 0x10d   :  { %v641_v53 = vadd.f32 %v1144_v48, %v576_v23  ;;  %v632_v4 = vpop.f32.mrf.mxu0 }
 0x10e   :  { %v947_v40 = vadd.f32 %v918_v2, %v891_v11  ;;  %v889_v9 = vadd.f32 %v858_v31, %v759_v13  ;;  %v762_v12 = vmax.f32 %v754_v52, 0.0  ;;  %v752_v55 = vadd.f32 %v1556_v43, %v696_v50  ;;  %v874_v43 = vpop.f32.mrf.mxu1 }
 0x10f   :  { %v701_v57 = vmul.f32 %v1550_v32, %v641_v53  ;;  %v633_v58 = vadd.f32 %v632_v4, %v568_v54  ;;  %v1145_v60 = vpop.f32.mrf.mxu0 }
 0x110   :  { %956 = vst.msk [vmem:[%s1625_s7 + $0x10] sm:$0xff] %vm953_vm2, %v947_v40  ;;  %v945_v25 = vadd.f32 %v908_v15, %v889_v9  ;;  %v892_v51 = vadd.f32 %v1153_v36, %v762_v12  ;;  %v760_v17 = vmax.f32 %v752_v55, 0.0  ;;  %v644_v18 = vadd.f32 %v1145_v60, %v579_v8  ;;  %v933_v15 = vpop.permute.xlu1 %932  ;;  %v1157_v45 = vpop.f32.mrf.mxu1 }
 0x111   :  { %v699_v19 = vmul.f32 %v1546_v27, %v633_v58  ;;  %v757_v20 = vadd.f32 %v1564_v0, %v701_v57  ;;  %v635_v21 = vpop.f32.mrf.mxu0 }
 0x112   :  { %954 = vst.msk [vmem:[%s1625_s7] sm:$0xff] %vm953_vm2, %v945_v25  ;;  %v948_v32 = vadd.f32 %v923_v10, %v892_v51  ;;  %v890_v39 = vadd.f32 %v861_v62, %v760_v17  ;;  %v702_v29 = vmul.f32 %v1552_v35, %v644_v18  ;;  %v636_v30 = vadd.f32 %v635_v21, %v571_v14  ;;  %v938_v35 = vpop.permute.xlu0 %937 }
 0x113   :  { %v765_v31 = vmax.f32 %v757_v20, 0.0  ;;  %v755_v33 = vadd.f32 %v1560_v56, %v699_v19 }
 0x114   :  { %957 = vst.msk [vmem:[%s1625_s7 + $0x18] sm:$0xff] %vm953_vm2, %v948_v32  ;;  %v946_v27 = vadd.f32 %v1568_v22, %v890_v39  ;;  %v700_v0 = vmul.f32 %v1548_v28, %v636_v30  ;;  %v758_v41 = vadd.f32 %v1566_v5, %v702_v29  ;;  %v943_v38 = vpop.permute.xlu1 %942  ;;  %v877_v5 = vpop.f32.mrf.mxu1 }
 0x115   :  { %v895_v42 = vadd.f32 %v1156_v26, %v765_v31  ;;  %v763_v44 = vmax.f32 %v755_v33, 0.0 }
 0x116   :  { %955 = vst.msk [vmem:[%s1625_s7 + $0x8] sm:$0xff] %vm953_vm2, %v946_v27  ;;  %v766_v56 = vmax.f32 %v758_v41, 0.0  ;;  %v756_v46 = vadd.f32 %v1562_v59, %v700_v0 }
 0x117   :  { %v951_v34 = vadd.f32 %v938_v35, %v895_v42  ;;  %v893_v36 = vadd.f32 %v874_v43, %v763_v44 }
 0x118   :  { %v896_v37 = vadd.f32 %v1157_v45, %v766_v56  ;;  %v764_v22 = vmax.f32 %v756_v46, 0.0 }
 0x119   :  { %960 = vst.msk [vmem:[%s1625_s7 + $0x30] sm:$0xff] %vm953_vm2, %v951_v34  ;;  %v949_v28 = vadd.f32 %v928_v16, %v893_v36 }
 0x11a   :  { %v952_v47 = vadd.f32 %v943_v38, %v896_v37  ;;  %v894_v49 = vadd.f32 %v877_v5, %v764_v22 }
 0x11b   :  { %958 = vst.msk [vmem:[%s1625_s7 + $0x20] sm:$0xff] %vm953_vm2, %v949_v28 }
 0x11c   :  { %961 = vst.msk [vmem:[%s1625_s7 + $0x38] sm:$0xff] %vm953_vm2, %v952_v47  ;;  %v950_v59 = vadd.f32 %v933_v15, %v894_v49 }
 0x11e   :  { %959 = vst.msk [vmem:[%s1625_s7 + $0x28] sm:$0xff] %vm953_vm2, %v950_v59 }

// kernel: unet_forward.40
= control target key start
LH: loop header
LB: loop body
LE: loop exit
PB: predicated region body
PF: predicated region fallthrough
CT: control target
= control target key end

     0   :  { %v766_v1 = vmov 0   ;;  %vm368_vm0 = vcmask 523264   ;;  %vm582_vm1 = vcmask 64512   ;;  %s972_s1 = inlined_call_operand.vmem [shape: bf16[576,8], index: 1, kind: input, shape index: {}]   ;;  %s973_s0 = inlined_call_operand.vmem [shape: bf16[32,576], index: 0, kind: input, shape index: {}]   ;;  %s974_s2 = inlined_call_operand.vmem [shape: f32[32,1], index: 2, kind: input, shape index: {}]   ;;  %s975_s3 = inlined_call_operand.vmem [shape: f32[32,1], index: 3, kind: input, shape index: {}]   ;;  %s976_s4 = inlined_call_operand.vmem [shape: f32[32,8], index: 4, kind: output, shape index: {}]  }
   0x1   :  { %v716_v0 = vld [vmem:[%s972_s1 + $0x78] sm:$0xff]   ;;  %715 = vset.pattern.permute.xlu1 %v766_v1  ;;  %714 = vset.pattern.permute.xlu0 %v766_v1  ;;  %v720_v5 = vld [vmem:[%s972_s1 + $0x70] sm:$0xff]   ;;  %v724_v9 = vld [vmem:[%s972_s1 + $0x68] sm:$0xff]  }
   0x2   :  { %v717_v2 = vld [vmem:[%s972_s1 + $0xf8] sm:$0xff]   ;;  %639 = vmatprep.subr.bf16.mxu0 %v716_v0  ;;  %v721_v6 = vld [vmem:[%s972_s1 + $0xf0] sm:$0xff]   ;;  %v725_v10 = vld [vmem:[%s972_s1 + $0xe8] sm:$0xff]  }
   0x3   :  { %v718_v3 = vld [vmem:[%s972_s1 + $0x38] sm:$0xff]   ;;  %667 = vmatprep.subr.bf16.mxu1 %v717_v2  ;;  %v722_v7 = vld [vmem:[%s972_s1 + $0x30] sm:$0xff]   ;;  %v726_v11 = vld [vmem:[%s972_s1 + $0x28] sm:$0xff]  }
   0x4   :  { %v719_v4 = vld [vmem:[%s972_s1 + $0xb8] sm:$0xff]   ;;  %640 = vmatpush3.bf16.msra.mxu0 %v718_v3  ;;  %v723_v8 = vld [vmem:[%s972_s1 + $0xb0] sm:$0xff]   ;;  %v727_v12 = vld [vmem:[%s972_s1 + $0xa8] sm:$0xff]  }
   0x5   :  { %668 = vmatpush3.bf16.msra.mxu1 %v719_v4  ;;  %641 = vmatprep.subr.bf16.mxu0 %v720_v5  ;;  %v728_v13 = vld [vmem:[%s972_s1 + $0x60] sm:$0xff]   ;;  %v732_v17 = vld [vmem:[%s972_s1 + $0x58] sm:$0xff]   ;;  %v736_v21 = vld [vmem:[%s972_s1 + $0x50] sm:$0xff]  }
   0x6   :  { %669 = vmatprep.subr.bf16.mxu1 %v721_v6  ;;  %v729_v14 = vld [vmem:[%s972_s1 + $0xe0] sm:$0xff]   ;;  %v733_v18 = vld [vmem:[%s972_s1 + $0xd8] sm:$0xff]   ;;  %v737_v22 = vld [vmem:[%s972_s1 + $0xd0] sm:$0xff]  }
   0x7   :  { %v730_v15 = vld [vmem:[%s972_s1 + $0x20] sm:$0xff]   ;;  %v734_v19 = vld [vmem:[%s972_s1 + $0x18] sm:$0xff]   ;;  %v738_v23 = vld [vmem:[%s972_s1 + $0x10] sm:$0xff]  }
   0x8   :  { %642 = vmatpush3.bf16.msra.mxu0 %v722_v7  ;;  %v731_v16 = vld [vmem:[%s972_s1 + $0xa0] sm:$0xff]   ;;  %v735_v20 = vld [vmem:[%s972_s1 + $0x98] sm:$0xff]   ;;  %v739_v24 = vld [vmem:[%s972_s1 + $0x90] sm:$0xff]  }
   0x9   :  { %670 = vmatpush3.bf16.msra.mxu1 %v723_v8  ;;  %643 = vmatprep.subr.bf16.mxu0 %v724_v9  ;;  %v740_v25 = vld [vmem:[%s972_s1 + $0x48] sm:$0xff]   ;;  %v744_v29 = vld [vmem:[%s972_s1 + $0x40] sm:$0xff]   ;;  %v754_v37 = vld [vmem:[%s972_s1 + $0x118] sm:$0xff]  }
   0xa   :  { %671 = vmatprep.subr.bf16.mxu1 %v725_v10  ;;  %v741_v26 = vld [vmem:[%s972_s1 + $0xc8] sm:$0xff]   ;;  %v745_v30 = vld [vmem:[%s972_s1 + $0xc0] sm:$0xff]   ;;  %v755_v38 = vld [vmem:[%s972_s1 + $0x110] sm:$0xff]  }
   0xb   :  { %v742_v27 = vld [vmem:[%s972_s1 + $0x8] sm:$0xff]   ;;  %v746_v31 = vld [vmem:[%s972_s1] sm:$0xff]   ;;  %v524_v46 = vld [vmem:[%s974_s2 + $0x10] sm:$0xff] }
   0xc   :  { %644 = vmatpush3.bf16.msra.mxu0 %v726_v11  ;;  %v743_v28 = vld [vmem:[%s972_s1 + $0x88] sm:$0xff]   ;;  %v747_v32 = vld [vmem:[%s972_s1 + $0x80] sm:$0xff]   ;;  %538 = vperm.xlu1 %715, %v524_v46   ;;  %v525_v48 = vld [vmem:[%s974_s2 + $0x18] sm:$0xff] }
   0xd   :  { %672 = vmatpush3.bf16.msra.mxu1 %v727_v12  ;;  %645 = vmatprep.subr.bf16.mxu0 %v728_v13  ;;  %v748_v33 = vld [vmem:[%s973_s0] ss:$20 sps:$4 sm:$0xff]   ;;  %v750_v34 = vld [vmem:[%s973_s0 + $0x4] ss:$20 sps:$4 sm:$0xff]   ;;  %v751_v35 = vld [vmem:[%s973_s0 + $0x8] ss:$20 sps:$4 sm:$0xff]  }
   0xe   :  { %673 = vmatprep.subr.bf16.mxu1 %v729_v14  ;;  %v753_v36 = vld [vmem:[%s973_s0 + $0xc] ss:$20 sps:$4 sm:$0xff]   ;;  %407 = vmatprep.mubr.bf16.mxu0 %v750_v34  ;;  %v758_v40 = vld [vmem:[%s973_s0 + $0x34] ss:$20 sps:$4 sm:$0xff]   ;;  %v761_v43 = vld [vmem:[%s973_s0 + $0x30] ss:$20 sps:$4 sm:$0xff]  }
   0xf   :  { %456 = vmatprep.mubr.bf16.mxu1 %v753_v36  ;;  %v756_v39 = vld [vmem:[%s973_s0 + $0x2c] ss:$20 sps:$4 sm:$0xff]   ;;  %v760_v41 = vld [vmem:[%s973_s0 + $0x28] ss:$20 sps:$4 sm:$0xff]   ;;  %v764_v44 = vld [vmem:[%s973_s0 + $0x10] ss:$20 sps:$4 sm:$0xff]  }
  0x10   :  { %646 = vmatpush3.bf16.msra.mxu0 %v730_v15  ;;  %v762_v42 = vld [vmem:[%s972_s1 + $0x108] sm:$0xff]   ;;  %v763_v45 = vld [vmem:[%s972_s1 + $0x100] sm:$0xff]   ;;  %543 = vperm.xlu1 %715, %v525_v48   ;;  %v553_v53 = vld [vmem:[%s975_s3 + $0x18] sm:$0xff] }
  0x11   :  { %674 = vmatpush3.bf16.msra.mxu1 %v731_v16  ;;  %647 = vmatprep.subr.bf16.mxu0 %v732_v17  ;;  %v522_v47 = vld [vmem:[%s974_s2] sm:$0xff]  ;;  %v523_v49 = vld [vmem:[%s974_s2 + $0x8] sm:$0xff]  ;;  %v552_v54 = vld [vmem:[%s975_s3 + $0x10] sm:$0xff] }
  0x12   :  { %675 = vmatprep.subr.bf16.mxu1 %v733_v18  ;;  %528 = vperm.xlu0 %714, %v522_v47   ;;  %v765_v50 = vld [vmem:[%s973_s0 + $0x38] ss:$20 sps:$4 sm:$0xff]   ;;  %v550_v52 = vld [vmem:[%s975_s3] sm:$0xff] }
  0x13   :  { %v551_v51 = vld [vmem:[%s975_s3 + $0x8] sm:$0xff] }
  0x14   :  { %648 = vmatpush3.bf16.msra.mxu0 %v734_v19  ;;  %561 = vperm.xlu1 %715, %v551_v51  }
  0x15   :  { %676 = vmatpush3.bf16.msra.mxu1 %v735_v20  ;;  %649 = vmatprep.subr.bf16.mxu0 %v736_v21 }
  0x16   :  { %677 = vmatprep.subr.bf16.mxu1 %v737_v22  ;;  %533 = vperm.xlu0 %714, %v523_v49  }
  0x18   :  { %650 = vmatpush3.bf16.msra.mxu0 %v738_v23  ;;  %571 = vperm.xlu1 %715, %v553_v53  }
  0x19   :  { %678 = vmatpush3.bf16.msra.mxu1 %v739_v24  ;;  %651 = vmatprep.subr.bf16.mxu0 %v740_v25 }
  0x1a   :  { %679 = vmatprep.subr.bf16.mxu1 %v741_v26  ;;  %556 = vperm.xlu0 %714, %v550_v52  }
  0x1c   :  { %652 = vmatpush3.bf16.msra.mxu0 %v742_v27 }
  0x1d   :  { %680 = vmatpush3.bf16.msra.mxu1 %v743_v28  ;;  %653 = vmatprep.subr.bf16.mxu0 %v744_v29 }
  0x1e   :  { %681 = vmatprep.subr.bf16.mxu1 %v745_v30  ;;  %566 = vperm.xlu0 %714, %v552_v54  }
  0x20   :  { %654 = vmatpush3.bf16.msra.mxu0 %v746_v31 }
  0x21   :  { %682 = vmatpush3.bf16.msra.mxu1 %v747_v32  ;;  %701 = vmatprep.subr.bf16.mxu0 %v754_v37 }
  0x23   :  { %408 = vmatmul.mubr.bf16.vlgmr.msra.gmra.mxu0 %v748_v33 }
  0x24   :  { %457 = vmatmul.mubr.bf16.vlgmr.msra.gmra.mxu1 %v751_v35  ;;  %702 = vmatpush3.bf16.msra.mxu0 %v754_v37 }
  0x25   :  { %703 = vmatprep.subr.bf16.mxu0 %v755_v38  ;;  %415 = vmatprep.mubr.bf16.mxu0 %v756_v39 }
  0x26   :  { %464 = vmatprep.mubr.bf16.mxu1 %v758_v40 }
  0x28   :  { %704 = vmatpush3.bf16.msra.mxu0 %v755_v38 }
  0x29   :  { %705 = vmatprep.subr.bf16.mxu0 %v762_v42 }
  0x2b   :  { %416 = vmatmul.mubr.bf16.gmra.mxu0 %v760_v41 }
  0x2c   :  { %465 = vmatmul.mubr.bf16.gmra.mxu1 %v761_v43  ;;  %709 = vmatprep.mubr.msk.bf16.mxu0 %vm368_vm0, %v764_v44 }
  0x2d   :  { %706 = vmatpush3.bf16.msra.mxu0 %v762_v42 }
  0x2e   :  { %707 = vmatprep.subr.bf16.mxu0 %v763_v45 }
  0x31   :  { %708 = vmatpush3.bf16.msra.mxu0 %v763_v45 }
  0x34   :  { %710 = vmatmul.mubr.msk.bf16.vlgmr.msra.gmra.mxu0 %vm368_vm0, %v765_v50 }
  0x87   :  { %v539_v63 = vpop.permute.xlu1 %538 }
  0x8b   :  { %v544_v9 = vpop.permute.xlu1 %543 }
  0x8d   :  { %v529_v59 = vpop.permute.xlu0 %528 }
  0x8f   :  { %v562_v24 = vpop.permute.xlu1 %561 }
  0x91   :  { %v534_v2 = vpop.permute.xlu0 %533 }
  0x93   :  { %v572_v40 = vpop.permute.xlu1 %571 }
  0x95   :  { %v557_v14 = vpop.permute.xlu0 %556 }
  0x99   :  { %v567_v29 = vpop.permute.xlu0 %566 }
  0xe3   :  { %v655_v55 = vpop.f32.mrf.mxu0 }
  0xe4   :  { %v683_v56 = vpop.f32.mrf.mxu1 }
  0xe5   :  { %v656_v57 = vpop.f32.mrf.mxu0 }
  0xe6   :  { %v684_v58 = vpop.f32.mrf.mxu1  ;;  %v657_v11 = vadd.f32 %v656_v57, %v655_v55 }
  0xe7   :  { %v658_v60 = vpop.f32.mrf.mxu0  ;;  %v685_v12 = vadd.f32 %v684_v58, %v683_v56 }
  0xe8   :  { %v686_v61 = vpop.f32.mrf.mxu1 }
  0xe9   :  { %v659_v62 = vpop.f32.mrf.mxu0  ;;  %v459_v23 = vadd.f32 %v685_v12, %v657_v11 }
  0xea   :  { %v687_v0 = vpop.f32.mrf.mxu1  ;;  %v660_v20 = vadd.f32 %v659_v62, %v658_v60 }
  0xeb   :  { %v661_v1 = vpop.f32.mrf.mxu0  ;;  %v688_v21 = vadd.f32 %v687_v0, %v686_v61 }
  0xec   :  { %v689_v3 = vpop.f32.mrf.mxu1 }
  0xed   :  { %v662_v4 = vpop.f32.mrf.mxu0  ;;  %v462_v34 = vadd.f32 %v688_v21, %v660_v20 }
  0xee   :  { %v690_v5 = vpop.f32.mrf.mxu1  ;;  %v663_v6 = vadd.f32 %v662_v4, %v661_v1 }
  0xef   :  { %v691_v7 = vadd.f32 %v690_v5, %v689_v3  ;;  %v664_v8 = vpop.f32.mrf.mxu0 }
  0xf0   :  { %v692_v10 = vpop.f32.mrf.mxu1 }
  0xf1   :  { %v665_v13 = vpop.f32.mrf.mxu0  ;;  %v467_v18 = vadd.f32 %v691_v7, %v663_v6 }
  0xf2   :  { %v693_v15 = vpop.f32.mrf.mxu1  ;;  %v666_v16 = vadd.f32 %v665_v13, %v664_v8 }
  0xf3   :  { %v694_v17 = vadd.f32 %v693_v15, %v692_v10 }
  0xf4   :  { %v711_v19 = vpop.f32.mrf.mxu0 }
  0xf5   :  { %v516_v22 = vadd.f32 %v711_v19, %v467_v18  ;;  %v470_v28 = vadd.f32 %v694_v17, %v666_v16 }
  0xf6   :  { %v507_v25 = vpop.f32.mrf.mxu0 }
  0xf7   :  { %v548_v26 = vmul.f32 %v539_v63, %v516_v22  ;;  %v508_v27 = vadd.f32 %v507_v25, %v459_v23 }
  0xf8   :  { %v712_v30 = vpop.f32.mrf.mxu0 }
  0xf9   :  { %v576_v31 = vadd.f32 %v567_v29, %v548_v26  ;;  %v546_v32 = vmul.f32 %v529_v59, %v508_v27  ;;  %v519_v33 = vadd.f32 %v712_v30, %v470_v28 }
  0xfa   :  { %v510_v35 = vpop.f32.mrf.mxu0 }
  0xfb   :  { %v580_v36 = vmax.f32 %v576_v31, 0.0  ;;  %v574_v37 = vadd.f32 %v557_v14, %v546_v32  ;;  %v549_v38 = vmul.f32 %v544_v9, %v519_v33  ;;  %v511_v39 = vadd.f32 %v510_v35, %v462_v34 }
  0xfd   :  { %585 = vst.msk [vmem:[%s976_s4 + $0x10] sm:$0xff] %vm582_vm1, %v580_v36  ;;  %v578_v41 = vmax.f32 %v574_v37, 0.0  ;;  %v577_v42 = vadd.f32 %v572_v40, %v549_v38  ;;  %v547_v43 = vmul.f32 %v534_v2, %v511_v39 }
  0xff   :  { %583 = vst.msk [vmem:[%s976_s4] sm:$0xff] %vm582_vm1, %v578_v41  ;;  %v581_v44 = vmax.f32 %v577_v42, 0.0  ;;  %v575_v45 = vadd.f32 %v562_v24, %v547_v43 }
 0x101   :  { %586 = vst.msk [vmem:[%s976_s4 + $0x18] sm:$0xff] %vm582_vm1, %v581_v44  ;;  %v579_v46 = vmax.f32 %v575_v45, 0.0 }
 0x103   :  { %584 = vst.msk [vmem:[%s976_s4 + $0x8] sm:$0xff] %vm582_vm1, %v579_v46 }

// kernel: unet_forward.42
= control target key start
LH: loop header
LB: loop body
LE: loop exit
PB: predicated region body
PF: predicated region fallthrough
CT: control target
= control target key end

     0   :  { %v644_v1 = vmov 0   ;;  %vm209_vm0 = vcmask 261120   ;;  %vm420_vm1 = vcmask 523264   ;;  %vm508_vm2 = vcmask 64512   ;;  %s829_s1 = inlined_call_operand.vmem [shape: bf16[288,8], index: 1, kind: input, shape index: {}]   ;;  %s830_s0 = inlined_call_operand.vmem [shape: bf16[32,288], index: 0, kind: input, shape index: {}]   ;;  %s831_s5 = inlined_call_operand.vmem [shape: bf16[64,8], index: 5, kind: input, shape index: {}]   ;;  %s832_s4 = inlined_call_operand.vmem [shape: bf16[32,64], index: 4, kind: input, shape index: {}]   ;;  %s833_s2 = inlined_call_operand.vmem [shape: f32[32,1], index: 2, kind: input, shape index: {}]   ;;  %s834_s3 = inlined_call_operand.vmem [shape: f32[32,1], index: 3, kind: input, shape index: {}]   ;;  %s835_s6 = inlined_call_operand.vmem [shape: f32[32,1], index: 6, kind: input, shape index: {}]   ;;  %s836_s7 = inlined_call_operand.vmem [shape: f32[32,8], index: 7, kind: output, shape index: {}]  }
   0x1   :  { %v612_v0 = vld [vmem:[%s829_s1 + $0x78] sm:$0xff]   ;;  %611 = vset.pattern.permute.xlu1 %v644_v1  ;;  %610 = vset.pattern.permute.xlu0 %v644_v1  ;;  %v614_v3 = vld [vmem:[%s829_s1 + $0x70] sm:$0xff]   ;;  %v616_v5 = vld [vmem:[%s829_s1 + $0x68] sm:$0xff]  }
   0x2   :  { %v613_v2 = vld [vmem:[%s829_s1 + $0x38] sm:$0xff]   ;;  %551 = vmatprep.subr.bf16.mxu0 %v612_v0  ;;  %v615_v4 = vld [vmem:[%s829_s1 + $0x30] sm:$0xff]   ;;  %v617_v6 = vld [vmem:[%s829_s1 + $0x28] sm:$0xff]  }
   0x3   :  { %552 = vmatpush3.bf16.msra.mxu0 %v613_v2  ;;  %v618_v7 = vld [vmem:[%s829_s1 + $0x60] sm:$0xff]   ;;  %v622_v8 = vld [vmem:[%s829_s1 + $0x88] sm:$0xff]   ;;  %v620_v10 = vld [vmem:[%s829_s1 + $0x58] sm:$0xff]  }
   0x4   :  { %553 = vmatprep.subr.bf16.mxu0 %v614_v3  ;;  %v619_v9 = vld [vmem:[%s829_s1 + $0x20] sm:$0xff]   ;;  %589 = vmatprep.subr.bf16.mxu1 %v622_v8  ;;  %v621_v12 = vld [vmem:[%s829_s1 + $0x18] sm:$0xff]   ;;  %v623_v13 = vld [vmem:[%s829_s1 + $0x50] sm:$0xff]  }
   0x5   :  { %590 = vmatpush3.bf16.msra.mxu1 %v622_v8  ;;  %v625_v11 = vld [vmem:[%s829_s1 + $0x80] sm:$0xff]   ;;  %v628_v14 = vld [vmem:[%s830_s0 + $0x8] ss:$12 sps:$4 sm:$0xff]   ;;  %v629_v15 = vld [vmem:[%s831_s5 + $0x18] sm:$0xff]  }
   0x6   :  { %591 = vmatprep.subr.bf16.mxu1 %v625_v11  ;;  %593 = vmatprep.mubr.msk.bf16.mxu1 %vm209_vm0, %v628_v14  ;;  %v630_v16 = vld [vmem:[%s830_s0 + $0x20] ss:$12 sps:$4 sm:$0xff]   ;;  %v624_v17 = vld [vmem:[%s829_s1 + $0x10] sm:$0xff]   ;;  %v639_v30 = vld [vmem:[%s830_s0 + $0x1c] ss:$12 sps:$4 sm:$0xff]  }
   0x7   :  { %554 = vmatpush3.bf16.msra.mxu0 %v615_v4  ;;  %v626_v18 = vld [vmem:[%s829_s1 + $0x48] sm:$0xff]   ;;  %v633_v20 = vld [vmem:[%s831_s5 + $0x10] sm:$0xff]   ;;  %v631_v21 = vld [vmem:[%s829_s1 + $0x40] sm:$0xff]  }
   0x8   :  { %555 = vmatprep.subr.bf16.mxu0 %v616_v5  ;;  %v627_v19 = vld [vmem:[%s829_s1 + $0x8] sm:$0xff]   ;;  %v636_v22 = vld [vmem:[%s830_s0 + $0x4] ss:$12 sps:$4 sm:$0xff]   ;;  %v317_v31 = vld [vmem:[%s833_s2 + $0x18] sm:$0xff] }
   0x9   :  { %592 = vmatpush3.bf16.msra.mxu1 %v625_v11  ;;  %v637_v23 = vld [vmem:[%s831_s5 + $0x8] sm:$0xff]   ;;  %248 = vmatprep.mubr.bf16.mxu0 %v636_v22  ;;  %v632_v24 = vld [vmem:[%s829_s1] sm:$0xff]   ;;  %v316_v27 = vld [vmem:[%s833_s2 + $0x10] sm:$0xff] }
   0xa   :  { %597 = vmatprep.subr.bf16.mxu1 %v629_v15  ;;  %v638_v25 = vld [vmem:[%s831_s5] sm:$0xff]   ;;  %330 = vperm.xlu1 %611, %v316_v27   ;;  %v643_v32 = vld [vmem:[%s832_s4 + $0x8] sm:$0xff]   ;;  %v345_v37 = vld [vmem:[%s834_s3 + $0x18] sm:$0xff] }
   0xb   :  { %556 = vmatpush3.bf16.msra.mxu0 %v617_v6  ;;  %v642_v26 = vld [vmem:[%s832_s4] sm:$0xff]   ;;  %v315_v33 = vld [vmem:[%s833_s2 + $0x8] sm:$0xff]  ;;  %v344_v38 = vld [vmem:[%s834_s3 + $0x10] sm:$0xff] }
   0xc   :  { %557 = vmatprep.subr.bf16.mxu0 %v618_v7  ;;  %594 = vmatmul.mubr.msk.bf16.vlgmr.msra.gmra.mxu1 %vm209_vm0, %v630_v16  ;;  %v314_v28 = vld [vmem:[%s833_s2] sm:$0xff]  ;;  %v343_v34 = vld [vmem:[%s834_s3 + $0x8] sm:$0xff]  ;;  %v483_v41 = vld [vmem:[%s835_s6 + $0x18] sm:$0xff] }
   0xd   :  { %598 = vmatpush3.bf16.msra.mxu1 %v629_v15  ;;  %605 = vmatprep.mubr.msk.bf16.mxu1 %vm420_vm1, %v642_v26  ;;  %v634_v29 = vld [vmem:[%s830_s0] ss:$12 sps:$4 sm:$0xff]   ;;  %v641_v36 = vld [vmem:[%s830_s0 + $0x18] ss:$12 sps:$4 sm:$0xff]   ;;  %v482_v42 = vld [vmem:[%s835_s6 + $0x10] sm:$0xff] }
   0xe   :  { %599 = vmatprep.subr.bf16.mxu1 %v633_v20  ;;  %320 = vperm.xlu0 %610, %v314_v28   ;;  %v342_v35 = vld [vmem:[%s834_s3] sm:$0xff]  ;;  %v481_v39 = vld [vmem:[%s835_s6 + $0x8] sm:$0xff] }
   0xf   :  { %558 = vmatpush3.bf16.msra.mxu0 %v619_v9  ;;  %335 = vperm.xlu1 %611, %v317_v31   ;;  %v480_v40 = vld [vmem:[%s835_s6] sm:$0xff] }
  0x10   :  { %559 = vmatprep.subr.bf16.mxu0 %v620_v10 }
  0x11   :  { %600 = vmatpush3.bf16.msra.mxu1 %v633_v20 }
  0x12   :  { %601 = vmatprep.subr.bf16.mxu1 %v637_v23  ;;  %325 = vperm.xlu0 %610, %v315_v33  }
  0x13   :  { %560 = vmatpush3.bf16.msra.mxu0 %v621_v12  ;;  %353 = vperm.xlu1 %611, %v343_v34  }
  0x14   :  { %561 = vmatprep.subr.bf16.mxu0 %v623_v13 }
  0x15   :  { %602 = vmatpush3.bf16.msra.mxu1 %v637_v23 }
  0x16   :  { %603 = vmatprep.subr.bf16.mxu1 %v638_v25  ;;  %348 = vperm.xlu0 %610, %v342_v35  }
  0x17   :  { %562 = vmatpush3.bf16.msra.mxu0 %v624_v17  ;;  %363 = vperm.xlu1 %611, %v345_v37  }
  0x18   :  { %563 = vmatprep.subr.bf16.mxu0 %v626_v18 }
  0x19   :  { %604 = vmatpush3.bf16.msra.mxu1 %v638_v25 }
  0x1a   :  { %358 = vperm.xlu0 %610, %v344_v38  }
  0x1b   :  { %564 = vmatpush3.bf16.msra.mxu0 %v627_v19  ;;  %491 = vperm.xlu1 %611, %v481_v39  }
  0x1c   :  { %565 = vmatprep.subr.bf16.mxu0 %v631_v21  ;;  %606 = vmatmul.mubr.msk.bf16.vlgmr.msra.gmra.mxu1 %vm420_vm1, %v643_v32 }
  0x1e   :  { %486 = vperm.xlu0 %610, %v480_v40  }
  0x1f   :  { %566 = vmatpush3.bf16.msra.mxu0 %v632_v24  ;;  %501 = vperm.xlu1 %611, %v483_v41  }
  0x22   :  { %249 = vmatmul.mubr.bf16.vlgmr.msra.gmra.mxu0 %v634_v29  ;;  %496 = vperm.xlu0 %610, %v482_v42  }
  0x23   :  { %256 = vmatprep.mubr.bf16.mxu0 %v639_v30 }
  0x2a   :  { %257 = vmatmul.mubr.bf16.gmra.mxu0 %v641_v36 }
  0x85   :  { %v331_v46 = vpop.permute.xlu1 %330 }
  0x89   :  { %v321_v44 = vpop.permute.xlu0 %320 }
  0x8a   :  { %v336_v49 = vpop.permute.xlu1 %335 }
  0x8d   :  { %v326_v47 = vpop.permute.xlu0 %325 }
  0x8e   :  { %v354_v57 = vpop.permute.xlu1 %353 }
  0x91   :  { %v349_v52 = vpop.permute.xlu0 %348 }
  0x92   :  { %v364_v8 = vpop.permute.xlu1 %363 }
  0x95   :  { %v359_v61 = vpop.permute.xlu0 %358 }
  0x96   :  { %v492_v23 = vpop.permute.xlu1 %491 }
  0x99   :  { %v487_v10 = vpop.permute.xlu0 %486 }
  0x9a   :  { %v502_v33 = vpop.permute.xlu1 %501 }
  0x9d   :  { %v497_v29 = vpop.permute.xlu0 %496 }
  0xcc   :  { %v595_v43 = vpop.f32.mrf.mxu1 }
  0xce   :  { %v299_v45 = vpop.f32.mrf.mxu1 }
  0xd0   :  { %v596_v48 = vpop.f32.mrf.mxu1 }
  0xd2   :  { %v302_v51 = vpop.f32.mrf.mxu1 }
  0xdc   :  { %v607_v54 = vpop.f32.mrf.mxu1 }
  0xde   :  { %v461_v60 = vpop.f32.mrf.mxu1 }
  0xe0   :  { %v608_v4 = vpop.f32.mrf.mxu1 }
  0xe2   :  { %v567_v50 = vpop.f32.mrf.mxu0  ;;  %v464_v15 = vpop.f32.mrf.mxu1 }
  0xe4   :  { %v568_v53 = vpop.f32.mrf.mxu0 }
  0xe5   :  { %v569_v55 = vadd.f32 %v568_v53, %v567_v50 }
  0xe6   :  { %v570_v56 = vpop.f32.mrf.mxu0 }
  0xe7   :  { %v300_v58 = vadd.f32 %v569_v55, %v299_v45 }
  0xe8   :  { %v571_v59 = vpop.f32.mrf.mxu0 }
  0xe9   :  { %v338_v62 = vmul.f32 %v321_v44, %v300_v58  ;;  %v572_v63 = vadd.f32 %v571_v59, %v570_v56 }
  0xea   :  { %v573_v0 = vpop.f32.mrf.mxu0 }
  0xeb   :  { %v303_v1 = vadd.f32 %v572_v63, %v302_v51  ;;  %v366_v2 = vadd.f32 %v349_v52, %v338_v62 }
  0xec   :  { %v574_v3 = vpop.f32.mrf.mxu0 }
  0xed   :  { %v339_v5 = vmul.f32 %v326_v47, %v303_v1  ;;  %v575_v6 = vadd.f32 %v574_v3, %v573_v0  ;;  %v370_v7 = vmax.f32 %v366_v2, 0.0 }
  0xee   :  { %v576_v9 = vpop.f32.mrf.mxu0 }
  0xef   :  { %v308_v11 = vadd.f32 %v595_v43, %v575_v6  ;;  %v476_v12 = vadd.f32 %v461_v60, %v370_v7  ;;  %v367_v13 = vadd.f32 %v354_v57, %v339_v5 }
  0xf0   :  { %v577_v14 = vpop.f32.mrf.mxu0 }
  0xf1   :  { %v340_v16 = vmul.f32 %v331_v46, %v308_v11  ;;  %v504_v17 = vadd.f32 %v487_v10, %v476_v12  ;;  %v578_v18 = vadd.f32 %v577_v14, %v576_v9  ;;  %v371_v19 = vmax.f32 %v367_v13, 0.0 }
  0xf3   :  { %v368_v20 = vadd.f32 %v359_v61, %v340_v16  ;;  %509 = vst.msk [vmem:[%s836_s7] sm:$0xff] %vm508_vm2, %v504_v17  ;;  %v311_v21 = vadd.f32 %v596_v48, %v578_v18  ;;  %v477_v22 = vadd.f32 %v464_v15, %v371_v19 }
  0xf5   :  { %v372_v24 = vmax.f32 %v368_v20, 0.0  ;;  %v341_v25 = vmul.f32 %v336_v49, %v311_v21  ;;  %v505_v26 = vadd.f32 %v492_v23, %v477_v22 }
  0xf7   :  { %v478_v27 = vadd.f32 %v607_v54, %v372_v24  ;;  %v369_v28 = vadd.f32 %v364_v8, %v341_v25  ;;  %510 = vst.msk [vmem:[%s836_s7 + $0x8] sm:$0xff] %vm508_vm2, %v505_v26 }
  0xf9   :  { %v506_v30 = vadd.f32 %v497_v29, %v478_v27  ;;  %v373_v31 = vmax.f32 %v369_v28, 0.0 }
  0xfb   :  { %511 = vst.msk [vmem:[%s836_s7 + $0x10] sm:$0xff] %vm508_vm2, %v506_v30  ;;  %v479_v32 = vadd.f32 %v608_v4, %v373_v31 }
  0xfd   :  { %v507_v34 = vadd.f32 %v502_v33, %v479_v32 }
  0xff   :  { %512 = vst.msk [vmem:[%s836_s7 + $0x18] sm:$0xff] %vm508_vm2, %v507_v34 }

// kernel: unet_forward.43
= control target key start
LH: loop header
LB: loop body
LE: loop exit
PB: predicated region body
PF: predicated region fallthrough
CT: control target
= control target key end

     0   :  { %v385_v1 = vmov 0.0   ;;  %vm386_vm0 = vmmov 0   ;;  %v387_v3 = vmov 0   ;;  %vm181_vm1 = vcmask 261120   ;;  %s497_s1 = inlined_call_operand.vmem [shape: bf16[288,32], index: 1, kind: input, shape index: {}]   ;;  %s498_s0 = inlined_call_operand.vmem [shape: bf16[16,288], index: 0, kind: input, shape index: {}]   ;;  %s499_s2 = inlined_call_operand.vmem [shape: f32[16,1], index: 2, kind: input, shape index: {}]   ;;  %s500_s3 = inlined_call_operand.vmem [shape: f32[16,1], index: 3, kind: input, shape index: {}]   ;;  %s501_s4 = inlined_call_operand.vmem [shape: f32[16,32], index: 4, kind: output, shape index: {}]  }
   0x1   :  { %v363_v0 = vld [vmem:[%s497_s1 + $0x78] sm:$0xff]   ;;  %350 = vmatprep.subr.bf16.mxu1 %v385_v1  ;;  %354 = vmatprep.mubr.msk.bf16.mxu1 %vm386_vm0, %v385_v1  ;;  %v365_v4 = vld [vmem:[%s497_s1 + $0x70] sm:$0xff]   ;;  %v367_v6 = vld [vmem:[%s497_s1 + $0x68] sm:$0xff]  }
   0x2   :  { %v364_v2 = vld [vmem:[%s497_s1 + $0x38] sm:$0xff]   ;;  %361 = vset.pattern.permute.xlu0 %v387_v3  ;;  %362 = vset.pattern.permute.xlu1 %v387_v3  ;;  %v366_v5 = vld [vmem:[%s497_s1 + $0x30] sm:$0xff]   ;;  %v368_v7 = vld [vmem:[%s497_s1 + $0x28] sm:$0xff]  }
   0x3   :  { %325 = vmatprep.subr.bf16.mxu0 %v363_v0  ;;  %v369_v8 = vld [vmem:[%s497_s1 + $0x60] sm:$0xff]   ;;  %v371_v10 = vld [vmem:[%s497_s1 + $0x58] sm:$0xff]   ;;  %v375_v11 = vld [vmem:[%s497_s1 + $0x88] sm:$0xff]  }
   0x4   :  { %326 = vmatpush3.bf16.msra.mxu0 %v364_v2  ;;  %v370_v9 = vld [vmem:[%s497_s1 + $0x20] sm:$0xff]   ;;  %v372_v12 = vld [vmem:[%s497_s1 + $0x18] sm:$0xff]   ;;  %351 = vmatpush3.bf16.msra.mxu1 %v375_v11  ;;  %v373_v14 = vld [vmem:[%s497_s1 + $0x50] sm:$0xff]  }
   0x5   :  { %327 = vmatprep.subr.bf16.mxu0 %v365_v4  ;;  %352 = vmatprep.subr.bf16.mxu1 %v385_v1  ;;  %v378_v13 = vld [vmem:[%s497_s1 + $0x80] sm:$0xff]   ;;  %v374_v15 = vld [vmem:[%s497_s1 + $0x10] sm:$0xff]   ;;  %v376_v17 = vld [vmem:[%s497_s1 + $0x48] sm:$0xff]  }
   0x6   :  { %v381_v16 = vld [vmem:[%s498_s0 + $0x8] ss:$12 sps:$4 sm:$0xff]   ;;  %v384_v18 = vld [vmem:[%s498_s0 + $0x4] ss:$12 sps:$4 sm:$0xff]   ;;  %v382_v26 = vld [vmem:[%s498_s0] ss:$12 sps:$4 sm:$0xff]  }
   0x7   :  { %v267_v19 = vld [vmem:[%s499_s2] sm:$0xff]  ;;  %217 = vmatprep.mubr.bf16.mxu0 %v384_v18  ;;  %v268_v21 = vld [vmem:[%s499_s2 + $0x8] sm:$0xff] }
   0x8   :  { %328 = vmatpush3.bf16.msra.mxu0 %v366_v5  ;;  %353 = vmatpush3.bf16.msra.mxu1 %v378_v13  ;;  %v281_v20 = vld [vmem:[%s500_s3] sm:$0xff]  ;;  %v377_v22 = vld [vmem:[%s497_s1 + $0x8] sm:$0xff]  }
   0x9   :  { %329 = vmatprep.subr.bf16.mxu0 %v367_v6  ;;  %271 = vperm.xlu0 %361, %v267_v19   ;;  %v282_v23 = vld [vmem:[%s500_s3 + $0x8] sm:$0xff]  ;;  %v379_v24 = vld [vmem:[%s497_s1 + $0x40] sm:$0xff]  }
   0xa   :  { %285 = vperm.xlu1 %362, %v281_v20   ;;  %v380_v25 = vld [vmem:[%s497_s1] sm:$0xff]  }
   0xb   :  { %355 = vmatmul.mubr.msk.bf16.vlgmr.msra.gmra.mxu1 %vm181_vm1, %v381_v16 }
   0xc   :  { %330 = vmatpush3.bf16.msra.mxu0 %v368_v7 }
   0xd   :  { %331 = vmatprep.subr.bf16.mxu0 %v369_v8  ;;  %276 = vperm.xlu0 %361, %v268_v21  }
   0xe   :  { %290 = vperm.xlu1 %362, %v282_v23  }
  0x10   :  { %332 = vmatpush3.bf16.msra.mxu0 %v370_v9 }
  0x11   :  { %333 = vmatprep.subr.bf16.mxu0 %v371_v10 }
  0x14   :  { %334 = vmatpush3.bf16.msra.mxu0 %v372_v12 }
  0x15   :  { %335 = vmatprep.subr.bf16.mxu0 %v373_v14 }
  0x18   :  { %336 = vmatpush3.bf16.msra.mxu0 %v374_v15 }
  0x19   :  { %337 = vmatprep.subr.bf16.mxu0 %v376_v17 }
  0x1c   :  { %338 = vmatpush3.bf16.msra.mxu0 %v377_v22 }
  0x1d   :  { %339 = vmatprep.subr.bf16.mxu0 %v379_v24 }
  0x20   :  { %340 = vmatpush3.bf16.msra.mxu0 %v380_v25 }
  0x23   :  { %218 = vmatmul.mubr.bf16.vlgmr.msra.gmra.mxu0 %v382_v26 }
  0x84   :  { %v272_v34 = vpop.permute.xlu0 %271 }
  0x85   :  { %v286_v37 = vpop.permute.xlu1 %285 }
  0x88   :  { %v277_v43 = vpop.permute.xlu0 %276 }
  0x89   :  { %v291_v46 = vpop.permute.xlu1 %290 }
  0xcb   :  { %v260_v27 = vpop.f32.mrf.mxu1 }
  0xcd   :  { %v356_v28 = vpop.f32.mrf.mxu1 }
  0xcf   :  { %v263_v29 = vpop.f32.mrf.mxu1 }
  0xd1   :  { %v357_v30 = vpop.f32.mrf.mxu1 }
  0xe3   :  { %v341_v31 = vpop.f32.mrf.mxu0 }
  0xe5   :  { %v342_v32 = vpop.f32.mrf.mxu0 }
  0xe6   :  { %v343_v33 = vadd.f32 %v342_v32, %v341_v31 }
  0xe7   :  { %v344_v35 = vpop.f32.mrf.mxu0 }
  0xe8   :  { %v261_v36 = vadd.f32 %v343_v33, %v260_v27 }
  0xe9   :  { %v345_v38 = vpop.f32.mrf.mxu0 }
  0xea   :  { %v279_v39 = vmul.f32 %v272_v34, %v261_v36  ;;  %v346_v40 = vadd.f32 %v345_v38, %v344_v35 }
  0xec   :  { %v293_v41 = vadd.f32 %v286_v37, %v279_v39  ;;  %v264_v42 = vadd.f32 %v346_v40, %v263_v29 }
  0xee   :  { %v295_v44 = vmax.f32 %v293_v41, 0.0  ;;  %v280_v45 = vmul.f32 %v277_v43, %v264_v42 }
  0xf0   :  { %297 = vst.msk [vmem:[%s501_s4] sm:$0xff] %vm181_vm1, %v295_v44  ;;  %v294_v47 = vadd.f32 %v291_v46, %v280_v45 }
  0xf2   :  { %v296_v48 = vmax.f32 %v294_v47, 0.0 }
  0xf4   :  { %298 = vst.msk [vmem:[%s501_s4 + $0x8] sm:$0xff] %vm181_vm1, %v296_v48 }

// kernel: unet_forward.45
= control target key start
LH: loop header
LB: loop body
LE: loop exit
PB: predicated region body
PF: predicated region fallthrough
CT: control target
= control target key end

     0   :  { %v322_v0 = vmov 0   ;;  %v323_v2 = vmov 0.0   ;;  %vm324_vm0 = vmmov 0   ;;  %vm110_vm1 = vcmask 130048   ;;  %s434_s1 = inlined_call_operand.vmem [shape: bf16[144,32], index: 1, kind: input, shape index: {}]   ;;  %s435_s5 = inlined_call_operand.vmem [shape: bf16[32,32], index: 5, kind: input, shape index: {}]   ;;  %s436_s0 = inlined_call_operand.vmem [shape: bf16[16,144], index: 0, kind: input, shape index: {}]   ;;  %s437_s4 = inlined_call_operand.vmem [shape: bf16[16,32], index: 4, kind: input, shape index: {}]   ;;  %s438_s2 = inlined_call_operand.vmem [shape: f32[16,1], index: 2, kind: input, shape index: {}]   ;;  %s439_s3 = inlined_call_operand.vmem [shape: f32[16,1], index: 3, kind: input, shape index: {}]   ;;  %s440_s6 = inlined_call_operand.vmem [shape: f32[16,1], index: 6, kind: input, shape index: {}]   ;;  %s441_s7 = inlined_call_operand.vmem [shape: f32[16,32], index: 7, kind: output, shape index: {}]  }
   0x1   :  { %114 = vmatprep.subr.bf16.mxu0 %v322_v0  ;;  %v307_v1 = vld [vmem:[%s434_s1 + $0x38] sm:$0xff]   ;;  %294 = vmatprep.subr.bf16.mxu1 %v323_v2  ;;  %v308_v3 = vld [vmem:[%s434_s1 + $0x30] sm:$0xff]   ;;  %v309_v4 = vld [vmem:[%s434_s1 + $0x28] sm:$0xff]   ;;  %vm208_vm2 = vcmask 261120  }
   0x2   :  { %298 = vmatprep.mubr.msk.bf16.mxu1 %vm324_vm0, %v323_v2  ;;  %305 = vset.pattern.permute.xlu0 %v322_v0  ;;  %v315_v5 = vld [vmem:[%s435_s5 + $0x8] sm:$0xff]   ;;  %v310_v6 = vld [vmem:[%s434_s1 + $0x20] sm:$0xff]   ;;  %v311_v12 = vld [vmem:[%s434_s1 + $0x18] sm:$0xff]  }
   0x3   :  { %115 = vmatpush1.bf16.msra.mxu0 %v307_v1  ;;  %306 = vset.pattern.permute.xlu1 %v322_v0  ;;  %v317_v7 = vld [vmem:[%s435_s5] sm:$0xff]   ;;  %v156_v13 = vld [vmem:[%s438_s2 + $0x8] sm:$0xff]  ;;  %v312_v15 = vld [vmem:[%s434_s1 + $0x10] sm:$0xff]  }
   0x4   :  { %116 = vmatprep.subr.bf16.mxu0 %v322_v0  ;;  %295 = vmatpush3.bf16.msra.mxu1 %v315_v5  ;;  %v320_v8 = vld [vmem:[%s436_s0 + $0x4] ss:$8 sps:$4 sm:$0xff]   ;;  %v318_v21 = vld [vmem:[%s436_s0] ss:$8 sps:$4 sm:$0xff]  }
   0x5   :  { %296 = vmatprep.subr.bf16.mxu1 %v323_v2  ;;  %v321_v9 = vld [vmem:[%s437_s4] sm:$0xff]   ;;  %286 = vmatprep.mubr.msk.bf16.mxu0 %vm110_vm1, %v320_v8  ;;  %v170_v14 = vld [vmem:[%s439_s3 + $0x8] sm:$0xff] }
   0x6   :  { %v155_v10 = vld [vmem:[%s438_s2] sm:$0xff]  ;;  %v256_v17 = vld [vmem:[%s440_s6 + $0x8] sm:$0xff] }
   0x7   :  { %117 = vmatpush1.bf16.msra.mxu0 %v308_v3  ;;  %v169_v11 = vld [vmem:[%s439_s3] sm:$0xff]  ;;  %159 = vperm.xlu0 %305, %v155_v10   ;;  %v313_v18 = vld [vmem:[%s434_s1 + $0x8] sm:$0xff]  }
   0x8   :  { %118 = vmatprep.subr.bf16.mxu0 %v322_v0  ;;  %297 = vmatpush3.bf16.msra.mxu1 %v317_v7  ;;  %v255_v16 = vld [vmem:[%s440_s6] sm:$0xff] }
   0x9   :  { %173 = vperm.xlu1 %306, %v169_v11   ;;  %v314_v19 = vld [vmem:[%s434_s1] sm:$0xff]  }
   0xa   :  { %v316_v20 = vld [vmem:[%s434_s1 + $0x40] sm:$0xff]  }
   0xb   :  { %119 = vmatpush1.bf16.msra.mxu0 %v309_v4  ;;  %299 = vmatmul.mubr.msk.bf16.vlgmr.msra.gmra.mxu1 %vm208_vm2, %v321_v9 }
   0xc   :  { %120 = vmatprep.subr.bf16.mxu0 %v322_v0  ;;  %164 = vperm.xlu0 %305, %v156_v13  }
   0xd   :  { %178 = vperm.xlu1 %306, %v170_v14  }
   0xf   :  { %121 = vmatpush1.bf16.msra.mxu0 %v310_v6 }
  0x10   :  { %122 = vmatprep.subr.bf16.mxu0 %v322_v0  ;;  %259 = vperm.xlu0 %305, %v255_v16  }
  0x11   :  { %264 = vperm.xlu1 %306, %v256_v17  }
  0x13   :  { %123 = vmatpush1.bf16.msra.mxu0 %v311_v12 }
  0x14   :  { %124 = vmatprep.subr.bf16.mxu0 %v322_v0 }
  0x17   :  { %125 = vmatpush1.bf16.msra.mxu0 %v312_v15 }
  0x18   :  { %126 = vmatprep.subr.bf16.mxu0 %v322_v0 }
  0x1b   :  { %127 = vmatpush1.bf16.msra.mxu0 %v313_v18 }
  0x1c   :  { %128 = vmatprep.subr.bf16.mxu0 %v322_v0 }
  0x1f   :  { %129 = vmatpush1.bf16.msra.mxu0 %v314_v19 }
  0x20   :  { %144 = vmatprep.subr.bf16.mxu0 %v322_v0 }
  0x23   :  { %145 = vmatpush2.bf16.msra.mxu0 %v316_v20 }
  0x26   :  { %147 = vmatmul.mubr.bf16.vlgmr.msra.gmra.mxu0 %v318_v21 }
  0x82   :  { %v160_v26 = vpop.permute.xlu0 %159 }
  0x84   :  { %v174_v27 = vpop.permute.xlu1 %173 }
  0x87   :  { %v165_v30 = vpop.permute.xlu0 %164 }
  0x88   :  { %v179_v36 = vpop.permute.xlu1 %178 }
  0x8b   :  { %v260_v40 = vpop.permute.xlu0 %259 }
  0x8c   :  { %v265_v44 = vpop.permute.xlu1 %264 }
  0xcb   :  { %v246_v22 = vpop.f32.mrf.mxu1 }
  0xcd   :  { %v300_v23 = vpop.f32.mrf.mxu1 }
  0xcf   :  { %v249_v24 = vpop.f32.mrf.mxu1 }
  0xd1   :  { %v301_v25 = vpop.f32.mrf.mxu1 }
  0xe6   :  { %v148_v28 = vpop.f32.mrf.mxu0 }
  0xe7   :  { %v167_v29 = vmul.f32 %v160_v26, %v148_v28 }
  0xe8   :  { %v150_v31 = vpop.f32.mrf.mxu0 }
  0xe9   :  { %v181_v32 = vadd.f32 %v174_v27, %v167_v29 }
  0xea   :  { %v151_v33 = vpop.f32.mrf.mxu0 }
  0xeb   :  { %v183_v34 = vmax.f32 %v181_v32, 0.0  ;;  %v168_v35 = vmul.f32 %v165_v30, %v151_v33 }
  0xec   :  { %v153_v37 = vpop.f32.mrf.mxu0 }
  0xed   :  { %v253_v38 = vadd.f32 %v246_v22, %v183_v34  ;;  %v182_v39 = vadd.f32 %v179_v36, %v168_v35 }
  0xef   :  { %v267_v41 = vadd.f32 %v260_v40, %v253_v38  ;;  %v184_v42 = vmax.f32 %v182_v39, 0.0 }
  0xf1   :  { %v254_v43 = vadd.f32 %v249_v24, %v184_v42  ;;  %269 = vst.msk [vmem:[%s441_s7] sm:$0xff] %vm208_vm2, %v267_v41 }
  0xf3   :  { %v268_v45 = vadd.f32 %v265_v44, %v254_v43 }
  0xf5   :  { %270 = vst.msk [vmem:[%s441_s7 + $0x8] sm:$0xff] %vm208_vm2, %v268_v45 }

// kernel: unet_forward.46
= control target key start
LH: loop header
LB: loop body
LE: loop exit
PB: predicated region body
PF: predicated region fallthrough
CT: control target
= control target key end

     0   :  { %v186_v0 = vmov 0   ;;  %vm97_vm0 = vcmask 130048   ;;  %s251_s1 = inlined_call_operand.vmem [shape: bf16[144,128], index: 1, kind: input, shape index: {}]   ;;  %s252_s0 = inlined_call_operand.vmem [shape: bf16[8,144], index: 0, kind: input, shape index: {}]   ;;  %s253_s2 = inlined_call_operand.vmem [shape: f32[8,1], index: 2, kind: input, shape index: {}]   ;;  %s254_s3 = inlined_call_operand.vmem [shape: f32[8,1], index: 3, kind: input, shape index: {}]   ;;  %s255_s4 = inlined_call_operand.vmem [shape: f32[8,128], index: 4, kind: output, shape index: {}]  }
   0x1   :  { %101 = vmatprep.subr.bf16.mxu0 %v186_v0  ;;  %v175_v1 = vld [vmem:[%s251_s1 + $0x38] sm:$0xff]   ;;  %174 = vset.pattern.permute.xlu0 %v186_v0  ;;  %v176_v2 = vld [vmem:[%s251_s1 + $0x30] sm:$0xff]   ;;  %v177_v3 = vld [vmem:[%s251_s1 + $0x28] sm:$0xff]  }
   0x2   :  { %102 = vmatpush1.bf16.msra.mxu0 %v175_v1  ;;  %v18_v4 = vld [vmem:[%s252_s0] sm:$0xff]  ;;  %v179_v9 = vld [vmem:[%s251_s1 + $0x18] sm:$0xff]   ;;  %v180_v10 = vld [vmem:[%s251_s1 + $0x10] sm:$0xff]  }
   0x3   :  { %103 = vmatprep.subr.bf16.mxu0 %v186_v0  ;;  %v141_v5 = vld [vmem:[%s253_s2] sm:$0xff]  ;;  %v162_v7 = vcombine.high %v18_v4, %v18_v4  ;;  %v181_v11 = vld [vmem:[%s251_s1 + $0x8] sm:$0xff]   ;;  %v161_v14 = vcombine.low %v18_v4, %v18_v4 }
   0x4   :  { %v178_v6 = vld [vmem:[%s251_s1 + $0x20] sm:$0xff]   ;;  %144 = vperm.xlu0 %174, %v141_v5  }
   0x5   :  { %v148_v8 = vld [vmem:[%s254_s3] sm:$0xff]  ;;  %172 = vmatprep.mubr.msk.bf16.mxu0 %vm97_vm0, %v162_v7 }
   0x6   :  { %104 = vmatpush1.bf16.msra.mxu0 %v176_v2  ;;  %v182_v12 = vld [vmem:[%s251_s1] sm:$0xff]  }
   0x7   :  { %105 = vmatprep.subr.bf16.mxu0 %v186_v0  ;;  %v183_v13 = vld [vmem:[%s251_s1 + $0x40] sm:$0xff]  }
   0x8   :  { %151 = vperm.xlu0 %174, %v148_v8  }
   0xa   :  { %106 = vmatpush1.bf16.msra.mxu0 %v177_v3 }
   0xb   :  { %107 = vmatprep.subr.bf16.mxu0 %v186_v0 }
   0xe   :  { %108 = vmatpush1.bf16.msra.mxu0 %v178_v6 }
   0xf   :  { %109 = vmatprep.subr.bf16.mxu0 %v186_v0 }
  0x12   :  { %110 = vmatpush1.bf16.msra.mxu0 %v179_v9 }
  0x13   :  { %111 = vmatprep.subr.bf16.mxu0 %v186_v0 }
  0x16   :  { %112 = vmatpush1.bf16.msra.mxu0 %v180_v10 }
  0x17   :  { %113 = vmatprep.subr.bf16.mxu0 %v186_v0 }
  0x1a   :  { %114 = vmatpush1.bf16.msra.mxu0 %v181_v11 }
  0x1b   :  { %115 = vmatprep.subr.bf16.mxu0 %v186_v0 }
  0x1e   :  { %116 = vmatpush1.bf16.msra.mxu0 %v182_v12 }
  0x1f   :  { %131 = vmatprep.subr.bf16.mxu0 %v186_v0 }
  0x22   :  { %132 = vmatpush2.bf16.msra.mxu0 %v183_v13 }
  0x25   :  { %134 = vmatmul.mubr.bf16.vlgmr.msra.gmra.mxu0 %v161_v14 }
  0x7f   :  { %v145_v15 = vpop.permute.xlu0 %144 }
  0x83   :  { %v152_v18 = vpop.permute.xlu0 %151 }
  0xe5   :  { %v135_v16 = vpop.f32.mrf.mxu0 }
  0xe6   :  { %v147_v17 = vmul.f32 %v145_v15, %v135_v16 }
  0xe7   :  { %v137_v19 = vpop.f32.mrf.mxu0 }
  0xe8   :  { %v154_v20 = vadd.f32 %v152_v18, %v147_v17 }
  0xe9   :  { %v138_v21 = vpop.f32.mrf.mxu0 }
  0xea   :  { %v155_v22 = vmax.f32 %v154_v20, 0.0 }
  0xeb   :  { %v139_v23 = vpop.f32.mrf.mxu0 }
  0xec   :  { %156 = vst [vmem:[%s255_s4] sm:$0xff] %v155_v22 }

// kernel: unet_forward.48
= control target key start
LH: loop header
LB: loop body
LE: loop exit
PB: predicated region body
PF: predicated region fallthrough
CT: control target
= control target key end

     0   :  { %vm68_vm0 = vcmask 1043456   ;;  %v240_v0 = vmov 0.0   ;;  %vm241_vm1 = vmmov 0   ;;  %v242_v5 = vmov 0   ;;  %s319_s1 = inlined_call_operand.vmem [shape: bf16[72,128], index: 1, kind: input, shape index: {}]   ;;  %s320_s5 = inlined_call_operand.vmem [shape: bf16[16,128], index: 5, kind: input, shape index: {}]   ;;  %s321_s4 = inlined_call_operand.vmem [shape: bf16[8,16], index: 4, kind: input, shape index: {}]   ;;  %s322_s2 = inlined_call_operand.vmem [shape: f32[8,1], index: 2, kind: input, shape index: {}]   ;;  %s323_s6 = inlined_call_operand.vmem [shape: f32[8,1], index: 6, kind: input, shape index: {}]   ;;  %s324_s3 = inlined_call_operand.vmem [shape: f32[8,1], index: 3, kind: input, shape index: {}]   ;;  %s325_s0 = inlined_call_operand.vmem [shape: bf16[8,72], index: 0, kind: input, shape index: {}]   ;;  %s326_s7 = inlined_call_operand.vmem [shape: f32[8,128], index: 7, kind: output, shape index: {}]  }
   0x1   :  { %209 = vmatprep.subr.bf16.mxu0 %v240_v0  ;;  %v234_v1 = vld [vmem:[%s319_s1 + $0x20] ss:$0 sps:$4 sm:$0xff]   ;;  %223 = vmatprep.subr.bf16.mxu1 %v240_v0  ;;  %v235_v3 = vld [vmem:[%s319_s1 + $0x18] sm:$0xff]   ;;  %vm136_vm2 = vcmask 130048   ;;  %v236_v8 = vld [vmem:[%s319_s1 + $0x10] sm:$0xff]   ;;  %vm64_vm3 = vcmask 588800  }
   0x2   :  { %225 = vmatprep.mubr.msk.bf16.mxu1 %vm241_vm1, %v240_v0  ;;  %219 = vmatprep.mubr.msk.bf16.mxu0 %vm241_vm1, %v240_v0  ;;  %v70_v2 = vsel %vm68_vm0, %v234_v1, 0  ;;  %v238_v4 = vld [vmem:[%s320_s5] sm:$0xff]   ;;  %v237_v11 = vld [vmem:[%s319_s1 + $0x8] sm:$0xff]  }
   0x3   :  { %210 = vmatpush3.bf16.msra.mxu0 %v70_v2  ;;  %232 = vset.pattern.permute.xlu0 %v242_v5  ;;  %v127_v6 = vld [vmem:[%s321_s4] sm:$0xf] }
   0x4   :  { %211 = vmatprep.subr.bf16.mxu0 %v240_v0  ;;  %233 = vset.pattern.permute.xlu1 %v242_v5  ;;  %v112_v7 = vld [vmem:[%s322_s2] sm:$0xff] }
   0x5   :  { %224 = vmatpush3.bf16.msra.mxu1 %v238_v4  ;;  %115 = vperm.xlu0 %232, %v112_v7   ;;  %v181_v9 = vld [vmem:[%s323_s6] sm:$0xff] }
   0x6   :  { %v119_v10 = vld [vmem:[%s324_s3] sm:$0xff]  ;;  %184 = vperm.xlu1 %233, %v181_v9  }
   0x7   :  { %212 = vmatpush3.bf16.msra.mxu0 %v235_v3  ;;  %v239_v12 = vld [vmem:[%s319_s1] sm:$0xff]  }
   0x8   :  { %213 = vmatprep.subr.bf16.mxu0 %v240_v0  ;;  %226 = vmatmul.mubr.msk.bf16.vlgmr.msra.gmra.mxu1 %vm136_vm2, %v127_v6  ;;  %v27_v13 = vld [vmem:[%s325_s0] sm:$0xf] }
   0x9   :  { %122 = vperm.xlu0 %232, %v119_v10  }
   0xb   :  { %214 = vmatpush3.bf16.msra.mxu0 %v236_v8 }
   0xc   :  { %215 = vmatprep.subr.bf16.mxu0 %v240_v0 }
   0xf   :  { %216 = vmatpush3.bf16.msra.mxu0 %v237_v11 }
  0x10   :  { %217 = vmatprep.subr.bf16.mxu0 %v240_v0 }
  0x13   :  { %218 = vmatpush3.bf16.msra.mxu0 %v239_v12 }
  0x16   :  { %220 = vmatmul.mubr.msk.bf16.vlgmr.msra.gmra.mxu0 %vm64_vm3, %v27_v13 }
  0x80   :  { %v116_v18 = vpop.permute.xlu0 %115 }
  0x81   :  { %v185_v27 = vpop.permute.xlu1 %184 }
  0x84   :  { %v123_v21 = vpop.permute.xlu0 %122 }
  0xc8   :  { %v174_v14 = vpop.f32.mrf.mxu1 }
  0xca   :  { %v227_v15 = vpop.f32.mrf.mxu1 }
  0xcc   :  { %v177_v16 = vpop.f32.mrf.mxu1 }
  0xce   :  { %v228_v17 = vpop.f32.mrf.mxu1 }
  0xd6   :  { %v106_v19 = vpop.f32.mrf.mxu0 }
  0xd7   :  { %v118_v20 = vmul.f32 %v116_v18, %v106_v19 }
  0xd8   :  { %v221_v22 = vpop.f32.mrf.mxu0 }
  0xd9   :  { %v125_v23 = vadd.f32 %v123_v21, %v118_v20 }
  0xda   :  { %v109_v24 = vpop.f32.mrf.mxu0 }
  0xdb   :  { %v126_v25 = vmax.f32 %v125_v23, 0.0 }
  0xdc   :  { %v222_v26 = vpop.f32.mrf.mxu0 }
  0xdd   :  { %v180_v28 = vadd.f32 %v174_v14, %v126_v25 }
  0xdf   :  { %v187_v29 = vadd.f32 %v185_v27, %v180_v28 }
  0xe1   :  { %188 = vst [vmem:[%s326_s7] sm:$0xff] %v187_v29 }

// kernel: unet_forward.49
= control target key start
LH: loop header
LB: loop body
LE: loop exit
PB: predicated region body
PF: predicated region fallthrough
CT: control target
= control target key end

     0   :  { %s577_s15 = smov 0   ;;  %s579_s16 = smov 0   ;;  %s638_s0 = inlined_call_operand.vmem [shape: bf16[4,72], index: 0, kind: input, shape index: {}]   ;;  %s639_s1 = inlined_call_operand.vmem [shape: bf16[72,512], index: 1, kind: input, shape index: {}]   ;;  %s640_s2 = inlined_call_operand.vmem [shape: f32[4,1], index: 2, kind: input, shape index: {}]   ;;  %s641_s3 = inlined_call_operand.vmem [shape: f32[4,1], index: 3, kind: input, shape index: {}]   ;;  %s642_s4 = inlined_call_operand.vmem [shape: f32[4,512], index: 4, kind: output, shape index: {}]  }
   0x1   :  { %s581_s17 = smov 0  }
   0x2 LB: > { %s461_s18 = sadd.s32 4294967295, %s549_s17   ;;  %s594_s19 = sadd.s32 1, %s549_s17   ;;  %s549_s17 = sphi %s581_s17, %s645_s17   ;;  %s545_s16 = sphi %s579_s16, %s644_s16   ;;  %s541_s15 = sphi %s577_s15, %s643_s15  }
   0x3   : > { %s39_s20 = ssub.s32 %s549_s17, %s594_s19  ;;  %s42_s21 = sadd.s32 1, %s545_s16 }
   0x4   : > { %p40_p0 = scmp.eq.s32.totalorder %s39_s20, 0  ;;  %p49_p1 = scmp.ne.s32.totalorder %s545_s16, %s541_s15 }
   0x5   : > { %p50_p2 = scmp.eq.s32.totalorder %s549_s17, 0  ;;  %p464_p4 = scmp.ge.s32.totalorder %s549_s17, 2 }
   0x6   : > { %s603_s22 = scalar_select %p40_p0, %s545_s16, %s42_s21  }
   0x7   : > { %p51_p3 = por %p50_p2, %p49_p1  ;;  %152 = sbr.rel (%p464_p4) target bundleno = 21 (0x15), region = 28 }
   0xc   : > { %155 = sbr.rel (!%p51_p3) target bundleno = 21 (0x15), region = 32  ;;  %s157_s23 = sand.u32 (%p51_p3), 1, %s545_s16  }
   0xd   : > { %s484_s24 = sshll.u32 (%p51_p3), %s549_s17, 3  ;;  %s485_s25 = smul.u32 (%p51_p3), 72, %s157_s23 }
   0xe   : > { %s162_s28 = scalar_lea.vmem (%p51_p3), %s639_s1, %s484_s24 }
   0xf   : > { %v207_v0 = vld [vmem:[%s162_s28] sm:$0xff] (%p51_p3)  ;;  %v209_v1 = vld [vmem:[%s162_s28 + $0x10] sm:$0xff] (%p51_p3)  ;;  %s159_s29 = scalar_lea.vmem (%p51_p3), [#allocation2], %s485_s25 }
  0x10   : > { %v211_v2 = vld [vmem:[%s162_s28 + $0x20] sm:$0xff] (%p51_p3)  ;;  %v213_v3 = vld [vmem:[%s162_s28 + $0x30] sm:$0xff] (%p51_p3)  ;;  %208 = vst [vmem:[%s159_s29] sm:$0xff] (%p51_p3), %v207_v0  ;;  %210 = vst [vmem:[%s159_s29 + $0x8] sm:$0xff] (%p51_p3), %v209_v1 }
  0x11   : > { %v215_v4 = vld [vmem:[%s162_s28 + $0x40] sm:$0xff]  ;;  %v217_v5 = vld [vmem:[%s162_s28 + $0x50] sm:$0xff]  ;;  %212 = vst [vmem:[%s159_s29 + $0x10] sm:$0xff] %v211_v2  ;;  %214 = vst [vmem:[%s159_s29 + $0x18] sm:$0xff] %v213_v3 }
  0x12   : > { %216 = vst [vmem:[%s159_s29 + $0x20] sm:$0xff] %v215_v4  ;;  %218 = vst [vmem:[%s159_s29 + $0x28] sm:$0xff] %v217_v5  ;;  %v219_v6 = vld [vmem:[%s162_s28 + $0x60] sm:$0xff]  ;;  %v221_v7 = vld [vmem:[%s162_s28 + $0x70] sm:$0xff] }
  0x13   : > { %v223_v8 = vld [vmem:[%s162_s28 + $0x80] sm:$0xff]  ;;  %220 = vst [vmem:[%s159_s29 + $0x30] sm:$0xff] %v219_v6  ;;  %222 = vst [vmem:[%s159_s29 + $0x38] sm:$0xff] %v221_v7 }
  0x14   : > { %224 = vst [vmem:[%s159_s29 + $0x40] sm:$0xff] %v223_v8 }
  0x15 PF: > { %p467_p5 = scmp.ge.s32.totalorder %s549_s17, 1  ;;  %p229_p6 = scmp.lt.s32.totalorder %s549_s17, 3 }
  0x17   : > { %p230_p7 = pnand %p467_p5, %p229_p6 }
  0x18   : > { %s236_s30 = sand.u32 (!%p230_p7), 1, %s541_s15   ;;  %s468_s13 = sshll.u32 (!%p230_p7), %s461_s18, 1 }
  0x19   : > { %233 = sbr.rel (%p230_p7) target bundleno = 259 (0x103), region = 70  ;;  %p263_p8 = scmp.lt.s32.totalorder (!%p230_p7), %s468_s13, 3 }
  0x1a   : > { %s486_s5 = smul.u32 (!%p230_p7), 72, %s236_s30 }
  0x1c   : > { %s238_s10 = scalar_lea.vmem (!%p230_p7), [#allocation2], %s486_s5 }
  0x1e   : > { %v551_v9 = vmov 0   ;;  %v376_v10 = vld [vmem:[%s640_s2] sm:$0xf]  ;;  %vm328_vm0 = vcmask 1043456   ;;  %v515_v15 = vld [vmem:[%s238_s10 + $0x34] ss:$8 sps:$4 sm:$0xff]  }
  0x1f   : > { %367 = vmatprep.mubr.bf16.mxu0 %v551_v9  ;;  %512 = vset.pattern.permute.xlu0 %v551_v9  ;;  %v384_v11 = vld [vmem:[%s641_s3] sm:$0xf]  ;;  %v518_v18 = vld [vmem:[%s238_s10 + $0x24] ss:$8 sps:$4 sm:$0xff]   ;;  %v521_v20 = vld [vmem:[%s238_s10 + $0x14] ss:$8 sps:$4 sm:$0xff]  }
  0x20   : > { %379 = vperm.xlu0 %512, %v376_v10   ;;  %v278_v12 = vld [vmem:[%s238_s10 + $0x40] sm:$0xff]  ;;  %v517_v17 = vld [vmem:[%s238_s10 + $0x30] ss:$8 sps:$4 sm:$0xff]   ;;  %vm324_vm1 = vcmask 588800   ;;  %s647_s13 = smov (!%p263_p8, %s468_s13), 3 }
  0x21   : > { %v479_v13 = vcombine.high %v278_v12, %v278_v12  ;;  %v478_v14 = vcombine.low %v278_v12, %v278_v12  ;;  %v520_v19 = vld [vmem:[%s238_s10 + $0x20] ss:$8 sps:$4 sm:$0xff]   ;;  %v523_v21 = vld [vmem:[%s238_s10 + $0x10] ss:$8 sps:$4 sm:$0xff]   ;;  %v524_v22 = vld [vmem:[%s238_s10 + $0x4] ss:$8 sps:$4 sm:$0xff]  }
  0x22   : > { %v526_v23 = vld [vmem:[%s238_s10] ss:$8 sps:$4 sm:$0xff]   ;;  %s469_s14 = sshll.u32 %s647_s13, 2 }
  0x23   : > { %480 = vmatprep.subr.msk.bf16.mxu0 %vm328_vm0, %v479_v13  ;;  %v330_v16 = vsel %vm328_vm0, %v478_v14, 0  ;;  %v269_v24 = vld [vmem:[%s638_s0] sm:$0x3]  ;;  %s266_s17 = scalar_lea.vmem %s642_s4, %s469_s14 }
  0x24   : > { %387 = vperm.xlu0 %512, %v384_v11   ;;  %342 = vmatpush1.bf16.msra.mxu0 %v330_v16 }
  0x25   : > { %343 = vmatprep.subr.bf16.mxu0 %v515_v15 }
  0x28   : > { %344 = vmatpush1.bf16.msra.mxu0 %v517_v17 }
  0x29   : > { %345 = vmatprep.subr.bf16.mxu0 %v518_v18 }
  0x2c   : > { %346 = vmatpush1.bf16.msra.mxu0 %v520_v19 }
  0x2d   : > { %347 = vmatprep.subr.bf16.mxu0 %v521_v20 }
  0x30   : > { %348 = vmatpush1.bf16.msra.mxu0 %v523_v21 }
  0x31   : > { %349 = vmatprep.subr.bf16.mxu0 %v524_v22 }
  0x34   : > { %350 = vmatpush1.bf16.msra.mxu0 %v526_v23 }
  0x37   : > { %481 = vmatmul.mubr.msk.bf16.vlgmr.msra.gmra.mxu0 %vm324_vm1, %v269_v24 }
  0x9b   : > { %v380_v25 = vpop.permute.xlu0 %379 }
  0x9f   : > { %v388_v28 = vpop.permute.xlu0 %387 }
  0xf7   : > { %v369_v26 = vpop.f32.mrf.mxu0 }
  0xf8   : > { %v382_v27 = vmul.f32 %v380_v25, %v369_v26 }
  0xf9   : > { %v371_v29 = vpop.f32.mrf.mxu0 }
  0xfa   : > { %v390_v30 = vadd.f32 %v388_v28, %v382_v27  ;;  %v383_v31 = vmul.f32 %v380_v25, %v371_v29 }
  0xfb   : > { %v373_v32 = vpop.f32.mrf.mxu0 }
  0xfc   : > { %v391_v33 = vadd.f32 %v388_v28, %v383_v31  ;;  %v392_v35 = vmax.f32 %v390_v30, 0.0 }
  0xfd   : > { %v374_v34 = vpop.f32.mrf.mxu0 }
  0xfe   : > { %v393_v36 = vmax.f32 %v391_v33, 0.0 }
 0x100   : > { %v396_v37 = vcombine.low %v392_v35, %v393_v36 }
 0x102   : > { %398 = vst [vmem:[%s266_s17] sm:$0xff] %v396_v37 }
 0x103 PF: > { %p11_p9 = scmp.ge.s32.totalorder %s594_s19, 4   ;;  %s643_s15 = smov %s545_s16 }
 0x104   : > { %s644_s16 = smov %s603_s22  ;;  %s645_s17 = smov %s594_s19 }
 0x105   :  { %13 = sbr.rel (!%p11_p9) target bundleno = 2 (0x2), region = 109 }

// kernel: unet_forward.51
= control target key start
LH: loop header
LB: loop body
LE: loop exit
PB: predicated region body
PF: predicated region fallthrough
CT: control target
= control target key end

     0   :  { %s735_s24 = smov 0   ;;  %s737_s25 = smov 0   ;;  %s812_s0 = inlined_call_operand.vmem [shape: bf16[4,36], index: 0, kind: input, shape index: {}]   ;;  %s813_s1 = inlined_call_operand.vmem [shape: bf16[36,512], index: 1, kind: input, shape index: {}]   ;;  %s814_s2 = inlined_call_operand.vmem [shape: f32[4,1], index: 2, kind: input, shape index: {}]   ;;  %s815_s3 = inlined_call_operand.vmem [shape: f32[4,1], index: 3, kind: input, shape index: {}]   ;;  %s816_s4 = inlined_call_operand.vmem [shape: bf16[4,8], index: 4, kind: input, shape index: {}]   ;;  %s817_s5 = inlined_call_operand.vmem [shape: bf16[8,512], index: 5, kind: input, shape index: {}]   ;;  %s818_s6 = inlined_call_operand.vmem [shape: f32[4,1], index: 6, kind: input, shape index: {}]   ;;  %s819_s7 = inlined_call_operand.vmem [shape: f32[4,512], index: 7, kind: output, shape index: {}]  }
   0x1   :  { %s739_s26 = smov 0  }
   0x2 LB: > { %s605_s27 = sadd.s32 4294967295, %s692_s26   ;;  %s752_s28 = sadd.s32 1, %s692_s26   ;;  %s692_s26 = sphi %s739_s26, %s822_s26   ;;  %s688_s25 = sphi %s737_s25, %s821_s25   ;;  %s684_s24 = sphi %s735_s24, %s820_s24  }
   0x3   : > { %s42_s29 = ssub.s32 %s692_s26, %s752_s28  ;;  %s45_s30 = sadd.s32 1, %s688_s25 }
   0x4   : > { %p43_p0 = scmp.eq.s32.totalorder %s42_s29, 0  ;;  %p52_p1 = scmp.ne.s32.totalorder %s688_s25, %s684_s24 }
   0x5   : > { %p53_p2 = scmp.eq.s32.totalorder %s692_s26, 0  ;;  %p608_p4 = scmp.ge.s32.totalorder %s692_s26, 2 }
   0x6   : > { %s761_s8 = scalar_select %p43_p0, %s688_s25, %s45_s30  }
   0x7   : > { %p54_p3 = por %p53_p2, %p52_p1  ;;  %229 = sbr.rel (%p608_p4) target bundleno = 19 (0x13), region = 36 }
   0xc   : > { %232 = sbr.rel (!%p54_p3) target bundleno = 19 (0x13), region = 40  ;;  %s234_s9 = sand.u32 (%p54_p3), 1, %s688_s25  }
   0xd   : > { %s630_s10 = sshll.u32 (%p54_p3), %s692_s26, 3  ;;  %s631_s11 = smul.u32 (%p54_p3), 40, %s234_s9 }
   0xe   : > { %s239_s14 = scalar_lea.vmem (%p54_p3), %s813_s1, %s630_s10 }
   0xf   : > { %v276_v0 = vld [vmem:[%s239_s14] sm:$0xff] (%p54_p3)  ;;  %v278_v1 = vld [vmem:[%s239_s14 + $0x10] sm:$0xff] (%p54_p3)  ;;  %s236_s15 = scalar_lea.vmem (%p54_p3), [#allocation2], %s631_s11 }
  0x10   : > { %v280_v2 = vld [vmem:[%s239_s14 + $0x20] sm:$0xff] (%p54_p3)  ;;  %v282_v3 = vld [vmem:[%s239_s14 + $0x30] sm:$0xff] (%p54_p3)  ;;  %277 = vst [vmem:[%s236_s15] sm:$0xff] (%p54_p3), %v276_v0  ;;  %279 = vst [vmem:[%s236_s15 + $0x8] sm:$0xff] (%p54_p3), %v278_v1 }
  0x11   : > { %v284_v4 = vld [vmem:[%s239_s14 + $0x40] sm:$0xff]  ;;  %281 = vst [vmem:[%s236_s15 + $0x10] sm:$0xff] %v280_v2  ;;  %283 = vst [vmem:[%s236_s15 + $0x18] sm:$0xff] %v282_v3 }
  0x12   : > { %285 = vst [vmem:[%s236_s15 + $0x20] sm:$0xff] %v284_v4 }
  0x13 PF: > { %p611_p5 = scmp.ge.s32.totalorder %s692_s26, 1  ;;  %p299_p6 = scmp.lt.s32.totalorder %s692_s26, 3 }
  0x15   : > { %p300_p7 = pnand %p611_p5, %p299_p6 }
  0x16   : > { %s306_s16 = sand.u32 (!%p300_p7), 1, %s684_s24   ;;  %s612_s17 = sshll.u32 (!%p300_p7), %s605_s27, 1 }
  0x17   : > { %303 = sbr.rel (%p300_p7) target bundleno = 254 (0xfe), region = 82  ;;  %p344_p8 = scmp.lt.s32.totalorder (!%p300_p7), %s612_s17, 3 }
  0x18   : > { %s632_s18 = smul.u32 (!%p300_p7), 40, %s306_s16 }
  0x1a   : > { %s308_s26 = scalar_lea.vmem (!%p300_p7), [#allocation2], %s632_s18 }
  0x1c   : > { %v694_v5 = vmov 0   ;;  %v439_v6 = vld [vmem:[%s814_s2] sm:$0xf]  ;;  %vm391_vm0 = vcmask 1041408   ;;  %s824_s17 = smov (!%p344_p8, %s612_s17), 3  ;;  %vm468_vm1 = vcmask 1043456  }
  0x1d   : > { %430 = vmatprep.mubr.bf16.mxu0 %v694_v5  ;;  %507 = vmatprep.mubr.bf16.mxu1 %v694_v5  ;;  %v447_v7 = vld [vmem:[%s815_s3] sm:$0xf]  ;;  %v662_v12 = vld [vmem:[%s308_s26 + $0x14] ss:$8 sps:$4 sm:$0xff]   ;;  %s613_s27 = sshll.u32 %s824_s17, 2  ;;  %vm464_vm2 = vcmask 64512  }
  0x1e   : > { %658 = vset.pattern.permute.xlu0 %v694_v5  ;;  %659 = vset.pattern.permute.xlu1 %v694_v5  ;;  %v518_v8 = vld [vmem:[%s818_s6] sm:$0xf]  ;;  %s347_s9 = scalar_lea.vmem %s817_s5, %s613_s27  ;;  %v665_v16 = vld [vmem:[%s308_s26 + $0x4] ss:$8 sps:$4 sm:$0xff]   ;;  %vm387_vm3 = vcmask 293888   ;;  %s353_s16 = scalar_lea.vmem %s819_s7, %s613_s27 }
  0x1f   : > { %442 = vperm.xlu0 %658, %v439_v6   ;;  %v361_v9 = vld [vmem:[%s308_s26 + $0x20] sm:$0x33]  ;;  %521 = vperm.xlu1 %659, %v518_v8   ;;  %v664_v14 = vld [vmem:[%s308_s26 + $0x10] ss:$8 sps:$4 sm:$0xff]  }
  0x20   : > { %v621_v10 = vcombine.high %v361_v9, %v361_v9  ;;  %v620_v11 = vcombine.low %v361_v9, %v361_v9  ;;  %v458_v15 = vld [vmem:[%s347_s9] sm:$0xff] }
  0x21   : > { %v625_v17 = vcombine.high %v458_v15, %v458_v15  ;;  %v624_v18 = vcombine.low %v458_v15, %v458_v15  ;;  %v668_v20 = vld [vmem:[%s308_s26] ss:$8 sps:$4 sm:$0xff]  }
  0x22   : > { %622 = vmatprep.subr.msk.bf16.mxu0 %vm391_vm0, %v621_v10  ;;  %v393_v13 = vsel %vm391_vm0, %v620_v11, 0  ;;  %v457_v21 = vld [vmem:[%s816_s4] sm:$0x3] }
  0x23   : > { %450 = vperm.xlu0 %658, %v447_v7   ;;  %409 = vmatpush1.bf16.msra.mxu0 %v393_v13  ;;  %v470_v19 = vsel %vm468_vm1, %v624_v18, 0  ;;  %v356_v22 = vld [vmem:[%s812_s0] sm:$0x3] }
  0x24   : > { %410 = vmatprep.subr.bf16.mxu0 %v662_v12  ;;  %626 = vmatprep.subr.msk.bf16.mxu1 %vm468_vm1, %v625_v17 }
  0x25   : > { %490 = vmatpush1.bf16.msra.mxu1 %v470_v19 }
  0x27   : > { %411 = vmatpush1.bf16.msra.mxu0 %v664_v14 }
  0x28   : > { %412 = vmatprep.subr.bf16.mxu0 %v665_v16  ;;  %627 = vmatmul.mubr.msk.bf16.vlgmr.msra.gmra.mxu1 %vm464_vm2, %v457_v21 }
  0x2b   : > { %413 = vmatpush1.bf16.msra.mxu0 %v668_v20 }
  0x2e   : > { %623 = vmatmul.mubr.msk.bf16.vlgmr.msra.gmra.mxu0 %vm387_vm3, %v356_v22 }
  0x9a   : > { %v443_v23 = vpop.permute.xlu0 %442  ;;  %v522_v40 = vpop.permute.xlu1 %521 }
  0x9e   : > { %v451_v28 = vpop.permute.xlu0 %450 }
  0xe8   : > { %v509_v24 = vpop.f32.mrf.mxu1 }
  0xea   : > { %v511_v25 = vpop.f32.mrf.mxu1 }
  0xec   : > { %v513_v27 = vpop.f32.mrf.mxu1 }
  0xee   : > { %v432_v26 = vpop.f32.mrf.mxu0  ;;  %v514_v31 = vpop.f32.mrf.mxu1 }
  0xef   : > { %v445_v29 = vmul.f32 %v443_v23, %v432_v26 }
  0xf0   : > { %v434_v30 = vpop.f32.mrf.mxu0 }
  0xf1   : > { %v453_v32 = vadd.f32 %v451_v28, %v445_v29  ;;  %v446_v33 = vmul.f32 %v443_v23, %v434_v30 }
  0xf2   : > { %v436_v34 = vpop.f32.mrf.mxu0 }
  0xf3   : > { %v455_v35 = vmax.f32 %v453_v32, 0.0  ;;  %v454_v36 = vadd.f32 %v451_v28, %v446_v33 }
  0xf4   : > { %v437_v37 = vpop.f32.mrf.mxu0 }
  0xf5   : > { %v516_v38 = vadd.f32 %v509_v24, %v455_v35  ;;  %v456_v39 = vmax.f32 %v454_v36, 0.0 }
  0xf7   : > { %v517_v41 = vadd.f32 %v511_v25, %v456_v39  ;;  %v524_v42 = vadd.f32 %v522_v40, %v516_v38 }
  0xf9   : > { %v525_v43 = vadd.f32 %v522_v40, %v517_v41 }
  0xfb   : > { %v528_v44 = vcombine.low %v524_v42, %v525_v43 }
  0xfd   : > { %530 = vst [vmem:[%s353_s16] sm:$0xff] %v528_v44 }
  0xfe PF: > { %p14_p9 = scmp.ge.s32.totalorder %s752_s28, 4   ;;  %s820_s24 = smov %s688_s25 }
  0xff   : > { %s821_s25 = smov %s761_s8  ;;  %s822_s26 = smov %s752_s28 }
 0x100   :  { %16 = sbr.rel (!%p14_p9) target bundleno = 2 (0x2), region = 124 }

// kernel: unet_forward.56
= control target key start
LH: loop header
LB: loop body
LE: loop exit
PB: predicated region body
PF: predicated region fallthrough
CT: control target
= control target key end

     0   :  { %s431_s19 = smov 0   ;;  %s455_s0 = inlined_call_operand.vmem [shape: bf16[1,4], index: 0, kind: input, shape index: {}]   ;;  %s456_s1 = inlined_call_operand.vmem [shape: bf16[4,512], index: 1, kind: input, shape index: {}]   ;;  %s457_s2 = inlined_call_operand.<no memory space> [shape: f32[1,1], index: 2, kind: input, shape index: {}]   ;;  %s458_s4 = inlined_call_operand.vmem [shape: f32[1,512], index: 4, kind: output, shape index: {}]   ;;  %s459_s3 = inlined_call_operand.<no memory space> [shape: f32[1,1], index: 3, kind: input, shape index: {}]  }
   0x1   :  { %v9_v0 = vstv %s457_s2  ;;  %v11_v1 = vstv %s459_s3 }
   0x2   :  { %10 = vst [vmem:[#allocation2] sm:$0x1] %v9_v0  ;;  %12 = vst [vmem:[#allocation3] sm:$0x1] %v11_v1 }
   0x3 LB: > { %s366_s20 = sadd.s32 4294967295, %s396_s19   ;;  %p370_p0 = scmp.ge.s32.totalorder %s396_s19, 1  ;;  %s396_s19 = sphi %s431_s19, %s18_s19  }
   0x4   : > { %p167_p1 = scmp.lt.s32.totalorder %s396_s19, 3 }
   0x6   : > { %p168_p2 = pnand %p370_p0, %p167_p1 }
   0x7   : > { %s371_s2 = sshll.u32 (!%p168_p2), %s366_s20, 1 }
   0x8   : > { %171 = sbr.rel (%p168_p2) target bundleno = 231 (0xe7), region = 36  ;;  %p193_p3 = scmp.lt.s32.totalorder (!%p168_p2), %s371_s2, 3 }
   0xd   : > { %v398_v2 = vmov 0   ;;  %v267_v3 = vld [vmem:[#allocation2] sm:$0x1]  ;;  %s461_s2 = smov (!%p193_p3, %s371_s2), 3  ;;  %v279_v4 = vld [vmem:[#allocation3] sm:$0x1]  ;;  %v273_v9 = vlaneseq }
   0xe   : > { %258 = vmatprep.mubr.bf16.mxu0 %v398_v2  ;;  %389 = vset.pattern.permute.xlu0 %v398_v2  ;;  %s372_s3 = sshll.u32 %s461_s2, 1  ;;  %vm219_vm0 = vcmask 1041408   ;;  %v204_v8 = vld [vmem:[%s455_s0] sm:$0x1]  ;;  %vm215_vm1 = vcmask 31744   ;;  %s201_s28 = scalar_lea.vmem %s458_s4, %s461_s2 }
   0xf   : > { %270 = vperm.xlu0 %389, %v267_v3   ;;  %s196_s23 = scalar_lea.vmem %s456_s1, %s372_s3  ;;  %v274_v10 = vshrl.u32 %v273_v9, 7  ;;  %v399_v15 = vmov 1966171168   ;;  %vm313_vm2 = vcmp.lt.s32.totalorder %v273_v9, 256 }
  0x10   : > { %v374_v5 = vld.sshfl [vmem:[%s196_s23] sm:$0x33 pattern:$0x76325410]  ;;  %v297_v16 = vunpack.c.l.s4 %v399_v15 }
  0x11   : > { %v214_v6 = vcombine.high %v374_v5, %v374_v5  ;;  %v221_v7 = vsel %vm219_vm0, %v374_v5, 0  ;;  %v275_v12 = vsub.s32 0, %v274_v10 }
  0x12   : > { %v298_v21 = vunpack.c.0.s8 %v297_v16 }
  0x13   : > { %282 = vperm.xlu0 %389, %v279_v4   ;;  %375 = vmatprep.subr.msk.bf16.mxu0 %vm219_vm0, %v214_v6 }
  0x14   : > { %241 = vmatpush1.bf16.msra.mxu0 %v221_v7  ;;  %v301_v27 = vsub.s32 %v298_v21, %v274_v10 }
  0x17   : > { %376 = vmatmul.mubr.msk.bf16.vlgmr.msra.gmra.mxu0 %vm215_vm1, %v204_v8 }
  0x8a   : > { %v271_v11 = vpop.permute.xlu0 %270 }
  0x8b   : > { %v276_v13 = vrot.slane %v271_v11, %v275_v12 }
  0x8e   : > { %v283_v14 = vpop.permute.xlu0 %282 }
  0x8f   : > { %v288_v18 = vrot.slane %v283_v14, %v275_v12 }
  0xd7   : > { %v260_v17 = vpop.f32.mrf.mxu0 }
  0xd8   : > { %v277_v19 = vmul.f32 %v276_v13, %v260_v17 }
  0xd9   : > { %v262_v20 = vpop.f32.mrf.mxu0 }
  0xda   : > { %v289_v22 = vadd.f32 %v288_v18, %v277_v19  ;;  %v278_v23 = vmul.f32 %v276_v13, %v262_v20 }
  0xdb   : > { %v264_v24 = vpop.f32.mrf.mxu0 }
  0xdc   : > { %v290_v25 = vadd.f32 %v288_v18, %v278_v23  ;;  %v291_v28 = vmax.f32 %v289_v22, 0.0 }
  0xdd   : > { %v265_v26 = vpop.f32.mrf.mxu0 }
  0xde   : > { %v292_v29 = vmax.f32 %v290_v25, 0.0 }
  0xe0   : > { %v295_v30 = vcombine.low %v291_v28, %v292_v29 }
  0xe2   : > { %v302_v31 = vrot.slane %v295_v30, %v301_v27 }
  0xe4   : > { %v309_v32 = vrot.slane %v302_v31, %v301_v27 }
  0xe6   : > { %315 = vst.msk [vmem:[%s201_s28] sm:$0x3] %vm313_vm2, %v309_v32 }
  0xe7 PF: > { %s18_s19 = sadd.s32 1, %s396_s19  }
  0xe8   : > { %p15_p4 = scmp.ge.s32.totalorder %s18_s19, 4  }
  0xea   :  { %17 = sbr.rel (!%p15_p4) target bundleno = 3 (0x3), region = 66 }

// kernel: unet_forward.55
= control target key start
LH: loop header
LB: loop body
LE: loop exit
PB: predicated region body
PF: predicated region fallthrough
CT: control target
= control target key end

     0   :  { %vm28_vm0 = vcmask 1043456   ;;  %v113_v0 = vmov 0.0   ;;  %vm114_vm1 = vmmov 0   ;;  %v115_v5 = vmov 0   ;;  %s156_s1 = inlined_call_operand.vmem [shape: bf16[8,128], index: 1, kind: input, shape index: {}]   ;;  %s157_s0 = inlined_call_operand.vmem [shape: bf16[1,8], index: 0, kind: input, shape index: {}]   ;;  %s158_s2 = inlined_call_operand.<no memory space> [shape: f32[1,1], index: 2, kind: input, shape index: {}]   ;;  %s159_s3 = inlined_call_operand.<no memory space> [shape: f32[1,1], index: 3, kind: input, shape index: {}]   ;;  %s160_s4 = inlined_call_operand.vmem [shape: f32[1,128], index: 4, kind: output, shape index: {}]  }
   0x1   :  { %103 = vmatprep.subr.bf16.mxu0 %v113_v0  ;;  %v23_v1 = vld [vmem:[%s156_s1] sm:$0xf]  ;;  %105 = vmatprep.mubr.msk.bf16.mxu0 %vm114_vm1, %v113_v0  ;;  %v9_v2 = vstv %s158_s2  ;;  %v11_v3 = vstv %s159_s3  ;;  %vm24_vm2 = vcmask 64512   ;;  %v78_v9 = vlaneseq }
   0x2   :  { %v30_v4 = vsel %vm28_vm0, %v23_v1, 0  ;;  %112 = vset.pattern.permute.xlu0 %v115_v5  ;;  %10 = vst [vmem:[#allocation2] sm:$0x1] %v9_v2  ;;  %12 = vst [vmem:[#allocation3] sm:$0x1] %v11_v3 }
   0x3   :  { %104 = vmatpush3.bf16.msra.mxu0 %v30_v4  ;;  %v22_v6 = vld [vmem:[%s157_s0] sm:$0x1]  ;;  %v79_v10 = vshrl.u32 %v78_v9, 7 }
   0x5   :  { %v80_v12 = vsub.s32 0, %v79_v10 }
   0x6   :  { %106 = vmatmul.mubr.msk.bf16.vlgmr.msra.gmra.mxu0 %vm24_vm2, %v22_v6 }
   0x9   :  { %v72_v7 = vld [vmem:[#allocation2] sm:$0x1]  ;;  %v83_v8 = vld [vmem:[#allocation3] sm:$0x1] }
   0xa   :  { %75 = vperm.xlu0 %112, %v72_v7  }
   0xe   :  { %86 = vperm.xlu0 %112, %v83_v8  }
  0x85   :  { %v76_v11 = vpop.permute.xlu0 %75 }
  0x86   :  { %v81_v14 = vrot.slane %v76_v11, %v80_v12 }
  0x89   :  { %v87_v13 = vpop.permute.xlu0 %86 }
  0x8a   :  { %v92_v16 = vrot.slane %v87_v13, %v80_v12 }
  0xc6   :  { %v66_v15 = vpop.f32.mrf.mxu0 }
  0xc7   :  { %v82_v17 = vmul.f32 %v81_v14, %v66_v15 }
  0xc8   :  { %v107_v18 = vpop.f32.mrf.mxu0 }
  0xc9   :  { %v93_v19 = vadd.f32 %v92_v16, %v82_v17 }
  0xca   :  { %v69_v20 = vpop.f32.mrf.mxu0 }
  0xcb   :  { %v94_v21 = vmax.f32 %v93_v19, 0.0 }
  0xcc   :  { %v108_v22 = vpop.f32.mrf.mxu0 }
  0xcd   :  { %95 = vst [vmem:[%s160_s4] sm:$0x1] %v94_v21 }

// kernel: unet_forward.54
= control target key start
LH: loop header
LB: loop body
LE: loop exit
PB: predicated region body
PF: predicated region fallthrough
CT: control target
= control target key end

     0   :  { %v119_v0 = vmov 0.0   ;;  %vm120_vm0 = vmmov 0   ;;  %v121_v3 = vmov 0   ;;  %vm31_vm1 = vcmask 130048   ;;  %s162_s1 = inlined_call_operand.vmem [shape: bf16[16,32], index: 1, kind: input, shape index: {}]   ;;  %s163_s0 = inlined_call_operand.vmem [shape: bf16[1,16], index: 0, kind: input, shape index: {}]   ;;  %s164_s2 = inlined_call_operand.<no memory space> [shape: f32[1,1], index: 2, kind: input, shape index: {}]   ;;  %s165_s3 = inlined_call_operand.<no memory space> [shape: f32[1,1], index: 3, kind: input, shape index: {}]   ;;  %s166_s4 = inlined_call_operand.vmem [shape: f32[1,32], index: 4, kind: output, shape index: {}]  }
   0x1   :  { %108 = vmatprep.subr.bf16.mxu0 %v119_v0  ;;  %v118_v1 = vld [vmem:[%s162_s1] sm:$0xff]   ;;  %110 = vmatprep.mubr.msk.bf16.mxu0 %vm120_vm0, %v119_v0  ;;  %v9_v2 = vstv %s164_s2  ;;  %v11_v4 = vstv %s165_s3  ;;  %v81_v8 = vlaneseq  ;;  %vm98_vm2 = vcmask 253952  }
   0x2   :  { %117 = vset.pattern.permute.xlu0 %v121_v3  ;;  %10 = vst [vmem:[#allocation2] sm:$0x1] %v9_v2  ;;  %109 = vmatpush3.bf16.msra.mxu0 %v118_v1  ;;  %v22_v5 = vld [vmem:[%s163_s0] sm:$0x1]  ;;  %12 = vst [vmem:[#allocation3] sm:$0x1] %v11_v4 }
   0x3   :  { %v82_v9 = vshrl.u32 %v81_v8, 7 }
   0x5   :  { %111 = vmatmul.mubr.msk.bf16.vlgmr.msra.gmra.mxu0 %vm31_vm1, %v22_v5  ;;  %v83_v11 = vsub.s32 0, %v82_v9 }
   0x9   :  { %v75_v6 = vld [vmem:[#allocation2] sm:$0x1]  ;;  %v86_v7 = vld [vmem:[#allocation3] sm:$0x1] }
   0xa   :  { %78 = vperm.xlu0 %117, %v75_v6  }
   0xe   :  { %89 = vperm.xlu0 %117, %v86_v7  }
  0x85   :  { %v79_v10 = vpop.permute.xlu0 %78 }
  0x86   :  { %v84_v13 = vrot.slane %v79_v10, %v83_v11 }
  0x89   :  { %v90_v12 = vpop.permute.xlu0 %89 }
  0x8a   :  { %v95_v15 = vrot.slane %v90_v12, %v83_v11 }
  0xc5   :  { %v69_v14 = vpop.f32.mrf.mxu0 }
  0xc6   :  { %v85_v16 = vmul.f32 %v84_v13, %v69_v14 }
  0xc7   :  { %v112_v17 = vpop.f32.mrf.mxu0 }
  0xc8   :  { %v96_v18 = vadd.f32 %v95_v15, %v85_v16 }
  0xc9   :  { %v72_v19 = vpop.f32.mrf.mxu0 }
  0xca   :  { %v97_v20 = vmax.f32 %v96_v18, 0.0 }
  0xcb   :  { %v113_v21 = vpop.f32.mrf.mxu0 }
  0xcc   :  { %99 = vst.msk [vmem:[%s166_s4] sm:$0x1] %vm98_vm2, %v97_v20 }

// kernel: unet_forward.53
= control target key start
LH: loop header
LB: loop body
LE: loop exit
PB: predicated region body
PF: predicated region fallthrough
CT: control target
= control target key end

     0   :  { %v132_v0 = vmov 0.0   ;;  %vm133_vm0 = vmmov 0   ;;  %v134_v3 = vmov 0   ;;  %vm39_vm1 = vcmask 261120   ;;  %s178_s1 = inlined_call_operand.vmem [shape: bf16[32,8], index: 1, kind: input, shape index: {}]   ;;  %s179_s2 = inlined_call_operand.<no memory space> [shape: f32[1,1], index: 2, kind: input, shape index: {}]   ;;  %s180_s3 = inlined_call_operand.<no memory space> [shape: f32[1,1], index: 3, kind: input, shape index: {}]   ;;  %s181_s0 = inlined_call_operand.vmem [shape: bf16[1,32], index: 0, kind: input, shape index: {}]   ;;  %s182_s4 = inlined_call_operand.vmem [shape: f32[1,8], index: 4, kind: output, shape index: {}]  }
   0x1   :  { %118 = vmatprep.subr.bf16.mxu0 %v132_v0  ;;  %v130_v1 = vld [vmem:[%s178_s1 + $0x8] sm:$0xff]   ;;  %122 = vmatprep.mubr.msk.bf16.mxu0 %vm133_vm0, %v132_v0  ;;  %v9_v2 = vstv %s179_s2  ;;  %v11_v4 = vstv %s180_s3  ;;  %v131_v5 = vld [vmem:[%s178_s1] sm:$0xff]   ;;  %v89_v9 = vlaneseq  ;;  %vm106_vm2 = vcmask 57344  }
   0x2   :  { %129 = vset.pattern.permute.xlu0 %v134_v3  ;;  %10 = vst [vmem:[#allocation2] sm:$0x1] %v9_v2  ;;  %119 = vmatpush3.bf16.msra.mxu0 %v130_v1  ;;  %12 = vst [vmem:[#allocation3] sm:$0x1] %v11_v4  ;;  %v22_v6 = vld [vmem:[%s181_s0] sm:$0x1] }
   0x3   :  { %120 = vmatprep.subr.bf16.mxu0 %v132_v0  ;;  %v90_v10 = vshrl.u32 %v89_v9, 7 }
   0x5   :  { %v91_v12 = vsub.s32 0, %v90_v10 }
   0x6   :  { %121 = vmatpush3.bf16.msra.mxu0 %v131_v5 }
   0x9   :  { %v83_v7 = vld [vmem:[#allocation2] sm:$0x1]  ;;  %123 = vmatmul.mubr.msk.bf16.vlgmr.msra.gmra.mxu0 %vm39_vm1, %v22_v6  ;;  %v94_v8 = vld [vmem:[#allocation3] sm:$0x1] }
   0xa   :  { %86 = vperm.xlu0 %129, %v83_v7  }
   0xe   :  { %97 = vperm.xlu0 %129, %v94_v8  }
  0x85   :  { %v87_v11 = vpop.permute.xlu0 %86 }
  0x86   :  { %v92_v14 = vrot.slane %v87_v11, %v91_v12 }
  0x89   :  { %v98_v13 = vpop.permute.xlu0 %97 }
  0x8a   :  { %v103_v16 = vrot.slane %v98_v13, %v91_v12 }
  0xc9   :  { %v77_v15 = vpop.f32.mrf.mxu0 }
  0xca   :  { %v93_v17 = vmul.f32 %v92_v14, %v77_v15 }
  0xcb   :  { %v124_v18 = vpop.f32.mrf.mxu0 }
  0xcc   :  { %v104_v19 = vadd.f32 %v103_v16, %v93_v17 }
  0xcd   :  { %v80_v20 = vpop.f32.mrf.mxu0 }
  0xce   :  { %v105_v21 = vmax.f32 %v104_v19, 0.0 }
  0xcf   :  { %v125_v22 = vpop.f32.mrf.mxu0 }
  0xd0   :  { %107 = vst.msk [vmem:[%s182_s4] sm:$0x1] %vm106_vm2, %v105_v21 }

// kernel: unet_forward.52
= control target key start
LH: loop header
LB: loop body
LE: loop exit
PB: predicated region body
PF: predicated region fallthrough
CT: control target
= control target key end

     0   :  { %v158_v0 = vmov 0.0   ;;  %vm159_vm0 = vmmov 0   ;;  %v160_v3 = vmov 0   ;;  %vm55_vm1 = vcmask 523264   ;;  %s210_s1 = inlined_call_operand.vmem [shape: bf16[64,2], index: 1, kind: input, shape index: {}]   ;;  %s211_s2 = inlined_call_operand.<no memory space> [shape: f32[1,1], index: 2, kind: input, shape index: {}]   ;;  %s212_s3 = inlined_call_operand.<no memory space> [shape: f32[1,1], index: 3, kind: input, shape index: {}]   ;;  %s213_s0 = inlined_call_operand.vmem [shape: bf16[1,64], index: 0, kind: input, shape index: {}]   ;;  %s214_s4 = inlined_call_operand.vmem [shape: f32[1,2], index: 4, kind: output, shape index: {}]  }
   0x1   :  { %138 = vmatprep.subr.bf16.mxu0 %v158_v0  ;;  %v154_v1 = vld [vmem:[%s210_s1 + $0x18] sm:$0xff]   ;;  %146 = vmatprep.mubr.msk.bf16.mxu0 %vm159_vm0, %v158_v0  ;;  %v9_v2 = vstv %s211_s2  ;;  %v11_v4 = vstv %s212_s3  ;;  %v155_v5 = vld [vmem:[%s210_s1 + $0x10] sm:$0xff]   ;;  %v105_v11 = vlaneseq  ;;  %vm122_vm2 = vcmask 8192  }
   0x2   :  { %153 = vset.pattern.permute.xlu0 %v160_v3  ;;  %10 = vst [vmem:[#allocation2] sm:$0x1] %v9_v2  ;;  %139 = vmatpush3.bf16.msra.mxu0 %v154_v1  ;;  %12 = vst [vmem:[#allocation3] sm:$0x1] %v11_v4  ;;  %v156_v6 = vld [vmem:[%s210_s1 + $0x8] sm:$0xff]   ;;  %v157_v8 = vld [vmem:[%s210_s1] sm:$0xff]  }
   0x3   :  { %140 = vmatprep.subr.bf16.mxu0 %v158_v0  ;;  %v22_v10 = vld [vmem:[%s213_s0] sm:$0x1]  ;;  %v106_v12 = vshrl.u32 %v105_v11, 7 }
   0x5   :  { %v107_v14 = vsub.s32 0, %v106_v12 }
   0x6   :  { %141 = vmatpush3.bf16.msra.mxu0 %v155_v5 }
   0x7   :  { %142 = vmatprep.subr.bf16.mxu0 %v158_v0 }
   0x9   :  { %v99_v7 = vld [vmem:[#allocation2] sm:$0x1]  ;;  %v110_v9 = vld [vmem:[#allocation3] sm:$0x1] }
   0xa   :  { %102 = vperm.xlu0 %153, %v99_v7   ;;  %143 = vmatpush3.bf16.msra.mxu0 %v156_v6 }
   0xb   :  { %144 = vmatprep.subr.bf16.mxu0 %v158_v0 }
   0xe   :  { %113 = vperm.xlu0 %153, %v110_v9   ;;  %145 = vmatpush3.bf16.msra.mxu0 %v157_v8 }
  0x11   :  { %147 = vmatmul.mubr.msk.bf16.vlgmr.msra.gmra.mxu0 %vm55_vm1, %v22_v10 }
  0x85   :  { %v103_v13 = vpop.permute.xlu0 %102 }
  0x86   :  { %v108_v16 = vrot.slane %v103_v13, %v107_v14 }
  0x89   :  { %v114_v15 = vpop.permute.xlu0 %113 }
  0x8a   :  { %v119_v18 = vrot.slane %v114_v15, %v107_v14 }
  0xd1   :  { %v93_v17 = vpop.f32.mrf.mxu0 }
  0xd2   :  { %v109_v19 = vmul.f32 %v108_v16, %v93_v17 }
  0xd3   :  { %v148_v20 = vpop.f32.mrf.mxu0 }
  0xd4   :  { %v120_v21 = vadd.f32 %v119_v18, %v109_v19 }
  0xd5   :  { %v96_v22 = vpop.f32.mrf.mxu0 }
  0xd6   :  { %v121_v23 = vmax.f32 %v120_v21, 0.0 }
  0xd7   :  { %v149_v24 = vpop.f32.mrf.mxu0 }
  0xd8   :  { %123 = vst.msk [vmem:[%s214_s4] sm:$0x1] %vm122_vm2, %v121_v23 }

// kernel: unet_forward.57
= control target key start
LH: loop header
LB: loop body
LE: loop exit
PB: predicated region body
PF: predicated region fallthrough
CT: control target
= control target key end

     0   :  { %s403_s15 = smov 0   ;;  %s432_s0 = inlined_call_operand.vmem [shape: bf16[3,5], index: 0, kind: input, shape index: {}]   ;;  %s433_s1 = inlined_call_operand.vmem [shape: bf16[5,512], index: 1, kind: input, shape index: {}]   ;;  %s434_s2 = inlined_call_operand.vmem [shape: f32[3,1], index: 2, kind: input, shape index: {}]   ;;  %s435_s3 = inlined_call_operand.vmem [shape: f32[3,1], index: 3, kind: input, shape index: {}]   ;;  %s436_s4 = inlined_call_operand.vmem [shape: f32[3,512], index: 4, kind: output, shape index: {}]  }
   0x1 LB: > { %s341_s16 = sadd.s32 4294967295, %s374_s15   ;;  %p345_p0 = scmp.ge.s32.totalorder %s374_s15, 1  ;;  %s374_s15 = sphi %s403_s15, %s14_s15  }
   0x2   : > { %p163_p1 = scmp.lt.s32.totalorder %s374_s15, 3 }
   0x4   : > { %p164_p2 = pnand %p345_p0, %p163_p1 }
   0x5   : > { %s346_s17 = sshll.u32 (!%p164_p2), %s341_s16, 1 }
   0x6   : > { %167 = sbr.rel (%p164_p2) target bundleno = 225 (0xe1), region = 36  ;;  %p190_p3 = scmp.lt.s32.totalorder (!%p164_p2), %s346_s17, 3 }
   0xb   : > { %vm213_vm0 = vcmask 1041408   ;;  %v376_v0 = vmov 0   ;;  %v264_v1 = vld [vmem:[%s434_s2] sm:$0x7]  ;;  %s438_s17 = smov (!%p190_p3, %s346_s17), 3  ;;  %vm214_vm1 = vcmask 1042432  }
   0xc   : > { %255 = vmatprep.mubr.bf16.mxu0 %v376_v0  ;;  %365 = vset.pattern.permute.xlu0 %v376_v0  ;;  %v377_v2 = vmov 65535   ;;  %v272_v4 = vld [vmem:[%s435_s3] sm:$0x7]  ;;  %s347_s22 = sshll.u32 %s438_s17, 2  ;;  %vm209_vm2 = vcmask 39936  }
   0xd   : > { %267 = vperm.xlu0 %365, %v264_v1   ;;  %v215_v3 = vsel %vm213_vm0, 4294967295, %v377_v2  ;;  %s193_s25 = scalar_lea.vmem %s433_s1, %s347_s22  ;;  %v202_v11 = vld [vmem:[%s432_s0] sm:$0x3]  ;;  %s199_s30 = scalar_lea.vmem %s436_s4, %s347_s22 }
   0xe   : > { %v203_v5 = vld [vmem:[%s193_s25] sm:$0x77]  ;;  %v216_v6 = vsel %vm214_vm1, %v215_v3, 0 }
   0xf   : > { %v351_v7 = vcombine.high %v203_v5, %v203_v5  ;;  %v350_v8 = vcombine.low %v203_v5, %v203_v5 }
  0x11   : > { %275 = vperm.xlu0 %365, %v272_v4   ;;  %v221_v9 = vand.u32 %v351_v7, %v216_v6  ;;  %v218_v10 = vand.u32 %v350_v8, %v216_v6 }
  0x13   : > { %237 = vmatprep.subr.bf16.mxu0 %v221_v9 }
  0x14   : > { %238 = vmatpush1.bf16.msra.mxu0 %v218_v10 }
  0x17   : > { %352 = vmatmul.mubr.msk.bf16.vlgmr.msra.gmra.mxu0 %vm209_vm2, %v202_v11 }
  0x88   : > { %v268_v12 = vpop.permute.xlu0 %267 }
  0x8c   : > { %v276_v17 = vpop.permute.xlu0 %275 }
  0xd7   : > { %v257_v13 = vpop.f32.mrf.mxu0 }
  0xd8   : > { %v270_v14 = vmul.f32 %v268_v12, %v257_v13 }
  0xd9   : > { %v259_v15 = vpop.f32.mrf.mxu0 }
  0xda   : > { %v271_v16 = vmul.f32 %v268_v12, %v259_v15  ;;  %v278_v19 = vadd.f32 %v276_v17, %v270_v14 }
  0xdb   : > { %v261_v18 = vpop.f32.mrf.mxu0 }
  0xdc   : > { %v279_v20 = vadd.f32 %v276_v17, %v271_v16 }
  0xdd   : > { %v262_v21 = vpop.f32.mrf.mxu0 }
  0xde   : > { %v282_v22 = vcombine.low %v278_v19, %v279_v20 }
  0xe0   : > { %284 = vst [vmem:[%s199_s30] sm:$0x77] %v282_v22 }
  0xe1 PF: > { %s14_s15 = sadd.s32 1, %s374_s15  }
  0xe2   : > { %p11_p4 = scmp.ge.s32.totalorder %s14_s15, 4  }
  0xe4   :  { %13 = sbr.rel (!%p11_p4) target bundleno = 1 (0x1), region = 66 }

</bundles_post_ra>
